<compile_context>
chip_gen: v7x
topology: tpu7x:2x2x1
jax: 0.10.0
libtpu: 0.0.40
codegen_flags: <defaults>
</compile_context>

<pallas_src>
import functools

import jax
import jax.numpy as jnp
from jax.experimental import pallas as pl
from jax.experimental.pallas import tpu as pltpu

BN_EPS = 1e-3
STEM_CH = 48
HEAD_CH = 1792
NUM_CLASSES = 18

_VMEM_LIMIT = 48 * 1024 * 1024   # < 64 MiB physical on v7x; plenty on v5e/v6e

# EfficientNet-B4 stage config after width/depth scaling (w=1.4, d=1.8):
# (repeats, kernel, stride, expand_ratio, in_ch, out_ch, se_ratio)
B4_STAGES = [
    (2, 3, 1, 1, 48, 24, 0.25),
    (4, 3, 2, 6, 24, 32, 0.25),
    (4, 5, 2, 6, 32, 56, 0.25),
    (6, 3, 2, 6, 56, 112, 0.25),
    (6, 5, 1, 6, 112, 160, 0.25),
    (8, 5, 2, 6, 160, 272, 0.25),
    (2, 3, 1, 6, 272, 448, 0.25),
]


# ----------------------------------------------------------------------------
# Fused 1x1-conv matmul: out = act(((x * scale?) @ w) + b) [+ residual]
# x kept per-batch 3-D (Nb, HW, Cin) so the per-batch SE channel scale can be
# fused straight into the matmul.  bf16 operands, fp32 accumulation.
# ----------------------------------------------------------------------------

@functools.lru_cache(maxsize=None)
def _build_conv1x1(Nb, M, K, N, tm, act, has_scale, has_res):

    def kernel(*refs):
        it = iter(refs)
        x_ref = next(it)
        s_ref = next(it) if has_scale else None
        w_ref = next(it)
        b_ref = next(it)
        r_ref = next(it) if has_res else None
        o_ref = next(it)

        xv = x_ref[0]                                    # (tm, K) bf16
        if has_scale:
            xv = xv * s_ref[0]                           # (1, K) broadcast
        acc = jnp.dot(xv, w_ref[...], preferred_element_type=jnp.float32)
        acc = acc + b_ref[...]                           # (1, N) f32
        if act == "swish":
            acc = acc * jax.nn.sigmoid(acc)
        elif act == "sigmoid":
            acc = jax.nn.sigmoid(acc)
        if has_res:
            acc = acc + r_ref[0].astype(jnp.float32)
        o_ref[0] = acc.astype(o_ref.dtype)

    in_specs = [pl.BlockSpec((1, tm, K), lambda b, i: (b, i, 0))]
    if has_scale:
        in_specs.append(pl.BlockSpec((1, 1, K), lambda b, i: (b, 0, 0)))
    in_specs += [pl.BlockSpec((K, N), lambda b, i: (0, 0)),
                 pl.BlockSpec((1, N), lambda b, i: (0, 0))]
    if has_res:
        in_specs.append(pl.BlockSpec((1, tm, N), lambda b, i: (b, i, 0)))

    f = pl.pallas_call(
        kernel,
        grid=(Nb, M // tm),
        in_specs=in_specs,
        out_specs=pl.BlockSpec((1, tm, N), lambda b, i: (b, i, 0)),
        out_shape=jax.ShapeDtypeStruct((Nb, M, N), jnp.bfloat16),
        compiler_params=pltpu.CompilerParams(
            dimension_semantics=("parallel", "parallel"),
            vmem_limit_bytes=_VMEM_LIMIT),
    )
    return jax.jit(f)


def _pick_tm(HW, target=512):
    """Pick an M tile that is a multiple of 8 or the full dim; pad if ragged."""
    if HW <= target:
        return HW, HW                              # single full-M block
    for tm in (512, 256, 128, 64, 32, 16):
        if HW % tm == 0:
            return tm, HW
    tm = target
    return tm, ((HW + tm - 1) // tm) * tm          # pad ragged M, slice after


def conv1x1(x, w, b, act="none", scale=None, residual=None):
    Nb, H, W, Cin = x.shape
    Cout = w.shape[1]
    HW = H * W
    tm, HWp = _pick_tm(HW)
    x3 = x.reshape(Nb, HW, Cin)
    res3 = residual.reshape(Nb, HW, Cout) if residual is not None else None
    if HWp != HW:
        x3 = jnp.pad(x3, ((0, 0), (0, HWp - HW), (0, 0)))
        if res3 is not None:
            res3 = jnp.pad(res3, ((0, 0), (0, HWp - HW), (0, 0)))
    f = _build_conv1x1(Nb, HWp, Cin, Cout, tm, act,
                       scale is not None, res3 is not None)
    args = [x3]
    if scale is not None:
        args.append(scale)                         # (Nb, 1, Cin) bf16
    args += [w, b.reshape(1, Cout)]
    if res3 is not None:
        args.append(res3)
    out = f(*args)
    if HWp != HW:
        out = out[:, :HW]
    return out.reshape(Nb, H, W, Cout)


# ----------------------------------------------------------------------------
# Stride-phase decomposition so strided convs are computed directly in-kernel.
# ----------------------------------------------------------------------------

def _pad_and_phase(x, k, s):
    """TF-SAME pad; for stride s>1 decompose into s*s stride-phases so the conv
    kernel computes the strided output directly with unit-stride slices
    (no s^2-times overcompute + subsample).  Returns (phased, A, B, Ho, Wo)
    with phased of shape (Nb, s*s, A, B, C)."""
    Nb, H, W, C = x.shape
    Ho, Wo = -(-H // s), -(-W // s)
    ph = max((Ho - 1) * s + k - H, 0)
    pw = max((Wo - 1) * s + k - W, 0)
    xp = jnp.pad(x, ((0, 0), (ph // 2, ph - ph // 2),
                     (pw // 2, pw - pw // 2), (0, 0)))
    if s == 1:
        return xp[:, None], xp.shape[1], xp.shape[2], Ho, Wo
    A = Ho + (k - 1) // s
    B = Wo + (k - 1) // s
    phases = []
    for p in range(s):
        for q in range(s):
            t = xp[:, p::s, q::s, :][:, :A, :B, :]
            pr, pc = A - t.shape[1], B - t.shape[2]
            if pr or pc:
                t = jnp.pad(t, ((0, 0), (0, pr), (0, pc), (0, 0)))
            phases.append(t)
    return jnp.stack(phases, axis=1), A, B, Ho, Wo


def _pick_ct(C, per_channel_bytes, budget=4 * 1024 * 1024):
    """Channel tile: full C unless C % 128 == 0 and the block is large."""
    cands = [C]
    if C % 128 == 0:
        cands += [t for t in (1344, 896, 768, 512, 384, 256, 128)
                  if t < C and C % t == 0]
    for ct in cands:
        if ct * per_channel_bytes <= budget:
            return ct
    return cands[-1]


# ----------------------------------------------------------------------------
# Depthwise KxK conv (+ folded BN bias + swish), gridded (batch, channel-tile).
# NOTE: at very large spatial extents the spatial dims could additionally be
# row-tiled with a halo; channel/batch tiling covers the B4 shapes here.
# ----------------------------------------------------------------------------

@functools.lru_cache(maxsize=None)
def _build_dwconv(Nb, ss, A, B, C, Ct, k, s, Ho, Wo):

    def kernel(x_ref, w_ref, b_ref, o_ref):
        x = x_ref[0]                                     # (ss, A, B, Ct) bf16
        acc = jnp.zeros((Ho, Wo, Ct), jnp.float32)
        for di in range(k):
            for dj in range(k):
                pidx = (di % s) * s + (dj % s)
                ai, aj = di // s, dj // s
                tap = x[pidx, ai:ai + Ho, aj:aj + Wo, :].astype(jnp.float32)
                acc = acc + tap * w_ref[di * k + dj]
        acc = acc + b_ref[0]
        acc = acc * jax.nn.sigmoid(acc)
        o_ref[0] = acc.astype(o_ref.dtype)

    f = pl.pallas_call(
        kernel,
        grid=(Nb, C // Ct),
        in_specs=[pl.BlockSpec((1, ss, A, B, Ct), lambda b, c: (b, 0, 0, 0, c)),
                  pl.BlockSpec((k * k, Ct), lambda b, c: (0, c)),
                  pl.BlockSpec((1, Ct), lambda b, c: (0, c))],
        out_specs=pl.BlockSpec((1, Ho, Wo, Ct), lambda b, c: (b, 0, 0, c)),
        out_shape=jax.ShapeDtypeStruct((Nb, Ho, Wo, C), jnp.bfloat16),
        compiler_params=pltpu.CompilerParams(
            dimension_semantics=("parallel", "parallel"),
            vmem_limit_bytes=_VMEM_LIMIT),
    )
    return jax.jit(f)


def depthwise_conv_bn_swish(x, w, b, k, stride):
    Nb, H, W, C = x.shape
    phased, A, B, Ho, Wo = _pad_and_phase(x, k, stride)
    ss = stride * stride
    per_ch = ss * A * B * phased.dtype.itemsize
    ct = _pick_ct(C, per_ch)
    f = _build_dwconv(Nb, ss, A, B, C, ct, k, stride, Ho, Wo)
    return f(phased, w.reshape(k * k, C), b.reshape(1, C))


# ----------------------------------------------------------------------------
# Stem 3x3 / stride-2 conv (+ folded BN + swish) without HBM im2col.
# Cin is tiny (3), so the per-tap channel reduction runs on the VPU.
# ----------------------------------------------------------------------------

@functools.lru_cache(maxsize=None)
def _build_stem(Nb, ss, A, B, Cin, Cout, k, s, Ho, Wo):

    def kernel(x_ref, w_ref, b_ref, o_ref):
        x = x_ref[0]                                     # (ss, A, B, Cin)
        acc = jnp.zeros((Ho, Wo, Cout), jnp.float32)
        for di in range(k):
            for dj in range(k):
                pidx = (di % s) * s + (dj % s)
                ai, aj = di // s, dj // s
                tap = x[pidx, ai:ai + Ho, aj:aj + Wo, :].astype(jnp.float32)
                for c in range(Cin):
                    acc = acc + tap[:, :, c:c + 1] * w_ref[di * k + dj, c]
        acc = acc + b_ref[0]
        acc = acc * jax.nn.sigmoid(acc)
        o_ref[0] = acc.astype(o_ref.dtype)

    f = pl.pallas_call(
        kernel,
        grid=(Nb,),
        in_specs=[pl.BlockSpec((1, ss, A, B, Cin), lambda b: (b, 0, 0, 0, 0)),
                  pl.BlockSpec((k * k, Cin, Cout), lambda b: (0, 0, 0)),
                  pl.BlockSpec((1, Cout), lambda b: (0, 0))],
        out_specs=pl.BlockSpec((1, Ho, Wo, Cout), lambda b: (b, 0, 0, 0)),
        out_shape=jax.ShapeDtypeStruct((Nb, Ho, Wo, Cout), jnp.bfloat16),
        compiler_params=pltpu.CompilerParams(
            dimension_semantics=("parallel",),
            vmem_limit_bytes=_VMEM_LIMIT),
    )
    return jax.jit(f)


def stem_conv_bn_swish(x, w, b, k=3, stride=2):
    Nb, H, W, Cin = x.shape
    Cout = w.shape[-1]
    phased, A, B, Ho, Wo = _pad_and_phase(x, k, stride)
    ss = stride * stride
    f = _build_stem(Nb, ss, A, B, Cin, Cout, k, stride, Ho, Wo)
    return f(phased, w.reshape(k * k, Cin, Cout), b.reshape(1, Cout))


# ----------------------------------------------------------------------------
# Squeeze-Excite: only the per-channel scale is produced here; the rescale is
# fused into the following projection matmul.
# ----------------------------------------------------------------------------

@functools.lru_cache(maxsize=None)
def _build_se_scale(Nb, H, W, C, S):

    def kernel(x_ref, w1_ref, b1_ref, w2_ref, b2_ref, o_ref):
        x = x_ref[0].astype(jnp.float32)                 # (H, W, C)
        pooled = jnp.mean(x.reshape(H * W, C), axis=0, keepdims=True)  # (1, C)
        h = jnp.dot(pooled, w1_ref[...], preferred_element_type=jnp.float32)
        h = h + b1_ref[...]
        h = h * jax.nn.sigmoid(h)                        # swish
        t = jnp.dot(h, w2_ref[...], preferred_element_type=jnp.float32)
        t = jax.nn.sigmoid(t + b2_ref[...])              # (1, C)
        o_ref[0] = t.astype(o_ref.dtype)

    f = pl.pallas_call(
        kernel,
        grid=(Nb,),
        in_specs=[pl.BlockSpec((1, H, W, C), lambda b: (b, 0, 0, 0)),
                  pl.BlockSpec((C, S), lambda b: (0, 0)),
                  pl.BlockSpec((1, S), lambda b: (0, 0)),
                  pl.BlockSpec((S, C), lambda b: (0, 0)),
                  pl.BlockSpec((1, C), lambda b: (0, 0))],
        out_specs=pl.BlockSpec((1, 1, C), lambda b: (b, 0, 0)),
        out_shape=jax.ShapeDtypeStruct((Nb, 1, C), jnp.bfloat16),
        compiler_params=pltpu.CompilerParams(
            dimension_semantics=("parallel",),
            vmem_limit_bytes=_VMEM_LIMIT),
    )
    return jax.jit(f)


# ----------------------------------------------------------------------------
# Global average pool and final Linear.
# ----------------------------------------------------------------------------

@functools.lru_cache(maxsize=None)
def _build_pool(Nb, H, W, C):
    def kernel(x_ref, o_ref):
        x = x_ref[0].astype(jnp.float32)
        o_ref[0] = jnp.mean(x.reshape(H * W, C), axis=0, keepdims=True)

    f = pl.pallas_call(
        kernel,
        grid=(Nb,),
        in_specs=[pl.BlockSpec((1, H, W, C), lambda b: (b, 0, 0, 0))],
        out_specs=pl.BlockSpec((1, 1, C), lambda b: (b, 0, 0)),
        out_shape=jax.ShapeDtypeStruct((Nb, 1, C), jnp.float32),
        compiler_params=pltpu.CompilerParams(
            dimension_semantics=("parallel",)),
    )
    return jax.jit(f)


@functools.lru_cache(maxsize=None)
def _build_dense(M, K, N):
    def kernel(x_ref, w_ref, b_ref, o_ref):
        acc = jnp.dot(x_ref[...].astype(jnp.bfloat16), w_ref[...],
                      preferred_element_type=jnp.float32)
        o_ref[...] = acc + b_ref[...]

    f = pl.pallas_call(
        kernel, out_shape=jax.ShapeDtypeStruct((M, N), jnp.float32))
    return jax.jit(f)


# ----------------------------------------------------------------------------
# Deterministic synthetic parameters (BN folded into conv weights).
# ----------------------------------------------------------------------------

class KeyGen:
    def __init__(self, key):
        self.key = key
        self.i = 0

    def __call__(self):
        k = jax.random.fold_in(self.key, self.i)
        self.i += 1
        return k


def _bn_fold(kg, cout):
    gamma = jax.random.uniform(kg(), (cout,), minval=0.8, maxval=1.2)
    beta = 0.05 * jax.random.normal(kg(), (cout,))
    mean = 0.05 * jax.random.normal(kg(), (cout,))
    var = jax.random.uniform(kg(), (cout,), minval=0.8, maxval=1.2)
    scale = gamma / jnp.sqrt(var + BN_EPS)
    bias = beta - mean * scale
    return scale, bias


def _conv_w(kg, shape, fan_in):
    return jax.random.normal(kg(), shape) / jnp.sqrt(float(fan_in))


def init_params(seed=0):
    kg = KeyGen(jax.random.PRNGKey(seed))
    params = {}

    w = _conv_w(kg, (3, 3, 3, STEM_CH), 3 * 3 * 3)
    s, b = _bn_fold(kg, STEM_CH)
    params["stem_w"], params["stem_b"] = (w * s).astype(jnp.float32), b

    blocks = []
    for (r, k, st, e, cin, cout, se) in B4_STAGES:
        for bi in range(r):
            icin = cin if bi == 0 else cout
            istride = st if bi == 0 else 1
            cexp = icin * e
            p = {"k": k, "stride": istride, "expand": e, "cin": icin, "cout": cout}
            if e != 1:
                w = _conv_w(kg, (icin, cexp), icin)
                s, bb = _bn_fold(kg, cexp)
                p["expand_w"], p["expand_b"] = (w * s).astype(jnp.bfloat16), bb
            w = _conv_w(kg, (k, k, cexp), k * k)
            s, bb = _bn_fold(kg, cexp)
            p["dw_w"], p["dw_b"] = (w * s).astype(jnp.float32), bb
            sq = max(1, int(icin * se))
            p["se_rw"] = _conv_w(kg, (cexp, sq), cexp)
            p["se_rb"] = 0.05 * jax.random.normal(kg(), (sq,))
            p["se_ew"] = _conv_w(kg, (sq, cexp), sq)
            p["se_eb"] = 0.05 * jax.random.normal(kg(), (cexp,))
            w = _conv_w(kg, (cexp, cout), cexp)
            s, bb = _bn_fold(kg, cout)
            p["proj_w"], p["proj_b"] = (w * s).astype(jnp.bfloat16), bb
            blocks.append(p)
    params["blocks"] = blocks

    w = _conv_w(kg, (B4_STAGES[-1][5], HEAD_CH), B4_STAGES[-1][5])
    s, bb = _bn_fold(kg, HEAD_CH)
    params["head_w"], params["head_b"] = (w * s).astype(jnp.bfloat16), bb

    params["fc_w"] = _conv_w(kg, (HEAD_CH, NUM_CLASSES), HEAD_CH).astype(jnp.bfloat16)
    params["fc_b"] = 0.05 * jax.random.normal(kg(), (NUM_CLASSES,))
    return params


# ----------------------------------------------------------------------------
# Forward pass.
# ----------------------------------------------------------------------------

def mbconv_block(x, p):
    inp = x
    if p["expand"] != 1:
        x = conv1x1(x, p["expand_w"], p["expand_b"], act="swish")
    x = depthwise_conv_bn_swish(x, p["dw_w"], p["dw_b"], p["k"], p["stride"])
    Nb, H, W, C = x.shape
    se_f = _build_se_scale(Nb, H, W, C, p["se_rw"].shape[1])
    scale = se_f(x, p["se_rw"], p["se_rb"].reshape(1, -1),
                 p["se_ew"], p["se_eb"].reshape(1, -1))        # (Nb, 1, C)
    residual = inp if (p["stride"] == 1 and p["cin"] == p["cout"]) else None
    # drop_connect is identity in eval mode.
    x = conv1x1(x, p["proj_w"], p["proj_b"], act="none",
                scale=scale, residual=residual)
    return x


def efficientnet_b4_forward(params, x_nchw):
    x = jnp.transpose(x_nchw, (0, 2, 3, 1)).astype(jnp.bfloat16)   # NCHW -> NHWC
    x = stem_conv_bn_swish(x, params["stem_w"], params["stem_b"], 3, 2)
    for p in params["blocks"]:
        x = mbconv_block(x, p)
    x = conv1x1(x, params["head_w"], params["head_b"], act="swish")
    Nb, H, W, C = x.shape
    pooled = _build_pool(Nb, H, W, C)(x)[:, 0, :]                  # (Nb, C)
    # TODO(synk): Dropout(p=0.4) is identity in eval mode; omitted on purpose.
    dense = _build_dense(Nb, C, NUM_CLASSES)
    out = dense(pooled, params["fc_w"], params["fc_b"].reshape(1, -1))
    return out


if __name__ == "__main__":
    key = jax.random.PRNGKey(0)
    x = jax.random.normal(key, (2, 3, 32, 32), dtype=jnp.float32)   # small NCHW input
    params = init_params(seed=0)
    out = efficientnet_b4_forward(params, x)
    out = jax.block_until_ready(out)
    assert out.shape == (2, NUM_CLASSES), out.shape
    assert bool(jnp.all(jnp.isfinite(out)))
    print("KERNEL_OK")
</pallas_src>

<mosaic_0001>
module attributes {stable_mosaic.version = 11 : i64} {
  func.func @kernel(%arg0: i32, %arg1: memref<1x4x17x17x3xbf16, #tpu.memory_space<vmem>>, %arg2: memref<9x3x48xf32, #tpu.memory_space<vmem>>, %arg3: memref<1x48xf32, #tpu.memory_space<vmem>>, %arg4: memref<1x16x16x48xbf16, #tpu.memory_space<vmem>>) attributes {dimension_semantics = [#tpu.dimension_semantics<parallel>], iteration_bounds = array<i64: 2>, scalar_prefetch = 0 : i64, scratch_operands = 0 : i64, tpu.core_type = #tpu.core_type<tc>, window_params = [{transform_indices = @transform_0, window_bounds = array<i64: 1, 4, 17, 17, 3>}, {pipeline_mode = #tpu.pipeline_mode<synchronous>, transform_indices = @transform_1, window_bounds = array<i64: 9, 3, 48>}, {pipeline_mode = #tpu.pipeline_mode<synchronous>, transform_indices = @transform_2, window_bounds = array<i64: 1, 48>}, {transform_indices = @transform_3, window_bounds = array<i64: 1, 16, 16, 48>}]} {
    %c0 = arith.constant 0 : index
    %c0_0 = arith.constant 0 : index
    %c0_1 = arith.constant 0 : index
    %c0_2 = arith.constant 0 : index
    %c0_3 = arith.constant 0 : index
    %0 = vector.load %arg1[%c0, %c0_0, %c0_1, %c0_2, %c0_3] : memref<1x4x17x17x3xbf16, #tpu.memory_space<vmem>>, vector<1x4x17x17x3xbf16>
    %1 = vector.shape_cast %0 : vector<1x4x17x17x3xbf16> to vector<4x17x17x3xbf16>
    %cst = arith.constant 0.000000e+00 : f32
    %2 = vector.broadcast %cst : f32 to vector<16x16x48xf32>
    %3 = vector.extract_strided_slice %1 {offsets = [0, 0, 0, 0], sizes = [1, 16, 16, 3], strides = [1, 1, 1, 1]} : vector<4x17x17x3xbf16> to vector<1x16x16x3xbf16>
    %4 = vector.shape_cast %3 : vector<1x16x16x3xbf16> to vector<16x16x3xbf16>
    %5 = arith.extf %4 : vector<16x16x3xbf16> to vector<16x16x3xf32>
    %6 = vector.extract_strided_slice %5 {offsets = [0, 0, 0], sizes = [16, 16, 1], strides = [1, 1, 1]} : vector<16x16x3xf32> to vector<16x16x1xf32>
    %c0_4 = arith.constant 0 : index
    %c0_5 = arith.constant 0 : index
    %c0_6 = arith.constant 0 : index
    %7 = vector.load %arg2[%c0_4, %c0_5, %c0_6] : memref<9x3x48xf32, #tpu.memory_space<vmem>>, vector<1x1x48xf32>
    %8 = vector.shape_cast %7 : vector<1x1x48xf32> to vector<48xf32>
    %9 = vector.shape_cast %8 : vector<48xf32> to vector<1x1x48xf32>
    %10 = vector.broadcast %6 : vector<16x16x1xf32> to vector<16x16x48xf32>
    %11 = vector.broadcast %9 : vector<1x1x48xf32> to vector<16x16x48xf32>
    %12 = arith.mulf %10, %11 : vector<16x16x48xf32>
    %13 = arith.addf %2, %12 : vector<16x16x48xf32>
    %14 = vector.extract_strided_slice %5 {offsets = [0, 0, 1], sizes = [16, 16, 1], strides = [1, 1, 1]} : vector<16x16x3xf32> to vector<16x16x1xf32>
    %c0_7 = arith.constant 0 : index
    %c1 = arith.constant 1 : index
    %c0_8 = arith.constant 0 : index
    %15 = vector.load %arg2[%c0_7, %c1, %c0_8] : memref<9x3x48xf32, #tpu.memory_space<vmem>>, vector<1x1x48xf32>
    %16 = vector.shape_cast %15 : vector<1x1x48xf32> to vector<48xf32>
    %17 = vector.shape_cast %16 : vector<48xf32> to vector<1x1x48xf32>
    %18 = vector.broadcast %14 : vector<16x16x1xf32> to vector<16x16x48xf32>
    %19 = vector.broadcast %17 : vector<1x1x48xf32> to vector<16x16x48xf32>
    %20 = arith.mulf %18, %19 : vector<16x16x48xf32>
    %21 = arith.addf %13, %20 : vector<16x16x48xf32>
    %22 = vector.extract_strided_slice %5 {offsets = [0, 0, 2], sizes = [16, 16, 1], strides = [1, 1, 1]} : vector<16x16x3xf32> to vector<16x16x1xf32>
    %c0_9 = arith.constant 0 : index
    %c2 = arith.constant 2 : index
    %c0_10 = arith.constant 0 : index
    %23 = vector.load %arg2[%c0_9, %c2, %c0_10] : memref<9x3x48xf32, #tpu.memory_space<vmem>>, vector<1x1x48xf32>
    %24 = vector.shape_cast %23 : vector<1x1x48xf32> to vector<48xf32>
    %25 = vector.shape_cast %24 : vector<48xf32> to vector<1x1x48xf32>
    %26 = vector.broadcast %22 : vector<16x16x1xf32> to vector<16x16x48xf32>
    %27 = vector.broadcast %25 : vector<1x1x48xf32> to vector<16x16x48xf32>
    %28 = arith.mulf %26, %27 : vector<16x16x48xf32>
    %29 = arith.addf %21, %28 : vector<16x16x48xf32>
    %30 = vector.extract_strided_slice %1 {offsets = [1, 0, 0, 0], sizes = [1, 16, 16, 3], strides = [1, 1, 1, 1]} : vector<4x17x17x3xbf16> to vector<1x16x16x3xbf16>
    %31 = vector.shape_cast %30 : vector<1x16x16x3xbf16> to vector<16x16x3xbf16>
    %32 = arith.extf %31 : vector<16x16x3xbf16> to vector<16x16x3xf32>
    %33 = vector.extract_strided_slice %32 {offsets = [0, 0, 0], sizes = [16, 16, 1], strides = [1, 1, 1]} : vector<16x16x3xf32> to vector<16x16x1xf32>
    %c1_11 = arith.constant 1 : index
    %c0_12 = arith.constant 0 : index
    %c0_13 = arith.constant 0 : index
    %34 = vector.load %arg2[%c1_11, %c0_12, %c0_13] : memref<9x3x48xf32, #tpu.memory_space<vmem>>, vector<1x1x48xf32>
    %35 = vector.shape_cast %34 : vector<1x1x48xf32> to vector<48xf32>
    %36 = vector.shape_cast %35 : vector<48xf32> to vector<1x1x48xf32>
    %37 = vector.broadcast %33 : vector<16x16x1xf32> to vector<16x16x48xf32>
    %38 = vector.broadcast %36 : vector<1x1x48xf32> to vector<16x16x48xf32>
    %39 = arith.mulf %37, %38 : vector<16x16x48xf32>
    %40 = arith.addf %29, %39 : vector<16x16x48xf32>
    %41 = vector.extract_strided_slice %32 {offsets = [0, 0, 1], sizes = [16, 16, 1], strides = [1, 1, 1]} : vector<16x16x3xf32> to vector<16x16x1xf32>
    %c1_14 = arith.constant 1 : index
    %c1_15 = arith.constant 1 : index
    %c0_16 = arith.constant 0 : index
    %42 = vector.load %arg2[%c1_14, %c1_15, %c0_16] : memref<9x3x48xf32, #tpu.memory_space<vmem>>, vector<1x1x48xf32>
    %43 = vector.shape_cast %42 : vector<1x1x48xf32> to vector<48xf32>
    %44 = vector.shape_cast %43 : vector<48xf32> to vector<1x1x48xf32>
    %45 = vector.broadcast %41 : vector<16x16x1xf32> to vector<16x16x48xf32>
    %46 = vector.broadcast %44 : vector<1x1x48xf32> to vector<16x16x48xf32>
    %47 = arith.mulf %45, %46 : vector<16x16x48xf32>
    %48 = arith.addf %40, %47 : vector<16x16x48xf32>
    %49 = vector.extract_strided_slice %32 {offsets = [0, 0, 2], sizes = [16, 16, 1], strides = [1, 1, 1]} : vector<16x16x3xf32> to vector<16x16x1xf32>
    %c1_17 = arith.constant 1 : index
    %c2_18 = arith.constant 2 : index
    %c0_19 = arith.constant 0 : index
    %50 = vector.load %arg2[%c1_17, %c2_18, %c0_19] : memref<9x3x48xf32, #tpu.memory_space<vmem>>, vector<1x1x48xf32>
    %51 = vector.shape_cast %50 : vector<1x1x48xf32> to vector<48xf32>
    %52 = vector.shape_cast %51 : vector<48xf32> to vector<1x1x48xf32>
    %53 = vector.broadcast %49 : vector<16x16x1xf32> to vector<16x16x48xf32>
    %54 = vector.broadcast %52 : vector<1x1x48xf32> to vector<16x16x48xf32>
    %55 = arith.mulf %53, %54 : vector<16x16x48xf32>
    %56 = arith.addf %48, %55 : vector<16x16x48xf32>
    %57 = vector.extract_strided_slice %1 {offsets = [0, 0, 1, 0], sizes = [1, 16, 16, 3], strides = [1, 1, 1, 1]} : vector<4x17x17x3xbf16> to vector<1x16x16x3xbf16>
    %58 = vector.shape_cast %57 : vector<1x16x16x3xbf16> to vector<16x16x3xbf16>
    %59 = arith.extf %58 : vector<16x16x3xbf16> to vector<16x16x3xf32>
    %60 = vector.extract_strided_slice %59 {offsets = [0, 0, 0], sizes = [16, 16, 1], strides = [1, 1, 1]} : vector<16x16x3xf32> to vector<16x16x1xf32>
    %c2_20 = arith.constant 2 : index
    %c0_21 = arith.constant 0 : index
    %c0_22 = arith.constant 0 : index
    %61 = vector.load %arg2[%c2_20, %c0_21, %c0_22] : memref<9x3x48xf32, #tpu.memory_space<vmem>>, vector<1x1x48xf32>
    %62 = vector.shape_cast %61 : vector<1x1x48xf32> to vector<48xf32>
    %63 = vector.shape_cast %62 : vector<48xf32> to vector<1x1x48xf32>
    %64 = vector.broadcast %60 : vector<16x16x1xf32> to vector<16x16x48xf32>
    %65 = vector.broadcast %63 : vector<1x1x48xf32> to vector<16x16x48xf32>
    %66 = arith.mulf %64, %65 : vector<16x16x48xf32>
    %67 = arith.addf %56, %66 : vector<16x16x48xf32>
    %68 = vector.extract_strided_slice %59 {offsets = [0, 0, 1], sizes = [16, 16, 1], strides = [1, 1, 1]} : vector<16x16x3xf32> to vector<16x16x1xf32>
    %c2_23 = arith.constant 2 : index
    %c1_24 = arith.constant 1 : index
    %c0_25 = arith.constant 0 : index
    %69 = vector.load %arg2[%c2_23, %c1_24, %c0_25] : memref<9x3x48xf32, #tpu.memory_space<vmem>>, vector<1x1x48xf32>
    %70 = vector.shape_cast %69 : vector<1x1x48xf32> to vector<48xf32>
    %71 = vector.shape_cast %70 : vector<48xf32> to vector<1x1x48xf32>
    %72 = vector.broadcast %68 : vector<16x16x1xf32> to vector<16x16x48xf32>
    %73 = vector.broadcast %71 : vector<1x1x48xf32> to vector<16x16x48xf32>
    %74 = arith.mulf %72, %73 : vector<16x16x48xf32>
    %75 = arith.addf %67, %74 : vector<16x16x48xf32>
    %76 = vector.extract_strided_slice %59 {offsets = [0, 0, 2], sizes = [16, 16, 1], strides = [1, 1, 1]} : vector<16x16x3xf32> to vector<16x16x1xf32>
    %c2_26 = arith.constant 2 : index
    %c2_27 = arith.constant 2 : index
    %c0_28 = arith.constant 0 : index
    %77 = vector.load %arg2[%c2_26, %c2_27, %c0_28] : memref<9x3x48xf32, #tpu.memory_space<vmem>>, vector<1x1x48xf32>
    %78 = vector.shape_cast %77 : vector<1x1x48xf32> to vector<48xf32>
    %79 = vector.shape_cast %78 : vector<48xf32> to vector<1x1x48xf32>
    %80 = vector.broadcast %76 : vector<16x16x1xf32> to vector<16x16x48xf32>
    %81 = vector.broadcast %79 : vector<1x1x48xf32> to vector<16x16x48xf32>
    %82 = arith.mulf %80, %81 : vector<16x16x48xf32>
    %83 = arith.addf %75, %82 : vector<16x16x48xf32>
    %84 = vector.extract_strided_slice %1 {offsets = [2, 0, 0, 0], sizes = [1, 16, 16, 3], strides = [1, 1, 1, 1]} : vector<4x17x17x3xbf16> to vector<1x16x16x3xbf16>
    %85 = vector.shape_cast %84 : vector<1x16x16x3xbf16> to vector<16x16x3xbf16>
    %86 = arith.extf %85 : vector<16x16x3xbf16> to vector<16x16x3xf32>
    %87 = vector.extract_strided_slice %86 {offsets = [0, 0, 0], sizes = [16, 16, 1], strides = [1, 1, 1]} : vector<16x16x3xf32> to vector<16x16x1xf32>
    %c3 = arith.constant 3 : index
    %c0_29 = arith.constant 0 : index
    %c0_30 = arith.constant 0 : index
    %88 = vector.load %arg2[%c3, %c0_29, %c0_30] : memref<9x3x48xf32, #tpu.memory_space<vmem>>, vector<1x1x48xf32>
    %89 = vector.shape_cast %88 : vector<1x1x48xf32> to vector<48xf32>
    %90 = vector.shape_cast %89 : vector<48xf32> to vector<1x1x48xf32>
    %91 = vector.broadcast %87 : vector<16x16x1xf32> to vector<16x16x48xf32>
    %92 = vector.broadcast %90 : vector<1x1x48xf32> to vector<16x16x48xf32>
    %93 = arith.mulf %91, %92 : vector<16x16x48xf32>
    %94 = arith.addf %83, %93 : vector<16x16x48xf32>
    %95 = vector.extract_strided_slice %86 {offsets = [0, 0, 1], sizes = [16, 16, 1], strides = [1, 1, 1]} : vector<16x16x3xf32> to vector<16x16x1xf32>
    %c3_31 = arith.constant 3 : index
    %c1_32 = arith.constant 1 : index
    %c0_33 = arith.constant 0 : index
    %96 = vector.load %arg2[%c3_31, %c1_32, %c0_33] : memref<9x3x48xf32, #tpu.memory_space<vmem>>, vector<1x1x48xf32>
    %97 = vector.shape_cast %96 : vector<1x1x48xf32> to vector<48xf32>
    %98 = vector.shape_cast %97 : vector<48xf32> to vector<1x1x48xf32>
    %99 = vector.broadcast %95 : vector<16x16x1xf32> to vector<16x16x48xf32>
    %100 = vector.broadcast %98 : vector<1x1x48xf32> to vector<16x16x48xf32>
    %101 = arith.mulf %99, %100 : vector<16x16x48xf32>
    %102 = arith.addf %94, %101 : vector<16x16x48xf32>
    %103 = vector.extract_strided_slice %86 {offsets = [0, 0, 2], sizes = [16, 16, 1], strides = [1, 1, 1]} : vector<16x16x3xf32> to vector<16x16x1xf32>
    %c3_34 = arith.constant 3 : index
    %c2_35 = arith.constant 2 : index
    %c0_36 = arith.constant 0 : index
    %104 = vector.load %arg2[%c3_34, %c2_35, %c0_36] : memref<9x3x48xf32, #tpu.memory_space<vmem>>, vector<1x1x48xf32>
    %105 = vector.shape_cast %104 : vector<1x1x48xf32> to vector<48xf32>
    %106 = vector.shape_cast %105 : vector<48xf32> to vector<1x1x48xf32>
    %107 = vector.broadcast %103 : vector<16x16x1xf32> to vector<16x16x48xf32>
    %108 = vector.broadcast %106 : vector<1x1x48xf32> to vector<16x16x48xf32>
    %109 = arith.mulf %107, %108 : vector<16x16x48xf32>
    %110 = arith.addf %102, %109 : vector<16x16x48xf32>
    %111 = vector.extract_strided_slice %1 {offsets = [3, 0, 0, 0], sizes = [1, 16, 16, 3], strides = [1, 1, 1, 1]} : vector<4x17x17x3xbf16> to vector<1x16x16x3xbf16>
    %112 = vector.shape_cast %111 : vector<1x16x16x3xbf16> to vector<16x16x3xbf16>
    %113 = arith.extf %112 : vector<16x16x3xbf16> to vector<16x16x3xf32>
    %114 = vector.extract_strided_slice %113 {offsets = [0, 0, 0], sizes = [16, 16, 1], strides = [1, 1, 1]} : vector<16x16x3xf32> to vector<16x16x1xf32>
    %c4 = arith.constant 4 : index
    %c0_37 = arith.constant 0 : index
    %c0_38 = arith.constant 0 : index
    %115 = vector.load %arg2[%c4, %c0_37, %c0_38] : memref<9x3x48xf32, #tpu.memory_space<vmem>>, vector<1x1x48xf32>
    %116 = vector.shape_cast %115 : vector<1x1x48xf32> to vector<48xf32>
    %117 = vector.shape_cast %116 : vector<48xf32> to vector<1x1x48xf32>
    %118 = vector.broadcast %114 : vector<16x16x1xf32> to vector<16x16x48xf32>
    %119 = vector.broadcast %117 : vector<1x1x48xf32> to vector<16x16x48xf32>
    %120 = arith.mulf %118, %119 : vector<16x16x48xf32>
    %121 = arith.addf %110, %120 : vector<16x16x48xf32>
    %122 = vector.extract_strided_slice %113 {offsets = [0, 0, 1], sizes = [16, 16, 1], strides = [1, 1, 1]} : vector<16x16x3xf32> to vector<16x16x1xf32>
    %c4_39 = arith.constant 4 : index
    %c1_40 = arith.constant 1 : index
    %c0_41 = arith.constant 0 : index
    %123 = vector.load %arg2[%c4_39, %c1_40, %c0_41] : memref<9x3x48xf32, #tpu.memory_space<vmem>>, vector<1x1x48xf32>
    %124 = vector.shape_cast %123 : vector<1x1x48xf32> to vector<48xf32>
    %125 = vector.shape_cast %124 : vector<48xf32> to vector<1x1x48xf32>
    %126 = vector.broadcast %122 : vector<16x16x1xf32> to vector<16x16x48xf32>
    %127 = vector.broadcast %125 : vector<1x1x48xf32> to vector<16x16x48xf32>
    %128 = arith.mulf %126, %127 : vector<16x16x48xf32>
    %129 = arith.addf %121, %128 : vector<16x16x48xf32>
    %130 = vector.extract_strided_slice %113 {offsets = [0, 0, 2], sizes = [16, 16, 1], strides = [1, 1, 1]} : vector<16x16x3xf32> to vector<16x16x1xf32>
    %c4_42 = arith.constant 4 : index
    %c2_43 = arith.constant 2 : index
    %c0_44 = arith.constant 0 : index
    %131 = vector.load %arg2[%c4_42, %c2_43, %c0_44] : memref<9x3x48xf32, #tpu.memory_space<vmem>>, vector<1x1x48xf32>
    %132 = vector.shape_cast %131 : vector<1x1x48xf32> to vector<48xf32>
    %133 = vector.shape_cast %132 : vector<48xf32> to vector<1x1x48xf32>
    %134 = vector.broadcast %130 : vector<16x16x1xf32> to vector<16x16x48xf32>
    %135 = vector.broadcast %133 : vector<1x1x48xf32> to vector<16x16x48xf32>
    %136 = arith.mulf %134, %135 : vector<16x16x48xf32>
    %137 = arith.addf %129, %136 : vector<16x16x48xf32>
    %138 = vector.extract_strided_slice %1 {offsets = [2, 0, 1, 0], sizes = [1, 16, 16, 3], strides = [1, 1, 1, 1]} : vector<4x17x17x3xbf16> to vector<1x16x16x3xbf16>
    %139 = vector.shape_cast %138 : vector<1x16x16x3xbf16> to vector<16x16x3xbf16>
    %140 = arith.extf %139 : vector<16x16x3xbf16> to vector<16x16x3xf32>
    %141 = vector.extract_strided_slice %140 {offsets = [0, 0, 0], sizes = [16, 16, 1], strides = [1, 1, 1]} : vector<16x16x3xf32> to vector<16x16x1xf32>
    %c5 = arith.constant 5 : index
    %c0_45 = arith.constant 0 : index
    %c0_46 = arith.constant 0 : index
    %142 = vector.load %arg2[%c5, %c0_45, %c0_46] : memref<9x3x48xf32, #tpu.memory_space<vmem>>, vector<1x1x48xf32>
    %143 = vector.shape_cast %142 : vector<1x1x48xf32> to vector<48xf32>
    %144 = vector.shape_cast %143 : vector<48xf32> to vector<1x1x48xf32>
    %145 = vector.broadcast %141 : vector<16x16x1xf32> to vector<16x16x48xf32>
    %146 = vector.broadcast %144 : vector<1x1x48xf32> to vector<16x16x48xf32>
    %147 = arith.mulf %145, %146 : vector<16x16x48xf32>
    %148 = arith.addf %137, %147 : vector<16x16x48xf32>
    %149 = vector.extract_strided_slice %140 {offsets = [0, 0, 1], sizes = [16, 16, 1], strides = [1, 1, 1]} : vector<16x16x3xf32> to vector<16x16x1xf32>
    %c5_47 = arith.constant 5 : index
    %c1_48 = arith.constant 1 : index
    %c0_49 = arith.constant 0 : index
    %150 = vector.load %arg2[%c5_47, %c1_48, %c0_49] : memref<9x3x48xf32, #tpu.memory_space<vmem>>, vector<1x1x48xf32>
    %151 = vector.shape_cast %150 : vector<1x1x48xf32> to vector<48xf32>
    %152 = vector.shape_cast %151 : vector<48xf32> to vector<1x1x48xf32>
    %153 = vector.broadcast %149 : vector<16x16x1xf32> to vector<16x16x48xf32>
    %154 = vector.broadcast %152 : vector<1x1x48xf32> to vector<16x16x48xf32>
    %155 = arith.mulf %153, %154 : vector<16x16x48xf32>
    %156 = arith.addf %148, %155 : vector<16x16x48xf32>
    %157 = vector.extract_strided_slice %140 {offsets = [0, 0, 2], sizes = [16, 16, 1], strides = [1, 1, 1]} : vector<16x16x3xf32> to vector<16x16x1xf32>
    %c5_50 = arith.constant 5 : index
    %c2_51 = arith.constant 2 : index
    %c0_52 = arith.constant 0 : index
    %158 = vector.load %arg2[%c5_50, %c2_51, %c0_52] : memref<9x3x48xf32, #tpu.memory_space<vmem>>, vector<1x1x48xf32>
    %159 = vector.shape_cast %158 : vector<1x1x48xf32> to vector<48xf32>
    %160 = vector.shape_cast %159 : vector<48xf32> to vector<1x1x48xf32>
    %161 = vector.broadcast %157 : vector<16x16x1xf32> to vector<16x16x48xf32>
    %162 = vector.broadcast %160 : vector<1x1x48xf32> to vector<16x16x48xf32>
    %163 = arith.mulf %161, %162 : vector<16x16x48xf32>
    %164 = arith.addf %156, %163 : vector<16x16x48xf32>
    %165 = vector.extract_strided_slice %1 {offsets = [0, 1, 0, 0], sizes = [1, 16, 16, 3], strides = [1, 1, 1, 1]} : vector<4x17x17x3xbf16> to vector<1x16x16x3xbf16>
    %166 = vector.shape_cast %165 : vector<1x16x16x3xbf16> to vector<16x16x3xbf16>
    %167 = arith.extf %166 : vector<16x16x3xbf16> to vector<16x16x3xf32>
    %168 = vector.extract_strided_slice %167 {offsets = [0, 0, 0], sizes = [16, 16, 1], strides = [1, 1, 1]} : vector<16x16x3xf32> to vector<16x16x1xf32>
    %c6 = arith.constant 6 : index
    %c0_53 = arith.constant 0 : index
    %c0_54 = arith.constant 0 : index
    %169 = vector.load %arg2[%c6, %c0_53, %c0_54] : memref<9x3x48xf32, #tpu.memory_space<vmem>>, vector<1x1x48xf32>
    %170 = vector.shape_cast %169 : vector<1x1x48xf32> to vector<48xf32>
    %171 = vector.shape_cast %170 : vector<48xf32> to vector<1x1x48xf32>
    %172 = vector.broadcast %168 : vector<16x16x1xf32> to vector<16x16x48xf32>
    %173 = vector.broadcast %171 : vector<1x1x48xf32> to vector<16x16x48xf32>
    %174 = arith.mulf %172, %173 : vector<16x16x48xf32>
    %175 = arith.addf %164, %174 : vector<16x16x48xf32>
    %176 = vector.extract_strided_slice %167 {offsets = [0, 0, 1], sizes = [16, 16, 1], strides = [1, 1, 1]} : vector<16x16x3xf32> to vector<16x16x1xf32>
    %c6_55 = arith.constant 6 : index
    %c1_56 = arith.constant 1 : index
    %c0_57 = arith.constant 0 : index
    %177 = vector.load %arg2[%c6_55, %c1_56, %c0_57] : memref<9x3x48xf32, #tpu.memory_space<vmem>>, vector<1x1x48xf32>
    %178 = vector.shape_cast %177 : vector<1x1x48xf32> to vector<48xf32>
    %179 = vector.shape_cast %178 : vector<48xf32> to vector<1x1x48xf32>
    %180 = vector.broadcast %176 : vector<16x16x1xf32> to vector<16x16x48xf32>
    %181 = vector.broadcast %179 : vector<1x1x48xf32> to vector<16x16x48xf32>
    %182 = arith.mulf %180, %181 : vector<16x16x48xf32>
    %183 = arith.addf %175, %182 : vector<16x16x48xf32>
    %184 = vector.extract_strided_slice %167 {offsets = [0, 0, 2], sizes = [16, 16, 1], strides = [1, 1, 1]} : vector<16x16x3xf32> to vector<16x16x1xf32>
    %c6_58 = arith.constant 6 : index
    %c2_59 = arith.constant 2 : index
    %c0_60 = arith.constant 0 : index
    %185 = vector.load %arg2[%c6_58, %c2_59, %c0_60] : memref<9x3x48xf32, #tpu.memory_space<vmem>>, vector<1x1x48xf32>
    %186 = vector.shape_cast %185 : vector<1x1x48xf32> to vector<48xf32>
    %187 = vector.shape_cast %186 : vector<48xf32> to vector<1x1x48xf32>
    %188 = vector.broadcast %184 : vector<16x16x1xf32> to vector<16x16x48xf32>
    %189 = vector.broadcast %187 : vector<1x1x48xf32> to vector<16x16x48xf32>
    %190 = arith.mulf %188, %189 : vector<16x16x48xf32>
    %191 = arith.addf %183, %190 : vector<16x16x48xf32>
    %192 = vector.extract_strided_slice %1 {offsets = [1, 1, 0, 0], sizes = [1, 16, 16, 3], strides = [1, 1, 1, 1]} : vector<4x17x17x3xbf16> to vector<1x16x16x3xbf16>
    %193 = vector.shape_cast %192 : vector<1x16x16x3xbf16> to vector<16x16x3xbf16>
    %194 = arith.extf %193 : vector<16x16x3xbf16> to vector<16x16x3xf32>
    %195 = vector.extract_strided_slice %194 {offsets = [0, 0, 0], sizes = [16, 16, 1], strides = [1, 1, 1]} : vector<16x16x3xf32> to vector<16x16x1xf32>
    %c7 = arith.constant 7 : index
    %c0_61 = arith.constant 0 : index
    %c0_62 = arith.constant 0 : index
    %196 = vector.load %arg2[%c7, %c0_61, %c0_62] : memref<9x3x48xf32, #tpu.memory_space<vmem>>, vector<1x1x48xf32>
    %197 = vector.shape_cast %196 : vector<1x1x48xf32> to vector<48xf32>
    %198 = vector.shape_cast %197 : vector<48xf32> to vector<1x1x48xf32>
    %199 = vector.broadcast %195 : vector<16x16x1xf32> to vector<16x16x48xf32>
    %200 = vector.broadcast %198 : vector<1x1x48xf32> to vector<16x16x48xf32>
    %201 = arith.mulf %199, %200 : vector<16x16x48xf32>
    %202 = arith.addf %191, %201 : vector<16x16x48xf32>
    %203 = vector.extract_strided_slice %194 {offsets = [0, 0, 1], sizes = [16, 16, 1], strides = [1, 1, 1]} : vector<16x16x3xf32> to vector<16x16x1xf32>
    %c7_63 = arith.constant 7 : index
    %c1_64 = arith.constant 1 : index
    %c0_65 = arith.constant 0 : index
    %204 = vector.load %arg2[%c7_63, %c1_64, %c0_65] : memref<9x3x48xf32, #tpu.memory_space<vmem>>, vector<1x1x48xf32>
    %205 = vector.shape_cast %204 : vector<1x1x48xf32> to vector<48xf32>
    %206 = vector.shape_cast %205 : vector<48xf32> to vector<1x1x48xf32>
    %207 = vector.broadcast %203 : vector<16x16x1xf32> to vector<16x16x48xf32>
    %208 = vector.broadcast %206 : vector<1x1x48xf32> to vector<16x16x48xf32>
    %209 = arith.mulf %207, %208 : vector<16x16x48xf32>
    %210 = arith.addf %202, %209 : vector<16x16x48xf32>
    %211 = vector.extract_strided_slice %194 {offsets = [0, 0, 2], sizes = [16, 16, 1], strides = [1, 1, 1]} : vector<16x16x3xf32> to vector<16x16x1xf32>
    %c7_66 = arith.constant 7 : index
    %c2_67 = arith.constant 2 : index
    %c0_68 = arith.constant 0 : index
    %212 = vector.load %arg2[%c7_66, %c2_67, %c0_68] : memref<9x3x48xf32, #tpu.memory_space<vmem>>, vector<1x1x48xf32>
    %213 = vector.shape_cast %212 : vector<1x1x48xf32> to vector<48xf32>
    %214 = vector.shape_cast %213 : vector<48xf32> to vector<1x1x48xf32>
    %215 = vector.broadcast %211 : vector<16x16x1xf32> to vector<16x16x48xf32>
    %216 = vector.broadcast %214 : vector<1x1x48xf32> to vector<16x16x48xf32>
    %217 = arith.mulf %215, %216 : vector<16x16x48xf32>
    %218 = arith.addf %210, %217 : vector<16x16x48xf32>
    %219 = vector.extract_strided_slice %1 {offsets = [0, 1, 1, 0], sizes = [1, 16, 16, 3], strides = [1, 1, 1, 1]} : vector<4x17x17x3xbf16> to vector<1x16x16x3xbf16>
    %220 = vector.shape_cast %219 : vector<1x16x16x3xbf16> to vector<16x16x3xbf16>
    %221 = arith.extf %220 : vector<16x16x3xbf16> to vector<16x16x3xf32>
    %222 = vector.extract_strided_slice %221 {offsets = [0, 0, 0], sizes = [16, 16, 1], strides = [1, 1, 1]} : vector<16x16x3xf32> to vector<16x16x1xf32>
    %c8 = arith.constant 8 : index
    %c0_69 = arith.constant 0 : index
    %c0_70 = arith.constant 0 : index
    %223 = vector.load %arg2[%c8, %c0_69, %c0_70] : memref<9x3x48xf32, #tpu.memory_space<vmem>>, vector<1x1x48xf32>
    %224 = vector.shape_cast %223 : vector<1x1x48xf32> to vector<48xf32>
    %225 = vector.shape_cast %224 : vector<48xf32> to vector<1x1x48xf32>
    %226 = vector.broadcast %222 : vector<16x16x1xf32> to vector<16x16x48xf32>
    %227 = vector.broadcast %225 : vector<1x1x48xf32> to vector<16x16x48xf32>
    %228 = arith.mulf %226, %227 : vector<16x16x48xf32>
    %229 = arith.addf %218, %228 : vector<16x16x48xf32>
    %230 = vector.extract_strided_slice %221 {offsets = [0, 0, 1], sizes = [16, 16, 1], strides = [1, 1, 1]} : vector<16x16x3xf32> to vector<16x16x1xf32>
    %c8_71 = arith.constant 8 : index
    %c1_72 = arith.constant 1 : index
    %c0_73 = arith.constant 0 : index
    %231 = vector.load %arg2[%c8_71, %c1_72, %c0_73] : memref<9x3x48xf32, #tpu.memory_space<vmem>>, vector<1x1x48xf32>
    %232 = vector.shape_cast %231 : vector<1x1x48xf32> to vector<48xf32>
    %233 = vector.shape_cast %232 : vector<48xf32> to vector<1x1x48xf32>
    %234 = vector.broadcast %230 : vector<16x16x1xf32> to vector<16x16x48xf32>
    %235 = vector.broadcast %233 : vector<1x1x48xf32> to vector<16x16x48xf32>
    %236 = arith.mulf %234, %235 : vector<16x16x48xf32>
    %237 = arith.addf %229, %236 : vector<16x16x48xf32>
    %238 = vector.extract_strided_slice %221 {offsets = [0, 0, 2], sizes = [16, 16, 1], strides = [1, 1, 1]} : vector<16x16x3xf32> to vector<16x16x1xf32>
    %c8_74 = arith.constant 8 : index
    %c2_75 = arith.constant 2 : index
    %c0_76 = arith.constant 0 : index
    %239 = vector.load %arg2[%c8_74, %c2_75, %c0_76] : memref<9x3x48xf32, #tpu.memory_space<vmem>>, vector<1x1x48xf32>
    %240 = vector.shape_cast %239 : vector<1x1x48xf32> to vector<48xf32>
    %241 = vector.shape_cast %240 : vector<48xf32> to vector<1x1x48xf32>
    %242 = vector.broadcast %238 : vector<16x16x1xf32> to vector<16x16x48xf32>
    %243 = vector.broadcast %241 : vector<1x1x48xf32> to vector<16x16x48xf32>
    %244 = arith.mulf %242, %243 : vector<16x16x48xf32>
    %245 = arith.addf %237, %244 : vector<16x16x48xf32>
    %c0_77 = arith.constant 0 : index
    %c0_78 = arith.constant 0 : index
    %246 = vector.load %arg3[%c0_77, %c0_78] : memref<1x48xf32, #tpu.memory_space<vmem>>, vector<1x48xf32>
    %247 = vector.shape_cast %246 : vector<1x48xf32> to vector<48xf32>
    %248 = vector.shape_cast %247 : vector<48xf32> to vector<1x1x48xf32>
    %249 = vector.broadcast %248 : vector<1x1x48xf32> to vector<16x16x48xf32>
    %250 = arith.addf %245, %249 : vector<16x16x48xf32>
    %251 = arith.negf %250 : vector<16x16x48xf32>
    %252 = math.exp %251 : vector<16x16x48xf32>
    %cst_79 = arith.constant 1.000000e+00 : f32
    %253 = vector.broadcast %cst_79 : f32 to vector<16x16x48xf32>
    %254 = arith.addf %253, %252 : vector<16x16x48xf32>
    %255 = arith.divf %253, %254 : vector<16x16x48xf32>
    %256 = arith.mulf %250, %255 : vector<16x16x48xf32>
    %257 = arith.truncf %256 : vector<16x16x48xf32> to vector<16x16x48xbf16>
    %c0_80 = arith.constant 0 : index
    %c0_81 = arith.constant 0 : index
    %c0_82 = arith.constant 0 : index
    %c0_83 = arith.constant 0 : index
    %258 = vector.load %arg4[%c0_80, %c0_81, %c0_82, %c0_83] : memref<1x16x16x48xbf16, #tpu.memory_space<vmem>>, vector<1x16x16x48xbf16>
    %259 = vector.shape_cast %258 : vector<1x16x16x48xbf16> to vector<16x16x48xbf16>
    %260 = vector.shape_cast %257 : vector<16x16x48xbf16> to vector<1x16x16x48xbf16>
    tpu.vector_store %arg4[%c0_80, %c0_81, %c0_82, %c0_83], %260 {strides = array<i32>} : memref<1x16x16x48xbf16, #tpu.memory_space<vmem>>, vector<1x16x16x48xbf16>,
    return
  }
  func.func @transform_0(%arg0: i32) -> (i32, i32, i32, i32, i32) {
    %c0_i32 = arith.constant 0 : i32
    %c0_i32_0 = arith.constant 0 : i32
    %c0_i32_1 = arith.constant 0 : i32
    %c0_i32_2 = arith.constant 0 : i32
    %c0_i32_3 = arith.constant 0 : i32
    return %arg0, %c0_i32, %c0_i32_0, %c0_i32_1, %c0_i32_2 : i32, i32, i32, i32, i32
  }
  func.func @transform_1(%arg0: i32) -> (i32, i32, i32) {
    %c0_i32 = arith.constant 0 : i32
    %c0_i32_0 = arith.constant 0 : i32
    %c0_i32_1 = arith.constant 0 : i32
    %c0_i32_2 = arith.constant 0 : i32
    return %c0_i32, %c0_i32_0, %c0_i32_1 : i32, i32, i32
  }
  func.func @transform_2(%arg0: i32) -> (i32, i32) {
    %c0_i32 = arith.constant 0 : i32
    %c0_i32_0 = arith.constant 0 : i32
    %c0_i32_1 = arith.constant 0 : i32
    return %c0_i32, %c0_i32_0 : i32, i32
  }
  func.func @transform_3(%arg0: i32) -> (i32, i32, i32, i32) {
    %c0_i32 = arith.constant 0 : i32
    %c0_i32_0 = arith.constant 0 : i32
    %c0_i32_1 = arith.constant 0 : i32
    %c0_i32_2 = arith.constant 0 : i32
    return %arg0, %c0_i32, %c0_i32_0, %c0_i32_1 : i32, i32, i32, i32
  }
}

</mosaic_0001>

<bundles_post_ra>
// kernel: tpu_custom_call.1
= control target key start
LH: loop header
LB: loop body
LE: loop exit
PB: predicated region body
PF: predicated region fallthrough
CT: control target
= control target key end

     0   :  { %8 = vsyncpa [#allocation3], 0  ;;  %s15074_s0 = inlined_call_operand.vmem [shape: bf16[2,4,17,17,3], index: 0, kind: input, shape index: {}]   ;;  %s15075_s1 = inlined_call_operand.vmem [shape: f32[9,3,48], index: 1, kind: input, shape index: {}]   ;;  %s15076_s2 = inlined_call_operand.vmem [shape: f32[1,48], index: 2, kind: input, shape index: {}]   ;;  %s15077_s3 = inlined_call_operand.hbm [shape: bf16[2,16,16,48], index: 3, kind: output, shape index: {}]  }
   0x1   :  { %10 = vsyncpa [#allocation3 + $0x1], 0  ;;  %s8487_s12 = smov 0   ;;  %s8489_s13 = smov 0  }
   0x2   :  { %s8491_s14 = smov 0   ;;  %s8493_s15 = smov 0  }
   0x3 LB: > { %s8508_s16 = sadd.s32 4294967295, %s8459_s15   ;;  %s6600_s17 = sadd.s32 4294967294, %s8459_s15   ;;  %s8459_s15 = sphi %s8493_s15, %s17385_s15   ;;  %s8455_s14 = sphi %s8491_s14, %s17384_s14   ;;  %s8451_s13 = sphi %s8489_s13, %s17383_s13   ;;  %s8447_s12 = sphi %s8487_s12, %s17382_s12  }
   0x4   : > { %s8512_s18 = sadd.s32 1, %s8459_s15   ;;  %s91_s19 = sadd.s32 1, %s8455_s14 }
   0x5   : > { %s88_s20 = ssub.s32 %s8459_s15, %s8512_s18  ;;  %p101_p0 = scmp.ne.s32.totalorder %s8455_s14, %s8451_s13 }
   0x6   : > { %p89_p1 = scmp.eq.s32.totalorder %s88_s20, 0  ;;  %p102_p2 = scmp.eq.s32.totalorder %s8508_s16, 1 }
   0x7   : > { %p107_p3 = scmp.ne.s32.totalorder %s8451_s13, %s8447_s12  ;;  %p108_p4 = scmp.eq.s32.totalorder %s6600_s17, 1 }
   0x8   : > { %s8523_s21 = scalar_select %p89_p1, %s8455_s14, %s91_s19  }
   0x9   : > { %p8525_p5 = por %p102_p2, %p101_p0  ;;  %p8529_p6 = por %p108_p4, %p107_p3 }
   0xa   : > { %p6603_p7 = scmp.ge.s32.totalorder %s8459_s15, 1  ;;  %p140_p8 = scmp.lt.s32.totalorder %s8459_s15, 3 }
   0xc   : > { %p141_p9 = pnand %p6603_p7, %p140_p8 }
   0xe   : > { %144 = sbr.rel (%p141_p9) target bundleno = 1103 (0x44f), region = 32 }
  0x15   : > { %p164_p10 = scmp.lt.s32.totalorder %s8508_s16, 1  ;;  %v15078_v0 = vmov 0   ;;  %vm1843_vm0 = vcmask 1046528   ;;  %vm6491_vm1 = vcmask 388096   ;;  %s161_s11 = sand.u32 1, %s8451_s13  }
  0x16   : > { %6980 = vset.pattern.permute.xlu1 %v15078_v0  ;;  %6969 = vset.pattern.permute.xlu0 %v15078_v0  ;;  %s6604_s17 = sshll.u32 %s161_s11, 7  ;;  %s6759_s9 = sshll.u32 %s8508_s16, 11 }
  0x17   : > { %s165_s24 = scalar_select %p164_p10, %s8508_s16, 1 }
  0x18   : > { %s14120_s19 = scalar_lea.vmem [#allocation2], %s6604_s17  ;;  %s15023_s20 = scalar_lea.hbm %s15077_s3, %s6759_s9 }
  0x19   : > { %s6924_s25 = smul.u32 816, %s165_s24  ;;  %s15033_s16 = scalar_lea.sflag [#allocation3], %s161_s11 }
  0x1b   : > { %s8542_s28 = scalar_lea.vmem %s15074_s0, %s6924_s25  ;;  %s8464_s25 = smov [#allocation2]  }
  0x1c   : > { %v6892_v1 = vld [vmem:[%s8542_s28 + $0x18] sm:$0xff]   ;;  %v6761_v2 = vld [vmem:[%s8542_s28] sm:$0xff]   ;;  %v172_v8 = vld [vmem:[%s8542_s28 + $0xc] sm:$0xff]   ;;  %s8401_s26 = sshll.u32 %s8464_s25, 4  ;;  %s8402_s26 = int_to_ptr.vmem [resolvable:$false] %s8401_s26 }
  0x1d   : > { %v178_v3 = vld [vmem:[%s8542_s28 + $0x24] sm:$0xff]   ;;  %v6766_v4 = vunpack.c.l.bf16 %v6892_v1  ;;  %v6767_v5 = vunpack.c.h.bf16 %v6892_v1  ;;  %v6762_v6 = vunpack.c.l.bf16 %v6761_v2  ;;  %v6763_v7 = vunpack.c.h.bf16 %v6761_v2  ;;  %v184_v9 = vld [vmem:[%s8542_s28 + $0x3c] sm:$0xff]   ;;  %v6893_v14 = vld [vmem:[%s8542_s28 + $0x30] sm:$0xff]   ;;  %s8403_s27 = scalar_lea.vmem %s8402_s26, 4096 }
  0x1e   : > { %v340_v10 = vunpack.c.l.bf16 %v178_v3  ;;  %v341_v11 = vunpack.c.h.bf16 %v178_v3  ;;  %v336_v12 = vunpack.c.l.bf16 %v172_v8  ;;  %v337_v13 = vunpack.c.h.bf16 %v172_v8  ;;  %v190_v23 = vld [vmem:[%s8542_s28 + $0x54] sm:$0xff]   ;;  %v6894_v24 = vld [vmem:[%s8542_s28 + $0x48] sm:$0xff]   ;;  %v6895_v32 = vld [vmem:[%s8542_s28 + $0x60] sm:$0xff]  }
  0x1f   : > { %v8550_v15 = vpack.i.bf16 %v6767_v5, %v6766_v4  ;;  %v8552_v16 = vpack.i.bf16 %v6763_v7, %v6762_v6  ;;  %v344_v17 = vunpack.c.l.bf16 %v184_v9  ;;  %v345_v18 = vunpack.c.h.bf16 %v184_v9  ;;  %v196_v31 = vld [vmem:[%s8542_s28 + $0x6c] sm:$0xff]   ;;  %v202_v39 = vld [vmem:[%s8542_s28 + $0x84] sm:$0xff]   ;;  %v6896_v40 = vld [vmem:[%s8542_s28 + $0x78] sm:$0xff]  }
  0x20   : > { %v8556_v19 = vpack.i.bf16 %v341_v11, %v340_v10  ;;  %v8558_v20 = vpack.i.bf16 %v337_v13, %v336_v12  ;;  %v6770_v21 = vunpack.c.l.bf16 %v6893_v14  ;;  %v6771_v22 = vunpack.c.h.bf16 %v6893_v14  ;;  %v208_v47 = vld [vmem:[%s8542_s28 + $0x9c] sm:$0xff]   ;;  %v6897_v48 = vld [vmem:[%s8542_s28 + $0x90] sm:$0xff]   ;;  %v6898_v56 = vld [vmem:[%s8542_s28 + $0xa8] sm:$0xff]  }
  0x21   : > { %6982 = vperm.xlu1 %6980, %v8550_v15   ;;  %6971 = vperm.xlu0 %6969, %v8552_v16   ;;  %v8562_v25 = vpack.i.bf16 %v345_v18, %v344_v17  ;;  %v348_v26 = vunpack.c.l.bf16 %v190_v23  ;;  %v349_v28 = vunpack.c.h.bf16 %v190_v23  ;;  %v6774_v29 = vunpack.c.l.bf16 %v6894_v24  ;;  %v214_v55 = vld [vmem:[%s8542_s28 + $0xb4] sm:$0xff]   ;;  %v220_v63 = vld [vmem:[%s8542_s28 + $0xcc] sm:$0xff]   ;;  %v6903_v14 = vld [vmem:[%s8542_s28 + $0x120] sm:$0xff]  }
  0x22   : > { %15393 = vst [vmem:[#allocation5_spill] sm:$0xff] %v8558_v20  ;;  %v8566_v27 = vpack.i.bf16 %v6771_v22, %v6770_v21  ;;  %v6775_v30 = vunpack.c.h.bf16 %v6894_v24  ;;  %v352_v33 = vunpack.c.l.bf16 %v196_v31  ;;  %v353_v34 = vunpack.c.h.bf16 %v196_v31  ;;  %v6901_v5 = vld [vmem:[%s8542_s28 + $0xf0] sm:$0xff]   ;;  %v6902_v9 = vld [vmem:[%s8542_s28 + $0x108] sm:$0xff]   ;;  %v6904_v22 = vld [vmem:[%s8542_s28 + $0x138] sm:$0xff]  }
  0x23   : > { %v8572_v35 = vpack.i.bf16 %v349_v28, %v348_v26  ;;  %v6778_v37 = vunpack.c.l.bf16 %v6895_v32  ;;  %v6779_v38 = vunpack.c.h.bf16 %v6895_v32  ;;  %v356_v41 = vunpack.c.l.bf16 %v202_v39  ;;  %v6905_v28 = vld [vmem:[%s8542_s28 + $0x150] sm:$0xff]   ;;  %v6906_v32 = vld [vmem:[%s8542_s28 + $0x168] sm:$0xff]  }
  0x24   : > { %15394 = vst [vmem:[#allocation6_spill] sm:$0xff] %v8566_v27  ;;  %v8574_v36 = vpack.i.bf16 %v6775_v30, %v6774_v29  ;;  %v357_v42 = vunpack.c.h.bf16 %v202_v39  ;;  %v8580_v43 = vpack.i.bf16 %v353_v34, %v352_v33  ;;  %v6782_v45 = vunpack.c.l.bf16 %v6896_v40 }
  0x25   : > { %6987 = vperm.xlu1 %6980, %v8556_v19   ;;  %6976 = vperm.xlu0 %6969, %v8558_v20   ;;  %v8582_v44 = vpack.i.bf16 %v6779_v38, %v6778_v37  ;;  %v6783_v46 = vunpack.c.h.bf16 %v6896_v40  ;;  %v360_v50 = vunpack.c.l.bf16 %v208_v47  ;;  %v361_v51 = vunpack.c.h.bf16 %v208_v47  ;;  %v6907_v38 = vld [vmem:[%s8542_s28 + $0x180] sm:$0xff]  }
  0x26   : > { %15395 = vst [vmem:[#allocation7_spill] sm:$0xff] %v8574_v36  ;;  %v8586_v49 = vpack.i.bf16 %v357_v42, %v356_v41  ;;  %v6786_v53 = vunpack.c.l.bf16 %v6897_v48  ;;  %v6787_v54 = vunpack.c.h.bf16 %v6897_v48  ;;  %v364_v58 = vunpack.c.l.bf16 %v214_v55  ;;  %v177_v42 = vld [vmem:[%s8542_s28 + $0x20] sm:$0x1] }
  0x27   : > { %15396 = vst [vmem:[#allocation8_spill] sm:$0xff] %v8582_v44  ;;  %v8590_v52 = vpack.i.bf16 %v6783_v46, %v6782_v45  ;;  %v8594_v57 = vpack.i.bf16 %v361_v51, %v360_v50  ;;  %v365_v60 = vunpack.c.h.bf16 %v214_v55  ;;  %v6790_v61 = vunpack.c.l.bf16 %v6898_v56  ;;  %v180_v45 = vld [vmem:[%s8542_s28 + $0x2c] sm:$0x1]  ;;  %v195_v50 = vld [vmem:[%s8542_s28 + $0x68] sm:$0x1] }
  0x28   : > { %v8598_v59 = vpack.i.bf16 %v6787_v54, %v6786_v53  ;;  %v6791_v62 = vunpack.c.h.bf16 %v6898_v56  ;;  %v989_v3 = vunpack.c.l.bf16 %v220_v63  ;;  %v990_v4 = vunpack.c.h.bf16 %v220_v63  ;;  %v198_v51 = vld [vmem:[%s8542_s28 + $0x74] sm:$0x1]  ;;  %v207_v56 = vld [vmem:[%s8542_s28 + $0x98] sm:$0x1] }
  0x29   : > { %6997 = vperm.xlu1 %6980, %v8562_v25   ;;  %6992 = vperm.xlu0 %6969, %v8566_v27   ;;  %15397 = vst [vmem:[#allocation9_spill] sm:$0xff] %v8590_v52  ;;  %v8603_v1 = vpack.i.bf16 %v365_v60, %v364_v58  ;;  %v6802_v7 = vunpack.c.l.bf16 %v6901_v5  ;;  %v6803_v8 = vunpack.c.h.bf16 %v6901_v5  ;;  %v15082_v10 = vmov 1   ;;  %v210_v58 = vld [vmem:[%s8542_s28 + $0xa4] sm:$0x1] }
  0x2a   : > { %15398 = vst [vmem:[#allocation10_spill] sm:$0xff] %v8598_v59  ;;  %v8605_v2 = vpack.i.bf16 %v6791_v62, %v6790_v61  ;;  %v8610_v6 = vpack.i.bf16 %v990_v4, %v989_v3  ;;  %v6806_v12 = vunpack.c.l.bf16 %v6902_v9  ;;  %v6807_v13 = vunpack.c.h.bf16 %v6902_v9  ;;  %v6908_v3 = vld [vmem:[%s8542_s28 + $0x198] sm:$0xff]  }
  0x2b   : > { %v8615_v11 = vpack.i.bf16 %v6803_v8, %v6802_v7  ;;  %v6810_v18 = vunpack.c.l.bf16 %v6903_v14  ;;  %v6811_v21 = vunpack.c.h.bf16 %v6903_v14  ;;  %v6814_v24 = vunpack.c.l.bf16 %v6904_v22  ;;  %v263_v8 = vld [vmem:[%s8542_s28 + $0x1bc] sm:$0xff]   ;;  %v269_v14 = vld [vmem:[%s8542_s28 + $0x1d4] sm:$0xff]  }
  0x2c   : > { %15399 = vst [vmem:[#allocation11_spill] sm:$0xff] %v8605_v2  ;;  %15400 = vst [vmem:[#allocation12_spill] sm:$0xff] %v8610_v6  ;;  %v8620_v17 = vpack.i.bf16 %v6807_v13, %v6806_v12  ;;  %v6815_v26 = vunpack.c.h.bf16 %v6904_v22  ;;  %v6818_v30 = vunpack.c.l.bf16 %v6905_v28  ;;  %v6819_v31 = vunpack.c.h.bf16 %v6905_v28 }
  0x2d   : > { %7007 = vperm.xlu1 %6980, %v8572_v35   ;;  %7002 = vperm.xlu0 %6969, %v8574_v36   ;;  %15401 = vst [vmem:[#allocation13_spill] sm:$0xff] %v8615_v11  ;;  %v8625_v23 = vpack.i.bf16 %v6811_v21, %v6810_v18  ;;  %v6822_v34 = vunpack.c.l.bf16 %v6906_v32  ;;  %v6823_v37 = vunpack.c.h.bf16 %v6906_v32  ;;  %v6826_v40 = vunpack.c.l.bf16 %v6907_v38 }
  0x2e   : > { %15402 = vst [vmem:[#allocation14_spill] sm:$0xff] %v8620_v17  ;;  %v8630_v29 = vpack.i.bf16 %v6815_v26, %v6814_v24  ;;  %v8635_v33 = vpack.i.bf16 %v6819_v31, %v6818_v30  ;;  %v6827_v41 = vunpack.c.h.bf16 %v6907_v38  ;;  %v1647_v47 = vunpack.c.l.bf16 %v177_v42  ;;  %v275_v24 = vld [vmem:[%s8542_s28 + $0x1ec] sm:$0xff]   ;;  %v281_v31 = vld [vmem:[%s8542_s28 + $0x204] sm:$0xff]   ;;  %v287_v42 = vld [vmem:[%s8542_s28 + $0x21c] sm:$0xff]  }
  0x2f   : > { %15403 = vst [vmem:[#allocation15_spill] sm:$0xff] %v8625_v23  ;;  %v8640_v39 = vpack.i.bf16 %v6823_v37, %v6822_v34  ;;  %v1648_v48 = vunpack.c.l.bf16 %v180_v45  ;;  %v1653_v54 = vunpack.c.l.bf16 %v195_v50  ;;  %v1654_v55 = vunpack.c.l.bf16 %v198_v51  ;;  %v293_v50 = vld [vmem:[%s8542_s28 + $0x234] sm:$0xff]  }
  0x30   : > { %15404 = vst [vmem:[#allocation16_spill] sm:$0xff] %v8630_v29  ;;  %15405 = vst [vmem:[#allocation17_spill] sm:$0xff] %v8635_v33  ;;  %v8646_v46 = vpack.i.bf16 %v6827_v41, %v6826_v40  ;;  %v1657_v61 = vunpack.c.l.bf16 %v207_v56  ;;  %v1658_v62 = vunpack.c.l.bf16 %v210_v58  ;;  %v15080_v63 = vmov 2   ;;  %v6900_v56 = vld [vmem:[%s8542_s28 + $0xd8] sm:$0xff]   ;;  %v299_v58 = vld [vmem:[%s8542_s28 + $0x24c] sm:$0xff]  }
  0x31   : > { %7017 = vperm.xlu1 %6980, %v8580_v43   ;;  %7012 = vperm.xlu0 %6969, %v8582_v44   ;;  %15406 = vst [vmem:[#allocation18_spill] sm:$0xff] %v8640_v39  ;;  %v8652_v53 = vpack.i.bf16 %v1648_v48, %v1647_v47  ;;  %v8658_v60 = vpack.i.bf16 %v1654_v55, %v1653_v54  ;;  %v6830_v5 = vunpack.c.l.bf16 %v6908_v3  ;;  %v6831_v7 = vunpack.c.h.bf16 %v6908_v3 }
  0x32   : > { %15407 = vst [vmem:[#allocation19_spill] sm:$0xff] %v8646_v46  ;;  %v8664_v4 = vpack.i.bf16 %v1658_v62, %v1657_v61  ;;  %v2612_v12 = vunpack.c.l.bf16 %v263_v8  ;;  %v2613_v13 = vunpack.c.h.bf16 %v263_v8  ;;  %v2616_v21 = vunpack.c.l.bf16 %v269_v14  ;;  %v6916_v8 = vld [vmem:[%s8542_s28 + $0x270] sm:$0xff]  }
  0x33   : > { %15408 = vst [vmem:[#allocation20_spill] sm:$0xff] %v8652_v53  ;;  %15409 = vst [vmem:[#allocation21_spill] sm:$0xff] %v8658_v60  ;;  %v8669_v9 = vpack.i.bf16 %v6831_v7, %v6830_v5  ;;  %v2617_v22 = vunpack.c.h.bf16 %v269_v14  ;;  %v2620_v28 = vunpack.c.l.bf16 %v275_v24  ;;  %v2621_v30 = vunpack.c.h.bf16 %v275_v24  ;;  %v310_v24 = vld [vmem:[%s8542_s28 + $0x294] sm:$0xff]  }
  0x34   : > { %15410 = vst [vmem:[#allocation22_spill] sm:$0xff] %v8664_v4  ;;  %v8674_v18 = vpack.i.bf16 %v2613_v13, %v2612_v12  ;;  %v2624_v38 = vunpack.c.l.bf16 %v281_v31  ;;  %v2625_v40 = vunpack.c.h.bf16 %v281_v31  ;;  %v2628_v47 = vunpack.c.l.bf16 %v287_v42 }
  0x35   : > { %7027 = vperm.xlu1 %6980, %v8586_v49   ;;  %7022 = vperm.xlu0 %6969, %v8590_v52   ;;  %15411 = vst [vmem:[#allocation23_spill] sm:$0xff] %v8669_v9  ;;  %v8680_v26 = vpack.i.bf16 %v2617_v22, %v2616_v21  ;;  %v8685_v37 = vpack.i.bf16 %v2621_v30, %v2620_v28  ;;  %v2629_v48 = vunpack.c.h.bf16 %v287_v42  ;;  %v2632_v54 = vunpack.c.l.bf16 %v293_v50  ;;  %v228_v22 = vld [vmem:[%s8542_s28 + $0xfc] sm:$0xff]  }
  0x36   : > { %15412 = vst [vmem:[#allocation24_spill] sm:$0xff] %v8674_v18  ;;  %v8692_v45 = vpack.i.bf16 %v2625_v40, %v2624_v38  ;;  %v2633_v55 = vunpack.c.h.bf16 %v293_v50  ;;  %v6798_v61 = vunpack.c.l.bf16 %v6900_v56  ;;  %v6799_v62 = vunpack.c.h.bf16 %v6900_v56  ;;  %v314_v38 = vld [vmem:[%s8542_s28 + $0x2ac] sm:$0xff]   ;;  %v318_v56 = vld [vmem:[%s8542_s28 + $0x2c4] sm:$0xff]  }
  0x37   : > { %15413 = vst [vmem:[#allocation25_spill] sm:$0xff] %v8680_v26  ;;  %15414 = vst [vmem:[#allocation26_spill] sm:$0xff] %v8685_v37  ;;  %v8697_v51 = vpack.i.bf16 %v2629_v48, %v2628_v47  ;;  %v2636_v5 = vunpack.c.l.bf16 %v299_v58  ;;  %v2637_v7 = vunpack.c.h.bf16 %v299_v58  ;;  %v6862_v14 = vunpack.c.l.bf16 %v6916_v8  ;;  %v240_v58 = vld [vmem:[%s8542_s28 + $0x144] sm:$0xff]  }
  0x38   : > { %15415 = vst [vmem:[#allocation27_spill] sm:$0xff] %v8692_v45  ;;  %v8703_v3 = vpack.i.bf16 %v2633_v55, %v2632_v54  ;;  %v8707_v12 = vpack.i.bf16 %v6799_v62, %v6798_v61  ;;  %v6863_v21 = vunpack.c.h.bf16 %v6916_v8  ;;  %v998_v28 = vunpack.c.h.bf16 %v228_v22  ;;  %v236_v55 = vld [vmem:[%s8542_s28 + $0x12c] sm:$0xff]   ;;  %v322_v61 = vld [vmem:[%s8542_s28 + $0x2dc] sm:$0xff]  }
  0x39   : > { %7037 = vperm.xlu1 %6980, %v8594_v57   ;;  %7032 = vperm.xlu0 %6969, %v8598_v59   ;;  %15416 = vst [vmem:[#allocation28_spill] sm:$0xff] %v8697_v51  ;;  %v8710_v13 = vpack.i.bf16 %v2637_v7, %v2636_v5  ;;  %v3270_v31 = vunpack.c.l.bf16 %v310_v24  ;;  %v3274_v50 = vunpack.c.l.bf16 %v314_v38  ;;  %v3275_v54 = vunpack.c.h.bf16 %v314_v38 }
  0x3a   : > { %15417 = vst [vmem:[#allocation29_spill] sm:$0xff] %v8703_v3  ;;  %v8717_v30 = vpack.i.bf16 %v6863_v21, %v6862_v14  ;;  %v1005_v5 = vunpack.c.l.bf16 %v236_v55  ;;  %v1006_v7 = vunpack.c.h.bf16 %v236_v55  ;;  %v3278_v14 = vunpack.c.l.bf16 %v318_v56 }
  0x3b   : > { %15418 = vst [vmem:[#allocation30_spill] sm:$0xff] %v8710_v13  ;;  %v8735_v8 = vpack.i.bf16 %v3275_v54, %v3274_v50  ;;  %v3279_v21 = vunpack.c.h.bf16 %v318_v56  ;;  %v259_v50 = vld [vmem:[%s8542_s28 + $0x1ac] sm:$0x1] }
  0x3c   : > { %15419 = vst [vmem:[#allocation31_spill] sm:$0xff] %v8717_v30  ;;  %v8741_v38 = vpack.i.bf16 %v1006_v7, %v1005_v5 }
  0x3d   : > { %7047 = vperm.xlu1 %6980, %v8603_v1   ;;  %7042 = vperm.xlu0 %6969, %v8605_v2   ;;  %15421 = vst [vmem:[#allocation33_spill] sm:$0xff] %v8735_v8  ;;  %v8747_v54 = vpack.i.bf16 %v3279_v21, %v3278_v14  ;;  %v3919_v21 = vunpack.c.l.bf16 %v259_v50 }
  0x3f   : > { %15422 = vst [vmem:[#allocation34_spill] sm:$0xff] %v8747_v54 }
  0x41   : > { %7051 = vset.pattern.permute.xlu1 %v15082_v10  ;;  %7139 = vperm.xlu0 %6969, %v8610_v6  }
  0x42   : > { %7053 = vperm.xlu1 %7051, %v8558_v20  }
  0x45   : > { %7155 = vperm.xlu0 %6969, %v8615_v11  }
  0x46   : > { %7058 = vperm.xlu1 %7051, %v8550_v15  }
  0x49   : > { %7165 = vperm.xlu0 %6969, %v8620_v17  }
  0x4a   : > { %7063 = vperm.xlu1 %7051, %v8566_v27  }
  0x4d   : > { %7175 = vperm.xlu0 %6969, %v8625_v23  }
  0x4e   : > { %7068 = vperm.xlu1 %7051, %v8574_v36  }
  0x51   : > { %7185 = vperm.xlu0 %6969, %v8630_v29  }
  0x52   : > { %7073 = vperm.xlu1 %7051, %v8582_v44  }
  0x55   : > { %7195 = vperm.xlu0 %6969, %v8635_v33  }
  0x56   : > { %7078 = vperm.xlu1 %7051, %v8590_v52  }
  0x59   : > { %7205 = vperm.xlu0 %6969, %v8640_v39  }
  0x5a   : > { %7083 = vperm.xlu1 %7051, %v8598_v59  }
  0x5d   : > { %7215 = vperm.xlu0 %6969, %v8646_v46  }
  0x5e   : > { %7088 = vperm.xlu1 %7051, %v8605_v2  }
  0x61   : > { %7313 = vperm.xlu0 %6969, %v8652_v53  }
  0x62   : > { %7092 = vset.pattern.permute.xlu1 %v15080_v63 }
  0x63   : > { %7094 = vperm.xlu1 %7092, %v8552_v16  }
  0x65   : > { %7328 = vperm.xlu0 %6969, %v8658_v60  }
  0x67   : > { %7099 = vperm.xlu1 %7092, %v8550_v15   ;;  %v224_v15 = vld [vmem:[%s8542_s28 + $0xe4] sm:$0xff]  }
  0x68   : > { %v993_v32 = vunpack.c.l.bf16 %v224_v15  ;;  %v994_v34 = vunpack.c.h.bf16 %v224_v15  ;;  %v997_v15 = vunpack.c.l.bf16 %v228_v22  ;;  %v1009_v22 = vunpack.c.l.bf16 %v240_v58 }
  0x69   : > { %7338 = vperm.xlu0 %6969, %v8664_v4  }
  0x6a   : > { %v8687_v41 = vpack.i.bf16 %v994_v34, %v993_v32  ;;  %v3271_v32 = vunpack.c.h.bf16 %v310_v24  ;;  %v232_v34 = vld [vmem:[%s8542_s28 + $0x114] sm:$0xff]   ;;  %v8722_v40 = vpack.i.bf16 %v998_v28, %v997_v15  ;;  %v1010_v24 = vunpack.c.h.bf16 %v240_v58  ;;  %v274_v58 = vld [vmem:[%s8542_s28 + $0x1e8] sm:$0x1] }
  0x6b   : > { %7104 = vperm.xlu1 %7092, %v8556_v19   ;;  %v1001_v42 = vunpack.c.l.bf16 %v232_v34  ;;  %v1002_v47 = vunpack.c.h.bf16 %v232_v34  ;;  %v3282_v15 = vunpack.c.l.bf16 %v322_v61  ;;  %v3283_v28 = vunpack.c.h.bf16 %v322_v61  ;;  %v248_v34 = vld [vmem:[%s8542_s28 + $0x174] sm:$0xff]  }
  0x6c   : > { %v8725_v48 = vpack.i.bf16 %v3271_v32, %v3270_v31  ;;  %v244_v31 = vld [vmem:[%s8542_s28 + $0x15c] sm:$0xff]   ;;  %v326_v32 = vld [vmem:[%s8542_s28 + $0x2f4] sm:$0xff]   ;;  %v8752_v63 = vpack.i.bf16 %v1010_v24, %v1009_v22  ;;  %v1017_v2 = vunpack.c.l.bf16 %v248_v34 }
  0x6d   : > { %7395 = vperm.xlu0 %6969, %v8669_v9   ;;  %v8732_v62 = vpack.i.bf16 %v1002_v47, %v1001_v42  ;;  %v330_v42 = vld [vmem:[%s8542_s28 + $0x30c] sm:$0xff]   ;;  %v256_v47 = vld [vmem:[%s8542_s28 + $0x1a0] sm:$0x1]  ;;  %v1013_v55 = vunpack.c.l.bf16 %v244_v31  ;;  %v1014_v56 = vunpack.c.h.bf16 %v244_v31  ;;  %v277_v61 = vld [vmem:[%s8542_s28 + $0x1f4] sm:$0x1]  ;;  %v8754_v10 = vpack.i.bf16 %v3283_v28, %v3282_v15 }
  0x6e   : > { %15420 = vst [vmem:[#allocation32_spill] sm:$0xff] %v8725_v48  ;;  %v3286_v5 = vunpack.c.l.bf16 %v326_v32  ;;  %v3287_v7 = vunpack.c.h.bf16 %v326_v32  ;;  %v3290_v59 = vunpack.c.l.bf16 %v330_v42  ;;  %v3918_v14 = vunpack.c.l.bf16 %v256_v47 }
  0x6f   : > { %7109 = vperm.xlu1 %7092, %v8562_v25   ;;  %15423 = vst [vmem:[#allocation35_spill] sm:$0xff] %v8754_v10  ;;  %v3924_v31 = vunpack.c.l.bf16 %v274_v58  ;;  %v8761_v32 = vpack.i.bf16 %v1014_v56, %v1013_v55  ;;  %v8796_v58 = vld [vmem:[%s15075_s1 + $0x8] ss:$0 sm:$0xff] }
  0x70   : > { %v8763_v52 = vpack.i.bf16 %v3287_v7, %v3286_v5  ;;  %v8770_v47 = vpack.i.bf16 %v3919_v21, %v3918_v14 }
  0x71   : > { %7411 = vperm.xlu0 %6969, %v8674_v18  }
  0x72   : > { %15424 = vst [vmem:[#allocation36_spill] sm:$0xff] %v8763_v52  ;;  %15426 = vst [vmem:[#allocation38_spill] sm:$0xff] %v8770_v47 }
  0x73   : > { %7114 = vperm.xlu1 %7092, %v8572_v35  }
  0x75   : > { %7421 = vperm.xlu0 %6969, %v8680_v26  }
  0x77   : > { %7119 = vperm.xlu1 %7092, %v8580_v43  }
  0x79   : > { %7431 = vperm.xlu0 %6969, %v8685_v37  }
  0x7b   : > { %7124 = vperm.xlu1 %7092, %v8586_v49  }
  0x7d   : > { %7441 = vperm.xlu0 %6969, %v8692_v45  }
  0x7f   : > { %7129 = vperm.xlu1 %7092, %v8594_v57  }
  0x81   : > { %7451 = vperm.xlu0 %6969, %v8697_v51   ;;  %v3925_v51 = vunpack.c.l.bf16 %v277_v61 }
  0x83   : > { %7134 = vperm.xlu1 %7092, %v8603_v1   ;;  %v8772_v50 = vpack.i.bf16 %v3925_v51, %v3924_v31 }
  0x85   : > { %7461 = vperm.xlu0 %6969, %v8703_v3   ;;  %v1018_v3 = vunpack.c.h.bf16 %v248_v34  ;;  %15427 = vst [vmem:[#allocation39_spill] sm:$0xff] %v8772_v50 }
  0x87   : > { %7143 = vset.pattern.permute.xlu1 %v15078_v0  ;;  %v286_v0 = vld [vmem:[%s8542_s28 + $0x218] sm:$0x1]  ;;  %v8765_v34 = vpack.i.bf16 %v1018_v3, %v1017_v2  ;;  %v171_v3 = vld [vmem:[%s8542_s28 + $0x8] sm:$0x1] }
  0x88   : > { %7145 = vperm.xlu1 %7143, %v8707_v12   ;;  %v3928_v22 = vunpack.c.l.bf16 %v286_v0  ;;  %v1645_v7 = vunpack.c.l.bf16 %v171_v3 }
  0x89   : > { %7471 = vperm.xlu0 %6969, %v8710_v13   ;;  %v301_v13 = vld [vmem:[%s8542_s28 + $0x254] sm:$0x1] }
  0x8a   : > { %v3933_v28 = vunpack.c.l.bf16 %v301_v13 }
  0x8c   : > { %7150 = vperm.xlu1 %7143, %v8687_v41  }
  0x8d   : > { %7569 = vperm.xlu0 %6969, %v8717_v30   ;;  %v298_v30 = vld [vmem:[%s8542_s28 + $0x248] sm:$0x1] }
  0x8e   : > { %v3932_v15 = vunpack.c.l.bf16 %v298_v30  ;;  %v8782_v30 = vld [vmem:[%s15075_s1] ss:$0 sm:$0xff] }
  0x90   : > { %7160 = vperm.xlu1 %7143, %v8722_v40   ;;  %v8777_v13 = vpack.i.bf16 %v3933_v28, %v3932_v15  ;;  %v8809_v15 = vld [vmem:[%s15075_s1 + $0x18] ss:$0 sm:$0xff] }
  0x91   : > { %7584 = vperm.xlu0 %6969, %v8725_v48   ;;  %v289_v48 = vld [vmem:[%s8542_s28 + $0x224] sm:$0x1] }
  0x92   : > { %v3929_v24 = vunpack.c.l.bf16 %v289_v48  ;;  %15429 = vst [vmem:[#allocation41_spill] sm:$0xff] %v8777_v13  ;;  %v174_v48 = vld [vmem:[%s8542_s28 + $0x14] sm:$0x1] }
  0x93   : > { %v1646_v14 = vunpack.c.l.bf16 %v174_v48 }
  0x94   : > { %7170 = vperm.xlu1 %7143, %v8732_v62   ;;  %v8775_v0 = vpack.i.bf16 %v3929_v24, %v3928_v22 }
  0x95   : > { %7594 = vperm.xlu0 %6969, %v8735_v8   ;;  %v3291_v8 = vunpack.c.h.bf16 %v330_v42  ;;  %v8825_v44 = vpack.i.bf16 %v1646_v14, %v1645_v7 }
  0x96   : > { %15428 = vst [vmem:[#allocation40_spill] sm:$0xff] %v8775_v0 }
  0x97   : > { %v8767_v42 = vpack.i.bf16 %v3291_v8, %v3290_v59  ;;  %v8787_v59 = vld [vmem:[%s15075_s1 + $0x20] ss:$0 sm:$0xff] }
  0x98   : > { %7180 = vperm.xlu1 %7143, %v8741_v38  }
  0x99   : > { %7604 = vperm.xlu0 %6969, %v8747_v54   ;;  %15425 = vst [vmem:[#allocation37_spill] sm:$0xff] %v8767_v42 }
  0x9c   : > { %7190 = vperm.xlu1 %7143, %v8752_v63  }
  0x9d   : > { %7614 = vperm.xlu0 %6969, %v8754_v10  }
  0xa0   : > { %v6983_v2 = vpop.permute.xlu1 %6982  ;;  %7200 = vperm.xlu1 %7143, %v8761_v32   ;;  %v6972_v51 = vpop.permute.xlu0 %6971 }
  0xa1   : > { %v6985_v8 = vunpack.i.h.bf16 %v6983_v2  ;;  %v6984_v55 = vunpack.i.l.bf16 %v6983_v2  ;;  %v6974_v56 = vunpack.i.h.bf16 %v6972_v51  ;;  %7624 = vperm.xlu0 %6969, %v8763_v52   ;;  %v6973_v31 = vunpack.i.l.bf16 %v6972_v51 }
  0xa3   : > { %v8799_v61 = vmul.f32 %v6985_v8, %v8782_v30  ;;  %v8802_v5 = vmul.f32 %v6985_v8, %v8787_v59  ;;  %v5365_v21 = vmul.f32 %v6984_v55, %v8787_v59  ;;  %v8812_v28 = vmul.f32 %v6985_v8, %v8796_v58 }
  0xa4   : > { %v6988_v22 = vpop.permute.xlu1 %6987  ;;  %7210 = vperm.xlu1 %7143, %v8765_v34   ;;  %v6977_v24 = vpop.permute.xlu0 %6976  ;;  %v8815_v2 = vmul.f32 %v6984_v55, %v8796_v58  ;;  %v8818_v3 = vmul.f32 %v6974_v56, %v8782_v30  ;;  %v8823_v52 = vmul.f32 %v6974_v56, %v8796_v58  ;;  %v8828_v37 = vmul.f32 %v6985_v8, %v8809_v15 }
  0xa5   : > { %15430 = vst [vmem:[#allocation42_spill] sm:$0xff] %v8799_v61  ;;  %15431 = vst [vmem:[#allocation43_spill] sm:$0xff] %v8812_v28  ;;  %7634 = vperm.xlu0 %6969, %v8767_v42   ;;  %v5463_v48 = vrot.slane %v5365_v21, 1  ;;  %v6990_v10 = vunpack.i.h.bf16 %v6988_v22  ;;  %v6989_v54 = vunpack.i.l.bf16 %v6988_v22  ;;  %v6979_v45 = vunpack.i.h.bf16 %v6977_v24 }
  0xa6   : > { %15432 = vst [vmem:[#allocation44_spill] sm:$0xff] %v8815_v2  ;;  %15433 = vst [vmem:[#allocation45_spill] sm:$0xff] %v8818_v3  ;;  %v8831_v36 = vmul.f32 %v6984_v55, %v8782_v30  ;;  %v8834_v26 = vmul.f32 %v6984_v55, %v8809_v15  ;;  %v8837_v51 = vmul.f32 %v6973_v31, %v8796_v58  ;;  %v15439_v56 = vmov 1  }
  0xa7   : > { %15434 = vst [vmem:[#allocation46_spill] sm:$0xff] %v8823_v52  ;;  %15435 = vst [vmem:[#allocation47_spill] sm:$0xff] %v8828_v37  ;;  %v8843_v8 = vmul.f32 %v6973_v31, %v8782_v30  ;;  %v8846_v14 = vmul.f32 %v6990_v10, %v8782_v30  ;;  %v15442_v55 = vrot.slane %v8802_v5, 1  ;;  %v8856_v27 = vmul.f32 %v6990_v10, %v8787_v59 }
  0xa8   : > { %15436 = vst [vmem:[#allocation48_spill] sm:$0xff] %v8831_v36  ;;  %15437 = vst [vmem:[#allocation49_spill] sm:$0xff] %v8834_v26  ;;  %v6998_v21 = vpop.permute.xlu1 %6997  ;;  %7219 = vset.pattern.permute.xlu1 %v15439_v56  ;;  %v6993_v42 = vpop.permute.xlu0 %6992  ;;  %v5368_v7 = vmul.f32 %v6989_v54, %v8787_v59  ;;  %v8861_v31 = vmul.f32 %v6990_v10, %v8796_v58  ;;  %v8864_v22 = vmul.f32 %v6989_v54, %v8796_v58 }
  0xa9   : > { %15438 = vst [vmem:[#allocation50_spill] sm:$0xff] %v8837_v51  ;;  %15440 = vst [vmem:[#allocation51_spill] sm:$0xff] %v8843_v8  ;;  %7221 = vperm.xlu1 %7219, %v8610_v6   ;;  %v8852_v37 = vsel %vm1843_vm0, %v5463_v48, %v15442_v55  ;;  %7731 = vperm.xlu0 %6969, %v8770_v47   ;;  %v8867_v6 = vmul.f32 %v6979_v45, %v8782_v30  ;;  %v6978_v48 = vunpack.i.l.bf16 %v6977_v24 }
  0xaa   : > { %15441 = vst [vmem:[#allocation52_spill] sm:$0xff] %v8846_v14  ;;  %15443 = vst [vmem:[#allocation53_spill] sm:$0xff] %v8852_v37  ;;  %v8871_v26 = vmul.f32 %v6990_v10, %v8809_v15  ;;  %v8874_v37 = vmul.f32 %v6979_v45, %v8796_v58  ;;  %v8879_v18 = vmul.f32 %v6989_v54, %v8782_v30  ;;  %v5468_v55 = vrot.slane %v5368_v7, 1 }
  0xab   : > { %15444 = vst [vmem:[#allocation54_spill] sm:$0xff] %v8861_v31  ;;  %15445 = vst [vmem:[#allocation55_spill] sm:$0xff] %v8864_v22  ;;  %v8882_v2 = vmul.f32 %v6989_v54, %v8809_v15  ;;  %v8885_v28 = vmul.f32 %v6979_v45, %v8787_v59  ;;  %v1750_v24 = vmul.f32 %v6978_v48, %v8796_v58  ;;  %v7000_v51 = vunpack.i.h.bf16 %v6998_v21 }
  0xac   : > { %15446 = vst [vmem:[#allocation56_spill] sm:$0xff] %v8871_v26  ;;  %15447 = vst [vmem:[#allocation57_spill] sm:$0xff] %v8874_v37  ;;  %v7008_v52 = vpop.permute.xlu1 %7007  ;;  %v8876_v47 = vpop.permute.xlu0 %7002  ;;  %v5362_v26 = vmul.f32 %v6978_v48, %v8787_v59  ;;  %v6995_v9 = vunpack.i.h.bf16 %v6993_v42  ;;  %v8896_v14 = vmul.f32 %v6979_v45, %v8809_v15  ;;  %v8907_v20 = vmul.f32 %v6978_v48, %v8782_v30 }
  0xad   : > { %15448 = vst [vmem:[#allocation58_spill] sm:$0xff] %v8879_v18  ;;  %15449 = vst [vmem:[#allocation59_spill] sm:$0xff] %v8882_v2  ;;  %7226 = vperm.xlu1 %7219, %v8687_v41   ;;  %7747 = vperm.xlu0 %6969, %v8772_v50   ;;  %v6999_v2 = vunpack.i.l.bf16 %v6998_v21  ;;  %v1849_v8 = vrot.slane %v1750_v24, 1  ;;  %v8899_v10 = vmul.f32 %v7000_v51, %v8782_v30  ;;  %v15454_v45 = vrot.slane %v8856_v27, 1 }
  0xae   : > { %15450 = vst [vmem:[#allocation60_spill] sm:$0xff] %v8885_v28  ;;  %15451 = vst [vmem:[#allocation61_spill] sm:$0xff] %v8896_v14  ;;  %v5458_v21 = vrot.slane %v5362_v26, 1  ;;  %v8910_v54 = vmul.f32 %v7000_v51, %v8796_v58  ;;  %v8919_v18 = vmul.f32 %v6978_v48, %v8809_v15  ;;  %v8922_v14 = vmul.f32 %v7000_v51, %v8787_v59 }
  0xaf   : > { %15452 = vst [vmem:[#allocation62_spill] sm:$0xff] %v8899_v10  ;;  %v8916_v24 = vsel %vm1843_vm0, %v5468_v55, %v15454_v45  ;;  %v5374_v50 = vmul.f32 %v6999_v2, %v8787_v59  ;;  %v8927_v26 = vmul.f32 %v7000_v51, %v8809_v15  ;;  %v8930_v22 = vmul.f32 %v6995_v9, %v8782_v30 }
  0xb0   : > { %v8901_v7 = vpop.permute.xlu1 %7017  ;;  %v8903_v3 = vpop.permute.xlu0 %7012  ;;  %15453 = vst [vmem:[#allocation63_spill] sm:$0xff] %v8910_v54  ;;  %15455 = vst [vmem:[#allocation64_spill] sm:$0xff] %v8916_v24  ;;  %v8933_v31 = vmul.f32 %v6995_v9, %v8796_v58  ;;  %v6994_v55 = vunpack.i.l.bf16 %v6993_v42  ;;  %v15460_v48 = vrot.slane %v8874_v37, 1  ;;  %v8941_v24 = vmul.f32 %v6999_v2, %v8782_v30 }
  0xb1   : > { %7231 = vperm.xlu1 %7219, %v8615_v11   ;;  %15456 = vst [vmem:[#allocation65_spill] sm:$0xff] %v8919_v18  ;;  %15457 = vst [vmem:[#allocation66_spill] sm:$0xff] %v8922_v14  ;;  %7757 = vperm.xlu0 %6969, %v8775_v0   ;;  %v8944_v18 = vmul.f32 %v6999_v2, %v8796_v58  ;;  %v8947_v51 = vmul.f32 %v6995_v9, %v8787_v59  ;;  %v15465_v42 = vrot.slane %v8885_v28, 1 }
  0xb2   : > { %15458 = vst [vmem:[#allocation67_spill] sm:$0xff] %v8927_v26  ;;  %15459 = vst [vmem:[#allocation68_spill] sm:$0xff] %v8933_v31  ;;  %v8938_v45 = vsel %vm1843_vm0, %v1849_v8, %v15460_v48  ;;  %v1759_v48 = vmul.f32 %v6994_v55, %v8796_v58  ;;  %v7010_v10 = vunpack.i.h.bf16 %v7008_v52  ;;  %v7009_v4 = vunpack.i.l.bf16 %v7008_v52 }
  0xb3   : > { %15461 = vst [vmem:[#allocation69_spill] sm:$0xff] %v8938_v45  ;;  %15462 = vst [vmem:[#allocation70_spill] sm:$0xff] %v8941_v24  ;;  %v8956_v37 = vsel %vm1843_vm0, %v5458_v21, %v15465_v42  ;;  %v5371_v45 = vmul.f32 %v6994_v55, %v8787_v59  ;;  %v5478_v24 = vrot.slane %v5374_v50, 1  ;;  %v8965_v28 = vmul.f32 %v6999_v2, %v8809_v15 }
  0xb4   : > { %15463 = vst [vmem:[#allocation71_spill] sm:$0xff] %v8944_v18  ;;  %15464 = vst [vmem:[#allocation72_spill] sm:$0xff] %v8947_v51  ;;  %v8949_v26 = vpop.permute.xlu1 %7027  ;;  %v8951_v0 = vpop.permute.xlu0 %7022  ;;  %v7005_v8 = vunpack.i.h.bf16 %v8876_v47  ;;  %v8974_v50 = vmul.f32 %v7010_v10, %v8787_v59  ;;  %v8982_v21 = vmul.f32 %v6995_v9, %v8809_v15  ;;  %v8985_v42 = vmul.f32 %v6994_v55, %v8782_v30 }
  0xb5   : > { %15466 = vst [vmem:[#allocation73_spill] sm:$0xff] %v8956_v37  ;;  %7236 = vperm.xlu1 %7219, %v8620_v17   ;;  %7767 = vperm.xlu0 %6969, %v8777_v13   ;;  %15467 = vst [vmem:[#allocation74_spill] sm:$0xff] %v8965_v28  ;;  %v1864_v37 = vrot.slane %v1759_v48, 1  ;;  %v5473_v54 = vrot.slane %v5371_v45, 1  ;;  %v8971_v17 = vmul.f32 %v7010_v10, %v8782_v30  ;;  %v15472_v48 = vrot.slane %v8922_v14, 1 }
  0xb6   : > { %15469 = vst [vmem:[#allocation76_spill] sm:$0xff] %v8974_v50  ;;  %15470 = vst [vmem:[#allocation77_spill] sm:$0xff] %v8982_v21  ;;  %v8988_v45 = vmul.f32 %v6994_v55, %v8809_v15  ;;  %v8997_v13 = vmul.f32 %v7010_v10, %v8796_v58  ;;  %v5380_v2 = vmul.f32 %v7009_v4, %v8787_v59  ;;  %v7004_v9 = vunpack.i.l.bf16 %v8876_v47 }
  0xb7   : > { %15468 = vst [vmem:[#allocation75_spill] sm:$0xff] %v8971_v17  ;;  %v8994_v28 = vsel %vm1843_vm0, %v5478_v24, %v15472_v48  ;;  %v9003_v21 = vmul.f32 %v7010_v10, %v8809_v15  ;;  %v9006_v55 = vmul.f32 %v7009_v4, %v8796_v58  ;;  %v9012_v24 = vmul.f32 %v7005_v8, %v8796_v58 }
  0xb8   : > { %v8976_v52 = vpop.permute.xlu1 %7037  ;;  %v8978_v11 = vpop.permute.xlu0 %7032  ;;  %15471 = vst [vmem:[#allocation78_spill] sm:$0xff] %v8988_v45  ;;  %15473 = vst [vmem:[#allocation79_spill] sm:$0xff] %v8994_v28  ;;  %v9009_v45 = vmul.f32 %v7005_v8, %v8782_v30  ;;  %v15478_v48 = vrot.slane %v8933_v31, 1  ;;  %v15480_v28 = vrot.slane %v8947_v51, 1  ;;  %v1765_v18 = vmul.f32 %v7004_v9, %v8796_v58 }
  0xb9   : > { %7241 = vperm.xlu1 %7219, %v8625_v23   ;;  %15474 = vst [vmem:[#allocation80_spill] sm:$0xff] %v8997_v13  ;;  %7771 = vset.pattern.permute.xlu0 %v15439_v56  ;;  %15475 = vst [vmem:[#allocation81_spill] sm:$0xff] %v9003_v21  ;;  %v5488_v17 = vrot.slane %v5380_v2, 1  ;;  %v9045_v51 = vmul.f32 %v7009_v4, %v8809_v15  ;;  %v7030_v13 = vunpack.i.h.bf16 %v8949_v26 }
  0xba   : > { %15476 = vst [vmem:[#allocation82_spill] sm:$0xff] %v9006_v55  ;;  %15477 = vst [vmem:[#allocation83_spill] sm:$0xff] %v9012_v24  ;;  %7773 = vperm.xlu0 %7771, %v8552_v16   ;;  %v9018_v47 = vsel %vm1843_vm0, %v1864_v37, %v15478_v48  ;;  %v9023_v10 = vsel %vm1843_vm0, %v5473_v54, %v15480_v28  ;;  %v9032_v16 = vmul.f32 %v7005_v8, %v8787_v59 }
  0xbb   : > { %15479 = vst [vmem:[#allocation84_spill] sm:$0xff] %v9018_v47  ;;  %15481 = vst [vmem:[#allocation85_spill] sm:$0xff] %v9023_v10  ;;  %v5377_v37 = vmul.f32 %v7004_v9, %v8787_v59  ;;  %v7020_v48 = vunpack.i.h.bf16 %v8901_v7  ;;  %v9038_v28 = vmul.f32 %v7009_v4, %v8782_v30  ;;  %v1874_v21 = vrot.slane %v1765_v18, 1 }
  0xbc   : > { %v9027_v23 = vpop.permute.xlu1 %7047  ;;  %v9029_v14 = vpop.permute.xlu0 %7042  ;;  %15482 = vst [vmem:[#allocation86_spill] sm:$0xff] %v9032_v16  ;;  %v7019_v10 = vunpack.i.l.bf16 %v8901_v7  ;;  %15484 = vst [vmem:[#allocation88_spill] sm:$0xff] %v9045_v51  ;;  %v9055_v54 = vmul.f32 %v7004_v9, %v8782_v30  ;;  %v9058_v18 = vmul.f32 %v7004_v9, %v8809_v15  ;;  %v15488_v4 = vrot.slane %v8974_v50, 1 }
  0xbd   : > { %7246 = vperm.xlu1 %7219, %v8630_v29   ;;  %15483 = vst [vmem:[#allocation87_spill] sm:$0xff] %v9038_v28  ;;  %v9048_v31 = vmul.f32 %v7020_v48, %v8782_v30  ;;  %v9052_v29 = vmul.f32 %v7005_v8, %v8809_v15  ;;  %v9061_v7 = vmul.f32 %v7020_v48, %v8787_v59  ;;  %v5483_v8 = vrot.slane %v5377_v37, 1 }
  0xbe   : > { %7778 = vperm.xlu0 %7771, %v8556_v19   ;;  %15487 = vst [vmem:[#allocation91_spill] sm:$0xff] %v9058_v18  ;;  %v9068_v47 = vsel %vm1843_vm0, %v5488_v17, %v15488_v4  ;;  %v15490_v9 = vrot.slane %v9012_v24, 1  ;;  %v9081_v55 = vmul.f32 %v7020_v48, %v8796_v58  ;;  %v9084_v17 = vmul.f32 %v7020_v48, %v8809_v15 }
  0xbf   : > { %15485 = vst [vmem:[#allocation89_spill] sm:$0xff] %v9048_v31  ;;  %15486 = vst [vmem:[#allocation90_spill] sm:$0xff] %v9052_v29  ;;  %v5386_v29 = vmul.f32 %v7019_v10, %v8787_v59  ;;  %v7015_v4 = vunpack.i.h.bf16 %v8903_v3  ;;  %v9088_v37 = vmul.f32 %v7019_v10, %v8782_v30  ;;  %v9091_v19 = vmul.f32 %v7019_v10, %v8796_v58 }
  0xc0   : > { %v9063_v2 = vpop.permute.xlu0 %7139  ;;  %15489 = vst [vmem:[#allocation92_spill] sm:$0xff] %v9068_v47  ;;  %v9078_v18 = vsel %vm1843_vm0, %v1874_v21, %v15490_v9  ;;  %15492 = vst [vmem:[#allocation94_spill] sm:$0xff] %v9081_v55  ;;  %v7014_v47 = vunpack.i.l.bf16 %v8903_v3  ;;  %v9127_v31 = vmul.f32 %v7019_v10, %v8809_v15  ;;  %v15502_v50 = vrot.slane %v9061_v7, 1 }
  0xc1   : > { %v9072_v51 = vpop.permute.xlu1 %7053  ;;  %7251 = vperm.xlu1 %7219, %v8635_v33   ;;  %15491 = vst [vmem:[#allocation93_spill] sm:$0xff] %v9078_v18  ;;  %15493 = vst [vmem:[#allocation95_spill] sm:$0xff] %v9084_v17  ;;  %v5498_v9 = vrot.slane %v5386_v29, 1  ;;  %v9098_v48 = vmul.f32 %v7015_v4, %v8782_v30  ;;  %v9101_v17 = vmul.f32 %v7015_v4, %v8787_v59  ;;  %v15497_v33 = vrot.slane %v9032_v16, 1 }
  0xc2   : > { %15494 = vst [vmem:[#allocation96_spill] sm:$0xff] %v9088_v37  ;;  %15495 = vst [vmem:[#allocation97_spill] sm:$0xff] %v9091_v19  ;;  %7783 = vperm.xlu0 %7771, %v8562_v25   ;;  %v9111_v3 = vmul.f32 %v7015_v4, %v8796_v58  ;;  %v1771_v25 = vmul.f32 %v7014_v47, %v8796_v58  ;;  %v7029_v29 = vunpack.i.l.bf16 %v8949_v26 }
  0xc3   : > { %15496 = vst [vmem:[#allocation98_spill] sm:$0xff] %v9101_v17  ;;  %v9108_v24 = vsel %vm1843_vm0, %v5483_v8, %v15497_v33  ;;  %v5383_v37 = vmul.f32 %v7014_v47, %v8787_v59  ;;  %v9121_v16 = vmul.f32 %v7030_v13, %v8782_v30  ;;  %v7025_v33 = vunpack.i.h.bf16 %v8951_v0  ;;  %15500 = vst [vmem:[#allocation101_spill] sm:$0xff] %v9127_v31 }
  0xc4   : > { %v9103_v18 = vpop.permute.xlu0 %7155  ;;  %15498 = vst [vmem:[#allocation99_spill] sm:$0xff] %v9108_v24  ;;  %v9130_v26 = vmul.f32 %v7030_v13, %v8787_v59  ;;  %v9142_v8 = vmul.f32 %v7014_v47, %v8782_v30  ;;  %v1884_v31 = vrot.slane %v1771_v25, 1  ;;  %v9148_v55 = vmul.f32 %v7014_v47, %v8809_v15 }
  0xc5   : > { %v9115_v21 = vpop.permute.xlu1 %7058  ;;  %7256 = vperm.xlu1 %7219, %v8640_v39   ;;  %15499 = vst [vmem:[#allocation100_spill] sm:$0xff] %v9121_v16  ;;  %v9136_v39 = vsel %vm1843_vm0, %v5498_v9, %v15502_v50  ;;  %v9139_v16 = vmul.f32 %v7015_v4, %v8809_v15  ;;  %v5493_v24 = vrot.slane %v5383_v37, 1  ;;  %v15506_v50 = vrot.slane %v9101_v17, 1 }
  0xc6   : > { %15501 = vst [vmem:[#allocation102_spill] sm:$0xff] %v9130_v26  ;;  %7788 = vperm.xlu0 %7771, %v8572_v35   ;;  %15503 = vst [vmem:[#allocation103_spill] sm:$0xff] %v9136_v39  ;;  %v5392_v35 = vmul.f32 %v7029_v29, %v8787_v59  ;;  %v9160_v37 = vmul.f32 %v7030_v13, %v8796_v58  ;;  %v9163_v9 = vmul.f32 %v7029_v29, %v8796_v58 }
  0xc7   : > { %15504 = vst [vmem:[#allocation104_spill] sm:$0xff] %v9139_v16  ;;  %15505 = vst [vmem:[#allocation105_spill] sm:$0xff] %v9148_v55  ;;  %v9157_v4 = vsel %vm1843_vm0, %v5493_v24, %v15506_v50  ;;  %v9166_v47 = vmul.f32 %v7025_v33, %v8782_v30  ;;  %v9170_v16 = vmul.f32 %v7025_v33, %v8796_v58  ;;  %v7024_v55 = vunpack.i.l.bf16 %v8951_v0 }
  0xc8   : > { %v9144_v19 = vpop.permute.xlu0 %7165  ;;  %15507 = vst [vmem:[#allocation106_spill] sm:$0xff] %v9157_v4  ;;  %15508 = vst [vmem:[#allocation107_spill] sm:$0xff] %v9160_v37  ;;  %v5508_v10 = vrot.slane %v5392_v35, 1  ;;  %v9175_v24 = vmul.f32 %v7030_v13, %v8809_v15  ;;  %v9178_v50 = vmul.f32 %v7029_v29, %v8782_v30  ;;  %v9181_v4 = vmul.f32 %v7025_v33, %v8787_v59 }
  0xc9   : > { %v9151_v28 = vpop.permute.xlu1 %7063  ;;  %7261 = vperm.xlu1 %7219, %v8646_v46   ;;  %15509 = vst [vmem:[#allocation108_spill] sm:$0xff] %v9163_v9  ;;  %15510 = vst [vmem:[#allocation109_spill] sm:$0xff] %v9170_v16  ;;  %v7040_v39 = vunpack.i.h.bf16 %v8976_v52  ;;  %v15514_v35 = vrot.slane %v9111_v3, 1  ;;  %v1777_v0 = vmul.f32 %v7024_v55, %v8796_v58  ;;  %v7035_v13 = vunpack.i.h.bf16 %v8978_v11 }
  0xca   : > { %7793 = vperm.xlu0 %7771, %v8580_v43   ;;  %15511 = vst [vmem:[#allocation110_spill] sm:$0xff] %v9175_v24  ;;  %15512 = vst [vmem:[#allocation111_spill] sm:$0xff] %v9178_v50  ;;  %v9192_v43 = vmul.f32 %v7029_v29, %v8809_v15  ;;  %v15517_v50 = vmov 2   ;;  %v5389_v36 = vmul.f32 %v7024_v55, %v8787_v59  ;;  %v9214_v60 = vmul.f32 %v7025_v33, %v8809_v15 }
  0xcb   : > { %15513 = vst [vmem:[#allocation112_spill] sm:$0xff] %v9181_v4  ;;  %v9189_v46 = vsel %vm1843_vm0, %v1884_v31, %v15514_v35  ;;  %v9202_v61 = vmul.f32 %v7040_v39, %v8782_v30  ;;  %v7039_v31 = vunpack.i.l.bf16 %v8976_v52  ;;  %v15519_v35 = vrot.slane %v9130_v26, 1 }
  0xcc   : > { %v9184_v25 = vpop.permute.xlu0 %7175  ;;  %15515 = vst [vmem:[#allocation113_spill] sm:$0xff] %v9189_v46  ;;  %15516 = vst [vmem:[#allocation114_spill] sm:$0xff] %v9192_v43  ;;  %v9219_v52 = vmul.f32 %v7024_v55, %v8782_v30  ;;  %v9222_v29 = vmul.f32 %v7040_v39, %v8796_v58  ;;  %v9230_v33 = vmul.f32 %v7040_v39, %v8787_v59 }
  0xcd   : > { %v9196_v24 = vpop.permute.xlu1 %7068  ;;  %7265 = vset.pattern.permute.xlu1 %v15517_v50  ;;  %15518 = vst [vmem:[#allocation115_spill] sm:$0xff] %v9202_v61  ;;  %v9210_v43 = vsel %vm1843_vm0, %v5508_v10, %v15519_v35  ;;  %15521 = vst [vmem:[#allocation117_spill] sm:$0xff] %v9214_v60  ;;  %v1894_v61 = vrot.slane %v1777_v0, 1  ;;  %v9227_v10 = vmul.f32 %v7024_v55, %v8809_v15  ;;  %v5503_v35 = vrot.slane %v5389_v36, 1 }
  0xce   : > { %7267 = vperm.xlu1 %7265, %v8707_v12   ;;  %15520 = vst [vmem:[#allocation116_spill] sm:$0xff] %v9210_v43  ;;  %7798 = vperm.xlu0 %7771, %v8586_v49   ;;  %15522 = vst [vmem:[#allocation118_spill] sm:$0xff] %v9222_v29  ;;  %v9233_v49 = vmul.f32 %v7035_v13, %v8782_v30  ;;  %v9238_v46 = vmul.f32 %v7040_v39, %v8809_v15  ;;  %v7034_v43 = vunpack.i.l.bf16 %v8978_v11 }
  0xcf   : > { %15523 = vst [vmem:[#allocation119_spill] sm:$0xff] %v9227_v10  ;;  %15524 = vst [vmem:[#allocation120_spill] sm:$0xff] %v9230_v33  ;;  %v9241_v0 = vmul.f32 %v7039_v31, %v8782_v30  ;;  %v9244_v60 = vmul.f32 %v7039_v31, %v8796_v58  ;;  %v5398_v55 = vmul.f32 %v7039_v31, %v8787_v59  ;;  %v7050_v39 = vunpack.i.h.bf16 %v9027_v23 }
  0xd0   : > { %v9224_v9 = vpop.permute.xlu0 %7185  ;;  %15525 = vst [vmem:[#allocation121_spill] sm:$0xff] %v9238_v46  ;;  %v9249_v36 = vmul.f32 %v7035_v13, %v8796_v58  ;;  %v9252_v10 = vmul.f32 %v7035_v13, %v8787_v59  ;;  %v15530_v46 = vrot.slane %v9170_v16, 1  ;;  %v7049_v50 = vunpack.i.l.bf16 %v9027_v23 }
  0xd1   : > { %v9235_v37 = vpop.permute.xlu1 %7073  ;;  %15526 = vst [vmem:[#allocation122_spill] sm:$0xff] %v9241_v0  ;;  %15527 = vst [vmem:[#allocation123_spill] sm:$0xff] %v9244_v60  ;;  %v15533_v11 = vrot.slane %v9181_v4, 1  ;;  %v1783_v16 = vmul.f32 %v7034_v43, %v8796_v58  ;;  %v5518_v0 = vrot.slane %v5398_v55, 1  ;;  %v5395_v23 = vmul.f32 %v7034_v43, %v8787_v59 }
  0xd2   : > { %7272 = vperm.xlu1 %7265, %v8687_v41   ;;  %15528 = vst [vmem:[#allocation124_spill] sm:$0xff] %v9249_v36  ;;  %15529 = vst [vmem:[#allocation125_spill] sm:$0xff] %v9252_v10  ;;  %7803 = vperm.xlu0 %7771, %v8594_v57   ;;  %v9260_v26 = vsel %vm1843_vm0, %v1894_v61, %v15530_v46  ;;  %v9264_v41 = vmul.f32 %v7039_v31, %v8809_v15  ;;  %v7045_v46 = vunpack.i.h.bf16 %v9029_v14 }
  0xd3   : > { %15531 = vst [vmem:[#allocation126_spill] sm:$0xff] %v9260_v26  ;;  %v9272_v56 = vsel %vm1843_vm0, %v5503_v35, %v15533_v11  ;;  %v9288_v57 = vmul.f32 %v7035_v13, %v8809_v15  ;;  %v5513_v55 = vrot.slane %v5395_v23, 1  ;;  %v9295_v31 = vmul.f32 %v7050_v39, %v8796_v58 }
  0xd4   : > { %15532 = vst [vmem:[#allocation127_spill] sm:$0xff] %v9264_v41  ;;  %v9267_v53 = vpop.permute.xlu0 %7195  ;;  %15534 = vst [vmem:[#allocation128_spill] sm:$0xff] %v9272_v56  ;;  %v9282_v41 = vmul.f32 %v7050_v39, %v8782_v30  ;;  %v9291_v56 = vmul.f32 %v7049_v50, %v8782_v30  ;;  %v9298_v26 = vmul.f32 %v7050_v39, %v8787_v59  ;;  %v7044_v29 = vunpack.i.l.bf16 %v9029_v14 }
  0xd5   : > { %v9277_v61 = vpop.permute.xlu1 %7078  ;;  %15536 = vst [vmem:[#allocation130_spill] sm:$0xff] %v9288_v57  ;;  %15538 = vst [vmem:[#allocation132_spill] sm:$0xff] %v9295_v31  ;;  %v1904_v11 = vrot.slane %v1783_v16, 1  ;;  %v9304_v13 = vmul.f32 %v7049_v50, %v8796_v58  ;;  %v5404_v57 = vmul.f32 %v7049_v50, %v8787_v59  ;;  %v9308_v60 = vmul.f32 %v7045_v46, %v8782_v30 }
  0xd6   : > { %15535 = vst [vmem:[#allocation129_spill] sm:$0xff] %v9282_v41  ;;  %7277 = vperm.xlu1 %7265, %v8722_v40   ;;  %15537 = vst [vmem:[#allocation131_spill] sm:$0xff] %v9291_v56  ;;  %7808 = vperm.xlu0 %7771, %v8603_v1   ;;  %v15541_v23 = vrot.slane %v9230_v33, 1  ;;  %v9318_v14 = vmul.f32 %v7034_v43, %v8782_v30  ;;  %v15543_v16 = vrot.slane %v9252_v10, 1 }
  0xd7   : > { %15539 = vst [vmem:[#allocation133_spill] sm:$0xff] %v9298_v26  ;;  %15540 = vst [vmem:[#allocation134_spill] sm:$0xff] %v9304_v13  ;;  %v9326_v41 = vmul.f32 %v7045_v46, %v8796_v58  ;;  %v9330_v17 = vmul.f32 %v7034_v43, %v8809_v15  ;;  %v9333_v33 = vmul.f32 %v7050_v39, %v8809_v15  ;;  %v15549_v43 = vrot.slane %v9249_v36, 1 }
  0xd8   : > { %v9301_v35 = vpop.permute.xlu0 %7205  ;;  %v9315_v4 = vsel %vm1843_vm0, %v5518_v0, %v15541_v23  ;;  %v9323_v56 = vsel %vm1843_vm0, %v5513_v55, %v15543_v16  ;;  %v9336_v0 = vmul.f32 %v7045_v46, %v8787_v59  ;;  %v1789_v23 = vmul.f32 %v7044_v29, %v8796_v58 }
  0xd9   : > { %v9310_v1 = vpop.permute.xlu1 %7083  ;;  %15542 = vst [vmem:[#allocation135_spill] sm:$0xff] %v9315_v4  ;;  %15544 = vst [vmem:[#allocation136_spill] sm:$0xff] %v9323_v56  ;;  %v5528_v56 = vrot.slane %v5404_v57, 1  ;;  %v5401_v4 = vmul.f32 %v7044_v29, %v8787_v59  ;;  %v9348_v39 = vsel %vm1843_vm0, %v1904_v11, %v15549_v43  ;;  %v9352_v58 = vmul.f32 %v7049_v50, %v8809_v15  ;;  %v9358_v57 = vld [vmem:[%s15075_s1 + $0x1] ss:$0 sm:$0xff] }
  0xda   : > { %15545 = vst [vmem:[#allocation137_spill] sm:$0xff] %v9326_v41  ;;  %7282 = vperm.xlu1 %7265, %v8732_v62   ;;  %15546 = vst [vmem:[#allocation138_spill] sm:$0xff] %v9330_v17  ;;  %7813 = vperm.xlu0 %7771, %v8707_v12   ;;  %v7142_v12 = vunpack.i.h.bf16 %v9063_v2  ;;  %v9363_v59 = vld [vmem:[%s15075_s1 + $0x9] ss:$0 sm:$0xff]  ;;  %v1914_v43 = vrot.slane %v1789_v23, 1  ;;  %v7056_v16 = vunpack.i.h.bf16 %v9072_v51  ;;  %v7055_v17 = vunpack.i.l.bf16 %v9072_v51 }
  0xdb   : > { %15547 = vst [vmem:[#allocation139_spill] sm:$0xff] %v9333_v33  ;;  %15548 = vst [vmem:[#allocation140_spill] sm:$0xff] %v9336_v0  ;;  %v9371_v50 = vld [vmem:[%s15075_s1 + $0x4] ss:$0 sm:$0xff]  ;;  %v9376_v33 = vld [vmem:[%s15075_s1 + $0x21] ss:$0 sm:$0xff]  ;;  %v9393_v36 = vmul.f32 %v7044_v29, %v8782_v30  ;;  %v9396_v51 = vmul.f32 %v7044_v29, %v8809_v15 }
  0xdc   : > { %v9343_v10 = vpop.permute.xlu0 %7215  ;;  %15550 = vst [vmem:[#allocation141_spill] sm:$0xff] %v9348_v39  ;;  %15551 = vst [vmem:[#allocation142_spill] sm:$0xff] %v9352_v58  ;;  %v9382_v58 = vmul.f32 %v7045_v46, %v8809_v15  ;;  %v5523_v11 = vrot.slane %v5401_v4, 1  ;;  %v7141_v39 = vunpack.i.l.bf16 %v9063_v2  ;;  %v15553_v13 = vrot.slane %v9298_v26, 1 }
  0xdd   : > { %v9365_v55 = vpop.permute.xlu1 %7088  ;;  %15555 = vst [vmem:[#allocation145_spill] sm:$0xff] %v9396_v51  ;;  %v731_v46 = vmul.f32 %v7056_v16, %v9358_v57  ;;  %v9402_v4 = vmul.f32 %v7142_v12, %v9371_v50  ;;  %v9413_v30 = vmul.f32 %v7056_v16, %v9376_v33  ;;  %v7158_v15 = vunpack.i.h.bf16 %v9103_v18 }
  0xde   : > { %7287 = vperm.xlu1 %7265, %v8741_v38   ;;  %15552 = vst [vmem:[#allocation143_spill] sm:$0xff] %v9382_v58  ;;  %7818 = vperm.xlu0 %7771, %v8722_v40   ;;  %v9390_v31 = vsel %vm1843_vm0, %v5528_v56, %v15553_v13  ;;  %v9407_v40 = vld [vmem:[%s15075_s1 + $0x19] ss:$0 sm:$0xff]  ;;  %v9410_v56 = vmul.f32 %v7056_v16, %v9363_v59  ;;  %v15557_v2 = vrot.slane %v9326_v41, 1 }
  0xdf   : > { %15554 = vst [vmem:[#allocation144_spill] sm:$0xff] %v9390_v31  ;;  %15556 = vst [vmem:[#allocation146_spill] sm:$0xff] %v9402_v4  ;;  %v730_v13 = vmul.f32 %v7055_v17, %v9358_v57  ;;  %v9423_v12 = vadd.f32 %v731_v46, %v8867_v6  ;;  %v5611_v23 = vmul.f32 %v7055_v17, %v9376_v33  ;;  %v15560_v31 = vrot.slane %v9336_v0, 1 }
  0xe0   : > { %v9399_v58 = vpop.permute.xlu0 %7313  ;;  %v9419_v29 = vsel %vm1843_vm0, %v1914_v43, %v15557_v2  ;;  %v9435_v41 = vmul.f32 %v7141_v39, %v9371_v50  ;;  %v9438_v43 = vmul.f32 %v7055_v17, %v9363_v59  ;;  %v7157_v6 = vunpack.i.l.bf16 %v9103_v18 }
  0xe1   : > { %15558 = vst [vmem:[#allocation147_spill] sm:$0xff] %v9419_v29  ;;  %15559 = vst [vmem:[#allocation148_spill] sm:$0xff] %v9423_v12  ;;  %v9432_v4 = vsel %vm1843_vm0, %v5523_v11, %v15560_v31  ;;  %v9443_v46 = vmul.f32 %v7056_v16, %v9407_v40  ;;  %v5707_v29 = vrot.slane %v5611_v23, 1  ;;  %v9449_v31 = vld [vmem:[%s15075_s1 + $0x1c] ss:$0 sm:$0xff]  ;;  %v7061_v39 = vunpack.i.h.bf16 %v9115_v21 }
  0xe2   : > { %7292 = vperm.xlu1 %7265, %v8752_v63   ;;  %v9427_v51 = vpop.permute.xlu1 %7094  ;;  %15561 = vst [vmem:[#allocation149_spill] sm:$0xff] %v9432_v4  ;;  %15562 = vst [vmem:[#allocation150_spill] sm:$0xff] %v9435_v41  ;;  %7823 = vperm.xlu0 %7771, %v8732_v62   ;;  %v9456_v18 = vmul.f32 %v7055_v17, %v9407_v40  ;;  %v9459_v62 = vmul.f32 %v7158_v15, %v9371_v50  ;;  %v7060_v16 = vunpack.i.l.bf16 %v9115_v21 }
  0xe3   : > { %15563 = vst [vmem:[#allocation151_spill] sm:$0xff] %v9438_v43  ;;  %15564 = vst [vmem:[#allocation152_spill] sm:$0xff] %v9443_v46  ;;  %v9463_v23 = vadd.f32 %v730_v13, %v8907_v20  ;;  %v9466_v2 = vmul.f32 %v7061_v39, %v9363_v59  ;;  %v7168_v46 = vunpack.i.h.bf16 %v9144_v19  ;;  %v7066_v41 = vunpack.i.h.bf16 %v9151_v28 }
  0xe4   : > { %v9452_v11 = vpop.permute.xlu0 %7328  ;;  %15565 = vst [vmem:[#allocation153_spill] sm:$0xff] %v9456_v18  ;;  %15566 = vst [vmem:[#allocation154_spill] sm:$0xff] %v9459_v62  ;;  %v9475_v18 = vmul.f32 %v7158_v15, %v9449_v31  ;;  %v9478_v21 = vmul.f32 %v7157_v6, %v9371_v50  ;;  %v9481_v20 = vmul.f32 %v7061_v39, %v9376_v33  ;;  %v15572_v13 = vrot.slane %v9413_v30, 1 }
  0xe5   : > { %15567 = vst [vmem:[#allocation155_spill] sm:$0xff] %v9463_v23  ;;  %15568 = vst [vmem:[#allocation156_spill] sm:$0xff] %v9466_v2  ;;  %v9490_v23 = vmul.f32 %v7157_v6, %v9449_v31  ;;  %v5614_v17 = vmul.f32 %v7060_v16, %v9376_v33  ;;  %v7167_v15 = vunpack.i.l.bf16 %v9144_v19  ;;  %v9497_v43 = vmul.f32 %v7061_v39, %v9358_v57 }
  0xe6   : > { %7297 = vperm.xlu1 %7265, %v8761_v32   ;;  %v9471_v4 = vpop.permute.xlu1 %7099  ;;  %15569 = vst [vmem:[#allocation157_spill] sm:$0xff] %v9475_v18  ;;  %15570 = vst [vmem:[#allocation158_spill] sm:$0xff] %v9478_v21  ;;  %7828 = vperm.xlu0 %7771, %v8741_v38   ;;  %v9487_v62 = vsel %vm1843_vm0, %v5707_v29, %v15572_v13  ;;  %v9500_v21 = vmul.f32 %v7061_v39, %v9407_v40  ;;  %v7065_v6 = vunpack.i.l.bf16 %v9151_v28 }
  0xe7   : > { %15571 = vst [vmem:[#allocation159_spill] sm:$0xff] %v9481_v20  ;;  %15573 = vst [vmem:[#allocation160_spill] sm:$0xff] %v9487_v62  ;;  %v9503_v38 = vmul.f32 %v7060_v16, %v9358_v57  ;;  %v9506_v29 = vmul.f32 %v7060_v16, %v9363_v59  ;;  %v9510_v13 = vmul.f32 %v7060_v16, %v9407_v40  ;;  %v5712_v62 = vrot.slane %v5614_v17, 1 }
  0xe8   : > { %15574 = vst [vmem:[#allocation161_spill] sm:$0xff] %v9490_v23  ;;  %v9494_v18 = vpop.permute.xlu0 %7338  ;;  %15575 = vst [vmem:[#allocation162_spill] sm:$0xff] %v9500_v21  ;;  %v9513_v19 = vmul.f32 %v7168_v46, %v9371_v50  ;;  %v737_v23 = vmul.f32 %v7066_v41, %v9358_v57  ;;  %v9521_v12 = vmul.f32 %v7066_v41, %v9363_v59  ;;  %v7071_v2 = vunpack.i.h.bf16 %v9196_v24 }
  0xe9   : > { %15576 = vst [vmem:[#allocation163_spill] sm:$0xff] %v9506_v29  ;;  %15577 = vst [vmem:[#allocation164_spill] sm:$0xff] %v9510_v13  ;;  %v9526_v16 = vmul.f32 %v7168_v46, %v9449_v31  ;;  %v9529_v13 = vmul.f32 %v7066_v41, %v9376_v33  ;;  %v9539_v0 = vmul.f32 %v7167_v15, %v9371_v50  ;;  %v7178_v28 = vunpack.i.h.bf16 %v9184_v25 }
  0xea   : > { %15578 = vst [vmem:[#allocation165_spill] sm:$0xff] %v9513_v19  ;;  %7302 = vperm.xlu1 %7265, %v8765_v34   ;;  %v9517_v39 = vpop.permute.xlu1 %7104  ;;  %15579 = vst [vmem:[#allocation166_spill] sm:$0xff] %v9521_v12  ;;  %7833 = vperm.xlu0 %7771, %v8752_v63   ;;  %v9532_v19 = vadd.f32 %v737_v23, %v8930_v22  ;;  %v9542_v63 = vmul.f32 %v7167_v15, %v9449_v31  ;;  %v15587_v17 = vrot.slane %v9481_v20, 1 }
  0xeb   : > { %15580 = vst [vmem:[#allocation167_spill] sm:$0xff] %v9526_v16  ;;  %15581 = vst [vmem:[#allocation168_spill] sm:$0xff] %v9529_v13  ;;  %v9546_v46 = vmul.f32 %v7066_v41, %v9407_v40  ;;  %v736_v22 = vmul.f32 %v7065_v6, %v9358_v57  ;;  %v5620_v23 = vmul.f32 %v7065_v6, %v9376_v33  ;;  %v7177_v16 = vunpack.i.l.bf16 %v9184_v25 }
  0xec   : > { %15582 = vst [vmem:[#allocation169_spill] sm:$0xff] %v9532_v19  ;;  %v9535_v21 = vpop.permute.xlu0 %7395  ;;  %15583 = vst [vmem:[#allocation170_spill] sm:$0xff] %v9539_v0  ;;  %v15586_v19 = vmov 0   ;;  %v9555_v0 = vsel %vm1843_vm0, %v5712_v62, %v15587_v17  ;;  %v741_v41 = vmul.f32 %v7071_v2, %v9358_v57  ;;  %v9569_v62 = vmul.f32 %v7071_v2, %v9363_v59 }
  0xed   : > { %15584 = vst [vmem:[#allocation171_spill] sm:$0xff] %v9542_v63  ;;  %15585 = vst [vmem:[#allocation172_spill] sm:$0xff] %v9546_v46  ;;  %v9559_v63 = vmul.f32 %v7065_v6, %v9363_v59  ;;  %v9566_v46 = vmul.f32 %v7065_v6, %v9407_v40  ;;  %v5722_v29 = vrot.slane %v5620_v23, 1  ;;  %v7070_v12 = vunpack.i.l.bf16 %v9196_v24 }
  0xee   : > { %7306 = vset.pattern.permute.xlu1 %v15586_v19  ;;  %15588 = vst [vmem:[#allocation173_spill] sm:$0xff] %v9555_v0  ;;  %7838 = vperm.xlu0 %7771, %v8761_v32   ;;  %15591 = vst [vmem:[#allocation176_spill] sm:$0xff] %v9569_v62  ;;  %v9571_v17 = vpop.permute.xlu1 %7109  ;;  %v9576_v0 = vmul.f32 %v7178_v28, %v9371_v50  ;;  %v9579_v32 = vmul.f32 %v7071_v2, %v9376_v33  ;;  %v7076_v20 = vunpack.i.h.bf16 %v9235_v37 }
  0xef   : > { %15589 = vst [vmem:[#allocation174_spill] sm:$0xff] %v9559_v63  ;;  %7308 = vperm.xlu1 %7306, %v8825_v44   ;;  %15590 = vst [vmem:[#allocation175_spill] sm:$0xff] %v9566_v46  ;;  %v9583_v25 = vadd.f32 %v741_v41, %v9009_v45  ;;  %v9586_v6 = vadd.f32 %v736_v22, %v8985_v42  ;;  %v9589_v23 = vmul.f32 %v7178_v28, %v9449_v31 }
  0xf0   : > { %v9573_v15 = vpop.permute.xlu0 %7411  ;;  %15592 = vst [vmem:[#allocation177_spill] sm:$0xff] %v9576_v0  ;;  %v9592_v46 = vmul.f32 %v7177_v16, %v9371_v50  ;;  %v9597_v26 = vmul.f32 %v7177_v16, %v9449_v31  ;;  %v5626_v24 = vmul.f32 %v7070_v12, %v9376_v33  ;;  %v7188_v45 = vunpack.i.h.bf16 %v9224_v9 }
  0xf1   : > { %15593 = vst [vmem:[#allocation178_spill] sm:$0xff] %v9583_v25  ;;  %15594 = vst [vmem:[#allocation179_spill] sm:$0xff] %v9586_v6  ;;  %v15598_v42 = vrot.slane %v9529_v13, 1  ;;  %v9609_v41 = vmul.f32 %v7071_v2, %v9407_v40  ;;  %v7187_v0 = vunpack.i.l.bf16 %v9224_v9  ;;  %v745_v63 = vmul.f32 %v7076_v20, %v9358_v57 }
  0xf2   : > { %15595 = vst [vmem:[#allocation180_spill] sm:$0xff] %v9589_v23  ;;  %15596 = vst [vmem:[#allocation181_spill] sm:$0xff] %v9592_v46  ;;  %7843 = vperm.xlu0 %7771, %v8765_v34   ;;  %v9617_v34 = vmul.f32 %v7070_v12, %v9363_v59  ;;  %v9624_v2 = vmul.f32 %v7076_v20, %v9376_v33  ;;  %v7075_v9 = vunpack.i.l.bf16 %v9235_v37  ;;  %v9627_v22 = vpop.permute.xlu1 %7114  ;;  %v7198_v46 = vunpack.i.h.bf16 %v9267_v53 }
  0xf3   : > { %15597 = vst [vmem:[#allocation182_spill] sm:$0xff] %v9597_v26  ;;  %v9605_v28 = vsel %vm1843_vm0, %v5722_v29, %v15598_v42  ;;  %15600 = vst [vmem:[#allocation184_spill] sm:$0xff] %v9609_v41  ;;  %v740_v26 = vmul.f32 %v7070_v12, %v9358_v57  ;;  %v9621_v29 = vmul.f32 %v7070_v12, %v9407_v40  ;;  %v5732_v42 = vrot.slane %v5626_v24, 1 }
  0xf4   : > { %15599 = vst [vmem:[#allocation183_spill] sm:$0xff] %v9605_v28  ;;  %v9612_v16 = vpop.permute.xlu0 %7421  ;;  %15601 = vst [vmem:[#allocation185_spill] sm:$0xff] %v9617_v34  ;;  %v9630_v23 = vmul.f32 %v7188_v45, %v9371_v50  ;;  %v9633_v41 = vmul.f32 %v7188_v45, %v9449_v31  ;;  %v9636_v28 = vmul.f32 %v7076_v20, %v9363_v59  ;;  %v7080_v34 = vunpack.i.l.bf16 %v9277_v61 }
  0xf5   : > { %15602 = vst [vmem:[#allocation186_spill] sm:$0xff] %v9621_v29  ;;  %15603 = vst [vmem:[#allocation187_spill] sm:$0xff] %v9624_v2  ;;  %v9639_v12 = vadd.f32 %v745_v63, %v9098_v48  ;;  %v9642_v24 = vmul.f32 %v7187_v0, %v9371_v50  ;;  %v9645_v29 = vmul.f32 %v7187_v0, %v9449_v31  ;;  %v7081_v48 = vunpack.i.h.bf16 %v9277_v61 }
  0xf6   : > { %15604 = vst [vmem:[#allocation188_spill] sm:$0xff] %v9630_v23  ;;  %15605 = vst [vmem:[#allocation189_spill] sm:$0xff] %v9633_v41  ;;  %v744_v37 = vmul.f32 %v7075_v9, %v9358_v57  ;;  %v9652_v45 = vadd.f32 %v740_v26, %v9055_v54  ;;  %v5632_v63 = vmul.f32 %v7075_v9, %v9376_v33  ;;  %v7197_v54 = vunpack.i.l.bf16 %v9267_v53  ;;  %v9684_v53 = vpop.permute.xlu1 %7119 }
  0xf7   : > { %15606 = vst [vmem:[#allocation190_spill] sm:$0xff] %v9636_v28  ;;  %15607 = vst [vmem:[#allocation191_spill] sm:$0xff] %v9639_v12  ;;  %v9666_v12 = vmul.f32 %v7075_v9, %v9363_v59  ;;  %v749_v61 = vmul.f32 %v7081_v48, %v9358_v57  ;;  %v9722_v25 = vmul.f32 %v7081_v48, %v9407_v40  ;;  %7848 = vperm.xlu0 %7771, %v8825_v44  }
  0xf8   : > { %15608 = vst [vmem:[#allocation192_spill] sm:$0xff] %v9642_v24  ;;  %15609 = vst [vmem:[#allocation193_spill] sm:$0xff] %v9645_v29  ;;  %v9649_v23 = vpop.permute.xlu0 %7431  ;;  %v15611_v24 = vrot.slane %v9579_v32, 1  ;;  %v9663_v29 = vmul.f32 %v7076_v20, %v9407_v40  ;;  %v5742_v41 = vrot.slane %v5632_v63, 1  ;;  %v9679_v20 = vmul.f32 %v7198_v46, %v9371_v50 }
  0xf9   : > { %15610 = vst [vmem:[#allocation194_spill] sm:$0xff] %v9652_v45  ;;  %15614 = vst [vmem:[#allocation197_spill] sm:$0xff] %v9666_v12  ;;  %v9673_v45 = vadd.f32 %v744_v37, %v9142_v8  ;;  %v15619_v63 = vrot.slane %v9624_v2, 1  ;;  %v9693_v8 = vmul.f32 %v7081_v48, %v9363_v59  ;;  %v7207_v12 = vunpack.i.l.bf16 %v9301_v35 }
  0xfa   : > { %v9660_v0 = vsel %vm1843_vm0, %v5732_v42, %v15611_v24  ;;  %15613 = vst [vmem:[#allocation196_spill] sm:$0xff] %v9663_v29  ;;  %v9676_v42 = vmul.f32 %v7075_v9, %v9407_v40  ;;  %15617 = vst [vmem:[#allocation200_spill] sm:$0xff] %v9679_v20  ;;  %v9682_v24 = vmul.f32 %v7198_v46, %v9449_v31  ;;  %v7086_v9 = vunpack.i.h.bf16 %v9310_v1 }
  0xfb   : > { %15612 = vst [vmem:[#allocation195_spill] sm:$0xff] %v9660_v0  ;;  %15615 = vst [vmem:[#allocation198_spill] sm:$0xff] %v9673_v45  ;;  %v9689_v26 = vsel %vm1843_vm0, %v5742_v41, %v15619_v63  ;;  %v9700_v46 = vmul.f32 %v7197_v54, %v9371_v50  ;;  %v7208_v41 = vunpack.i.h.bf16 %v9301_v35  ;;  %v748_v63 = vmul.f32 %v7080_v34, %v9358_v57 }
  0xfc   : > { %15616 = vst [vmem:[#allocation199_spill] sm:$0xff] %v9676_v42  ;;  %15618 = vst [vmem:[#allocation201_spill] sm:$0xff] %v9682_v24  ;;  %v9696_v37 = vpop.permute.xlu0 %7441  ;;  %v9703_v24 = vmul.f32 %v7081_v48, %v9376_v33  ;;  %v9711_v0 = vmul.f32 %v7080_v34, %v9363_v59  ;;  %v5638_v42 = vmul.f32 %v7080_v34, %v9376_v33  ;;  %v7085_v20 = vunpack.i.l.bf16 %v9310_v1  ;;  %v9735_v1 = vpop.permute.xlu1 %7124 }
  0xfd   : > { %15620 = vst [vmem:[#allocation202_spill] sm:$0xff] %v9689_v26  ;;  %15621 = vst [vmem:[#allocation203_spill] sm:$0xff] %v9693_v8  ;;  %v9708_v26 = vadd.f32 %v749_v61, %v9166_v47  ;;  %v9715_v29 = vmul.f32 %v7197_v54, %v9449_v31  ;;  %v9725_v47 = vmul.f32 %v7080_v34, %v9407_v40  ;;  %v15669_v2 = vrot.slane %v9061_v7, 1 }
  0xfe   : > { %15622 = vst [vmem:[#allocation204_spill] sm:$0xff] %v9700_v46  ;;  %15623 = vst [vmem:[#allocation205_spill] sm:$0xff] %v9703_v24  ;;  %v7218_v46 = vunpack.i.h.bf16 %v9343_v10  ;;  %v753_v61 = vmul.f32 %v7086_v9, %v9358_v57  ;;  %v5752_v54 = vrot.slane %v5638_v42, 1  ;;  %v9733_v35 = vmul.f32 %v7086_v9, %v9376_v33 }
  0xff   : > { %15624 = vst [vmem:[#allocation206_spill] sm:$0xff] %v9708_v26  ;;  %15625 = vst [vmem:[#allocation207_spill] sm:$0xff] %v9711_v0  ;;  %v9738_v45 = vadd.f32 %v748_v63, %v9219_v52  ;;  %v9742_v34 = vmul.f32 %v7086_v9, %v9363_v59  ;;  %v9750_v26 = vmul.f32 %v7208_v41, %v9449_v31  ;;  %v7091_v0 = vunpack.i.h.bf16 %v9365_v55 }
 0x100   : > { %15626 = vst [vmem:[#allocation208_spill] sm:$0xff] %v9715_v29  ;;  %15627 = vst [vmem:[#allocation209_spill] sm:$0xff] %v9722_v25  ;;  %v9730_v29 = vmul.f32 %v7208_v41, %v9371_v50  ;;  %v9745_v25 = vadd.f32 %v753_v61, %v9233_v49  ;;  %v9747_v42 = vpop.permute.xlu0 %7451  ;;  %v5644_v52 = vmul.f32 %v7085_v20, %v9376_v33  ;;  %v15639_v41 = vrot.slane %v9703_v24, 1 }
 0x101   : > { %15628 = vst [vmem:[#allocation210_spill] sm:$0xff] %v9725_v47  ;;  %15630 = vst [vmem:[#allocation212_spill] sm:$0xff] %v9733_v35  ;;  %v9756_v63 = vmul.f32 %v7207_v12, %v9371_v50  ;;  %v9759_v48 = vmul.f32 %v7207_v12, %v9449_v31  ;;  %v9762_v49 = vmul.f32 %v7086_v9, %v9407_v40  ;;  %v7217_v9 = vunpack.i.l.bf16 %v9343_v10 }
 0x102   : > { %15629 = vst [vmem:[#allocation211_spill] sm:$0xff] %v9730_v29  ;;  %15631 = vst [vmem:[#allocation213_spill] sm:$0xff] %v9738_v45  ;;  %v752_v29 = vmul.f32 %v7085_v20, %v9358_v57  ;;  %v9765_v61 = vmul.f32 %v7085_v20, %v9363_v59  ;;  %v9770_v47 = vsel %vm1843_vm0, %v5752_v54, %v15639_v41  ;;  %v15643_v54 = vrot.slane %v9733_v35, 1 }
 0x103   : > { %15632 = vst [vmem:[#allocation214_spill] sm:$0xff] %v9742_v34  ;;  %15633 = vst [vmem:[#allocation215_spill] sm:$0xff] %v9745_v25  ;;  %v7090_v25 = vunpack.i.l.bf16 %v9365_v55  ;;  %v9776_v12 = vmul.f32 %v7085_v20, %v9407_v40  ;;  %v757_v41 = vmul.f32 %v7091_v0, %v9358_v57  ;;  %v7315_v55 = vunpack.i.l.bf16 %v9399_v58 }
 0x104   : > { %15634 = vst [vmem:[#allocation216_spill] sm:$0xff] %v9750_v26  ;;  %15635 = vst [vmem:[#allocation217_spill] sm:$0xff] %v9756_v63  ;;  %v5762_v26 = vrot.slane %v5644_v52, 1  ;;  %v9790_v63 = vpop.permute.xlu1 %7129  ;;  %v9794_v10 = vmul.f32 %v7218_v46, %v9371_v50  ;;  %v7126_v13 = vunpack.i.l.bf16 %v9735_v1 }
 0x105   : > { %15636 = vst [vmem:[#allocation218_spill] sm:$0xff] %v9759_v48  ;;  %15637 = vst [vmem:[#allocation219_spill] sm:$0xff] %v9762_v49  ;;  %v7316_v49 = vunpack.i.h.bf16 %v9399_v58  ;;  %v9781_v48 = vadd.f32 %v752_v29, %v9318_v14  ;;  %v7097_v14 = vunpack.i.h.bf16 %v9427_v51  ;;  %v9800_v29 = vpop.permute.xlu0 %7461  ;;  %v9807_v58 = vadd.f32 %v757_v41, %v9308_v60  ;;  %v9827_v60 = vld [vmem:[%s15075_s1 + $0x20] ss:$0 sm:$0xff] }
 0x106   : > { %15638 = vst [vmem:[#allocation220_spill] sm:$0xff] %v9765_v61  ;;  %15640 = vst [vmem:[#allocation221_spill] sm:$0xff] %v9770_v47  ;;  %v9786_v52 = vsel %vm1843_vm0, %v5762_v26, %v15643_v54  ;;  %v9797_v47 = vmul.f32 %v7091_v0, %v9363_v59  ;;  %v9803_v26 = vmul.f32 %v7091_v0, %v9376_v33 }
 0x107   : > { %15641 = vst [vmem:[#allocation222_spill] sm:$0xff] %v9776_v12  ;;  %15642 = vst [vmem:[#allocation223_spill] sm:$0xff] %v9781_v48  ;;  %v756_v54 = vmul.f32 %v7090_v25, %v9358_v57  ;;  %v9810_v20 = vmul.f32 %v7090_v25, %v9363_v59  ;;  %v9818_v12 = vmul.f32 %v7218_v46, %v9449_v31 }
 0x108   : > { %15644 = vst [vmem:[#allocation224_spill] sm:$0xff] %v9786_v52  ;;  %15645 = vst [vmem:[#allocation225_spill] sm:$0xff] %v9794_v10  ;;  %v9815_v52 = vld [vmem:[%s15075_s1 + $0xa] ss:$0 sm:$0xff]  ;;  %v9821_v61 = vmul.f32 %v7217_v9, %v9371_v50  ;;  %v5650_v10 = vmul.f32 %v7090_v25, %v9376_v33  ;;  %v5370_v57 = vmul.f32 %v9827_v60, %v7316_v49  ;;  %v7331_v33 = vunpack.i.h.bf16 %v9452_v11 }
 0x109   : > { %15646 = vst [vmem:[#allocation226_spill] sm:$0xff] %v9797_v47  ;;  %15647 = vst [vmem:[#allocation227_spill] sm:$0xff] %v9803_v26  ;;  %v9831_v59 = vmul.f32 %v7217_v9, %v9449_v31  ;;  %v9834_v41 = vmul.f32 %v7091_v0, %v9407_v40  ;;  %v9837_v46 = vmul.f32 %v7090_v25, %v9407_v40  ;;  %v7096_v9 = vunpack.i.l.bf16 %v9427_v51  ;;  %v9861_v45 = vpop.permute.xlu0 %7471 }
 0x10a   : > { %15648 = vst [vmem:[#allocation228_spill] sm:$0xff] %v9807_v58  ;;  %15649 = vst [vmem:[#allocation229_spill] sm:$0xff] %v9810_v20  ;;  %v5367_v50 = vmul.f32 %v9827_v60, %v7315_v55  ;;  %v9847_v58 = vmul.f32 %v7097_v14, %v9815_v52  ;;  %v9852_v40 = vadd.f32 %v756_v54, %v9393_v36  ;;  %v9866_v36 = vld [vmem:[%s15075_s1 + $0x2] ss:$0 sm:$0xff]  ;;  %v7330_v0 = vunpack.i.l.bf16 %v9452_v11 }
 0x10b   : > { %15650 = vst [vmem:[#allocation230_spill] sm:$0xff] %v9818_v12  ;;  %15651 = vst [vmem:[#allocation231_spill] sm:$0xff] %v9821_v61  ;;  %v8356_v12 = vld [vmem:[%s15075_s1 + $0x8] ss:$0 sm:$0xff]  ;;  %v2366_v48 = vmul.f32 %v7096_v9, %v9815_v52  ;;  %v5388_v25 = vmul.f32 %v9827_v60, %v7331_v33  ;;  %v9882_v20 = vunpack.i.l.bf16 %v9471_v4  ;;  %v9893_v34 = vmul.f32 %v7097_v14, %v9866_v36 }
 0x10c   : > { %15652 = vst [vmem:[#allocation232_spill] sm:$0xff] %v9831_v59  ;;  %15653 = vst [vmem:[#allocation233_spill] sm:$0xff] %v9834_v41  ;;  %v9844_v61 = vmul.f32 %v8356_v12, %v7316_v49  ;;  %v9856_v41 = vpop.permute.xlu1 %7134  ;;  %v5471_v59 = vrot.slane %v5370_v57, 1  ;;  %v9858_v49 = vmul.f32 %v8356_v12, %v7315_v55  ;;  %v5466_v51 = vrot.slane %v5367_v50, 1  ;;  %v9876_v55 = vld [vmem:[%s15075_s1 + $0x22] ss:$0 sm:$0xff] }
 0x10d   : > { %15654 = vst [vmem:[#allocation234_spill] sm:$0xff] %v9837_v46  ;;  %15656 = vst [vmem:[#allocation236_spill] sm:$0xff] %v9847_v58  ;;  %v5772_v46 = vrot.slane %v5650_v10, 1  ;;  %v2462_v10 = vrot.slane %v2366_v48, 1  ;;  %v9871_v57 = vmul.f32 %v8356_v12, %v7331_v33  ;;  %v9879_v50 = vunpack.i.h.bf16 %v9471_v4  ;;  %v9898_v4 = vld [vmem:[%s15075_s1 + $0x1a] ss:$0 sm:$0xff] }
 0x10e   : > { %15655 = vst [vmem:[#allocation235_spill] sm:$0xff] %v9844_v61  ;;  %15657 = vst [vmem:[#allocation237_spill] sm:$0xff] %v9852_v40  ;;  %v5501_v40 = vrot.slane %v5388_v25, 1  ;;  %v1773_v6 = vmul.f32 %v8356_v12, %v7330_v0  ;;  %v5385_v11 = vmul.f32 %v9827_v60, %v7330_v0  ;;  %v15659_v48 = vrot.slane %v9803_v26, 1  ;;  %v9932_v61 = vpop.permute.xlu0 %7569 }
 0x10f   : > { %15658 = vst [vmem:[#allocation238_spill] sm:$0xff] %v9871_v57  ;;  %v7341_v25 = vunpack.i.h.bf16 %v9494_v18  ;;  %v15661_v54 = vrot.slane %v8856_v27, 1  ;;  %v9915_v14 = vmul.f32 %v9879_v50, %v9876_v55 }
 0x110   : > { %v9889_v33 = vsel %vm1843_vm0, %v5772_v46, %v15659_v48  ;;  %v9907_v46 = vmul.f32 %v7096_v9, %v9866_v36  ;;  %v9911_v48 = vmul.f32 %v9879_v50, %v9815_v52  ;;  %v9917_v35 = vpop.permute.xlu1 %7145  ;;  %v9937_v28 = vsel %vm1843_vm0, %v15669_v2, %v5501_v40 }
 0x111   : > { %15660 = vst [vmem:[#allocation239_spill] sm:$0xff] %v9889_v33  ;;  %v9904_v0 = vsel %vm1843_vm0, %v15661_v54, %v5471_v59  ;;  %15664 = vst [vmem:[#allocation242_spill] sm:$0xff] %v9915_v14  ;;  %v15665_v33 = vrot.slane %v8802_v5, 1  ;;  %v15667_v59 = vrot.slane %v9847_v58, 1  ;;  %v1887_v5 = vrot.slane %v1773_v6, 1 }
 0x112   : > { %15662 = vst [vmem:[#allocation240_spill] sm:$0xff] %v9904_v0  ;;  %15663 = vst [vmem:[#allocation241_spill] sm:$0xff] %v9911_v48  ;;  %v5863_v0 = vmul.f32 %v9882_v20, %v9876_v55  ;;  %v7340_v54 = vunpack.i.l.bf16 %v9494_v18  ;;  %v9952_v40 = vmul.f32 %v8356_v12, %v7341_v25  ;;  %v15675_v18 = vrot.slane %v9111_v3, 1 }
 0x113   : > { %v9922_v27 = vsel %vm1843_vm0, %v15665_v33, %v5466_v51  ;;  %v9927_v9 = vsel %vm1843_vm0, %v2462_v10, %v15667_v59  ;;  %15670 = vst [vmem:[#allocation245_spill] sm:$0xff] %v9937_v28  ;;  %v5496_v51 = vrot.slane %v5385_v11, 1  ;;  %v9941_v33 = vmul.f32 %v9879_v50, %v9898_v4 }
 0x114   : > { %15666 = vst [vmem:[#allocation243_spill] sm:$0xff] %v9922_v27  ;;  %15668 = vst [vmem:[#allocation244_spill] sm:$0xff] %v9927_v9  ;;  %v9945_v10 = vmul.f32 %v9882_v20, %v9815_v52  ;;  %v5400_v59 = vmul.f32 %v9827_v60, %v7341_v25  ;;  %v7107_v27 = vunpack.i.h.bf16 %v9517_v39  ;;  %v5961_v6 = vrot.slane %v5863_v0, 1  ;;  %v9971_v0 = vpop.permute.xlu1 %7150 }
 0x115   : > { %15671 = vst [vmem:[#allocation246_spill] sm:$0xff] %v9941_v33  ;;  %15673 = vst [vmem:[#allocation248_spill] sm:$0xff] %v9952_v40  ;;  %v9956_v11 = vmul.f32 %v9882_v20, %v9898_v4  ;;  %v1785_v28 = vmul.f32 %v8356_v12, %v7340_v54  ;;  %v5397_v33 = vmul.f32 %v9827_v60, %v7340_v54  ;;  %v7106_v9 = vunpack.i.l.bf16 %v9517_v39 }
 0x116   : > { %15672 = vst [vmem:[#allocation247_spill] sm:$0xff] %v9945_v10  ;;  %v9963_v57 = vsel %vm1843_vm0, %v15675_v18, %v1887_v5  ;;  %v5521_v7 = vrot.slane %v5400_v59, 1  ;;  %v9966_v2 = vmul.f32 %v7107_v27, %v9815_v52  ;;  %v9969_v25 = vmul.f32 %v7107_v27, %v9876_v55  ;;  %v9981_v5 = vpop.permute.xlu0 %7584 }
 0x117   : > { %15674 = vst [vmem:[#allocation249_spill] sm:$0xff] %v9956_v11  ;;  %15676 = vst [vmem:[#allocation250_spill] sm:$0xff] %v9963_v57  ;;  %v15679_v11 = vld [vmem:[#allocation98_spill] sm:$0xff]  ;;  %v7398_v3 = vunpack.i.h.bf16 %v9535_v21  ;;  %v7397_v54 = vunpack.i.l.bf16 %v9535_v21  ;;  %v15682_v59 = vrot.slane %v9915_v14, 1  ;;  %v1907_v48 = vrot.slane %v1785_v28, 1 }
 0x118   : > { %15677 = vst [vmem:[#allocation251_spill] sm:$0xff] %v9966_v2  ;;  %15678 = vst [vmem:[#allocation252_spill] sm:$0xff] %v9969_v25  ;;  %v15680_v12 = vrot.slane %v15679_v11, 1  ;;  %v9990_v11 = vmul.f32 %v7107_v27, %v9866_v36  ;;  %v9998_v21 = vmul.f32 %v7107_v27, %v9898_v4  ;;  %v10001_v39 = vmul.f32 %v7106_v9, %v9815_v52  ;;  %v10017_v27 = vld [vmem:[%s15075_s1 + $0xc] ss:$0 sm:$0xff] }
 0x119   : > { %v9986_v18 = vsel %vm1843_vm0, %v5961_v6, %v15682_v59  ;;  %v5866_v6 = vmul.f32 %v7106_v9, %v9876_v55  ;;  %v15687_v59 = vld [vmem:[#allocation120_spill] sm:$0xff]  ;;  %v10012_v14 = vmul.f32 %v7106_v9, %v9866_v36  ;;  %v7414_v40 = vunpack.i.h.bf16 %v9573_v15 }
 0x11a   : > { %v9976_v60 = vsel %vm1843_vm0, %v15680_v12, %v5496_v51  ;;  %15683 = vst [vmem:[#allocation253_spill] sm:$0xff] %v9986_v18  ;;  %15684 = vst [vmem:[#allocation254_spill] sm:$0xff] %v9990_v11  ;;  %v9995_v51 = vld [vmem:[%s15075_s1 + $0x14] ss:$0 sm:$0xff]  ;;  %v5516_v12 = vrot.slane %v5397_v33, 1  ;;  %v15688_v57 = vrot.slane %v15687_v59, 1  ;;  %v10036_v11 = vpop.permute.xlu1 %7160 }
 0x11b   : > { %15681 = vst [vmem:[#allocation98_spill] sm:$0xff] %v9976_v60  ;;  %15685 = vst [vmem:[#allocation255_spill] sm:$0xff] %v9998_v21  ;;  %v10020_v33 = vmul.f32 %v7398_v3, %v9995_v51  ;;  %v10023_v59 = vmul.f32 %v7397_v54, %v9995_v51  ;;  %v15693_v60 = vld [vmem:[#allocation124_spill] sm:$0xff]  ;;  %v10033_v21 = vmul.f32 %v7106_v9, %v9898_v4  ;;  %v5966_v2 = vrot.slane %v5866_v6, 1  ;;  %v10050_v9 = vpop.permute.xlu0 %7594  ;;  %v186_v6 = vld [vmem:[%s8542_s28 + $0x44] sm:$0x1] }
 0x11c   : > { %15686 = vst [vmem:[#allocation256_spill] sm:$0xff] %v10001_v39  ;;  %v10007_v28 = vsel %vm1843_vm0, %v15688_v57, %v5521_v7  ;;  %15690 = vst [vmem:[#allocation257_spill] sm:$0xff] %v10012_v14  ;;  %v7112_v57 = vunpack.i.h.bf16 %v9571_v17  ;;  %v7111_v7 = vunpack.i.l.bf16 %v9571_v17  ;;  %v15694_v18 = vrot.slane %v15693_v60, 1  ;;  %v15697_v14 = vld [vmem:[#allocation125_spill] sm:$0xff] }
 0x11d   : > { %15689 = vst [vmem:[#allocation120_spill] sm:$0xff] %v10007_v28  ;;  %15691 = vst [vmem:[#allocation258_spill] sm:$0xff] %v10020_v33  ;;  %v15698_v10 = vrot.slane %v15697_v14, 1  ;;  %v10045_v60 = vmul.f32 %v7398_v3, %v10017_v27  ;;  %v183_v3 = vld [vmem:[%s8542_s28 + $0x38] sm:$0x1] }
 0x11e   : > { %15692 = vst [vmem:[#allocation259_spill] sm:$0xff] %v10023_v59  ;;  %v10030_v28 = vsel %vm1843_vm0, %v15694_v18, %v1907_v48  ;;  %15696 = vst [vmem:[#allocation260_spill] sm:$0xff] %v10033_v21  ;;  %v10048_v48 = vmul.f32 %v7112_v57, %v9815_v52  ;;  %v10053_v18 = vmul.f32 %v7397_v54, %v10017_v27  ;;  %v15705_v21 = vrot.slane %v9969_v25, 1 }
 0x11f   : > { %15695 = vst [vmem:[#allocation124_spill] sm:$0xff] %v10030_v28  ;;  %v10041_v58 = vsel %vm1843_vm0, %v15698_v10, %v5516_v12  ;;  %15700 = vst [vmem:[#allocation261_spill] sm:$0xff] %v10045_v60  ;;  %v10056_v14 = vmul.f32 %v7112_v57, %v9876_v55  ;;  %v10059_v10 = vmul.f32 %v7111_v7, %v9815_v52  ;;  %v7413_v12 = vunpack.i.l.bf16 %v9573_v15  ;;  %v10098_v28 = vpop.permute.xlu1 %7170 }
 0x120   : > { %15699 = vst [vmem:[#allocation125_spill] sm:$0xff] %v10041_v58  ;;  %15701 = vst [vmem:[#allocation262_spill] sm:$0xff] %v10048_v48  ;;  %v5872_v17 = vmul.f32 %v7111_v7, %v9876_v55  ;;  %v7117_v58 = vunpack.i.h.bf16 %v9627_v22  ;;  %v10069_v54 = vsel %vm1843_vm0, %v5966_v2, %v15705_v21  ;;  %v10072_v39 = vmul.f32 %v7112_v57, %v9866_v36 }
 0x121   : > { %15702 = vst [vmem:[#allocation263_spill] sm:$0xff] %v10053_v18  ;;  %15703 = vst [vmem:[#allocation264_spill] sm:$0xff] %v10056_v14  ;;  %v10075_v60 = vmul.f32 %v7112_v57, %v9898_v4  ;;  %v10078_v15 = vmul.f32 %v7414_v40, %v9995_v51  ;;  %v10084_v33 = vmul.f32 %v7111_v7, %v9866_v36 }
 0x122   : > { %15704 = vst [vmem:[#allocation265_spill] sm:$0xff] %v10059_v10  ;;  %15706 = vst [vmem:[#allocation266_spill] sm:$0xff] %v10069_v54  ;;  %v10087_v18 = vmul.f32 %v7111_v7, %v9898_v4  ;;  %v10090_v2 = vmul.f32 %v7414_v40, %v10017_v27  ;;  %v7116_v54 = vunpack.i.l.bf16 %v9627_v22  ;;  %v5976_v59 = vrot.slane %v5872_v17, 1 }
 0x123   : > { %15707 = vst [vmem:[#allocation267_spill] sm:$0xff] %v10072_v39  ;;  %15708 = vst [vmem:[#allocation268_spill] sm:$0xff] %v10075_v60  ;;  %v10095_v60 = vmul.f32 %v7413_v12, %v9995_v51  ;;  %v10101_v25 = vmul.f32 %v7117_v58, %v9815_v52  ;;  %v1649_v7 = vunpack.c.l.bf16 %v183_v3  ;;  %v10103_v39 = vpop.permute.xlu0 %7604  ;;  %v10107_v21 = vmul.f32 %v7413_v12, %v10017_v27 }
 0x124   : > { %15709 = vst [vmem:[#allocation269_spill] sm:$0xff] %v10078_v15  ;;  %15710 = vst [vmem:[#allocation270_spill] sm:$0xff] %v10084_v33  ;;  %v10110_v57 = vmul.f32 %v7117_v58, %v9876_v55  ;;  %v10113_v22 = vmul.f32 %v7116_v54, %v9815_v52  ;;  %v10116_v17 = vmul.f32 %v7117_v58, %v9866_v36  ;;  %v7423_v40 = vunpack.i.l.bf16 %v9612_v16 }
 0x125   : > { %15711 = vst [vmem:[#allocation271_spill] sm:$0xff] %v10087_v18  ;;  %15712 = vst [vmem:[#allocation272_spill] sm:$0xff] %v10090_v2  ;;  %v1650_v18 = vunpack.c.l.bf16 %v186_v6  ;;  %v5878_v10 = vmul.f32 %v7116_v54, %v9876_v55  ;;  %v7424_v6 = vunpack.i.h.bf16 %v9612_v16  ;;  %v7122_v15 = vunpack.i.h.bf16 %v9684_v53 }
 0x126   : > { %15713 = vst [vmem:[#allocation273_spill] sm:$0xff] %v10095_v60  ;;  %15714 = vst [vmem:[#allocation274_spill] sm:$0xff] %v10101_v25  ;;  %v10132_v33 = vmul.f32 %v7117_v58, %v9898_v4  ;;  %v10138_v16 = vmul.f32 %v7116_v54, %v9866_v36  ;;  %v10142_v60 = vmul.f32 %v7116_v54, %v9898_v4  ;;  %v10147_v58 = vpop.permute.xlu1 %7180  ;;  %v15732_v26 = vrot.slane %v10110_v57, 1  ;;  %v201_v25 = vld [vmem:[%s8542_s28 + $0x80] sm:$0x1] }
 0x127   : > { %15715 = vst [vmem:[#allocation275_spill] sm:$0xff] %v10107_v21  ;;  %15716 = vst [vmem:[#allocation276_spill] sm:$0xff] %v10110_v57  ;;  %v10119_v3 = vpack.i.bf16 %v1650_v18, %v1649_v7  ;;  %v15719_v21 = vrot.slane %v10056_v14, 1  ;;  %v7121_v18 = vunpack.i.l.bf16 %v9684_v53  ;;  %v10153_v53 = vmul.f32 %v7424_v6, %v9995_v51  ;;  %v10158_v12 = vpop.permute.xlu0 %7614 }
 0x128   : > { %15717 = vst [vmem:[#allocation277_spill] sm:$0xff] %v10113_v22  ;;  %15718 = vst [vmem:[#allocation278_spill] sm:$0xff] %v10116_v17  ;;  %v5986_v17 = vrot.slane %v5878_v10, 1  ;;  %v10156_v7 = vmul.f32 %v7122_v15, %v9876_v55  ;;  %v10161_v54 = vmul.f32 %v7423_v40, %v10017_v27  ;;  %v10170_v10 = vmul.f32 %v7122_v15, %v9815_v52 }
 0x129   : > { %v10128_v2 = vsel %vm1843_vm0, %v5976_v59, %v15719_v21  ;;  %15721 = vst [vmem:[#allocation280_spill] sm:$0xff] %v10132_v33  ;;  %7318 = vperm.xlu1 %7306, %v10119_v3   ;;  %15722 = vst [vmem:[#allocation281_spill] sm:$0xff] %v10138_v16  ;;  %v189_v59 = vld [vmem:[%s8542_s28 + $0x50] sm:$0x1]  ;;  %v192_v21 = vld [vmem:[%s8542_s28 + $0x5c] sm:$0x1]  ;;  %v10150_v33 = vmul.f32 %v7424_v6, %v10017_v27  ;;  %v10173_v6 = vmul.f32 %v7121_v18, %v9815_v52 }
 0x12a   : > { %15720 = vst [vmem:[#allocation279_spill] sm:$0xff] %v10128_v2  ;;  %15723 = vst [vmem:[#allocation282_spill] sm:$0xff] %v10142_v60  ;;  %v10164_v2 = vmul.f32 %v7423_v40, %v9995_v51  ;;  %v10167_v60 = vmul.f32 %v7122_v15, %v9866_v36  ;;  %v5884_v22 = vmul.f32 %v7121_v18, %v9876_v55  ;;  %v1652_v16 = vunpack.c.l.bf16 %v192_v21  ;;  %v10196_v24 = vpop.permute.xlu1 %7190 }
 0x12b   : > { %15724 = vst [vmem:[#allocation283_spill] sm:$0xff] %v10150_v33  ;;  %15725 = vst [vmem:[#allocation284_spill] sm:$0xff] %v10153_v53  ;;  %v1651_v33 = vunpack.c.l.bf16 %v189_v59  ;;  %v7433_v40 = vunpack.i.l.bf16 %v9649_v23  ;;  %v10186_v47 = vsel %vm1843_vm0, %v5986_v17, %v15732_v26  ;;  %v10190_v21 = vmul.f32 %v7122_v15, %v9898_v4  ;;  %v204_v17 = vld [vmem:[%s8542_s28 + $0x8c] sm:$0x1]  ;;  %v10206_v15 = vpop.permute.xlu0 %7624 }
 0x12c   : > { %15726 = vst [vmem:[#allocation285_spill] sm:$0xff] %v10156_v7  ;;  %15727 = vst [vmem:[#allocation286_spill] sm:$0xff] %v10161_v54  ;;  %v7434_v54 = vunpack.i.h.bf16 %v9649_v23  ;;  %v5996_v14 = vrot.slane %v5884_v22, 1  ;;  %v10193_v23 = vmul.f32 %v7121_v18, %v9866_v36  ;;  %v10202_v26 = vmul.f32 %v7121_v18, %v9898_v4 }
 0x12d   : > { %15728 = vst [vmem:[#allocation287_spill] sm:$0xff] %v10164_v2  ;;  %15729 = vst [vmem:[#allocation288_spill] sm:$0xff] %v10167_v60  ;;  %v7127_v60 = vunpack.i.h.bf16 %v9735_v1  ;;  %v10180_v48 = vpack.i.bf16 %v1652_v16, %v1651_v33  ;;  %v10215_v33 = vmul.f32 %v7433_v40, %v10017_v27  ;;  %v15741_v18 = vrot.slane %v10156_v7, 1 }
 0x12e   : > { %15730 = vst [vmem:[#allocation289_spill] sm:$0xff] %v10170_v10  ;;  %15731 = vst [vmem:[#allocation290_spill] sm:$0xff] %v10173_v6  ;;  %v10209_v16 = vmul.f32 %v7434_v54, %v10017_v27  ;;  %v10212_v59 = vmul.f32 %v7434_v54, %v9995_v51  ;;  %v5890_v54 = vmul.f32 %v7126_v13, %v9876_v55  ;;  %v7444_v6 = vunpack.i.h.bf16 %v9696_v37 }
 0x12f   : > { %15733 = vst [vmem:[#allocation291_spill] sm:$0xff] %v10186_v47  ;;  %15734 = vst [vmem:[#allocation292_spill] sm:$0xff] %v10190_v21  ;;  %7323 = vperm.xlu1 %7306, %v10180_v48   ;;  %v10218_v1 = vmul.f32 %v7127_v60, %v9876_v55  ;;  %7853 = vperm.xlu0 %7771, %v10180_v48   ;;  %v10224_v22 = vsel %vm1843_vm0, %v5996_v14, %v15741_v18  ;;  %v1655_v47 = vunpack.c.l.bf16 %v201_v25 }
 0x130   : > { %15735 = vst [vmem:[#allocation293_spill] sm:$0xff] %v10193_v23  ;;  %15736 = vst [vmem:[#allocation294_spill] sm:$0xff] %v10202_v26  ;;  %v10227_v21 = vmul.f32 %v7433_v40, %v9995_v51  ;;  %v10230_v2 = vmul.f32 %v7127_v60, %v9815_v52  ;;  %v10234_v53 = vmul.f32 %v7126_v13, %v9815_v52  ;;  %v1656_v26 = vunpack.c.l.bf16 %v204_v17  ;;  %v10249_v17 = vpop.permute.xlu1 %7200 }
 0x131   : > { %15737 = vst [vmem:[#allocation295_spill] sm:$0xff] %v10209_v16  ;;  %15738 = vst [vmem:[#allocation296_spill] sm:$0xff] %v10212_v59  ;;  %v7443_v14 = vunpack.i.l.bf16 %v9696_v37  ;;  %v7132_v40 = vunpack.i.h.bf16 %v9790_v63  ;;  %v10241_v18 = vmul.f32 %v7127_v60, %v9866_v36  ;;  %v7131_v25 = vunpack.i.l.bf16 %v9790_v63  ;;  %v213_v37 = vld [vmem:[%s8542_s28 + $0xb0] sm:$0x1] }
 0x132   : > { %15739 = vst [vmem:[#allocation297_spill] sm:$0xff] %v10215_v33  ;;  %15740 = vst [vmem:[#allocation298_spill] sm:$0xff] %v10218_v1  ;;  %v6006_v33 = vrot.slane %v5890_v54, 1  ;;  %v10246_v7 = vpack.i.bf16 %v1656_v26, %v1655_v47  ;;  %v10255_v10 = vmul.f32 %v7126_v13, %v9866_v36  ;;  %v10261_v47 = vmul.f32 %v7126_v13, %v9898_v4  ;;  %v216_v54 = vld [vmem:[%s8542_s28 + $0xbc] sm:$0x1] }
 0x133   : > { %15742 = vst [vmem:[#allocation299_spill] sm:$0xff] %v10224_v22  ;;  %15743 = vst [vmem:[#allocation300_spill] sm:$0xff] %v10227_v21  ;;  %v10244_v22 = vmul.f32 %v7127_v60, %v9898_v4  ;;  %v10265_v63 = vmul.f32 %v7444_v6, %v10017_v27  ;;  %v10268_v26 = vmul.f32 %v7132_v40, %v9876_v55  ;;  %v15752_v16 = vrot.slane %v10218_v1, 1 }
 0x134   : > { %15744 = vst [vmem:[#allocation301_spill] sm:$0xff] %v10230_v2  ;;  %15745 = vst [vmem:[#allocation302_spill] sm:$0xff] %v10234_v53  ;;  %7333 = vperm.xlu1 %7306, %v10246_v7   ;;  %v10278_v60 = vmul.f32 %v7444_v6, %v9995_v51  ;;  %v10281_v13 = vmul.f32 %v7443_v14, %v10017_v27  ;;  %v10284_v21 = vmul.f32 %v7443_v14, %v9995_v51 }
 0x135   : > { %15746 = vst [vmem:[#allocation303_spill] sm:$0xff] %v10241_v18  ;;  %15747 = vst [vmem:[#allocation304_spill] sm:$0xff] %v10244_v22  ;;  %v10257_v18 = vpop.permute.xlu0 %7634  ;;  %v10275_v22 = vsel %vm1843_vm0, %v6006_v33, %v15752_v16  ;;  %v10287_v59 = vmul.f32 %v7132_v40, %v9866_v36  ;;  %v5896_v53 = vmul.f32 %v7131_v25, %v9876_v55  ;;  %v1659_v16 = vunpack.c.l.bf16 %v213_v37 }
 0x136   : > { %15748 = vst [vmem:[#allocation305_spill] sm:$0xff] %v10255_v10  ;;  %15749 = vst [vmem:[#allocation306_spill] sm:$0xff] %v10261_v47  ;;  %v10290_v47 = vmul.f32 %v7132_v40, %v9815_v52  ;;  %v10294_v33 = vmul.f32 %v7131_v25, %v9815_v52  ;;  %v1660_v6 = vunpack.c.l.bf16 %v216_v54  ;;  %7858 = vperm.xlu0 %7771, %v10246_v7   ;;  %v7453_v14 = vunpack.i.l.bf16 %v9747_v42  ;;  %v10301_v10 = vpop.permute.xlu1 %7210 }
 0x137   : > { %15750 = vst [vmem:[#allocation307_spill] sm:$0xff] %v10265_v63  ;;  %15751 = vst [vmem:[#allocation308_spill] sm:$0xff] %v10268_v26  ;;  %v6016_v63 = vrot.slane %v5896_v53, 1  ;;  %v7136_v54 = vunpack.i.l.bf16 %v9856_v41  ;;  %v10311_v53 = vmul.f32 %v7132_v40, %v9898_v4  ;;  %v10317_v2 = vmul.f32 %v7131_v25, %v9898_v4  ;;  %v257_v40 = vld [vmem:[%s8542_s28 + $0x1a4] sm:$0xff]  }
 0x138   : > { %15753 = vst [vmem:[#allocation309_spill] sm:$0xff] %v10275_v22  ;;  %15754 = vst [vmem:[#allocation310_spill] sm:$0xff] %v10278_v60  ;;  %v7454_v22 = vunpack.i.h.bf16 %v9747_v42  ;;  %v10304_v1 = vpack.i.bf16 %v1660_v6, %v1659_v16  ;;  %v10314_v42 = vmul.f32 %v7131_v25, %v9866_v36  ;;  %v10326_v6 = vmul.f32 %v7453_v14, %v9995_v51 }
 0x139   : > { %15755 = vst [vmem:[#allocation311_spill] sm:$0xff] %v10281_v13  ;;  %15756 = vst [vmem:[#allocation312_spill] sm:$0xff] %v10284_v21  ;;  %v10307_v37 = vpop.permute.xlu0 %7731  ;;  %v15765_v13 = vrot.slane %v10268_v26, 1  ;;  %v10338_v57 = vmul.f32 %v7453_v14, %v10017_v27  ;;  %v7463_v14 = vunpack.i.l.bf16 %v9800_v29  ;;  %v2608_v26 = vunpack.c.l.bf16 %v257_v40 }
 0x13a   : > { %15757 = vst [vmem:[#allocation313_spill] sm:$0xff] %v10287_v59  ;;  %15758 = vst [vmem:[#allocation314_spill] sm:$0xff] %v10290_v47  ;;  %v7137_v59 = vunpack.i.h.bf16 %v9856_v41  ;;  %7343 = vperm.xlu1 %7306, %v10304_v1   ;;  %v10323_v41 = vmul.f32 %v7454_v22, %v9995_v51  ;;  %v10335_v25 = vmul.f32 %v7454_v22, %v10017_v27  ;;  %7863 = vperm.xlu0 %7771, %v10304_v1   ;;  %v10356_v60 = vpop.permute.xlu1 %7221 }
 0x13b   : > { %15759 = vst [vmem:[#allocation315_spill] sm:$0xff] %v10294_v33  ;;  %15760 = vst [vmem:[#allocation316_spill] sm:$0xff] %v10311_v53  ;;  %v10332_v23 = vsel %vm1843_vm0, %v6016_v63, %v15765_v13  ;;  %v5902_v63 = vmul.f32 %v7136_v54, %v9876_v55  ;;  %v10352_v13 = vmul.f32 %v7136_v54, %v9815_v52  ;;  %v7464_v22 = vunpack.i.h.bf16 %v9800_v29 }
 0x13c   : > { %15761 = vst [vmem:[#allocation317_spill] sm:$0xff] %v10314_v42  ;;  %15762 = vst [vmem:[#allocation318_spill] sm:$0xff] %v10317_v2  ;;  %v10341_v16 = vmul.f32 %v7137_v59, %v9876_v55  ;;  %v10345_v53 = vmul.f32 %v7137_v59, %v9866_v36  ;;  %v10348_v21 = vmul.f32 %v7137_v59, %v9815_v52  ;;  %v2609_v55 = vunpack.c.h.bf16 %v257_v40  ;;  %v6910_v2 = vld [vmem:[%s8542_s28 + $0x1c8] sm:$0xff]   ;;  %v15795_v42 = vld [vmem:[#allocation21_spill] sm:$0xff] }
 0x13d   : > { %15763 = vst [vmem:[#allocation319_spill] sm:$0xff] %v10323_v41  ;;  %15764 = vst [vmem:[#allocation320_spill] sm:$0xff] %v10326_v6  ;;  %v10361_v33 = vmul.f32 %v7137_v59, %v9898_v4  ;;  %v10364_v52 = vpop.permute.xlu0 %7747  ;;  %v10368_v47 = vmul.f32 %v7136_v54, %v9866_v36  ;;  %v10371_v29 = vmul.f32 %v7136_v54, %v9898_v4  ;;  %v7147_v54 = vunpack.i.l.bf16 %v9917_v35  ;;  %v15784_v6 = vld [vmem:[#allocation42_spill] sm:$0xff] }
 0x13e   : > { %15766 = vst [vmem:[#allocation321_spill] sm:$0xff] %v10332_v23  ;;  %15767 = vst [vmem:[#allocation322_spill] sm:$0xff] %v10335_v25  ;;  %v15774_v25 = vmov 1   ;;  %v15777_v23 = vld [vmem:[#allocation20_spill] sm:$0xff]  ;;  %v10376_v59 = vmul.f32 %v7464_v22, %v9995_v51  ;;  %v10381_v40 = vpack.i.bf16 %v2609_v55, %v2608_v26  ;;  %v10387_v4 = vmul.f32 %v7464_v22, %v10017_v27 }
 0x13f   : > { %15768 = vst [vmem:[#allocation323_spill] sm:$0xff] %v10338_v57  ;;  %15769 = vst [vmem:[#allocation324_spill] sm:$0xff] %v10341_v16  ;;  %7347 = vset.pattern.permute.xlu1 %v15774_v25  ;;  %v7148_v57 = vunpack.i.h.bf16 %v9917_v35  ;;  %v6838_v26 = vunpack.c.l.bf16 %v6910_v2  ;;  %v15782_v55 = vrot.slane %v10341_v16, 1  ;;  %v7473_v41 = vunpack.i.l.bf16 %v9861_v45 }
 0x140   : > { %15770 = vst [vmem:[#allocation325_spill] sm:$0xff] %v10345_v53  ;;  %15771 = vst [vmem:[#allocation326_spill] sm:$0xff] %v10348_v21  ;;  %v6026_v53 = vrot.slane %v5902_v63, 1  ;;  %7349 = vperm.xlu1 %7347, %v15777_v23   ;;  %v10391_v63 = vmul.f32 %v7463_v14, %v10017_v27  ;;  %7868 = vperm.xlu0 %7771, %v10381_v40   ;;  %v6839_v22 = vunpack.c.h.bf16 %v6910_v2  ;;  %v7607_v16 = vunpack.i.h.bf16 %v10103_v39  ;;  %v15968_v23 = vld [vmem:[#allocation6_spill] sm:$0xff] }
 0x141   : > { %15772 = vst [vmem:[#allocation327_spill] sm:$0xff] %v10352_v13  ;;  %15773 = vst [vmem:[#allocation328_spill] sm:$0xff] %v10361_v33  ;;  %v10379_v33 = vmul.f32 %v7463_v14, %v9995_v51  ;;  %v765_v35 = vadd.f32 %v9497_v43, %v15784_v6  ;;  %v10403_v13 = vpop.permute.xlu1 %7226  ;;  %v10419_v43 = vpop.permute.xlu0 %7757  ;;  %v6911_v14 = vld [vmem:[%s8542_s28 + $0x1e0] sm:$0xff]  }
 0x142   : > { %15775 = vst [vmem:[#allocation329_spill] sm:$0xff] %v10368_v47  ;;  %15776 = vst [vmem:[#allocation330_spill] sm:$0xff] %v10371_v29  ;;  %v7474_v29 = vunpack.i.h.bf16 %v9861_v45  ;;  %v10398_v47 = vsel %vm1843_vm0, %v6026_v53, %v15782_v55  ;;  %v10416_v45 = vmul.f32 %v7148_v57, %v9449_v31  ;;  %v10424_v6 = vpack.i.bf16 %v6839_v22, %v6838_v26 }
 0x143   : > { %15778 = vst [vmem:[#allocation331_spill] sm:$0xff] %v10376_v59  ;;  %15779 = vst [vmem:[#allocation332_spill] sm:$0xff] %v10379_v33  ;;  %v7153_v55 = vunpack.i.h.bf16 %v9971_v0  ;;  %v10430_v33 = vmul.f32 %v7147_v54, %v9449_v31  ;;  %v10443_v22 = vmul.f32 %v7473_v41, %v9995_v51 }
 0x144   : > { %15780 = vst [vmem:[#allocation333_spill] sm:$0xff] %v10387_v4  ;;  %15781 = vst [vmem:[#allocation334_spill] sm:$0xff] %v10391_v63  ;;  %v10410_v4 = vld [vmem:[%s15075_s1 + $0x4] ss:$0 sm:$0xff]  ;;  %7354 = vperm.xlu1 %7347, %v10119_v3   ;;  %v7152_v63 = vunpack.i.l.bf16 %v9971_v0  ;;  %v10440_v26 = vmul.f32 %v7474_v29, %v10017_v27  ;;  %7873 = vperm.xlu0 %7771, %v10424_v6   ;;  %v929_v0 = vmul.f32 %v9882_v20, %v9866_v36  ;;  %v10461_v20 = vld [vmem:[%s15075_s1 + $0x10] ss:$0 sm:$0xff] }
 0x145   : > { %15783 = vst [vmem:[#allocation335_spill] sm:$0xff] %v10398_v47  ;;  %v10413_v53 = vmul.f32 %v10410_v4, %v7148_v57  ;;  %15786 = vst [vmem:[#allocation336_spill] sm:$0xff] %v10416_v45  ;;  %v10422_v2 = vmul.f32 %v10410_v4, %v7147_v54  ;;  %v10433_v57 = vmul.f32 %v7474_v29, %v9995_v51  ;;  %v15790_v45 = vld [vmem:[#allocation48_spill] sm:$0xff] }
 0x146   : > { %15788 = vst [vmem:[#allocation338_spill] sm:$0xff] %v10430_v33  ;;  %v764_v59 = vadd.f32 %v9503_v38, %v15790_v45  ;;  %v930_v47 = vmul.f32 %v9879_v50, %v9866_v36  ;;  %15791 = vst [vmem:[#allocation48_spill] sm:$0xff] %v10440_v26  ;;  %v10449_v54 = vmul.f32 %v7473_v41, %v10017_v27  ;;  %v7572_v38 = vunpack.i.h.bf16 %v9932_v61  ;;  %v6912_v27 = vld [vmem:[%s8542_s28 + $0x1f8] sm:$0xff]  }
 0x147   : > { %15785 = vst [vmem:[#allocation42_spill] sm:$0xff] %v10413_v53  ;;  %15787 = vst [vmem:[#allocation337_spill] sm:$0xff] %v10422_v2  ;;  %v6842_v45 = vunpack.c.l.bf16 %v6911_v14  ;;  %v1192_v50 = vmul.f32 %v10410_v4, %v7153_v55  ;;  %v10454_v29 = vmul.f32 %v7153_v55, %v9449_v31  ;;  %v1191_v26 = vmul.f32 %v10410_v4, %v7152_v63  ;;  %v10469_v55 = vpop.permute.xlu0 %7767 }
 0x148   : > { %15789 = vst [vmem:[#allocation339_spill] sm:$0xff] %v10433_v57  ;;  %15792 = vst [vmem:[#allocation340_spill] sm:$0xff] %v10443_v22  ;;  %v962_v33 = vadd.f32 %v930_v47, %v765_v35  ;;  %7359 = vperm.xlu1 %7347, %v15795_v42   ;;  %v6843_v36 = vunpack.c.h.bf16 %v6911_v14  ;;  %v10464_v47 = vpop.permute.xlu1 %7231  ;;  %v7571_v35 = vunpack.i.l.bf16 %v9932_v61  ;;  %v7163_v31 = vunpack.i.h.bf16 %v10036_v11  ;;  %v10478_v14 = vld [vmem:[%s15075_s1 + $0x1c] ss:$0 sm:$0xff] }
 0x149   : > { %15793 = vst [vmem:[#allocation341_spill] sm:$0xff] %v10449_v54  ;;  %15794 = vst [vmem:[#allocation342_spill] sm:$0xff] %v10454_v29  ;;  %v961_v54 = vadd.f32 %v929_v0, %v764_v59  ;;  %v7162_v53 = vunpack.i.l.bf16 %v10036_v11  ;;  %v10481_v41 = vmul.f32 %v10478_v14, %v7152_v63  ;;  %v10484_v61 = vmul.f32 %v7572_v38, %v10461_v20  ;;  %v15798_v11 = vld [vmem:[#allocation22_spill] sm:$0xff]  ;;  %v6913_v63 = vld [vmem:[%s8542_s28 + $0x210] sm:$0xff]  }
 0x14a   : > { %v10472_v2 = vpack.i.bf16 %v6843_v36, %v6842_v45  ;;  %v7587_v57 = vunpack.i.h.bf16 %v9981_v5  ;;  %v6846_v29 = vunpack.c.l.bf16 %v6912_v27  ;;  %v10489_v0 = vadd.f32 %v1192_v50, %v962_v33  ;;  %v6914_v50 = vld [vmem:[%s8542_s28 + $0x228] sm:$0xff]  }
 0x14b   : > { %15796 = vst [vmem:[#allocation343_spill] sm:$0xff] %v10481_v41  ;;  %15797 = vst [vmem:[#allocation344_spill] sm:$0xff] %v10484_v61  ;;  %v10487_v59 = vadd.f32 %v1191_v26, %v961_v54  ;;  %v7586_v45 = vunpack.i.l.bf16 %v9981_v5  ;;  %v6847_v36 = vunpack.c.h.bf16 %v6912_v27  ;;  %v10496_v22 = vmul.f32 %v7571_v35, %v10461_v20 }
 0x14c   : > { %7878 = vperm.xlu0 %7771, %v10472_v2   ;;  %7364 = vperm.xlu1 %7347, %v15798_v11   ;;  %v10499_v38 = vmul.f32 %v10410_v4, %v7163_v31  ;;  %v7173_v41 = vunpack.i.h.bf16 %v10098_v28  ;;  %v10503_v26 = vmul.f32 %v10478_v14, %v7163_v31  ;;  %v10506_v33 = vmul.f32 %v10410_v4, %v7162_v53  ;;  %v10514_v27 = vpop.permute.xlu1 %7236 }
 0x14d   : > { %15799 = vst [vmem:[#allocation345_spill] sm:$0xff] %v10496_v22  ;;  %v10509_v54 = vmul.f32 %v10478_v14, %v7162_v53  ;;  %v10511_v5 = vpack.i.bf16 %v6847_v36, %v6846_v29  ;;  %v10517_v35 = vmul.f32 %v7587_v57, %v10461_v20  ;;  %v7172_v61 = vunpack.i.l.bf16 %v10098_v28 }
 0x14e   : > { %15800 = vst [vmem:[#allocation346_spill] sm:$0xff] %v10499_v38  ;;  %15801 = vst [vmem:[#allocation347_spill] sm:$0xff] %v10503_v26  ;;  %v7597_v22 = vunpack.i.h.bf16 %v10050_v9  ;;  %v6850_v31 = vunpack.c.l.bf16 %v6913_v63  ;;  %v10521_v26 = vpop.permute.xlu0 %7773  ;;  %v15806_v53 = vmov 2   ;;  %v7596_v29 = vunpack.i.l.bf16 %v10050_v9  ;;  %v6915_v9 = vld [vmem:[%s8542_s28 + $0x240] sm:$0xff]  }
 0x14f   : > { %15802 = vst [vmem:[#allocation348_spill] sm:$0xff] %v10506_v33  ;;  %15803 = vst [vmem:[#allocation349_spill] sm:$0xff] %v10509_v54  ;;  %v10524_v33 = vmul.f32 %v7586_v45, %v10461_v20  ;;  %v6851_v36 = vunpack.c.h.bf16 %v6913_v63  ;;  %v7183_v57 = vunpack.i.h.bf16 %v10147_v58  ;;  %v10531_v28 = vmul.f32 %v10410_v4, %v7173_v41 }
 0x150   : > { %15804 = vst [vmem:[#allocation350_spill] sm:$0xff] %v10517_v35  ;;  %7883 = vperm.xlu0 %7771, %v10511_v5   ;;  %7368 = vset.pattern.permute.xlu1 %v15806_v53  ;;  %v6854_v54 = vunpack.c.l.bf16 %v6914_v50  ;;  %v6855_v35 = vunpack.c.h.bf16 %v6914_v50  ;;  %v10535_v38 = vmul.f32 %v10478_v14, %v7173_v41  ;;  %v10543_v63 = vmul.f32 %v10410_v4, %v7172_v61 }
 0x151   : > { %15805 = vst [vmem:[#allocation351_spill] sm:$0xff] %v10524_v33  ;;  %15807 = vst [vmem:[#allocation352_spill] sm:$0xff] %v10531_v28  ;;  %7370 = vperm.xlu1 %7368, %v8825_v44   ;;  %v10537_v45 = vpack.i.bf16 %v6851_v36, %v6850_v31  ;;  %v7182_v33 = vunpack.i.l.bf16 %v10147_v58  ;;  %v10546_v21 = vmul.f32 %v10478_v14, %v7172_v61  ;;  %v7606_v50 = vunpack.i.l.bf16 %v10103_v39  ;;  %v10562_v61 = vpop.permute.xlu1 %7241 }
 0x152   : > { %15808 = vst [vmem:[#allocation353_spill] sm:$0xff] %v10535_v38  ;;  %15809 = vst [vmem:[#allocation354_spill] sm:$0xff] %v10543_v63  ;;  %v10549_v44 = vmul.f32 %v7597_v22, %v10461_v20  ;;  %v10553_v41 = vmul.f32 %v7596_v29, %v10461_v20  ;;  %v10557_v58 = vmul.f32 %v10410_v4, %v7183_v57  ;;  %v7193_v36 = vunpack.i.h.bf16 %v10196_v24  ;;  %v10568_v29 = vpop.permute.xlu0 %7778 }
 0x153   : > { %15810 = vst [vmem:[#allocation355_spill] sm:$0xff] %v10546_v21  ;;  %v10559_v31 = vpack.i.bf16 %v6855_v35, %v6854_v54  ;;  %v10565_v22 = vmul.f32 %v10478_v14, %v7183_v57  ;;  %v6858_v39 = vunpack.c.l.bf16 %v6915_v9  ;;  %v6859_v38 = vunpack.c.h.bf16 %v6915_v9  ;;  %v302_v57 = vld [vmem:[%s8542_s28 + $0x264] sm:$0xff]  }
 0x154   : > { %15811 = vst [vmem:[#allocation356_spill] sm:$0xff] %v10549_v44  ;;  %15812 = vst [vmem:[#allocation357_spill] sm:$0xff] %v10553_v41  ;;  %7888 = vperm.xlu0 %7771, %v10537_v45   ;;  %v10571_v21 = vmul.f32 %v10410_v4, %v7182_v33  ;;  %v10574_v44 = vmul.f32 %v10478_v14, %v7182_v33  ;;  %v10577_v54 = vmul.f32 %v7607_v16, %v10461_v20 }
 0x155   : > { %15813 = vst [vmem:[#allocation358_spill] sm:$0xff] %v10557_v58  ;;  %15814 = vst [vmem:[#allocation359_spill] sm:$0xff] %v10559_v31  ;;  %7375 = vperm.xlu1 %7368, %v10119_v3   ;;  %v7192_v35 = vunpack.i.l.bf16 %v10196_v24  ;;  %v7617_v3 = vunpack.i.h.bf16 %v10158_v12  ;;  %v7616_v9 = vunpack.i.l.bf16 %v10158_v12  ;;  %v7203_v41 = vunpack.i.h.bf16 %v10249_v17 }
 0x156   : > { %15815 = vst [vmem:[#allocation360_spill] sm:$0xff] %v10565_v22  ;;  %15816 = vst [vmem:[#allocation361_spill] sm:$0xff] %v10571_v21  ;;  %v10582_v22 = vmul.f32 %v7606_v50, %v10461_v20  ;;  %v10589_v33 = vmul.f32 %v10410_v4, %v7193_v36  ;;  %v10592_v16 = vmul.f32 %v10478_v14, %v7193_v36  ;;  %v7202_v24 = vunpack.i.l.bf16 %v10249_v17 }
 0x157   : > { %15817 = vst [vmem:[#allocation362_spill] sm:$0xff] %v10574_v44  ;;  %15818 = vst [vmem:[#allocation363_spill] sm:$0xff] %v10577_v54  ;;  %v10594_v44 = vpack.i.bf16 %v6859_v38, %v6858_v39  ;;  %v7627_v50 = vunpack.i.h.bf16 %v10206_v15  ;;  %v3262_v54 = vunpack.c.l.bf16 %v302_v57  ;;  %v3263_v12 = vunpack.c.h.bf16 %v302_v57  ;;  %v10608_v39 = vpop.permute.xlu1 %7246 }
 0x158   : > { %15819 = vst [vmem:[#allocation364_spill] sm:$0xff] %v10582_v22  ;;  %7893 = vperm.xlu0 %7771, %v10559_v31   ;;  %15820 = vst [vmem:[#allocation365_spill] sm:$0xff] %v10589_v33  ;;  %v6917_v22 = vld [vmem:[%s8542_s28 + $0x288] sm:$0xff]   ;;  %v10601_v21 = vmul.f32 %v10410_v4, %v7192_v35  ;;  %v10604_v58 = vmul.f32 %v10478_v14, %v7192_v35  ;;  %v7626_v36 = vunpack.i.l.bf16 %v10206_v15  ;;  %v7213_v38 = vunpack.i.h.bf16 %v10301_v10  ;;  %v10622_v35 = vpop.permute.xlu0 %7783 }
 0x159   : > { %15821 = vst [vmem:[#allocation366_spill] sm:$0xff] %v10592_v16  ;;  %15822 = vst [vmem:[#allocation367_spill] sm:$0xff] %v10594_v44  ;;  %7380 = vperm.xlu1 %7368, %v10180_v48   ;;  %v10611_v48 = vmul.f32 %v7617_v3, %v10461_v20  ;;  %v10614_v17 = vmul.f32 %v7616_v9, %v10461_v20  ;;  %v10617_v57 = vmul.f32 %v10410_v4, %v7203_v41 }
 0x15a   : > { %15823 = vst [vmem:[#allocation368_spill] sm:$0xff] %v10601_v21  ;;  %15824 = vst [vmem:[#allocation369_spill] sm:$0xff] %v10604_v58  ;;  %v10620_v16 = vmul.f32 %v10478_v14, %v7203_v41  ;;  %v10626_v15 = vmul.f32 %v10410_v4, %v7202_v24  ;;  %v10629_v58 = vmul.f32 %v10478_v14, %v7202_v24  ;;  %v6866_v9 = vunpack.c.l.bf16 %v6917_v22 }
 0x15b   : > { %15825 = vst [vmem:[#allocation370_spill] sm:$0xff] %v10611_v48  ;;  %15826 = vst [vmem:[#allocation371_spill] sm:$0xff] %v10614_v17  ;;  %v10631_v3 = vpack.i.bf16 %v3263_v12, %v3262_v54  ;;  %v10634_v17 = vmul.f32 %v7627_v50, %v10461_v20  ;;  %v7212_v41 = vunpack.i.l.bf16 %v10301_v10  ;;  %v6918_v48 = vld [vmem:[%s8542_s28 + $0x2a0] sm:$0xff]   ;;  %v10646_v24 = vmul.f32 %v10478_v14, %v7213_v38 }
 0x15c   : > { %15827 = vst [vmem:[#allocation372_spill] sm:$0xff] %v10617_v57  ;;  %15828 = vst [vmem:[#allocation373_spill] sm:$0xff] %v10620_v16  ;;  %7898 = vperm.xlu0 %7771, %v10594_v44   ;;  %v6867_v16 = vunpack.c.h.bf16 %v6917_v22  ;;  %v10640_v57 = vmul.f32 %v7626_v36, %v10461_v20  ;;  %v7734_v54 = vunpack.i.h.bf16 %v10307_v37  ;;  %v7637_v50 = vunpack.i.h.bf16 %v10257_v18  ;;  %v6909_v22 = vld [vmem:[%s8542_s28 + $0x1b0] sm:$0xff]  }
 0x15d   : > { %15829 = vst [vmem:[#allocation374_spill] sm:$0xff] %v10626_v15  ;;  %15830 = vst [vmem:[#allocation375_spill] sm:$0xff] %v10629_v58  ;;  %7385 = vperm.xlu1 %7368, %v10246_v7   ;;  %v10643_v15 = vmul.f32 %v10410_v4, %v7213_v38  ;;  %v7636_v12 = vunpack.i.l.bf16 %v10257_v18  ;;  %v7224_v7 = vunpack.i.h.bf16 %v10356_v60  ;;  %v7733_v10 = vunpack.i.l.bf16 %v10307_v37  ;;  %v10667_v18 = vld [vmem:[%s15075_s1 + $0x5] ss:$0 sm:$0xff] }
 0x15e   : > { %15831 = vst [vmem:[#allocation376_spill] sm:$0xff] %v10631_v3  ;;  %15832 = vst [vmem:[#allocation377_spill] sm:$0xff] %v10634_v17  ;;  %v10655_v36 = vpack.i.bf16 %v6867_v16, %v6866_v9  ;;  %v7223_v58 = vunpack.i.l.bf16 %v10356_v60  ;;  %v6870_v38 = vunpack.c.l.bf16 %v6918_v48  ;;  %v10658_v17 = vpop.permute.xlu1 %7251  ;;  %v7229_v37 = vunpack.i.h.bf16 %v10403_v13  ;;  %v10671_v9 = vpop.permute.xlu0 %7788 }
 0x15f   : > { %15833 = vst [vmem:[#allocation378_spill] sm:$0xff] %v10640_v57  ;;  %15834 = vst [vmem:[#allocation379_spill] sm:$0xff] %v10643_v15  ;;  %v10661_v57 = vmul.f32 %v10410_v4, %v7212_v41  ;;  %v7228_v16 = vunpack.i.l.bf16 %v10403_v13  ;;  %v10674_v60 = vmul.f32 %v7734_v54, %v9995_v51  ;;  %v7750_v4 = vunpack.i.h.bf16 %v10364_v52 }
 0x160   : > { %15835 = vst [vmem:[#allocation380_spill] sm:$0xff] %v10646_v24  ;;  %7903 = vperm.xlu0 %7771, %v10631_v3   ;;  %15836 = vst [vmem:[#allocation381_spill] sm:$0xff] %v10655_v36  ;;  %v6871_v24 = vunpack.c.h.bf16 %v6918_v48  ;;  %v10677_v48 = vmul.f32 %v7733_v10, %v9995_v51  ;;  %v10682_v15 = vmul.f32 %v10478_v14, %v7212_v41  ;;  %v7749_v54 = vunpack.i.l.bf16 %v10364_v52  ;;  %v10703_v14 = vld [vmem:[%s15075_s1 + $0x1d] ss:$0 sm:$0xff] }
 0x161   : > { %15837 = vst [vmem:[#allocation382_spill] sm:$0xff] %v10661_v57  ;;  %7390 = vperm.xlu1 %7368, %v10304_v1   ;;  %15838 = vst [vmem:[#allocation383_spill] sm:$0xff] %v10674_v60  ;;  %v6834_v1 = vunpack.c.l.bf16 %v6909_v22  ;;  %v6919_v57 = vld [vmem:[%s8542_s28 + $0x2b8] sm:$0xff]   ;;  %v10685_v21 = vmul.f32 %v7637_v50, %v10461_v20  ;;  %v10688_v13 = vmul.f32 %v7636_v12, %v10461_v20  ;;  %v6835_v41 = vunpack.c.h.bf16 %v6909_v22 }
 0x162   : > { %15839 = vst [vmem:[#allocation384_spill] sm:$0xff] %v10677_v48  ;;  %15840 = vst [vmem:[#allocation385_spill] sm:$0xff] %v10682_v15  ;;  %v10693_v10 = vmul.f32 %v7224_v7, %v10667_v18  ;;  %v10696_v33 = vmul.f32 %v7223_v58, %v10667_v18  ;;  %v10698_v63 = vpack.i.bf16 %v6871_v24, %v6870_v38  ;;  %v6874_v50 = vunpack.c.l.bf16 %v6919_v57  ;;  %v6920_v7 = vld [vmem:[%s8542_s28 + $0x2d0] sm:$0xff]   ;;  %v10717_v22 = vpop.permute.xlu1 %7256  ;;  %v10727_v58 = vpop.permute.xlu0 %7793 }
 0x163   : > { %15841 = vst [vmem:[#allocation386_spill] sm:$0xff] %v10685_v21  ;;  %15842 = vst [vmem:[#allocation387_spill] sm:$0xff] %v10688_v13  ;;  %v1389_v52 = vmul.f32 %v7229_v37, %v10667_v18  ;;  %v1388_v20 = vmul.f32 %v7228_v16, %v10667_v18  ;;  %v6875_v12 = vunpack.c.h.bf16 %v6919_v57  ;;  %v10713_v38 = vmul.f32 %v7750_v4, %v9995_v51 }
 0x164   : > { %7908 = vperm.xlu0 %7771, %v10655_v36   ;;  %15843 = vst [vmem:[#allocation388_spill] sm:$0xff] %v10693_v10  ;;  %15844 = vst [vmem:[#allocation389_spill] sm:$0xff] %v10696_v33  ;;  %v10715_v15 = vpack.i.bf16 %v6835_v41, %v6834_v1  ;;  %v10720_v21 = vmul.f32 %v7229_v37, %v10703_v14  ;;  %v10723_v13 = vmul.f32 %v7749_v54, %v9995_v51 }
 0x165   : > { %15845 = vst [vmem:[#allocation390_spill] sm:$0xff] %v10698_v63  ;;  %7399 = vset.pattern.permute.xlu1 %v15586_v19  ;;  %15846 = vst [vmem:[#allocation391_spill] sm:$0xff] %v10713_v38  ;;  %v7760_v57 = vunpack.i.h.bf16 %v10419_v43  ;;  %v7759_v24 = vunpack.i.l.bf16 %v10419_v43  ;;  %v10731_v4 = vmul.f32 %v7228_v16, %v10703_v14  ;;  %v10733_v1 = vpack.i.bf16 %v6875_v12, %v6874_v50  ;;  %v6921_v12 = vld [vmem:[%s8542_s28 + $0x2e8] sm:$0xff]   ;;  %v15922_v19 = vld [vmem:[#allocation89_spill] sm:$0xff] }
 0x166   : > { %7401 = vperm.xlu1 %7399, %v10381_v40   ;;  %15847 = vst [vmem:[#allocation392_spill] sm:$0xff] %v10720_v21  ;;  %15848 = vst [vmem:[#allocation393_spill] sm:$0xff] %v10723_v13  ;;  %v7234_v37 = vunpack.i.h.bf16 %v10464_v47  ;;  %v6878_v41 = vunpack.c.l.bf16 %v6920_v7  ;;  %v10737_v54 = vadd.f32 %v1388_v20, %v10487_v59  ;;  %v10740_v21 = vadd.f32 %v1389_v52, %v10489_v0  ;;  %v10766_v60 = vpop.permute.xlu1 %7261 }
 0x167   : > { %15849 = vst [vmem:[#allocation394_spill] sm:$0xff] %v10731_v4  ;;  %15850 = vst [vmem:[#allocation395_spill] sm:$0xff] %v10733_v1  ;;  %v7233_v43 = vunpack.i.l.bf16 %v10464_v47  ;;  %v10744_v48 = vmul.f32 %v7760_v57, %v9995_v51  ;;  %v6879_v16 = vunpack.c.h.bf16 %v6920_v7  ;;  %v7770_v50 = vunpack.i.h.bf16 %v10469_v55 }
 0x168   : > { %7913 = vperm.xlu0 %7771, %v10698_v63   ;;  %v10752_v59 = vmul.f32 %v7759_v24, %v9995_v51  ;;  %v7239_v0 = vunpack.i.h.bf16 %v10514_v27  ;;  %v7769_v47 = vunpack.i.l.bf16 %v10469_v55  ;;  %v10758_v52 = vmul.f32 %v7234_v37, %v10667_v18  ;;  %v15901_v63 = vld [vmem:[#allocation70_spill] sm:$0xff] }
 0x169   : > { %15851 = vst [vmem:[#allocation396_spill] sm:$0xff] %v10744_v48  ;;  %v10761_v20 = vmul.f32 %v7234_v37, %v10703_v14  ;;  %v10763_v7 = vpack.i.bf16 %v6879_v16, %v6878_v41  ;;  %v7238_v57 = vunpack.i.l.bf16 %v10514_v27  ;;  %v10769_v24 = vmul.f32 %v7233_v43, %v10667_v18  ;;  %v6922_v48 = vld [vmem:[%s8542_s28 + $0x300] sm:$0xff]  }
 0x16a   : > { %7406 = vperm.xlu1 %7399, %v10715_v15   ;;  %15852 = vst [vmem:[#allocation397_spill] sm:$0xff] %v10752_v59  ;;  %15853 = vst [vmem:[#allocation398_spill] sm:$0xff] %v10758_v52  ;;  %v10772_v55 = vmul.f32 %v7233_v43, %v10703_v14  ;;  %v6882_v38 = vunpack.c.l.bf16 %v6921_v12  ;;  %v10775_v52 = vpop.permute.xlu0 %7798  ;;  %v10779_v37 = vmul.f32 %v7770_v50, %v9995_v51  ;;  %v6883_v41 = vunpack.c.h.bf16 %v6921_v12 }
 0x16b   : > { %15854 = vst [vmem:[#allocation399_spill] sm:$0xff] %v10761_v20  ;;  %15855 = vst [vmem:[#allocation400_spill] sm:$0xff] %v10763_v7  ;;  %v7776_v27 = vunpack.i.h.bf16 %v10521_v26  ;;  %v10784_v20 = vmul.f32 %v7239_v0, %v10667_v18  ;;  %v10787_v43 = vmul.f32 %v7769_v47, %v9995_v51  ;;  %v7775_v4 = vunpack.i.l.bf16 %v10521_v26  ;;  %v10808_v26 = vld [vmem:[%s15075_s1 + $0x1] ss:$0 sm:$0xff] }
 0x16c   : > { %7918 = vperm.xlu0 %7771, %v10733_v1   ;;  %15856 = vst [vmem:[#allocation401_spill] sm:$0xff] %v10769_v24  ;;  %15857 = vst [vmem:[#allocation402_spill] sm:$0xff] %v10772_v55  ;;  %v10793_v55 = vmul.f32 %v7239_v0, %v10703_v14  ;;  %v10796_v50 = vmul.f32 %v7238_v57, %v10667_v18  ;;  %v10798_v12 = vpack.i.bf16 %v6883_v41, %v6882_v38  ;;  %v15865_v24 = vld [vmem:[#allocation45_spill] sm:$0xff] }
 0x16d   : > { %15858 = vst [vmem:[#allocation403_spill] sm:$0xff] %v10779_v37  ;;  %15859 = vst [vmem:[#allocation404_spill] sm:$0xff] %v10784_v20  ;;  %v7244_v16 = vunpack.i.h.bf16 %v10562_v61  ;;  %v10802_v20 = vmul.f32 %v7238_v57, %v10703_v14  ;;  %v7243_v51 = vunpack.i.l.bf16 %v10562_v61  ;;  %v729_v0 = vmul.f32 %v10808_v26, %v7776_v27  ;;  %v10814_v57 = vpop.permute.xlu1 %7267 }
 0x16e   : > { %7416 = vperm.xlu1 %7399, %v10424_v6   ;;  %15860 = vst [vmem:[#allocation405_spill] sm:$0xff] %v10787_v43  ;;  %15861 = vst [vmem:[#allocation406_spill] sm:$0xff] %v10793_v55  ;;  %v728_v47 = vmul.f32 %v10808_v26, %v7775_v4  ;;  %v6886_v38 = vunpack.c.l.bf16 %v6922_v48  ;;  %v6887_v41 = vunpack.c.h.bf16 %v6922_v48  ;;  %v10827_v37 = vpop.permute.xlu0 %7803  ;;  %v7249_v28 = vunpack.i.h.bf16 %v10608_v39 }
 0x16f   : > { %15862 = vst [vmem:[#allocation407_spill] sm:$0xff] %v10796_v50  ;;  %15863 = vst [vmem:[#allocation408_spill] sm:$0xff] %v10798_v12  ;;  %v761_v33 = vadd.f32 %v729_v0, %v15865_v24  ;;  %v10831_v48 = vmul.f32 %v7244_v16, %v10667_v18  ;;  %v10834_v61 = vmul.f32 %v7244_v16, %v10703_v14  ;;  %v15870_v24 = vld [vmem:[#allocation51_spill] sm:$0xff]  ;;  %v7248_v59 = vunpack.i.l.bf16 %v10608_v39 }
 0x170   : > { %7923 = vperm.xlu0 %7771, %v10763_v7   ;;  %15864 = vst [vmem:[#allocation409_spill] sm:$0xff] %v10802_v20  ;;  %v10820_v20 = vld [vmem:[%s15075_s1 + $0x9] ss:$0 sm:$0xff]  ;;  %v10836_v10 = vpack.i.bf16 %v6887_v41, %v6886_v38  ;;  %v10841_v43 = vmul.f32 %v7243_v51, %v10667_v18  ;;  %v7781_v16 = vunpack.i.h.bf16 %v10568_v29  ;;  %v7780_v38 = vunpack.i.l.bf16 %v10568_v29 }
 0x171   : > { %v10823_v50 = vmul.f32 %v10820_v20, %v7776_v27  ;;  %v2057_v55 = vmul.f32 %v10820_v20, %v7775_v4  ;;  %15866 = vst [vmem:[#allocation45_spill] sm:$0xff] %v10831_v48  ;;  %15867 = vst [vmem:[#allocation410_spill] sm:$0xff] %v10834_v61  ;;  %v6923_v27 = vld [vmem:[%s8542_s28 + $0x318] sm:$0xff]   ;;  %v760_v4 = vadd.f32 %v728_v47, %v15870_v24  ;;  %v10866_v47 = vpop.permute.xlu1 %7272  ;;  %v7791_v1 = vunpack.i.h.bf16 %v10671_v9 }
 0x172   : > { %7426 = vperm.xlu1 %7399, %v10472_v2   ;;  %15868 = vst [vmem:[#allocation411_spill] sm:$0xff] %v10836_v10  ;;  %15869 = vst [vmem:[#allocation412_spill] sm:$0xff] %v10841_v43  ;;  %v10845_v0 = vadd.f32 %v9893_v34, %v761_v33  ;;  %v10849_v48 = vmul.f32 %v7243_v51, %v10703_v14  ;;  %v6890_v43 = vunpack.c.l.bf16 %v6923_v27  ;;  %v6891_v13 = vunpack.c.h.bf16 %v6923_v27  ;;  %v10877_v27 = vld [vmem:[%s15075_s1 + $0x21] ss:$0 sm:$0xff]  ;;  %v10883_v41 = vpop.permute.xlu0 %7808 }
 0x173   : > { %v2153_v61 = vrot.slane %v2057_v55, 1  ;;  %v10857_v34 = vmul.f32 %v7249_v28, %v10667_v18  ;;  %v10860_v33 = vmul.f32 %v7249_v28, %v10703_v14  ;;  %v735_v39 = vmul.f32 %v10808_v26, %v7781_v16 }
 0x174   : > { %7928 = vperm.xlu0 %7771, %v10798_v12   ;;  %15871 = vst [vmem:[#allocation51_spill] sm:$0xff] %v10845_v0  ;;  %15872 = vst [vmem:[#allocation413_spill] sm:$0xff] %v10849_v48  ;;  %v10864_v51 = vmul.f32 %v10820_v20, %v7781_v16  ;;  %v10869_v29 = vadd.f32 %v9907_v46, %v760_v4  ;;  %v10872_v55 = vmul.f32 %v7248_v59, %v10667_v18 }
 0x175   : > { %15873 = vst [vmem:[#allocation414_spill] sm:$0xff] %v10857_v34  ;;  %15874 = vst [vmem:[#allocation415_spill] sm:$0xff] %v10860_v33  ;;  %v10880_v28 = vmul.f32 %v10877_v27, %v7781_v16  ;;  %v734_v24 = vmul.f32 %v10808_v26, %v7780_v38  ;;  %v15877_v33 = vld [vmem:[#allocation52_spill] sm:$0xff]  ;;  %v10889_v46 = vmul.f32 %v10820_v20, %v7780_v38  ;;  %v7263_v11 = vunpack.i.l.bf16 %v10766_v60 }
 0x176   : > { %7436 = vperm.xlu1 %7399, %v10511_v5   ;;  %15875 = vst [vmem:[#allocation416_spill] sm:$0xff] %v10869_v29  ;;  %15876 = vst [vmem:[#allocation417_spill] sm:$0xff] %v10872_v55  ;;  %v10886_v48 = vadd.f32 %v735_v39, %v15877_v33  ;;  %v5617_v4 = vmul.f32 %v10877_v27, %v7780_v38  ;;  %v10893_v34 = vpack.i.bf16 %v6891_v13, %v6890_v43  ;;  %v10910_v13 = vld [vmem:[%s15075_s1 + $0x19] ss:$0 sm:$0xff] }
 0x177   : > { %15879 = vst [vmem:[#allocation418_spill] sm:$0xff] %v10889_v46  ;;  %v15881_v55 = vrot.slane %v10823_v50, 1  ;;  %v10901_v29 = vmul.f32 %v7248_v59, %v10703_v14  ;;  %v7254_v33 = vunpack.i.h.bf16 %v10658_v17  ;;  %v7253_v39 = vunpack.i.l.bf16 %v10658_v17 }
 0x178   : > { %7933 = vperm.xlu0 %7771, %v10836_v10   ;;  %15878 = vst [vmem:[#allocation52_spill] sm:$0xff] %v10886_v48  ;;  %15880 = vst [vmem:[#allocation419_spill] sm:$0xff] %v10893_v34  ;;  %v262_v48 = vld [vmem:[%s8542_s28 + $0x1b8] sm:$0x1]  ;;  %v10913_v43 = vmul.f32 %v10910_v13, %v7781_v16  ;;  %v7786_v59 = vunpack.i.h.bf16 %v10622_v35  ;;  %v7785_v10 = vunpack.i.l.bf16 %v10622_v35  ;;  %v5717_v7 = vrot.slane %v5617_v4, 1  ;;  %v15891_v4 = vld [vmem:[#allocation62_spill] sm:$0xff] }
 0x179   : > { %v10898_v0 = vsel %vm1843_vm0, %v2153_v61, %v15881_v55  ;;  %15883 = vst [vmem:[#allocation421_spill] sm:$0xff] %v10901_v29  ;;  %v10916_v61 = vmul.f32 %v10910_v13, %v7780_v38  ;;  %v15886_v55 = vld [vmem:[#allocation58_spill] sm:$0xff]  ;;  %v10928_v38 = vpop.permute.xlu1 %7277  ;;  %v7796_v3 = vunpack.i.h.bf16 %v10727_v58 }
 0x17a   : > { %7446 = vperm.xlu1 %7399, %v10537_v45   ;;  %15882 = vst [vmem:[#allocation420_spill] sm:$0xff] %v10898_v0  ;;  %15884 = vst [vmem:[#allocation422_spill] sm:$0xff] %v10913_v43  ;;  %v10922_v29 = vadd.f32 %v734_v24, %v15886_v55  ;;  %v265_v0 = vld [vmem:[%s8542_s28 + $0x1c4] sm:$0x1]  ;;  %v739_v16 = vmul.f32 %v10808_v26, %v7786_v59  ;;  %v3920_v43 = vunpack.c.l.bf16 %v262_v48  ;;  %v10941_v55 = vpop.permute.xlu0 %7813 }
 0x17b   : > { %15885 = vst [vmem:[#allocation423_spill] sm:$0xff] %v10916_v61  ;;  %v10931_v61 = vmul.f32 %v7254_v33, %v10667_v18  ;;  %v10937_v24 = vmul.f32 %v10877_v27, %v7786_v59  ;;  %v5623_v35 = vmul.f32 %v10877_v27, %v7785_v10  ;;  %v10947_v48 = vmul.f32 %v10820_v20, %v7786_v59 }
 0x17c   : > { %7938 = vperm.xlu0 %7771, %v10893_v34   ;;  %15887 = vst [vmem:[#allocation58_spill] sm:$0xff] %v10922_v29  ;;  %v10934_v34 = vmul.f32 %v7254_v33, %v10703_v14  ;;  %v10944_v12 = vadd.f32 %v739_v16, %v15891_v4  ;;  %v738_v17 = vmul.f32 %v10808_v26, %v7785_v10  ;;  %v15897_v16 = vrot.slane %v10880_v28, 1 }
 0x17d   : > { %15888 = vst [vmem:[#allocation424_spill] sm:$0xff] %v10931_v61  ;;  %15890 = vst [vmem:[#allocation426_spill] sm:$0xff] %v10937_v24  ;;  %v3921_v61 = vunpack.c.l.bf16 %v265_v0  ;;  %v10951_v33 = vmul.f32 %v7253_v39, %v10667_v18  ;;  %v10957_v46 = vmul.f32 %v10820_v20, %v7785_v10  ;;  %v5727_v29 = vrot.slane %v5623_v35, 1 }
 0x17e   : > { %15889 = vst [vmem:[#allocation425_spill] sm:$0xff] %v10934_v34  ;;  %7456 = vperm.xlu1 %7399, %v10559_v31   ;;  %15892 = vst [vmem:[#allocation62_spill] sm:$0xff] %v10944_v12  ;;  %v10954_v34 = vmul.f32 %v7253_v39, %v10703_v14  ;;  %v10962_v4 = vsel %vm1843_vm0, %v5717_v7, %v15897_v16  ;;  %v7259_v0 = vunpack.i.h.bf16 %v10717_v22  ;;  %v15296_v39 = vrot.slane %v10937_v24, 1  ;;  %v10983_v16 = vpop.permute.xlu1 %7282  ;;  %v10997_v35 = vpop.permute.xlu0 %7818  ;;  %v15952_v24 = vld [vmem:[#allocation44_spill] sm:$0xff] }
 0x17f   : > { %15893 = vst [vmem:[#allocation427_spill] sm:$0xff] %v10947_v48  ;;  %15894 = vst [vmem:[#allocation428_spill] sm:$0xff] %v10951_v33  ;;  %v10964_v12 = vpack.i.bf16 %v3921_v61, %v3920_v43  ;;  %v10969_v33 = vmul.f32 %v10910_v13, %v7786_v59  ;;  %v10975_v36 = vadd.f32 %v738_v17, %v15901_v63  ;;  %v280_v61 = vld [vmem:[%s8542_s28 + $0x200] sm:$0x1]  ;;  %v7258_v63 = vunpack.i.l.bf16 %v10717_v22  ;;  %v283_v17 = vld [vmem:[%s8542_s28 + $0x20c] sm:$0x1] }
 0x180   : > { %15895 = vst [vmem:[#allocation429_spill] sm:$0xff] %v10954_v34  ;;  %15896 = vst [vmem:[#allocation430_spill] sm:$0xff] %v10957_v46  ;;  %v7790_v34 = vunpack.i.l.bf16 %v10671_v9  ;;  %v10978_v7 = vmul.f32 %v10910_v13, %v7785_v10  ;;  %v743_v43 = vmul.f32 %v10808_v26, %v7791_v1  ;;  %v10989_v9 = vsel %vm1843_vm0, %v5727_v29, %v15296_v39  ;;  %v292_v46 = vld [vmem:[%s8542_s28 + $0x230] sm:$0x1] }
 0x181   : > { %15898 = vst [vmem:[#allocation431_spill] sm:$0xff] %v10962_v4  ;;  %15899 = vst [vmem:[#allocation432_spill] sm:$0xff] %v10964_v12  ;;  %7949 = vperm.xlu0 %7771, %v10964_v12   ;;  %v10993_v10 = vmul.f32 %v10877_v27, %v7791_v1  ;;  %v11003_v59 = vmul.f32 %v7259_v0, %v10703_v14  ;;  %v15907_v4 = vld [vmem:[#allocation75_spill] sm:$0xff]  ;;  %v11010_v22 = vmul.f32 %v10820_v20, %v7791_v1 }
 0x182   : > { %15900 = vst [vmem:[#allocation433_spill] sm:$0xff] %v10969_v33  ;;  %15902 = vst [vmem:[#allocation70_spill] sm:$0xff] %v10975_v36  ;;  %7466 = vperm.xlu1 %7399, %v10594_v44   ;;  %v11000_v33 = vmul.f32 %v7259_v0, %v10667_v18  ;;  %v5629_v29 = vmul.f32 %v10877_v27, %v7790_v34  ;;  %v742_v39 = vmul.f32 %v10808_v26, %v7790_v34  ;;  %v295_v36 = vld [vmem:[%s8542_s28 + $0x23c] sm:$0x1]  ;;  %v11032_v42 = vpop.permute.xlu1 %7287 }
 0x183   : > { %15903 = vst [vmem:[#allocation434_spill] sm:$0xff] %v10978_v7  ;;  %15904 = vst [vmem:[#allocation435_spill] sm:$0xff] %v10989_v9  ;;  %v11006_v7 = vadd.f32 %v743_v43, %v15907_v4  ;;  %v11014_v9 = vmul.f32 %v10820_v20, %v7790_v34  ;;  %v3926_v12 = vunpack.c.l.bf16 %v280_v61  ;;  %v7264_v4 = vunpack.i.h.bf16 %v10766_v60 }
 0x184   : > { %15905 = vst [vmem:[#allocation436_spill] sm:$0xff] %v11000_v33  ;;  %15906 = vst [vmem:[#allocation437_spill] sm:$0xff] %v11003_v59  ;;  %v5737_v0 = vrot.slane %v5629_v29, 1  ;;  %v3927_v59 = vunpack.c.l.bf16 %v283_v17  ;;  %v11021_v43 = vmul.f32 %v7258_v63, %v10667_v18  ;;  %v7795_v33 = vunpack.i.l.bf16 %v10727_v58 }
 0x185   : > { %15908 = vst [vmem:[#allocation75_spill] sm:$0xff] %v11006_v7  ;;  %15909 = vst [vmem:[#allocation438_spill] sm:$0xff] %v11010_v22  ;;  %v11024_v7 = vmul.f32 %v7258_v63, %v10703_v14  ;;  %v3930_v29 = vunpack.c.l.bf16 %v292_v46  ;;  %v3931_v17 = vunpack.c.l.bf16 %v295_v36  ;;  %v11039_v63 = vmul.f32 %v10910_v13, %v7790_v34 }
 0x186   : > { %15910 = vst [vmem:[#allocation439_spill] sm:$0xff] %v11014_v9  ;;  %15911 = vst [vmem:[#allocation440_spill] sm:$0xff] %v11021_v43  ;;  %7475 = vset.pattern.permute.xlu1 %v15774_v25  ;;  %v11029_v61 = vpack.i.bf16 %v3927_v59, %v3926_v12  ;;  %v11036_v43 = vmul.f32 %v10910_v13, %v7791_v1  ;;  %v747_v60 = vmul.f32 %v10808_v26, %v7796_v3  ;;  %v15916_v12 = vld [vmem:[#allocation87_spill] sm:$0xff] }
 0x187   : > { %15912 = vst [vmem:[#allocation441_spill] sm:$0xff] %v11024_v7  ;;  %15915 = vst [vmem:[#allocation444_spill] sm:$0xff] %v11039_v63  ;;  %v11042_v7 = vpop.permute.xlu0 %7823  ;;  %v11045_v59 = vadd.f32 %v742_v39, %v15916_v12  ;;  %v15918_v36 = vrot.slane %v10993_v10, 1  ;;  %v11055_v1 = vmul.f32 %v7264_v4, %v10667_v18  ;;  %v11058_v34 = vmul.f32 %v7264_v4, %v10703_v14 }
 0x188   : > { %15913 = vst [vmem:[#allocation442_spill] sm:$0xff] %v11029_v61  ;;  %15914 = vst [vmem:[#allocation443_spill] sm:$0xff] %v11036_v43  ;;  %7964 = vperm.xlu0 %7771, %v11029_v61   ;;  %v11061_v43 = vadd.f32 %v747_v60, %v15922_v19  ;;  %v11064_v39 = vmul.f32 %v10877_v27, %v7796_v3  ;;  %v5635_v12 = vmul.f32 %v10877_v27, %v7795_v33 }
 0x189   : > { %15917 = vst [vmem:[#allocation87_spill] sm:$0xff] %v11045_v59  ;;  %v11051_v46 = vsel %vm1843_vm0, %v5737_v0, %v15918_v36  ;;  %15920 = vst [vmem:[#allocation446_spill] sm:$0xff] %v11055_v1  ;;  %v11068_v58 = vmul.f32 %v7263_v11, %v10667_v18  ;;  %v11071_v0 = vmul.f32 %v10820_v20, %v7796_v3  ;;  %v7270_v60 = vunpack.i.h.bf16 %v10814_v57  ;;  %v11090_v1 = vld [vmem:[%s15075_s1 + $0x6] ss:$0 sm:$0xff] }
 0x18a   : > { %15919 = vst [vmem:[#allocation445_spill] sm:$0xff] %v11051_v46  ;;  %15921 = vst [vmem:[#allocation447_spill] sm:$0xff] %v11058_v34  ;;  %v746_v36 = vmul.f32 %v10808_v26, %v7795_v33  ;;  %v11074_v46 = vpack.i.bf16 %v3931_v17, %v3930_v29  ;;  %v11077_v4 = vmul.f32 %v10820_v20, %v7795_v33  ;;  %v5747_v19 = vrot.slane %v5635_v12, 1  ;;  %v11094_v12 = vpop.permute.xlu1 %7292 }
 0x18b   : > { %15923 = vst [vmem:[#allocation89_spill] sm:$0xff] %v11061_v43  ;;  %15924 = vst [vmem:[#allocation448_spill] sm:$0xff] %v11064_v39  ;;  %v11081_v34 = vmul.f32 %v7263_v11, %v10703_v14  ;;  %v11084_v63 = vmul.f32 %v10910_v13, %v7796_v3  ;;  %v7269_v29 = vunpack.i.l.bf16 %v10814_v57  ;;  %v7801_v17 = vunpack.i.h.bf16 %v10775_v52  ;;  %v15931_v11 = vld [vmem:[#allocation23_spill] sm:$0xff]  ;;  %v11101_v3 = vld [vmem:[%s15075_s1 + $0x1e] ss:$0 sm:$0xff] }
 0x18c   : > { %15925 = vst [vmem:[#allocation449_spill] sm:$0xff] %v11068_v58  ;;  %15926 = vst [vmem:[#allocation450_spill] sm:$0xff] %v11071_v0  ;;  %7974 = vperm.xlu0 %7771, %v11074_v46   ;;  %7477 = vperm.xlu1 %7475, %v15931_v11   ;;  %v15932_v57 = vld [vmem:[#allocation96_spill] sm:$0xff]  ;;  %v11111_v43 = vmul.f32 %v10910_v13, %v7795_v33  ;;  %v15935_v59 = vrot.slane %v11064_v39, 1  ;;  %v15948_v39 = vld [vmem:[#allocation111_spill] sm:$0xff]  ;;  %v15953_v48 = vrot.slane %v15952_v24, 1 }
 0x18d   : > { %15927 = vst [vmem:[#allocation451_spill] sm:$0xff] %v11074_v46  ;;  %15928 = vst [vmem:[#allocation452_spill] sm:$0xff] %v11077_v4  ;;  %v11108_v61 = vadd.f32 %v746_v36, %v15932_v57  ;;  %v751_v58 = vmul.f32 %v10808_v26, %v7801_v17  ;;  %v11124_v46 = vmul.f32 %v10877_v27, %v7801_v17  ;;  %v15940_v57 = vld [vmem:[#allocation100_spill] sm:$0xff]  ;;  %v15950_v4 = vld [vmem:[#allocation43_spill] sm:$0xff]  ;;  %v15955_v31 = vrot.slane %v9858_v49, 1 }
 0x18e   : > { %15929 = vst [vmem:[#allocation453_spill] sm:$0xff] %v11081_v34  ;;  %15930 = vst [vmem:[#allocation454_spill] sm:$0xff] %v11084_v63  ;;  %v7800_v63 = vunpack.i.l.bf16 %v10775_v52  ;;  %v11104_v34 = vpop.permute.xlu0 %7828  ;;  %v11118_v25 = vsel %vm1843_vm0, %v5747_v19, %v15935_v59  ;;  %v11121_v52 = vmul.f32 %v7270_v60, %v11090_v1  ;;  %v11127_v36 = vmul.f32 %v7270_v60, %v11101_v3  ;;  %v15944_v60 = vld [vmem:[#allocation5_spill] sm:$0xff] }
 0x18f   : > { %15933 = vst [vmem:[#allocation96_spill] sm:$0xff] %v11108_v61  ;;  %15934 = vst [vmem:[#allocation455_spill] sm:$0xff] %v11111_v43  ;;  %v11130_v33 = vmul.f32 %v7269_v29, %v11090_v1  ;;  %v11133_v43 = vadd.f32 %v751_v58, %v15940_v57  ;;  %v11138_v59 = vmul.f32 %v7269_v29, %v11101_v3  ;;  %v7274_v29 = vunpack.i.l.bf16 %v10866_v47 }
 0x190   : > { %15936 = vst [vmem:[#allocation456_spill] sm:$0xff] %v11118_v25  ;;  %15937 = vst [vmem:[#allocation457_spill] sm:$0xff] %v11121_v52  ;;  %v5641_v9 = vmul.f32 %v10877_v27, %v7800_v63  ;;  %7978 = vset.pattern.permute.xlu0 %v15806_v53  ;;  %v11141_v19 = vmul.f32 %v10820_v20, %v7801_v17  ;;  %v750_v25 = vmul.f32 %v10808_v26, %v7800_v63 }
 0x191   : > { %15938 = vst [vmem:[#allocation458_spill] sm:$0xff] %v11127_v36  ;;  %15939 = vst [vmem:[#allocation459_spill] sm:$0xff] %v11130_v33  ;;  %7482 = vperm.xlu1 %7475, %v10715_v15   ;;  %7980 = vperm.xlu0 %7978, %v15944_v60   ;;  %v7275_v36 = vunpack.i.h.bf16 %v10866_v47  ;;  %v11148_v58 = vmul.f32 %v10910_v13, %v7801_v17  ;;  %v11151_v57 = vmul.f32 %v10820_v20, %v7800_v63 }
 0x192   : > { %15941 = vst [vmem:[#allocation100_spill] sm:$0xff] %v11133_v43  ;;  %15942 = vst [vmem:[#allocation460_spill] sm:$0xff] %v11138_v59  ;;  %v7806_v59 = vunpack.i.h.bf16 %v10827_v37  ;;  %v11155_v43 = vpop.permute.xlu1 %7297  ;;  %v5757_v61 = vrot.slane %v5641_v9, 1  ;;  %v11159_v60 = vpop.permute.xlu0 %7833  ;;  %v11162_v52 = vmul.f32 %v10910_v13, %v7800_v63  ;;  %v1585_v17 = vmul.f32 %v7274_v29, %v11090_v1 }
 0x193   : > { %15943 = vst [vmem:[#allocation461_spill] sm:$0xff] %v11141_v19  ;;  %15945 = vst [vmem:[#allocation5_spill] sm:$0xff] %v11148_v58  ;;  %v1586_v33 = vmul.f32 %v7275_v36, %v11090_v1  ;;  %v7805_v47 = vunpack.i.l.bf16 %v10827_v37  ;;  %v11169_v0 = vadd.f32 %v750_v25, %v15948_v39  ;;  %v15951_v9 = vrot.slane %v15950_v4, 1  ;;  %v15957_v25 = vld [vmem:[#allocation115_spill] sm:$0xff] }
 0x194   : > { %15946 = vst [vmem:[#allocation462_spill] sm:$0xff] %v11151_v57  ;;  %15947 = vst [vmem:[#allocation463_spill] sm:$0xff] %v11162_v52  ;;  %v755_v58 = vmul.f32 %v10808_v26, %v7806_v59  ;;  %v15954_v52 = vld [vmem:[#allocation24_spill] sm:$0xff]  ;;  %v15960_v24 = vrot.slane %v11124_v46, 1  ;;  %v11201_v49 = vmul.f32 %v10877_v27, %v7806_v59  ;;  %v11205_v4 = vmul.f32 %v7274_v29, %v11101_v3 }
 0x195   : > { %15949 = vst [vmem:[#allocation111_spill] sm:$0xff] %v11169_v0  ;;  %v1856_v44 = vsel %vm1843_vm0, %v15953_v48, %v15951_v9  ;;  %v1618_v63 = vadd.f32 %v1586_v33, %v10740_v21  ;;  %7487 = vperm.xlu1 %7475, %v15954_v52   ;;  %v15956_v37 = vmov %v15951_v9  ;;  %v11188_v0 = vmul.f32 %v10820_v20, %v7806_v59 }
 0x196   : > { %v1858_v11 = vsel %vm1843_vm0, %v15956_v37, %v15955_v31  ;;  %v11185_v39 = vadd.f32 %v755_v58, %v15957_v25  ;;  %v11193_v21 = vsel %vm1843_vm0, %v5757_v61, %v15960_v24  ;;  %v11196_v48 = vmul.f32 %v7275_v36, %v11101_v3  ;;  %15963 = vst [vmem:[#allocation464_spill] sm:$0xff] %v11201_v49  ;;  %v11209_v37 = vpop.permute.xlu1 %7302 }
 0x197   : > { %15959 = vst [vmem:[#allocation44_spill] sm:$0xff] %v11188_v0  ;;  %15961 = vst [vmem:[#allocation24_spill] sm:$0xff] %v11193_v21  ;;  %v11198_v33 = vadd.f32 %v1858_v11, %v1618_v63  ;;  %v1617_v31 = vadd.f32 %v1585_v17, %v10737_v54  ;;  %v754_v58 = vmul.f32 %v10808_v26, %v7805_v47  ;;  %v7280_v11 = vunpack.i.h.bf16 %v10928_v38  ;;  %v11216_v63 = vpop.permute.xlu0 %7838 }
 0x198   : > { %15958 = vst [vmem:[#allocation43_spill] sm:$0xff] %v11185_v39  ;;  %15962 = vst [vmem:[#allocation115_spill] sm:$0xff] %v11196_v48  ;;  %v5647_v9 = vmul.f32 %v10877_v27, %v7805_v47  ;;  %v11212_v61 = vmul.f32 %v10820_v20, %v7805_v47  ;;  %v7811_v36 = vunpack.i.h.bf16 %v10883_v41  ;;  %v11220_v29 = vmul.f32 %v10910_v13, %v7806_v59 }
 0x199   : > { %15964 = vst [vmem:[#allocation465_spill] sm:$0xff] %v11205_v4  ;;  %v7810_v17 = vunpack.i.l.bf16 %v10883_v41  ;;  %v11225_v24 = vmul.f32 %v10910_v13, %v7805_v47  ;;  %7985 = vperm.xlu0 %7978, %v15968_v23   ;;  %v7279_v48 = vunpack.i.l.bf16 %v10928_v38  ;;  %v11229_v21 = vadd.f32 %v1856_v44, %v1617_v31  ;;  %v15969_v4 = vld [vmem:[#allocation122_spill] sm:$0xff]  ;;  %v15974_v38 = vld [vmem:[#allocation129_spill] sm:$0xff] }
 0x19a   : > { %15965 = vst [vmem:[#allocation466_spill] sm:$0xff] %v11212_v61  ;;  %15966 = vst [vmem:[#allocation467_spill] sm:$0xff] %v11220_v29  ;;  %v11232_v39 = vadd.f32 %v754_v58, %v15969_v4  ;;  %v5767_v54 = vrot.slane %v5647_v9, 1  ;;  %v759_v59 = vmul.f32 %v10808_v26, %v7811_v36  ;;  %v15971_v29 = vld [vmem:[#allocation25_spill] sm:$0xff]  ;;  %v11238_v25 = vmul.f32 %v7280_v11, %v11090_v1  ;;  %v11254_v9 = vpop.permute.xlu1 %7308 }
 0x19b   : > { %15967 = vst [vmem:[#allocation468_spill] sm:$0xff] %v11225_v24  ;;  %7492 = vperm.xlu1 %7475, %v15971_v29   ;;  %v11241_v47 = vmul.f32 %v10877_v27, %v7811_v36  ;;  %v758_v23 = vmul.f32 %v10808_v26, %v7810_v17  ;;  %v11245_v44 = vmul.f32 %v7280_v11, %v11101_v3  ;;  %v15978_v24 = vld [vmem:[#allocation131_spill] sm:$0xff] }
 0x19c   : > { %15970 = vst [vmem:[#allocation6_spill] sm:$0xff] %v11232_v39  ;;  %15972 = vst [vmem:[#allocation122_spill] sm:$0xff] %v11238_v25  ;;  %v11248_v31 = vadd.f32 %v759_v59, %v15974_v38  ;;  %v11251_v4 = vmul.f32 %v10820_v20, %v7811_v36  ;;  %v5653_v58 = vmul.f32 %v10877_v27, %v7810_v17  ;;  %v15981_v11 = vld [vmem:[#allocation7_spill] sm:$0xff]  ;;  %v7285_v59 = vunpack.i.h.bf16 %v10983_v16  ;;  %v11267_v38 = vpop.permute.xlu0 %7843 }
 0x19d   : > { %15973 = vst [vmem:[#allocation25_spill] sm:$0xff] %v11245_v44  ;;  %v11257_v41 = vmul.f32 %v7279_v48, %v11090_v1  ;;  %v11260_v61 = vadd.f32 %v758_v23, %v15978_v24  ;;  %v11263_v26 = vmul.f32 %v10820_v20, %v7810_v17  ;;  %7990 = vperm.xlu0 %7978, %v15981_v11   ;;  %v15982_v44 = vrot.slane %v11201_v49, 1 }
 0x19e   : > { %15975 = vst [vmem:[#allocation129_spill] sm:$0xff] %v11248_v31  ;;  %15976 = vst [vmem:[#allocation469_spill] sm:$0xff] %v11251_v4  ;;  %v11275_v57 = vmul.f32 %v7279_v48, %v11101_v3  ;;  %v11278_v24 = vmul.f32 %v10910_v13, %v7811_v36  ;;  %v7284_v23 = vunpack.i.l.bf16 %v10983_v16  ;;  %v5777_v11 = vrot.slane %v5653_v58, 1  ;;  %v15989_v16 = vld [vmem:[#allocation26_spill] sm:$0xff] }
 0x19f   : > { %15977 = vst [vmem:[#allocation470_spill] sm:$0xff] %v11257_v41  ;;  %15979 = vst [vmem:[#allocation131_spill] sm:$0xff] %v11260_v61  ;;  %v11272_v31 = vsel %vm1843_vm0, %v5767_v54, %v15982_v44  ;;  %v7816_v39 = vunpack.i.h.bf16 %v10941_v55  ;;  %v11285_v49 = vmul.f32 %v10910_v13, %v7810_v17  ;;  %v7815_v54 = vunpack.i.l.bf16 %v10941_v55  ;;  %7497 = vperm.xlu1 %7475, %v15989_v16   ;;  %v15991_v41 = vld [vmem:[#allocation8_spill] sm:$0xff] }
 0x1a0   : > { %15980 = vst [vmem:[#allocation471_spill] sm:$0xff] %v11263_v26  ;;  %15983 = vst [vmem:[#allocation7_spill] sm:$0xff] %v11272_v31  ;;  %v11290_v44 = vmul.f32 %v7285_v59, %v11090_v1  ;;  %v11293_v36 = vmul.f32 %v7285_v59, %v11101_v3  ;;  %v7290_v58 = vunpack.i.h.bf16 %v11032_v42  ;;  %v11298_v61 = vmul.f32 %v7284_v23, %v11090_v1 }
 0x1a1   : > { %15984 = vst [vmem:[#allocation472_spill] sm:$0xff] %v11275_v57  ;;  %15985 = vst [vmem:[#allocation473_spill] sm:$0xff] %v11278_v24  ;;  %7995 = vperm.xlu0 %7978, %v15991_v41   ;;  %v7289_v13 = vunpack.i.l.bf16 %v11032_v42  ;;  %v15992_v17 = vrot.slane %v11241_v47, 1  ;;  %v11310_v59 = vmul.f32 %v7284_v23, %v11101_v3  ;;  %v7821_v24 = vunpack.i.h.bf16 %v10997_v35  ;;  %v11316_v57 = vpop.permute.xlu0 %7848 }
 0x1a2   : > { %15986 = vst [vmem:[#allocation474_spill] sm:$0xff] %v11285_v49  ;;  %15987 = vst [vmem:[#allocation475_spill] sm:$0xff] %v11290_v44  ;;  %v11319_v41 = vmul.f32 %v7816_v39, %v10703_v14  ;;  %v11322_v42 = vmul.f32 %v7815_v54, %v10667_v18  ;;  %v11325_v31 = vmul.f32 %v7815_v54, %v10703_v14  ;;  %v7825_v49 = vunpack.i.l.bf16 %v11042_v7 }
 0x1a3   : > { %15988 = vst [vmem:[#allocation476_spill] sm:$0xff] %v11293_v36  ;;  %15990 = vst [vmem:[#allocation26_spill] sm:$0xff] %v11298_v61  ;;  %v11307_v48 = vsel %vm1843_vm0, %v5777_v11, %v15992_v17  ;;  %v11313_v36 = vmul.f32 %v7816_v39, %v10667_v18  ;;  %v7820_v11 = vunpack.i.l.bf16 %v10997_v35  ;;  %v11329_v23 = vmul.f32 %v7290_v58, %v11090_v1 }
 0x1a4   : > { %15993 = vst [vmem:[#allocation8_spill] sm:$0xff] %v11307_v48  ;;  %15994 = vst [vmem:[#allocation477_spill] sm:$0xff] %v11310_v59  ;;  %v11332_v17 = vmul.f32 %v7290_v58, %v11101_v3  ;;  %v15999_v59 = vld [vmem:[#allocation27_spill] sm:$0xff]  ;;  %v7295_v48 = vunpack.i.h.bf16 %v11094_v12  ;;  %v7294_v39 = vunpack.i.l.bf16 %v11094_v12  ;;  %v11341_v54 = vmul.f32 %v7289_v13, %v11101_v3 }
 0x1a5   : > { %15995 = vst [vmem:[#allocation478_spill] sm:$0xff] %v11319_v41  ;;  %15996 = vst [vmem:[#allocation479_spill] sm:$0xff] %v11325_v31  ;;  %7502 = vperm.xlu1 %7475, %v15999_v59   ;;  %v11338_v41 = vmul.f32 %v7289_v13, %v11090_v1  ;;  %v16002_v31 = vld [vmem:[#allocation9_spill] sm:$0xff]  ;;  %v11345_v35 = vmul.f32 %v7821_v24, %v10667_v18  ;;  %v11348_v58 = vmul.f32 %v7821_v24, %v10703_v14 }
 0x1a6   : > { %15997 = vst [vmem:[#allocation480_spill] sm:$0xff] %v11329_v23  ;;  %15998 = vst [vmem:[#allocation481_spill] sm:$0xff] %v11332_v17  ;;  %8000 = vperm.xlu0 %7978, %v16002_v31   ;;  %v7826_v17 = vunpack.i.h.bf16 %v11042_v7  ;;  %v11353_v12 = vmul.f32 %v7820_v11, %v10667_v18  ;;  %v11356_v23 = vmul.f32 %v7820_v11, %v10703_v14  ;;  %v7300_v13 = vunpack.i.h.bf16 %v11155_v43  ;;  %v16011_v11 = vld [vmem:[#allocation28_spill] sm:$0xff] }
 0x1a7   : > { %16000 = vst [vmem:[#allocation27_spill] sm:$0xff] %v11338_v41  ;;  %16001 = vst [vmem:[#allocation482_spill] sm:$0xff] %v11341_v54  ;;  %v7299_v31 = vunpack.i.l.bf16 %v11155_v43  ;;  %v11363_v26 = vmul.f32 %v7295_v48, %v11090_v1  ;;  %v11366_v24 = vmul.f32 %v7295_v48, %v11101_v3  ;;  %v11369_v7 = vmul.f32 %v7294_v39, %v11090_v1  ;;  %v16012_v41 = vld [vmem:[#allocation10_spill] sm:$0xff] }
 0x1a8   : > { %v11302_v55 = vpop.permute.xlu1 %7318  ;;  %16003 = vst [vmem:[#allocation9_spill] sm:$0xff] %v11345_v35  ;;  %16004 = vst [vmem:[#allocation483_spill] sm:$0xff] %v11348_v58  ;;  %v11372_v58 = vmul.f32 %v7294_v39, %v11101_v3  ;;  %v7831_v43 = vunpack.i.h.bf16 %v11104_v34  ;;  %v7830_v61 = vunpack.i.l.bf16 %v11104_v34  ;;  %v11384_v48 = vmul.f32 %v7826_v17, %v10703_v14 }
 0x1a9   : > { %16005 = vst [vmem:[#allocation484_spill] sm:$0xff] %v11353_v12  ;;  %16006 = vst [vmem:[#allocation485_spill] sm:$0xff] %v11356_v23  ;;  %7507 = vperm.xlu1 %7475, %v16011_v11   ;;  %v7305_v39 = vunpack.i.h.bf16 %v11209_v37  ;;  %v7304_v34 = vunpack.i.l.bf16 %v11209_v37  ;;  %v11401_v44 = vmul.f32 %v7299_v31, %v11090_v1 }
 0x1aa   : > { %16007 = vst [vmem:[#allocation486_spill] sm:$0xff] %v11363_v26  ;;  %16008 = vst [vmem:[#allocation487_spill] sm:$0xff] %v11366_v24  ;;  %8005 = vperm.xlu0 %7978, %v16012_v41   ;;  %v11381_v26 = vmul.f32 %v7826_v17, %v10667_v18  ;;  %v11387_v24 = vmul.f32 %v7825_v49, %v10667_v18  ;;  %v11394_v41 = vmul.f32 %v7300_v13, %v11090_v1 }
 0x1ab   : > { %16009 = vst [vmem:[#allocation488_spill] sm:$0xff] %v11369_v7  ;;  %16010 = vst [vmem:[#allocation489_spill] sm:$0xff] %v11372_v58  ;;  %v11391_v58 = vmul.f32 %v7825_v49, %v10703_v14  ;;  %v11397_v7 = vmul.f32 %v7300_v13, %v11101_v3  ;;  %v11404_v17 = vmul.f32 %v7299_v31, %v11101_v3  ;;  %v7835_v49 = vunpack.i.l.bf16 %v11159_v60  ;;  %v16026_v31 = vld [vmem:[#allocation11_spill] sm:$0xff] }
 0x1ac   : > { %16013 = vst [vmem:[#allocation28_spill] sm:$0xff] %v11381_v26  ;;  %16014 = vst [vmem:[#allocation10_spill] sm:$0xff] %v11384_v48  ;;  %v16021_v48 = vld [vmem:[#allocation29_spill] sm:$0xff]  ;;  %v11413_v13 = vmul.f32 %v7831_v43, %v10703_v14  ;;  %v11416_v37 = vmul.f32 %v7830_v61, %v10667_v18 }
 0x1ad   : > { %16015 = vst [vmem:[#allocation490_spill] sm:$0xff] %v11387_v24  ;;  %16016 = vst [vmem:[#allocation491_spill] sm:$0xff] %v11391_v58  ;;  %7512 = vperm.xlu1 %7475, %v16021_v48   ;;  %v7836_v24 = vunpack.i.h.bf16 %v11159_v60  ;;  %v11410_v58 = vmul.f32 %v7831_v43, %v10667_v18  ;;  %v11428_v60 = vmul.f32 %v7305_v39, %v11101_v3 }
 0x1ae   : > { %v11360_v54 = vpop.permute.xlu1 %7323  ;;  %v11375_v23 = vpop.permute.xlu0 %7853  ;;  %16017 = vst [vmem:[#allocation492_spill] sm:$0xff] %v11394_v41  ;;  %16018 = vst [vmem:[#allocation493_spill] sm:$0xff] %v11397_v7  ;;  %v11419_v7 = vmul.f32 %v7830_v61, %v10703_v14  ;;  %8010 = vperm.xlu0 %7978, %v16026_v31   ;;  %v11425_v41 = vmul.f32 %v7305_v39, %v11090_v1  ;;  %v11433_v43 = vmul.f32 %v7304_v34, %v11090_v1 }
 0x1af   : > { %16019 = vst [vmem:[#allocation494_spill] sm:$0xff] %v11401_v44  ;;  %16020 = vst [vmem:[#allocation495_spill] sm:$0xff] %v11404_v17  ;;  %v7311_v61 = vunpack.i.h.bf16 %v11254_v9  ;;  %v11439_v31 = vmul.f32 %v7304_v34, %v11101_v3  ;;  %v11445_v39 = vmul.f32 %v7836_v24, %v10703_v14  ;;  %v7840_v1 = vunpack.i.l.bf16 %v11216_v63 }
 0x1b0   : > { %16022 = vst [vmem:[#allocation29_spill] sm:$0xff] %v11410_v58  ;;  %16023 = vst [vmem:[#allocation496_spill] sm:$0xff] %v11413_v13  ;;  %v7841_v13 = vunpack.i.h.bf16 %v11216_v63  ;;  %v11442_v58 = vmul.f32 %v7836_v24, %v10667_v18  ;;  %v7846_v63 = vunpack.i.h.bf16 %v11267_v38  ;;  %v7326_v35 = vunpack.i.h.bf16 %v11360_v54 }
 0x1b1   : > { %16024 = vst [vmem:[#allocation497_spill] sm:$0xff] %v11416_v37  ;;  %16025 = vst [vmem:[#allocation498_spill] sm:$0xff] %v11419_v7  ;;  %v7310_v7 = vunpack.i.l.bf16 %v11254_v9  ;;  %v11459_v9 = vld [vmem:[%s15075_s1 + $0x20] ss:$0 sm:$0xff]  ;;  %v11483_v26 = vmul.f32 %v7840_v1, %v10667_v18  ;;  %v11486_v25 = vmul.f32 %v7840_v1, %v10703_v14 }
 0x1b2   : > { %16027 = vst [vmem:[#allocation11_spill] sm:$0xff] %v11425_v41  ;;  %16028 = vst [vmem:[#allocation499_spill] sm:$0xff] %v11428_v60  ;;  %v16033_v60 = vld [vmem:[#allocation30_spill] sm:$0xff]  ;;  %v16034_v41 = vld [vmem:[#allocation12_spill] sm:$0xff]  ;;  %v5364_v24 = vmul.f32 %v11459_v9, %v7311_v61  ;;  %v11475_v37 = vmul.f32 %v7841_v13, %v10667_v18  ;;  %v11498_v1 = vmul.f32 %v7846_v63, %v10667_v18 }
 0x1b3   : > { %v11422_v17 = vpop.permute.xlu1 %7333  ;;  %16029 = vst [vmem:[#allocation500_spill] sm:$0xff] %v11433_v43  ;;  %16030 = vst [vmem:[#allocation501_spill] sm:$0xff] %v11439_v31  ;;  %7517 = vperm.xlu1 %7475, %v16033_v60   ;;  %8015 = vperm.xlu0 %7978, %v16034_v41   ;;  %v11453_v43 = vld [vmem:[%s15075_s1 + $0x8] ss:$0 sm:$0xff]  ;;  %v7321_v41 = vunpack.i.h.bf16 %v11302_v55  ;;  %v11469_v31 = vmul.f32 %v7835_v49, %v10667_v18 }
 0x1b4   : > { %16031 = vst [vmem:[#allocation502_spill] sm:$0xff] %v11442_v58  ;;  %16032 = vst [vmem:[#allocation503_spill] sm:$0xff] %v11445_v39  ;;  %v1752_v3 = vmul.f32 %v11453_v43, %v7311_v61  ;;  %v11463_v34 = vmul.f32 %v11453_v43, %v7310_v7  ;;  %v7320_v39 = vunpack.i.l.bf16 %v11302_v55  ;;  %v11472_v58 = vmul.f32 %v7835_v49, %v10703_v14 }
 0x1b5   : > { %v11430_v44 = vpop.permute.xlu0 %7858  ;;  %16036 = vst [vmem:[#allocation12_spill] sm:$0xff] %v11469_v31  ;;  %16038 = vst [vmem:[#allocation505_spill] sm:$0xff] %v11475_v37  ;;  %v11478_v61 = vmul.f32 %v7841_v13, %v10703_v14  ;;  %v7845_v55 = vunpack.i.l.bf16 %v11267_v38  ;;  %v5461_v31 = vrot.slane %v5364_v24, 1  ;;  %v16042_v37 = vld [vmem:[#allocation13_spill] sm:$0xff]  ;;  %v5376_v13 = vmul.f32 %v11459_v9, %v7321_v41 }
 0x1b6   : > { %16035 = vst [vmem:[#allocation30_spill] sm:$0xff] %v11463_v34  ;;  %16037 = vst [vmem:[#allocation504_spill] sm:$0xff] %v11472_v58  ;;  %v1852_v58 = vrot.slane %v1752_v3, 1  ;;  %v11502_v38 = vmul.f32 %v11453_v43, %v7321_v41  ;;  %v5373_v24 = vmul.f32 %v11459_v9, %v7320_v39  ;;  %v11511_v34 = vmul.f32 %v7846_v63, %v10703_v14  ;;  %v16052_v63 = vld [vmem:[#allocation60_spill] sm:$0xff] }
 0x1b7   : > { %16039 = vst [vmem:[#allocation506_spill] sm:$0xff] %v11478_v61  ;;  %16040 = vst [vmem:[#allocation507_spill] sm:$0xff] %v11483_v26  ;;  %7521 = vset.pattern.permute.xlu1 %v15806_v53  ;;  %8020 = vperm.xlu0 %7978, %v16042_v37   ;;  %v7851_v61 = vunpack.i.h.bf16 %v11316_v57  ;;  %v5481_v3 = vrot.slane %v5376_v13, 1  ;;  %v7850_v37 = vunpack.i.l.bf16 %v11316_v57  ;;  %v7325_v26 = vunpack.i.l.bf16 %v11360_v54  ;;  %v16048_v13 = vld [vmem:[#allocation14_spill] sm:$0xff] }
 0x1b8   : > { %16041 = vst [vmem:[#allocation508_spill] sm:$0xff] %v11486_v25  ;;  %7523 = vperm.xlu1 %7521, %v10381_v40   ;;  %16043 = vst [vmem:[#allocation13_spill] sm:$0xff] %v11498_v1  ;;  %v1761_v25 = vmul.f32 %v11453_v43, %v7320_v39  ;;  %v11514_v1 = vmul.f32 %v7845_v55, %v10667_v18  ;;  %v11517_v41 = vmul.f32 %v7845_v55, %v10703_v14 }
 0x1b9   : > { %v11480_v7 = vpop.permute.xlu1 %7343  ;;  %v11490_v49 = vpop.permute.xlu0 %7863  ;;  %16044 = vst [vmem:[#allocation509_spill] sm:$0xff] %v11502_v38  ;;  %v2062_v40 = vmul.f32 %v10820_v20, %v7851_v61  ;;  %v5613_v12 = vmul.f32 %v10877_v27, %v7851_v61  ;;  %16045 = vst [vmem:[#allocation510_spill] sm:$0xff] %v11511_v34  ;;  %v16049_v61 = vld [vmem:[#allocation57_spill] sm:$0xff]  ;;  %v16053_v34 = vrot.slane %v16052_v63, 1  ;;  %v2059_v14 = vmul.f32 %v10820_v20, %v7850_v37 }
 0x1ba   : > { %16046 = vst [vmem:[#allocation511_spill] sm:$0xff] %v11514_v1  ;;  %16047 = vst [vmem:[#allocation512_spill] sm:$0xff] %v11517_v41  ;;  %v1867_v39 = vrot.slane %v1761_v25, 1  ;;  %v16050_v53 = vrot.slane %v16049_v61, 1  ;;  %v5382_v25 = vmul.f32 %v11459_v9, %v7326_v35  ;;  %v11551_v1 = vmul.f32 %v11453_v43, %v7326_v35 }
 0x1bb   : > { %8025 = vperm.xlu0 %7978, %v16048_v13   ;;  %v11531_v18 = vsel %vm1843_vm0, %v16053_v34, %v5461_v31  ;;  %v16055_v13 = vld [vmem:[#allocation66_spill] sm:$0xff]  ;;  %v2161_v63 = vrot.slane %v2062_v40, 1  ;;  %v5379_v31 = vmul.f32 %v11459_v9, %v7325_v26  ;;  %v16058_v34 = vld [vmem:[#allocation68_spill] sm:$0xff] }
 0x1bc   : > { %7528 = vperm.xlu1 %7521, %v10715_v15   ;;  %v11526_v54 = vsel %vm1843_vm0, %v16050_v53, %v1852_v58  ;;  %16054 = vst [vmem:[#allocation57_spill] sm:$0xff] %v11531_v18  ;;  %v16056_v41 = vrot.slane %v16055_v13, 1  ;;  %v5476_v53 = vrot.slane %v5373_v24, 1  ;;  %v1767_v58 = vmul.f32 %v11453_v43, %v7325_v26 }
 0x1bd   : > { %16051 = vst [vmem:[#allocation14_spill] sm:$0xff] %v11526_v54  ;;  %v5710_v54 = vrot.slane %v5613_v12, 1  ;;  %v16059_v37 = vrot.slane %v16058_v34, 1  ;;  %v7856_v13 = vunpack.i.h.bf16 %v11375_v23  ;;  %v2156_v15 = vrot.slane %v2059_v14, 1 }
 0x1be   : > { %v11541_v61 = vsel %vm1843_vm0, %v16056_v41, %v5481_v3  ;;  %v5491_v3 = vrot.slane %v5382_v25, 1  ;;  %v16061_v41 = vld [vmem:[#allocation15_spill] sm:$0xff]  ;;  %v7855_v24 = vunpack.i.l.bf16 %v11375_v23  ;;  %v7336_v12 = vunpack.i.h.bf16 %v11422_v17 }
 0x1bf   : > { %v11521_v57 = vpop.permute.xlu1 %7349  ;;  %v11535_v55 = vpop.permute.xlu0 %7868  ;;  %16057 = vst [vmem:[#allocation60_spill] sm:$0xff] %v11541_v61  ;;  %v11548_v18 = vsel %vm1843_vm0, %v16059_v37, %v1867_v39  ;;  %8030 = vperm.xlu0 %7978, %v16061_v41   ;;  %v1877_v40 = vrot.slane %v1767_v58, 1  ;;  %v5486_v26 = vrot.slane %v5379_v31, 1  ;;  %v2080_v39 = vmul.f32 %v10820_v20, %v7856_v13  ;;  %v16062_v37 = vld [vmem:[#allocation72_spill] sm:$0xff] }
 0x1c0   : > { %16060 = vst [vmem:[#allocation66_spill] sm:$0xff] %v11548_v18  ;;  %7533 = vperm.xlu1 %7521, %v10424_v6   ;;  %v7335_v34 = vunpack.i.l.bf16 %v11422_v17  ;;  %v16063_v61 = vrot.slane %v16062_v37, 1  ;;  %v5631_v25 = vmul.f32 %v10877_v27, %v7856_v13  ;;  %v2077_v23 = vmul.f32 %v10820_v20, %v7855_v24  ;;  %v16070_v18 = vld [vmem:[#allocation76_spill] sm:$0xff] }
 0x1c1   : > { %v5628_v58 = vmul.f32 %v10877_v27, %v7855_v24  ;;  %v16065_v6 = vrot.slane %v9410_v56, 1  ;;  %v16067_v17 = vrot.slane %v9413_v30, 1  ;;  %v16069_v13 = vrot.slane %v10823_v50, 1 }
 0x1c2   : > { %v11565_v14 = vsel %vm1843_vm0, %v16063_v61, %v5476_v53  ;;  %v5394_v61 = vmul.f32 %v11459_v9, %v7336_v12  ;;  %v1779_v53 = vmul.f32 %v11453_v43, %v7335_v34  ;;  %v16071_v38 = vrot.slane %v16070_v18, 1 }
 0x1c3   : > { %v11560_v35 = vpop.permute.xlu1 %7354  ;;  %16064 = vst [vmem:[#allocation68_spill] sm:$0xff] %v11565_v14  ;;  %v11570_v31 = vpop.permute.xlu0 %7873  ;;  %v11575_v41 = vsel %vm1843_vm0, %v16065_v6, %v2161_v63  ;;  %v11580_v37 = vsel %vm1843_vm0, %v16067_v17, %v5710_v54  ;;  %v11587_v24 = vsel %vm1843_vm0, %v16069_v13, %v2156_v15  ;;  %v5391_v30 = vmul.f32 %v11459_v9, %v7335_v34  ;;  %v16073_v54 = vld [vmem:[#allocation83_spill] sm:$0xff] }
 0x1c4   : > { %16066 = vst [vmem:[#allocation15_spill] sm:$0xff] %v11575_v41  ;;  %16068 = vst [vmem:[#allocation72_spill] sm:$0xff] %v11580_v37  ;;  %v11593_v63 = vsel %vm1843_vm0, %v16071_v38, %v5491_v3  ;;  %v16074_v6 = vrot.slane %v16073_v54, 1  ;;  %v16076_v37 = vld [vmem:[#allocation86_spill] sm:$0xff]  ;;  %v2191_v15 = vrot.slane %v2080_v39, 1  ;;  %v11607_v13 = vmul.f32 %v11453_v43, %v7336_v12  ;;  %7538 = vperm.xlu1 %7521, %v10472_v2  }
 0x1c5   : > { %16072 = vst [vmem:[#allocation76_spill] sm:$0xff] %v11593_v63  ;;  %v16077_v41 = vrot.slane %v16076_v37, 1  ;;  %v5740_v18 = vrot.slane %v5631_v25, 1  ;;  %v2186_v14 = vrot.slane %v2077_v23, 1  ;;  %v5735_v38 = vrot.slane %v5628_v58, 1 }
 0x1c6   : > { %v11599_v17 = vsel %vm1843_vm0, %v16074_v6, %v1877_v40  ;;  %16079 = vst [vmem:[#allocation513_spill] sm:$0xff] %v11607_v13  ;;  %v5511_v3 = vrot.slane %v5394_v61, 1  ;;  %v1897_v63 = vrot.slane %v1779_v53, 1  ;;  %v7861_v34 = vunpack.i.h.bf16 %v11430_v44  ;;  %v16080_v6 = vld [vmem:[#allocation16_spill] sm:$0xff] }
 0x1c7   : > { %16075 = vst [vmem:[#allocation83_spill] sm:$0xff] %v11599_v17  ;;  %v11604_v50 = vsel %vm1843_vm0, %v16077_v41, %v5486_v26  ;;  %v11610_v54 = vpop.permute.xlu1 %7359  ;;  %v5506_v40 = vrot.slane %v5391_v30, 1  ;;  %8035 = vperm.xlu0 %7978, %v16080_v6   ;;  %v7860_v37 = vunpack.i.l.bf16 %v11430_v44  ;;  %v7346_v26 = vunpack.i.h.bf16 %v11480_v7  ;;  %v16171_v17 = vld [vmem:[#allocation376_spill] sm:$0xff] }
 0x1c8   : > { %16078 = vst [vmem:[#allocation86_spill] sm:$0xff] %v11604_v50  ;;  %v7345_v39 = vunpack.i.l.bf16 %v11480_v7  ;;  %v2092_v25 = vmul.f32 %v10820_v20, %v7861_v34  ;;  %v5643_v23 = vmul.f32 %v10877_v27, %v7861_v34  ;;  %v16082_v53 = vrot.slane %v11010_v22, 1  ;;  %7543 = vperm.xlu1 %7521, %v10511_v5  }
 0x1c9   : > { %v2089_v41 = vmul.f32 %v10820_v20, %v7860_v37  ;;  %v5640_v61 = vmul.f32 %v10877_v27, %v7860_v37  ;;  %v11625_v44 = vmul.f32 %v11453_v43, %v7346_v26  ;;  %v16084_v2 = vrot.slane %v10993_v10, 1 }
 0x1ca   : > { %v11630_v7 = vsel %vm1843_vm0, %v16082_v53, %v2191_v15  ;;  %v5406_v34 = vmul.f32 %v11459_v9, %v7346_v26  ;;  %v1791_v6 = vmul.f32 %v11453_v43, %v7345_v39  ;;  %v16086_v58 = vrot.slane %v9569_v62, 1  ;;  %v16090_v15 = vld [vmem:[#allocation102_spill] sm:$0xff]  ;;  %v16093_v26 = vld [vmem:[#allocation17_spill] sm:$0xff] }
 0x1cb   : > { %v11616_v12 = vpop.permute.xlu0 %7878  ;;  %16081 = vst [vmem:[#allocation16_spill] sm:$0xff] %v11625_v44  ;;  %16083 = vst [vmem:[#allocation514_spill] sm:$0xff] %v11630_v7  ;;  %v11635_v30 = vsel %vm1843_vm0, %v16084_v2, %v5740_v18  ;;  %v16088_v50 = vrot.slane %v9579_v32, 1  ;;  %v16091_v53 = vrot.slane %v16090_v15, 1  ;;  %v5403_v18 = vmul.f32 %v11459_v9, %v7345_v39  ;;  %8040 = vperm.xlu0 %7978, %v16093_v26   ;;  %v16094_v43 = vld [vmem:[#allocation109_spill] sm:$0xff]  ;;  %v16104_v39 = vld [vmem:[#allocation18_spill] sm:$0xff] }
 0x1cc   : > { %16085 = vst [vmem:[#allocation515_spill] sm:$0xff] %v11635_v30  ;;  %v11642_v37 = vsel %vm1843_vm0, %v16086_v58, %v2186_v14  ;;  %v16095_v2 = vrot.slane %v16094_v43, 1  ;;  %v16097_v14 = vld [vmem:[#allocation112_spill] sm:$0xff]  ;;  %v2206_v15 = vrot.slane %v2089_v41, 1  ;;  %v5755_v9 = vrot.slane %v5640_v61, 1  ;;  %7548 = vperm.xlu1 %7521, %v10537_v45  }
 0x1cd   : > { %16087 = vst [vmem:[#allocation516_spill] sm:$0xff] %v11642_v37  ;;  %v11647_v13 = vsel %vm1843_vm0, %v16088_v50, %v5735_v38  ;;  %v11652_v10 = vsel %vm1843_vm0, %v16091_v53, %v5511_v3  ;;  %v16098_v58 = vrot.slane %v16097_v14, 1  ;;  %v2211_v50 = vrot.slane %v2092_v25, 1  ;;  %v11667_v3 = vpop.permute.xlu1 %7364 }
 0x1ce   : > { %16089 = vst [vmem:[#allocation517_spill] sm:$0xff] %v11647_v13  ;;  %16092 = vst [vmem:[#allocation102_spill] sm:$0xff] %v11652_v10  ;;  %v11659_v30 = vsel %vm1843_vm0, %v16095_v2, %v1897_v63  ;;  %v5760_v38 = vrot.slane %v5643_v23, 1  ;;  %v7866_v53 = vunpack.i.h.bf16 %v11490_v49  ;;  %v5531_v63 = vrot.slane %v5406_v34, 1  ;;  %v16107_v13 = vld [vmem:[#allocation205_spill] sm:$0xff] }
 0x1cf   : > { %16096 = vst [vmem:[#allocation17_spill] sm:$0xff] %v11659_v30  ;;  %v11664_v32 = vsel %vm1843_vm0, %v16098_v58, %v5506_v40  ;;  %v11671_v26 = vpop.permute.xlu0 %7883  ;;  %v1917_v43 = vrot.slane %v1791_v6, 1  ;;  %v7865_v2 = vunpack.i.l.bf16 %v11490_v49  ;;  %v7352_v40 = vunpack.i.h.bf16 %v11521_v57  ;;  %8045 = vperm.xlu0 %7978, %v16104_v39   ;;  %v16148_v30 = vld [vmem:[#allocation166_spill] sm:$0xff] }
 0x1d0   : > { %16099 = vst [vmem:[#allocation109_spill] sm:$0xff] %v11664_v32  ;;  %v5526_v25 = vrot.slane %v5403_v18, 1  ;;  %v2104_v23 = vmul.f32 %v10820_v20, %v7866_v53  ;;  %v7351_v5 = vunpack.i.l.bf16 %v11521_v57  ;;  %v5655_v41 = vmul.f32 %v10877_v27, %v7866_v53 }
 0x1d1   : > { %v2101_v61 = vmul.f32 %v10820_v20, %v7865_v2  ;;  %v5652_v14 = vmul.f32 %v10877_v27, %v7865_v2  ;;  %v2068_v58 = vmul.f32 %v10820_v20, %v7352_v40  ;;  %v16100_v34 = vrot.slane %v11141_v19, 1  ;;  %v11714_v39 = vpop.permute.xlu1 %7370 }
 0x1d2   : > { %v16102_v49 = vrot.slane %v11124_v46, 1  ;;  %v5619_v57 = vmul.f32 %v10877_v27, %v7352_v40  ;;  %v2065_v53 = vmul.f32 %v10820_v20, %v7351_v5  ;;  %v16105_v2 = vrot.slane %v9693_v8, 1  ;;  %v16110_v46 = vld [vmem:[#allocation133_spill] sm:$0xff]  ;;  %v16146_v8 = vld [vmem:[#allocation367_spill] sm:$0xff] }
 0x1d3   : > { %v11684_v6 = vsel %vm1843_vm0, %v16100_v34, %v2211_v50  ;;  %v16108_v10 = vrot.slane %v16107_v13, 1  ;;  %v16111_v34 = vrot.slane %v16110_v46, 1  ;;  %v16113_v40 = vld [vmem:[#allocation137_spill] sm:$0xff]  ;;  %v2231_v13 = vrot.slane %v2104_v23, 1  ;;  %v11722_v46 = vpop.permute.xlu0 %7888 }
 0x1d4   : > { %16101 = vst [vmem:[#allocation112_spill] sm:$0xff] %v11684_v6  ;;  %v11689_v18 = vsel %vm1843_vm0, %v16102_v49, %v5760_v38  ;;  %v11697_v32 = vsel %vm1843_vm0, %v16105_v2, %v2206_v15  ;;  %v16114_v49 = vrot.slane %v16113_v40, 1  ;;  %v2171_v40 = vrot.slane %v2068_v58, 1 }
 0x1d5   : > { %16103 = vst [vmem:[#allocation518_spill] sm:$0xff] %v11689_v18  ;;  %16106 = vst [vmem:[#allocation18_spill] sm:$0xff] %v11697_v32  ;;  %v11702_v50 = vsel %vm1843_vm0, %v16108_v10, %v5755_v9  ;;  %v11707_v38 = vsel %vm1843_vm0, %v16111_v34, %v5531_v63  ;;  %v16116_v18 = vld [vmem:[#allocation140_spill] sm:$0xff]  ;;  %v2166_v10 = vrot.slane %v2065_v53, 1  ;;  %v5616_v9 = vmul.f32 %v10877_v27, %v7351_v5  ;;  %v11748_v53 = vld [vmem:[%s15075_s1 + $0xd] ss:$0 sm:$0xff]  ;;  %v11761_v45 = vpop.permute.xlu1 %7375 }
 0x1d6   : > { %16109 = vst [vmem:[#allocation205_spill] sm:$0xff] %v11702_v50  ;;  %16112 = vst [vmem:[#allocation133_spill] sm:$0xff] %v11707_v38  ;;  %v11712_v20 = vsel %vm1843_vm0, %v16114_v49, %v1917_v43  ;;  %v16117_v15 = vrot.slane %v16116_v18, 1  ;;  %v5780_v63 = vrot.slane %v5655_v41, 1  ;;  %v2226_v34 = vrot.slane %v2101_v61, 1  ;;  %v16119_v43 = vld [vmem:[#allocation156_spill] sm:$0xff] }
 0x1d7   : > { %16115 = vst [vmem:[#allocation137_spill] sm:$0xff] %v11712_v20  ;;  %v5775_v50 = vrot.slane %v5652_v14, 1  ;;  %v5720_v38 = vrot.slane %v5619_v57, 1  ;;  %v16120_v49 = vrot.slane %v16119_v43, 1  ;;  %v7871_v23 = vunpack.i.h.bf16 %v11535_v55 }
 0x1d8   : > { %v11719_v2 = vsel %vm1843_vm0, %v16117_v15, %v5526_v25  ;;  %v11730_v25 = vld [vmem:[%s15075_s1 + $0x15] ss:$0 sm:$0xff]  ;;  %v7870_v41 = vunpack.i.l.bf16 %v11535_v55  ;;  %v7357_v61 = vunpack.i.h.bf16 %v11560_v35  ;;  %v7356_v14 = vunpack.i.l.bf16 %v11560_v35  ;;  %v11757_v35 = vld [vmem:[%s15075_s1 + $0x9] ss:$0 sm:$0xff] }
 0x1d9   : > { %16118 = vst [vmem:[#allocation140_spill] sm:$0xff] %v11719_v2  ;;  %v2167_v20 = vsel %vm1843_vm0, %v16120_v49, %v2166_v10  ;;  %v16122_v58 = vrot.slane %v11251_v4, 1  ;;  %v5715_v57 = vrot.slane %v5616_v9, 1  ;;  %v7876_v2 = vunpack.i.h.bf16 %v11570_v31  ;;  %v16131_v4 = vld [vmem:[#allocation227_spill] sm:$0xff] }
 0x1da   : > { %v11734_v5 = vadd.f32 %v2167_v20, %v11198_v33  ;;  %v11751_v33 = vmul.f32 %v7871_v23, %v11730_v25  ;;  %v4332_v55 = vmul.f32 %v7870_v41, %v11730_v25  ;;  %v2074_v20 = vmul.f32 %v11757_v35, %v7357_v61 }
 0x1db   : > { %v11742_v18 = vsel %vm1843_vm0, %v16122_v58, %v2231_v13  ;;  %v5625_v15 = vmul.f32 %v10877_v27, %v7357_v61  ;;  %v16125_v13 = vrot.slane %v11241_v47, 1  ;;  %v2071_v9 = vmul.f32 %v11757_v35, %v7356_v14  ;;  %v16127_v58 = vld [vmem:[#allocation19_spill] sm:$0xff] }
 0x1dc   : > { %16121 = vst [vmem:[#allocation156_spill] sm:$0xff] %v11734_v5  ;;  %16123 = vst [vmem:[#allocation519_spill] sm:$0xff] %v11742_v18  ;;  %v5622_v49 = vmul.f32 %v10877_v27, %v7356_v14  ;;  %8050 = vperm.xlu0 %7978, %v16127_v58   ;;  %v11772_v5 = vpop.permute.xlu0 %7893  ;;  %v16128_v18 = vld [vmem:[#allocation226_spill] sm:$0xff]  ;;  %v16132_v47 = vrot.slane %v16131_v4, 1  ;;  %v7875_v14 = vunpack.i.l.bf16 %v11570_v31  ;;  %v16135_v58 = vld [vmem:[#allocation159_spill] sm:$0xff]  ;;  %v11801_v4 = vmul.f32 %v7871_v23, %v11748_v53 }
 0x1dd   : > { %16124 = vst [vmem:[#allocation520_spill] sm:$0xff] %v11751_v33  ;;  %v11766_v10 = vsel %vm1843_vm0, %v16125_v13, %v5780_v63  ;;  %v16129_v44 = vrot.slane %v16128_v18, 1  ;;  %v16134_v13 = vrot.slane %v10864_v51, 1  ;;  %v7361_v23 = vunpack.i.l.bf16 %v11610_v54 }
 0x1de   : > { %16126 = vst [vmem:[#allocation521_spill] sm:$0xff] %v11766_v10  ;;  %v11782_v63 = vsel %vm1843_vm0, %v16132_v47, %v5775_v50  ;;  %v16136_v10 = vrot.slane %v16135_v58, 1  ;;  %v16140_v50 = vld [vmem:[#allocation359_spill] sm:$0xff]  ;;  %v4430_v47 = vrot.slane %v4332_v55, 1  ;;  %v5730_v58 = vrot.slane %v5625_v15, 1 }
 0x1df   : > { %v11777_v61 = vsel %vm1843_vm0, %v16129_v44, %v2226_v34  ;;  %16133 = vst [vmem:[#allocation227_spill] sm:$0xff] %v11782_v63  ;;  %v11787_v27 = vsel %vm1843_vm0, %v16134_v13, %v2171_v40  ;;  %v16138_v44 = vrot.slane %v10880_v28, 1  ;;  %7553 = vperm.xlu1 %7521, %v16140_v50   ;;  %v11805_v40 = vmul.f32 %v7876_v2, %v11730_v25  ;;  %v11812_v63 = vpop.permute.xlu1 %7380 }
 0x1e0   : > { %16130 = vst [vmem:[#allocation19_spill] sm:$0xff] %v11777_v61  ;;  %v11793_v32 = vsel %vm1843_vm0, %v16136_v10, %v5715_v57  ;;  %v2181_v13 = vrot.slane %v2074_v20, 1  ;;  %v2176_v57 = vrot.slane %v2071_v9, 1  ;;  %v5725_v10 = vrot.slane %v5622_v49, 1  ;;  %v11817_v20 = vpop.permute.xlu0 %7898  ;;  %v8366_v9 = vld [vmem:[%s15075_s1 + $0x21] ss:$0 sm:$0xff] }
 0x1e1   : > { %16137 = vst [vmem:[#allocation159_spill] sm:$0xff] %v11793_v32  ;;  %v11798_v34 = vsel %vm1843_vm0, %v16138_v44, %v5720_v38  ;;  %16141 = vst [vmem:[#allocation359_spill] sm:$0xff] %v11805_v40  ;;  %v4341_v38 = vmul.f32 %v7875_v14, %v11730_v25  ;;  %v7362_v44 = vunpack.i.h.bf16 %v11610_v54  ;;  %v7880_v31 = vunpack.i.l.bf16 %v11616_v12  ;;  %v16142_v32 = vld [vmem:[#allocation20_spill] sm:$0xff] }
 0x1e2   : > { %16139 = vst [vmem:[#allocation522_spill] sm:$0xff] %v11798_v34  ;;  %v7881_v34 = vunpack.i.h.bf16 %v11616_v12  ;;  %v7367_v55 = vunpack.i.h.bf16 %v11667_v3  ;;  %v2083_v54 = vmul.f32 %v11757_v35, %v7361_v23  ;;  %v5634_v28 = vmul.f32 %v8366_v9, %v7361_v23  ;;  %8055 = vperm.xlu0 %7978, %v16142_v32  }
 0x1e3   : > { %v4445_v50 = vrot.slane %v4341_v38, 1  ;;  %v2086_v15 = vmul.f32 %v11757_v35, %v7362_v44  ;;  %v5637_v49 = vmul.f32 %v8366_v9, %v7362_v44  ;;  %v11826_v38 = vmul.f32 %v7870_v41, %v11748_v53  ;;  %7558 = vperm.xlu1 %7521, %v16146_v8   ;;  %v16151_v41 = vld [vmem:[#allocation427_spill] sm:$0xff] }
 0x1e4   : > { %v16143_v12 = vrot.slane %v11751_v33, 1  ;;  %v11834_v18 = vmul.f32 %v7876_v2, %v11748_v53  ;;  %v11838_v44 = vmul.f32 %v7881_v34, %v11730_v25  ;;  %v16149_v23 = vrot.slane %v16148_v30, 1 }
 0x1e5   : > { %v16152_v6 = vrot.slane %v16151_v41, 1  ;;  %v11856_v8 = vmul.f32 %v7875_v14, %v11748_v53  ;;  %v11870_v14 = vpop.permute.xlu1 %7385 }
 0x1e6   : > { %v11831_v61 = vsel %vm1843_vm0, %v4430_v47, %v16143_v12  ;;  %16145 = vst [vmem:[#allocation523_spill] sm:$0xff] %v11834_v18  ;;  %16147 = vst [vmem:[#allocation367_spill] sm:$0xff] %v11838_v44  ;;  %v11843_v32 = vsel %vm1843_vm0, %v16149_v23, %v2176_v57  ;;  %v16154_v47 = vld [vmem:[#allocation426_spill] sm:$0xff]  ;;  %v16161_v57 = vrot.slane %v11805_v40, 1  ;;  %v11891_v40 = vmul.f32 %v8366_v9, %v7367_v55 }
 0x1e7   : > { %16144 = vst [vmem:[#allocation20_spill] sm:$0xff] %v11831_v61  ;;  %16150 = vst [vmem:[#allocation524_spill] sm:$0xff] %v11843_v32  ;;  %v11848_v33 = vsel %vm1843_vm0, %v16152_v6, %v2181_v13  ;;  %v16155_v12 = vrot.slane %v16154_v47, 1  ;;  %v16158_v61 = vld [vmem:[#allocation168_spill] sm:$0xff]  ;;  %v4347_v6 = vmul.f32 %v7880_v31, %v11730_v25  ;;  %v2098_v13 = vmul.f32 %v11757_v35, %v7367_v55 }
 0x1e8   : > { %16153 = vst [vmem:[#allocation427_spill] sm:$0xff] %v11848_v33  ;;  %16157 = vst [vmem:[#allocation525_spill] sm:$0xff] %v11856_v8  ;;  %v16159_v19 = vrot.slane %v16158_v61, 1  ;;  %v11866_v23 = vsel %vm1843_vm0, %v4445_v50, %v16161_v57  ;;  %v2201_v47 = vrot.slane %v2086_v15, 1  ;;  %v11875_v50 = vpop.permute.xlu0 %7903  ;;  %v7886_v57 = vunpack.i.h.bf16 %v11671_v26  ;;  %v16178_v55 = vld [vmem:[#allocation448_spill] sm:$0xff] }
 0x1e9   : > { %v11853_v2 = vsel %vm1843_vm0, %v16155_v12, %v5730_v58  ;;  %16162 = vst [vmem:[#allocation526_spill] sm:$0xff] %v11866_v23  ;;  %v5750_v58 = vrot.slane %v5637_v49, 1  ;;  %v2196_v12 = vrot.slane %v2083_v54, 1  ;;  %v4455_v8 = vrot.slane %v4347_v6, 1  ;;  %16169 = vst [vmem:[#allocation530_spill] sm:$0xff] %v11891_v40  ;;  %v16170_v23 = vld [vmem:[#allocation21_spill] sm:$0xff] }
 0x1ea   : > { %16156 = vst [vmem:[#allocation426_spill] sm:$0xff] %v11853_v2  ;;  %v11861_v37 = vsel %vm1843_vm0, %v16159_v19, %v5725_v10  ;;  %v5745_v2 = vrot.slane %v5634_v28, 1  ;;  %v2221_v19 = vrot.slane %v2098_v13, 1  ;;  %v7366_v10 = vunpack.i.l.bf16 %v11667_v3  ;;  %v16166_v13 = vld [vmem:[#allocation190_spill] sm:$0xff]  ;;  %8060 = vperm.xlu0 %7978, %v16170_v23  }
 0x1eb   : > { %16160 = vst [vmem:[#allocation168_spill] sm:$0xff] %v11861_v37  ;;  %v16163_v37 = vmov 0   ;;  %v7885_v15 = vunpack.i.l.bf16 %v11671_v26  ;;  %v11880_v49 = vmul.f32 %v7881_v34, %v11748_v53  ;;  %v11883_v28 = vmul.f32 %v7880_v31, %v11748_v53  ;;  %v16172_v31 = vld [vmem:[#allocation450_spill] sm:$0xff] }
 0x1ec   : > { %7562 = vset.pattern.permute.xlu1 %v16163_v37  ;;  %v2095_v54 = vmul.f32 %v11757_v35, %v7366_v10  ;;  %v5646_v6 = vmul.f32 %v8366_v9, %v7366_v10  ;;  %v16167_v3 = vrot.slane %v16166_v13, 1  ;;  %v11896_v26 = vmul.f32 %v7886_v57, %v11730_v25  ;;  %v16175_v10 = vld [vmem:[#allocation187_spill] sm:$0xff]  ;;  %v16213_v37 = vld [vmem:[#allocation264_spill] sm:$0xff] }
 0x1ed   : > { %16164 = vst [vmem:[#allocation527_spill] sm:$0xff] %v11880_v49  ;;  %16165 = vst [vmem:[#allocation528_spill] sm:$0xff] %v11883_v28  ;;  %7564 = vperm.xlu1 %7562, %v16171_v17   ;;  %v7373_v34 = vunpack.i.h.bf16 %v11714_v39  ;;  %v16173_v28 = vrot.slane %v16172_v31, 1  ;;  %v16176_v13 = vrot.slane %v16175_v10, 1  ;;  %v16179_v9 = vrot.slane %v16178_v55, 1 }
 0x1ee   : > { %v11889_v61 = vsel %vm1843_vm0, %v16167_v3, %v2196_v12  ;;  %v4353_v3 = vmul.f32 %v7885_v15, %v11730_v25  ;;  %v16181_v49 = vrot.slane %v11838_v44, 1  ;;  %v5765_v10 = vrot.slane %v5646_v6, 1 }
 0x1ef   : > { %16168 = vst [vmem:[#allocation529_spill] sm:$0xff] %v11889_v61  ;;  %v11902_v35 = vsel %vm1843_vm0, %v16173_v28, %v2201_v47  ;;  %v11907_v12 = vsel %vm1843_vm0, %v16176_v13, %v5745_v2  ;;  %v11912_v23 = vsel %vm1843_vm0, %v16179_v9, %v5750_v58  ;;  %v306_v61 = vld [vmem:[%s8542_s28 + $0x27c] sm:$0xff]   ;;  %v16183_v47 = vrot.slane %v11188_v0, 1  ;;  %v11929_v13 = vpop.permute.xlu1 %7390 }
 0x1f0   : > { %16174 = vst [vmem:[#allocation21_spill] sm:$0xff] %v11902_v35  ;;  %16177 = vst [vmem:[#allocation376_spill] sm:$0xff] %v11907_v12  ;;  %v11919_v31 = vsel %vm1843_vm0, %v4455_v8, %v16181_v49  ;;  %v11927_v2 = vmul.f32 %v7886_v57, %v11748_v53  ;;  %v2216_v58 = vrot.slane %v2095_v54, 1  ;;  %v7372_v9 = vunpack.i.l.bf16 %v11714_v39  ;;  %v16186_v8 = vld [vmem:[#allocation22_spill] sm:$0xff]  ;;  %v11947_v49 = vld [vmem:[%s15075_s1 + $0x22] ss:$0 sm:$0xff] }
 0x1f1   : > { %16180 = vst [vmem:[#allocation187_spill] sm:$0xff] %v11912_v23  ;;  %16182 = vst [vmem:[#allocation448_spill] sm:$0xff] %v11919_v31  ;;  %v11924_v28 = vsel %vm1843_vm0, %v16183_v47, %v2221_v19  ;;  %v11933_v23 = vpop.permute.xlu0 %7908  ;;  %8065 = vperm.xlu0 %7978, %v16186_v8   ;;  %v11939_v19 = vld [vmem:[%s15075_s1 + $0xa] ss:$0 sm:$0xff]  ;;  %v11950_v54 = vmul.f32 %v11947_v49, %v7373_v34  ;;  %v3266_v39 = vunpack.c.l.bf16 %v306_v61  ;;  %v3267_v6 = vunpack.c.h.bf16 %v306_v61 }
 0x1f2   : > { %16184 = vst [vmem:[#allocation531_spill] sm:$0xff] %v11924_v28  ;;  %16185 = vst [vmem:[#allocation532_spill] sm:$0xff] %v11927_v2  ;;  %v11942_v57 = vmul.f32 %v11939_v19, %v7373_v34  ;;  %v4465_v47 = vrot.slane %v4353_v3, 1  ;;  %v2368_v8 = vmul.f32 %v11939_v19, %v7372_v9  ;;  %v7891_v55 = vunpack.i.h.bf16 %v11722_v46  ;;  %v16187_v28 = vld [vmem:[#allocation214_spill] sm:$0xff] }
 0x1f3   : > { %v7890_v12 = vunpack.i.l.bf16 %v11722_v46  ;;  %v11955_v44 = vpack.i.bf16 %v3267_v6, %v3266_v39  ;;  %v7378_v31 = vunpack.i.h.bf16 %v11761_v45  ;;  %v7377_v2 = vunpack.i.l.bf16 %v11761_v45  ;;  %v16192_v6 = vld [vmem:[#allocation23_spill] sm:$0xff] }
 0x1f4   : > { %v16188_v0 = vrot.slane %v16187_v28, 1  ;;  %v11965_v61 = vmul.f32 %v7885_v15, %v11748_v53  ;;  %v2465_v3 = vrot.slane %v2368_v8, 1  ;;  %v11968_v9 = vmul.f32 %v7891_v55, %v11730_v25  ;;  %v16193_v15 = vld [vmem:[#allocation212_spill] sm:$0xff] }
 0x1f5   : > { %7574 = vperm.xlu1 %7562, %v11955_v44   ;;  %v4359_v39 = vmul.f32 %v7890_v12, %v11730_v25  ;;  %8070 = vperm.xlu0 %7978, %v16192_v6   ;;  %v2383_v45 = vmul.f32 %v11939_v19, %v7378_v31  ;;  %v7896_v40 = vunpack.i.h.bf16 %v11772_v5  ;;  %v16196_v6 = vrot.slane %v11896_v26, 1 }
 0x1f6   : > { %v11962_v34 = vsel %vm1843_vm0, %v16188_v0, %v2216_v58  ;;  %16190 = vst [vmem:[#allocation533_spill] sm:$0xff] %v11965_v61  ;;  %16191 = vst [vmem:[#allocation534_spill] sm:$0xff] %v11968_v9  ;;  %v5874_v0 = vmul.f32 %v11947_v49, %v7378_v31  ;;  %v11976_v58 = vpop.permute.xlu1 %7401  ;;  %v11986_v61 = vpop.permute.xlu0 %7913  ;;  %v11994_v31 = vmul.f32 %v7891_v55, %v11748_v53 }
 0x1f7   : > { %16189 = vst [vmem:[#allocation22_spill] sm:$0xff] %v11962_v34  ;;  %v16194_v34 = vrot.slane %v16193_v15, 1  ;;  %v11991_v35 = vsel %vm1843_vm0, %v4465_v47, %v16196_v6  ;;  %v11997_v15 = vmul.f32 %v11939_v19, %v7377_v2  ;;  %v12009_v62 = vmul.f32 %v11947_v49, %v7377_v2 }
 0x1f8   : > { %16197 = vst [vmem:[#allocation212_spill] sm:$0xff] %v11991_v35  ;;  %16198 = vst [vmem:[#allocation535_spill] sm:$0xff] %v11994_v31  ;;  %v4475_v47 = vrot.slane %v4359_v39, 1  ;;  %v2490_v6 = vrot.slane %v2383_v45, 1  ;;  %v5979_v55 = vrot.slane %v5874_v0, 1  ;;  %v16204_v35 = vld [vmem:[#allocation381_spill] sm:$0xff]  ;;  %v7895_v31 = vunpack.i.l.bf16 %v11772_v5 }
 0x1f9   : > { %v11981_v8 = vsel %vm1843_vm0, %v16194_v34, %v5765_v10  ;;  %16199 = vst [vmem:[#allocation536_spill] sm:$0xff] %v11997_v15  ;;  %v16200_v10 = vld [vmem:[#allocation236_spill] sm:$0xff]  ;;  %7579 = vperm.xlu1 %7562, %v16204_v35   ;;  %v7901_v2 = vunpack.i.h.bf16 %v11817_v20  ;;  %v12025_v0 = vmul.f32 %v7896_v40, %v11748_v53  ;;  %8075 = vperm.xlu0 %7978, %v15954_v52   ;;  %v7900_v52 = vunpack.i.l.bf16 %v11817_v20 }
 0x1fa   : > { %16195 = vst [vmem:[#allocation23_spill] sm:$0xff] %v11981_v8  ;;  %v16201_v34 = vrot.slane %v16200_v10, 1  ;;  %v12006_v8 = vmul.f32 %v7890_v12, %v11748_v53  ;;  %v12014_v10 = vmul.f32 %v7896_v40, %v11730_v25  ;;  %v4365_v46 = vmul.f32 %v7895_v31, %v11730_v25  ;;  %v12021_v39 = vpop.permute.xlu1 %7406  ;;  %v16209_v40 = vld [vmem:[#allocation390_spill] sm:$0xff] }
 0x1fb   : > { %16205 = vst [vmem:[#allocation381_spill] sm:$0xff] %v12025_v0  ;;  %v16206_v12 = vrot.slane %v11968_v9, 1  ;;  %v16210_v0 = vld [vmem:[#allocation262_spill] sm:$0xff]  ;;  %v16214_v9 = vrot.slane %v16213_v37, 1  ;;  %v12063_v20 = vmul.f32 %v7901_v2, %v11748_v53  ;;  %v7388_v37 = vunpack.i.h.bf16 %v11870_v14 }
 0x1fc   : > { %v12002_v28 = vsel %vm1843_vm0, %v16201_v34, %v2465_v3  ;;  %16203 = vst [vmem:[#allocation537_spill] sm:$0xff] %v12006_v8  ;;  %v7383_v3 = vunpack.i.h.bf16 %v11812_v63  ;;  %v7382_v34 = vunpack.i.l.bf16 %v11812_v63  ;;  %v12030_v63 = vpop.permute.xlu0 %7918  ;;  %v16211_v18 = vrot.slane %v16210_v0, 1 }
 0x1fd   : > { %16202 = vst [vmem:[#allocation236_spill] sm:$0xff] %v12002_v28  ;;  %v12035_v8 = vsel %vm1843_vm0, %v4475_v47, %v16206_v12  ;;  %7589 = vperm.xlu1 %7562, %v16209_v40   ;;  %v12053_v47 = vsel %vm1843_vm0, %v16214_v9, %v5979_v55  ;;  %v4485_v33 = vrot.slane %v4365_v46, 1  ;;  %16218 = vst [vmem:[#allocation542_spill] sm:$0xff] %v12063_v20  ;;  %v7387_v12 = vunpack.i.l.bf16 %v11870_v14  ;;  %v16220_v9 = vld [vmem:[#allocation395_spill] sm:$0xff] }
 0x1fe   : > { %v2389_v5 = vmul.f32 %v11939_v19, %v7383_v3  ;;  %v5880_v28 = vmul.f32 %v11947_v49, %v7383_v3  ;;  %16207 = vst [vmem:[#allocation538_spill] sm:$0xff] %v12035_v8  ;;  %v12038_v7 = vmul.f32 %v11939_v19, %v7382_v34  ;;  %v12041_v45 = vmul.f32 %v11947_v49, %v7382_v34 }
 0x1ff   : > { %v12048_v3 = vsel %vm1843_vm0, %v16211_v18, %v2490_v6  ;;  %16215 = vst [vmem:[#allocation264_spill] sm:$0xff] %v12053_v47  ;;  %v12057_v8 = vmul.f32 %v7901_v2, %v11730_v25  ;;  %v12060_v34 = vmul.f32 %v7895_v31, %v11748_v53  ;;  %v4371_v18 = vmul.f32 %v7900_v52, %v11730_v25  ;;  %v12070_v47 = vpop.permute.xlu1 %7416 }
 0x200   : > { %16208 = vst [vmem:[#allocation539_spill] sm:$0xff] %v12038_v7  ;;  %16212 = vst [vmem:[#allocation390_spill] sm:$0xff] %v12048_v3  ;;  %v2500_v6 = vrot.slane %v2389_v5, 1  ;;  %v5989_v3 = vrot.slane %v5880_v28, 1  ;;  %8080 = vperm.xlu0 %7978, %v15971_v29   ;;  %v2401_v2 = vmul.f32 %v11939_v19, %v7388_v37  ;;  %v12075_v0 = vpop.permute.xlu0 %7923  ;;  %v5892_v28 = vmul.f32 %v11947_v49, %v7388_v37  ;;  %v12098_v37 = vld [vmem:[%s15075_s1 + $0x11] ss:$0 sm:$0xff] }
 0x201   : > { %16216 = vst [vmem:[#allocation540_spill] sm:$0xff] %v12057_v8  ;;  %16217 = vst [vmem:[#allocation541_spill] sm:$0xff] %v12060_v34  ;;  %v4495_v46 = vrot.slane %v4371_v18, 1  ;;  %v12079_v5 = vmul.f32 %v11939_v19, %v7387_v12  ;;  %7599 = vperm.xlu1 %7562, %v16220_v9   ;;  %v7906_v14 = vunpack.i.h.bf16 %v11875_v50  ;;  %v7905_v55 = vunpack.i.l.bf16 %v11875_v50  ;;  %v16224_v7 = vld [vmem:[#allocation274_spill] sm:$0xff] }
 0x202   : > { %v16221_v31 = vrot.slane %v12014_v10, 1  ;;  %v12090_v29 = vmul.f32 %v7900_v52, %v11748_v53  ;;  %v12093_v20 = vmul.f32 %v11947_v49, %v7387_v12  ;;  %v7393_v34 = vunpack.i.h.bf16 %v11929_v13  ;;  %v16227_v52 = vld [vmem:[#allocation276_spill] sm:$0xff] }
 0x203   : > { %16219 = vst [vmem:[#allocation543_spill] sm:$0xff] %v12079_v5  ;;  %v16225_v50 = vrot.slane %v16224_v7, 1  ;;  %v16250_v5 = vld [vmem:[#allocation324_spill] sm:$0xff] }
 0x204   : > { %v12087_v18 = vsel %vm1843_vm0, %v4485_v33, %v16221_v31  ;;  %16223 = vst [vmem:[#allocation544_spill] sm:$0xff] %v12090_v29  ;;  %v2520_v33 = vrot.slane %v2401_v2, 1  ;;  %v7392_v31 = vunpack.i.l.bf16 %v11929_v13  ;;  %v16230_v29 = vrot.slane %v12057_v8, 1  ;;  %8085 = vperm.xlu0 %7978, %v15989_v16  }
 0x205   : > { %16222 = vst [vmem:[#allocation395_spill] sm:$0xff] %v12087_v18  ;;  %v12104_v15 = vsel %vm1843_vm0, %v16225_v50, %v2500_v6  ;;  %v16228_v18 = vrot.slane %v16227_v52, 1  ;;  %v2413_v7 = vmul.f32 %v11939_v19, %v7393_v34  ;;  %v5904_v6 = vmul.f32 %v11947_v49, %v7393_v34  ;;  %v12128_v52 = vpop.permute.xlu1 %7426  ;;  %v16236_v34 = vld [vmem:[#allocation301_spill] sm:$0xff] }
 0x206   : > { %16226 = vst [vmem:[#allocation545_spill] sm:$0xff] %v12104_v15  ;;  %v12115_v22 = vsel %vm1843_vm0, %v4495_v46, %v16230_v29  ;;  %v6009_v50 = vrot.slane %v5892_v28, 1  ;;  %v12122_v13 = vmul.f32 %v7906_v14, %v12098_v37  ;;  %v12132_v16 = vmul.f32 %v11939_v19, %v7392_v31  ;;  %v12134_v29 = vpop.permute.xlu0 %7928 }
 0x207   : > { %v12110_v12 = vsel %vm1843_vm0, %v16228_v18, %v5989_v3  ;;  %16231 = vst [vmem:[#allocation546_spill] sm:$0xff] %v12115_v22  ;;  %v12125_v3 = vmul.f32 %v7905_v55, %v12098_v37  ;;  %v16234_v18 = vld [vmem:[#allocation400_spill] sm:$0xff]  ;;  %v16237_v28 = vrot.slane %v16236_v34, 1  ;;  %v12142_v14 = vmul.f32 %v11947_v49, %v7392_v31  ;;  %v16239_v22 = vld [vmem:[#allocation298_spill] sm:$0xff] }
 0x208   : > { %16229 = vst [vmem:[#allocation276_spill] sm:$0xff] %v12110_v12  ;;  %16232 = vst [vmem:[#allocation547_spill] sm:$0xff] %v12122_v13  ;;  %7609 = vperm.xlu1 %7562, %v16234_v18   ;;  %v7911_v55 = vunpack.i.h.bf16 %v11933_v23  ;;  %v7910_v12 = vunpack.i.l.bf16 %v11933_v23  ;;  %v2540_v8 = vrot.slane %v2413_v7, 1  ;;  %v6029_v13 = vrot.slane %v5904_v6, 1  ;;  %8090 = vperm.xlu0 %7978, %v15999_v59   ;;  %v12160_v7 = vld [vmem:[%s15075_s1 + $0x14] ss:$0 sm:$0xff] }
 0x209   : > { %16233 = vst [vmem:[#allocation548_spill] sm:$0xff] %v12125_v3  ;;  %16235 = vst [vmem:[#allocation400_spill] sm:$0xff] %v12132_v16  ;;  %v12139_v2 = vsel %vm1843_vm0, %v16237_v28, %v2520_v33  ;;  %v7404_v46 = vunpack.i.h.bf16 %v11976_v58  ;;  %v7403_v3 = vunpack.i.l.bf16 %v11976_v58  ;;  %v16240_v34 = vrot.slane %v16239_v22, 1  ;;  %v16242_v28 = vld [vmem:[#allocation408_spill] sm:$0xff] }
 0x20a   : > { %16238 = vst [vmem:[#allocation549_spill] sm:$0xff] %v12139_v2  ;;  %v7916_v31 = vunpack.i.h.bf16 %v11986_v61  ;;  %v7915_v22 = vunpack.i.l.bf16 %v11986_v61  ;;  %v12171_v6 = vmul.f32 %v7911_v55, %v12098_v37  ;;  %v12177_v2 = vpop.permute.xlu1 %7436  ;;  %v16251_v32 = vrot.slane %v16250_v5, 1  ;;  %v12196_v30 = vpop.permute.xlu0 %7933 }
 0x20b   : > { %v12152_v33 = vsel %vm1843_vm0, %v16240_v34, %v6009_v50  ;;  %v12163_v59 = vmul.f32 %v12160_v7, %v7404_v46  ;;  %v12166_v23 = vmul.f32 %v12160_v7, %v7403_v3  ;;  %v12174_v50 = vmul.f32 %v7910_v12, %v12098_v37  ;;  %v16254_v12 = vld [vmem:[#allocation163_spill] sm:$0xff] }
 0x20c   : > { %16241 = vst [vmem:[#allocation298_spill] sm:$0xff] %v12152_v33  ;;  %7619 = vperm.xlu1 %7562, %v16242_v28   ;;  %16245 = vst [vmem:[#allocation551_spill] sm:$0xff] %v12171_v6  ;;  %v7409_v34 = vunpack.i.h.bf16 %v12021_v39  ;;  %v16247_v33 = vld [vmem:[#allocation326_spill] sm:$0xff]  ;;  %v12187_v61 = vsel %vm1843_vm0, %v16251_v32, %v6029_v13  ;;  %8095 = vperm.xlu0 %7978, %v16011_v11   ;;  %v16253_v55 = vrot.slane %v16119_v43, 1  ;;  %v16255_v58 = vrot.slane %v16254_v12, 1 }
 0x20d   : > { %16243 = vst [vmem:[#allocation408_spill] sm:$0xff] %v12163_v59  ;;  %16244 = vst [vmem:[#allocation550_spill] sm:$0xff] %v12166_v23  ;;  %v16248_v15 = vrot.slane %v16247_v33, 1  ;;  %v7408_v6 = vunpack.i.l.bf16 %v12021_v39  ;;  %v12210_v43 = vmul.f32 %v7916_v31, %v12098_v37  ;;  %v16260_v31 = vld [vmem:[#allocation241_spill] sm:$0xff]  ;;  %v7920_v13 = vunpack.i.l.bf16 %v12030_v63  ;;  %v16266_v23 = vld [vmem:[#allocation419_spill] sm:$0xff] }
 0x20e   : > { %16246 = vst [vmem:[#allocation552_spill] sm:$0xff] %v12174_v50  ;;  %16252 = vst [vmem:[#allocation324_spill] sm:$0xff] %v12187_v61  ;;  %v2165_v50 = vsel %vm1843_vm0, %v16255_v58, %v16253_v55  ;;  %v12217_v58 = vmul.f32 %v7915_v22, %v12098_v37  ;;  %v7921_v55 = vunpack.i.h.bf16 %v12030_v63  ;;  %v16261_v12 = vrot.slane %v16260_v31, 1  ;;  %v16262_v61 = vld [vmem:[#allocation247_spill] sm:$0xff] }
 0x20f   : > { %v12182_v16 = vsel %vm1843_vm0, %v16248_v15, %v2540_v8  ;;  %v12201_v8 = vld [vmem:[%s15075_s1 + $0xc] ss:$0 sm:$0xff]  ;;  %16256 = vst [vmem:[#allocation163_spill] sm:$0xff] %v12210_v43  ;;  %v16257_v15 = vld [vmem:[#allocation411_spill] sm:$0xff]  ;;  %v2269_v39 = vadd.f32 %v2165_v50, %v11229_v21  ;;  %v16263_v43 = vrot.slane %v16262_v61, 1  ;;  %v12230_v50 = vmul.f32 %v12160_v7, %v7408_v6  ;;  %v12240_v61 = vpop.permute.xlu1 %7446 }
 0x210   : > { %16249 = vst [vmem:[#allocation553_spill] sm:$0xff] %v12182_v16  ;;  %v12204_v32 = vmul.f32 %v12201_v8, %v7404_v46  ;;  %v12207_v11 = vmul.f32 %v12201_v8, %v7403_v3  ;;  %7629 = vperm.xlu1 %7562, %v16257_v15   ;;  %16258 = vst [vmem:[#allocation411_spill] sm:$0xff] %v12217_v58  ;;  %v12220_v46 = vmul.f32 %v12160_v7, %v7409_v34  ;;  %v16276_v31 = vld [vmem:[#allocation31_spill] sm:$0xff] }
 0x211   : > { %v2808_v3 = vmul.f32 %v12201_v8, %v7408_v6  ;;  %v2474_v21 = vsel %vm1843_vm0, %v16263_v43, %v16261_v12  ;;  %16264 = vst [vmem:[#allocation247_spill] sm:$0xff] %v12230_v50  ;;  %v7419_v22 = vunpack.i.h.bf16 %v12070_v47  ;;  %v12235_v5 = vmul.f32 %v12201_v8, %v7409_v34  ;;  %8100 = vperm.xlu0 %7978, %v16021_v48   ;;  %v12248_v34 = vpop.permute.xlu0 %7938 }
 0x212   : > { %16259 = vst [vmem:[#allocation554_spill] sm:$0xff] %v12220_v46  ;;  %v2578_v58 = vadd.f32 %v2474_v21, %v2269_v39  ;;  %v7418_v59 = vunpack.i.l.bf16 %v12070_v47  ;;  %v7429_v63 = vunpack.i.h.bf16 %v12128_v52  ;;  %v7428_v12 = vunpack.i.l.bf16 %v12128_v52 }
 0x213   : > { %16265 = vst [vmem:[#allocation555_spill] sm:$0xff] %v12235_v5  ;;  %v12244_v6 = vmul.f32 %v12160_v7, %v7419_v22  ;;  %v12253_v48 = vmul.f32 %v7921_v55, %v12098_v37  ;;  %v7926_v21 = vunpack.i.h.bf16 %v12075_v0  ;;  %v12259_v46 = vmul.f32 %v7920_v13, %v12098_v37  ;;  %v12279_v33 = vpop.permute.xlu1 %7456 }
 0x214   : > { %7639 = vperm.xlu1 %7562, %v16266_v23   ;;  %v12250_v39 = vadd.f32 %v2808_v3, %v2578_v58  ;;  %v4032_v47 = vmul.f32 %v12160_v7, %v7418_v59  ;;  %v7925_v16 = vunpack.i.l.bf16 %v12075_v0  ;;  %v4039_v52 = vmul.f32 %v12160_v7, %v7429_v63 }
 0x215   : > { %16267 = vst [vmem:[#allocation556_spill] sm:$0xff] %v12244_v6  ;;  %16268 = vst [vmem:[#allocation557_spill] sm:$0xff] %v12253_v48  ;;  %8105 = vperm.xlu0 %7978, %v16033_v60   ;;  %v16270_v3 = vmov 1   ;;  %v4038_v55 = vmul.f32 %v12160_v7, %v7428_v12  ;;  %v7931_v48 = vunpack.i.h.bf16 %v12134_v29  ;;  %v7930_v43 = vunpack.i.l.bf16 %v12134_v29 }
 0x216   : > { %16269 = vst [vmem:[#allocation558_spill] sm:$0xff] %v12259_v46  ;;  %v4136_v58 = vrot.slane %v4032_v47, 1  ;;  %v7439_v13 = vunpack.i.h.bf16 %v12177_v2  ;;  %v12271_v46 = vmul.f32 %v12201_v8, %v7419_v22  ;;  %v12274_v0 = vmul.f32 %v12201_v8, %v7418_v59 }
 0x217   : > { %v12277_v47 = vmul.f32 %v7926_v21, %v12098_v37  ;;  %v4147_v60 = vrot.slane %v4039_v52, 1  ;;  %v12282_v50 = vmul.f32 %v7925_v16, %v12098_v37  ;;  %v12285_v5 = vmul.f32 %v12201_v8, %v7429_v63 }
 0x218   : > { %7643 = vset.pattern.permute.xlu1 %v16270_v3  ;;  %16271 = vst [vmem:[#allocation559_spill] sm:$0xff] %v12271_v46  ;;  %16272 = vst [vmem:[#allocation560_spill] sm:$0xff] %v12274_v0  ;;  %v4146_v29 = vrot.slane %v4038_v55, 1  ;;  %v7438_v22 = vunpack.i.l.bf16 %v12177_v2  ;;  %v7950_v46 = vpop.permute.xlu0 %7949  ;;  %v16277_v59 = vrot.slane %v12244_v6, 1  ;;  %v12295_v52 = vmul.f32 %v12201_v8, %v7428_v12  ;;  %v16283_v6 = vld [vmem:[#allocation393_spill] sm:$0xff] }
 0x219   : > { %16273 = vst [vmem:[#allocation561_spill] sm:$0xff] %v12277_v47  ;;  %16274 = vst [vmem:[#allocation562_spill] sm:$0xff] %v12282_v50  ;;  %7645 = vperm.xlu1 %7643, %v16276_v31   ;;  %8110 = vperm.xlu0 %7978, %v16276_v31   ;;  %v12299_v16 = vmul.f32 %v12160_v7, %v7439_v13  ;;  %v12302_v63 = vmul.f32 %v7931_v48, %v12098_v37  ;;  %v16284_v47 = vrot.slane %v16283_v6, 1 }
 0x21a   : > { %16275 = vst [vmem:[#allocation563_spill] sm:$0xff] %v12285_v5  ;;  %v12292_v21 = vsel %vm1843_vm0, %v4136_v58, %v16277_v59  ;;  %16279 = vst [vmem:[#allocation564_spill] sm:$0xff] %v12295_v52  ;;  %v12305_v55 = vmul.f32 %v7930_v43, %v12098_v37  ;;  %v4044_v2 = vmul.f32 %v12160_v7, %v7438_v22  ;;  %v7936_v12 = vunpack.i.h.bf16 %v12196_v30 }
 0x21b   : > { %16278 = vst [vmem:[#allocation31_spill] sm:$0xff] %v12292_v21  ;;  %16280 = vst [vmem:[#allocation565_spill] sm:$0xff] %v12299_v16  ;;  %v12311_v58 = vsel %vm1843_vm0, %v4147_v60, %v16284_v47  ;;  %v7449_v31 = vunpack.i.h.bf16 %v12240_v61  ;;  %v7448_v59 = vunpack.i.l.bf16 %v12240_v61  ;;  %v12317_v50 = vsel %vm1843_vm0, %v4146_v29, %v4147_v60  ;;  %v7467_v60 = vpop.permute.xlu1 %7466 }
 0x21c   : > { %16281 = vst [vmem:[#allocation566_spill] sm:$0xff] %v12302_v63  ;;  %16282 = vst [vmem:[#allocation567_spill] sm:$0xff] %v12305_v55  ;;  %v12320_v48 = vmul.f32 %v12201_v8, %v7439_v13  ;;  %v7935_v43 = vunpack.i.l.bf16 %v12196_v30  ;;  %v12326_v47 = vmul.f32 %v12201_v8, %v7438_v22  ;;  %v16289_v63 = vld [vmem:[#allocation32_spill] sm:$0xff]  ;;  %v4156_v29 = vrot.slane %v4044_v2, 1  ;;  %v7965_v30 = vpop.permute.xlu0 %7964 }
 0x21d   : > { %16285 = vst [vmem:[#allocation393_spill] sm:$0xff] %v12311_v58  ;;  %16286 = vst [vmem:[#allocation568_spill] sm:$0xff] %v12317_v50  ;;  %7650 = vperm.xlu1 %7643, %v11955_v44   ;;  %8115 = vperm.xlu0 %7978, %v16289_v63   ;;  %v4051_v55 = vmul.f32 %v12160_v7, %v7449_v31  ;;  %v4050_v61 = vmul.f32 %v12160_v7, %v7448_v59  ;;  %v7941_v13 = vunpack.i.h.bf16 %v12248_v34 }
 0x21e   : > { %16287 = vst [vmem:[#allocation569_spill] sm:$0xff] %v12320_v48  ;;  %16288 = vst [vmem:[#allocation570_spill] sm:$0xff] %v12326_v47  ;;  %v7940_v58 = vunpack.i.l.bf16 %v12248_v34  ;;  %v12334_v50 = vmul.f32 %v7936_v12, %v12098_v37  ;;  %v7459_v22 = vunpack.i.h.bf16 %v12279_v33  ;;  %v7458_v21 = vunpack.i.l.bf16 %v12279_v33  ;;  %v16294_v12 = vld [vmem:[#allocation33_spill] sm:$0xff] }
 0x21f   : > { %v4167_v6 = vrot.slane %v4051_v55, 1  ;;  %v4166_v48 = vrot.slane %v4050_v61, 1  ;;  %v7952_v47 = vunpack.i.h.bf16 %v7950_v46  ;;  %v7951_v52 = vunpack.i.l.bf16 %v7950_v46 }
 0x220   : > { %16290 = vst [vmem:[#allocation32_spill] sm:$0xff] %v12334_v50  ;;  %v12340_v2 = vmul.f32 %v7935_v43, %v12098_v37  ;;  %v12343_v5 = vmul.f32 %v12201_v8, %v7449_v31  ;;  %v12346_v34 = vmul.f32 %v12201_v8, %v7448_v59  ;;  %v16295_v55 = vrot.slane %v12299_v16, 1  ;;  %v7478_v16 = vpop.permute.xlu1 %7477 }
 0x221   : > { %7655 = vperm.xlu1 %7643, %v16289_v63   ;;  %8120 = vperm.xlu0 %7978, %v16294_v12   ;;  %v12355_v63 = vmul.f32 %v7941_v13, %v12098_v37  ;;  %v12358_v46 = vmul.f32 %v7940_v58, %v12098_v37  ;;  %v12361_v43 = vmul.f32 %v12160_v7, %v7459_v22  ;;  %v7469_v61 = vunpack.i.h.bf16 %v7467_v60 }
 0x222   : > { %16291 = vst [vmem:[#allocation571_spill] sm:$0xff] %v12340_v2  ;;  %16292 = vst [vmem:[#allocation572_spill] sm:$0xff] %v12343_v5  ;;  %v12352_v33 = vsel %vm1843_vm0, %v4156_v29, %v16295_v55  ;;  %v4056_v31 = vmul.f32 %v12160_v7, %v7458_v21  ;;  %v12365_v59 = vmul.f32 %v7952_v47, %v11730_v25  ;;  %v7468_v50 = vunpack.i.l.bf16 %v7467_v60  ;;  %v16301_v55 = vld [vmem:[#allocation397_spill] sm:$0xff]  ;;  %v16305_v60 = vld [vmem:[#allocation34_spill] sm:$0xff] }
 0x223   : > { %16293 = vst [vmem:[#allocation573_spill] sm:$0xff] %v12346_v34  ;;  %16296 = vst [vmem:[#allocation33_spill] sm:$0xff] %v12352_v33  ;;  %v12368_v29 = vsel %vm1843_vm0, %v4166_v48, %v4167_v6  ;;  %v16302_v13 = vrot.slane %v16301_v55, 1  ;;  %v12376_v37 = vmul.f32 %v7951_v52, %v11730_v25  ;;  %v7966_v58 = vunpack.i.l.bf16 %v7965_v30  ;;  %v16333_v5 = vld [vmem:[#allocation37_spill] sm:$0xff] }
 0x224   : > { %16297 = vst [vmem:[#allocation574_spill] sm:$0xff] %v12355_v63  ;;  %16298 = vst [vmem:[#allocation575_spill] sm:$0xff] %v12358_v46  ;;  %v7975_v46 = vpop.permute.xlu0 %7974  ;;  %v12380_v47 = vmul.f32 %v12201_v8, %v7459_v22  ;;  %v4063_v48 = vmul.f32 %v12160_v7, %v7469_v61  ;;  %v4062_v2 = vmul.f32 %v12160_v7, %v7468_v50  ;;  %v7967_v55 = vunpack.i.h.bf16 %v7965_v30 }
 0x225   : > { %16299 = vst [vmem:[#allocation576_spill] sm:$0xff] %v12361_v43  ;;  %16300 = vst [vmem:[#allocation577_spill] sm:$0xff] %v12368_v29  ;;  %v12373_v63 = vsel %vm1843_vm0, %v4167_v6, %v16302_v13  ;;  %7660 = vperm.xlu1 %7643, %v16294_v12   ;;  %8125 = vperm.xlu0 %7978, %v16305_v60   ;;  %v12387_v13 = vmul.f32 %v12201_v8, %v7458_v21  ;;  %v4176_v12 = vrot.slane %v4056_v31, 1  ;;  %v16307_v6 = vld [vmem:[#allocation35_spill] sm:$0xff] }
 0x226   : > { %16303 = vst [vmem:[#allocation397_spill] sm:$0xff] %v12373_v63  ;;  %16304 = vst [vmem:[#allocation578_spill] sm:$0xff] %v12380_v47  ;;  %v4355_v52 = vmul.f32 %v7966_v58, %v11730_v25  ;;  %v7977_v63 = vunpack.i.h.bf16 %v7975_v46  ;;  %v4438_v22 = vrot.slane %v12376_v37, 1  ;;  %v7976_v47 = vunpack.i.l.bf16 %v7975_v46 }
 0x227   : > { %16306 = vst [vmem:[#allocation34_spill] sm:$0xff] %v12387_v13  ;;  %v4187_v34 = vrot.slane %v4063_v48, 1  ;;  %v4186_v7 = vrot.slane %v4062_v2, 1  ;;  %v12394_v30 = vmul.f32 %v7967_v55, %v11730_v25  ;;  %v7480_v21 = vunpack.i.h.bf16 %v7478_v16  ;;  %v7483_v13 = vpop.permute.xlu1 %7482  ;;  %v16315_v55 = vld [vmem:[#allocation36_spill] sm:$0xff] }
 0x228   : > { %v4468_v33 = vrot.slane %v4355_v52, 1  ;;  %v16308_v31 = vrot.slane %v11896_v26, 1  ;;  %v4367_v37 = vmul.f32 %v7976_v47, %v11730_v25  ;;  %v7479_v52 = vunpack.i.l.bf16 %v7478_v16  ;;  %v7981_v29 = vpop.permute.xlu0 %7980 }
 0x229   : > { %7665 = vperm.xlu1 %7643, %v16305_v60   ;;  %8130 = vperm.xlu0 %7978, %v16307_v6   ;;  %v12404_v46 = vmul.f32 %v12201_v8, %v7469_v61  ;;  %v12407_v2 = vmul.f32 %v12201_v8, %v7468_v50  ;;  %v12410_v60 = vmul.f32 %v7977_v63, %v11730_v25  ;;  %v7485_v47 = vunpack.i.h.bf16 %v7483_v13 }
 0x22a   : > { %v12400_v58 = vsel %vm1843_vm0, %v16308_v31, %v4468_v33  ;;  %v12413_v48 = vmul.f32 %v7480_v21, %v11730_v25  ;;  %v4488_v26 = vrot.slane %v4367_v37, 1  ;;  %v4329_v33 = vmul.f32 %v7479_v52, %v11730_v25 }
 0x22b   : > { %16309 = vst [vmem:[#allocation35_spill] sm:$0xff] %v12400_v58  ;;  %16310 = vst [vmem:[#allocation579_spill] sm:$0xff] %v12404_v46  ;;  %v16313_v16 = vrot.slane %v12361_v43, 1  ;;  %v7484_v8 = vunpack.i.l.bf16 %v7483_v13  ;;  %v7983_v50 = vunpack.i.h.bf16 %v7981_v29  ;;  %v7982_v63 = vunpack.i.l.bf16 %v7981_v29 }
 0x22c   : > { %16311 = vst [vmem:[#allocation580_spill] sm:$0xff] %v12407_v2  ;;  %16312 = vst [vmem:[#allocation581_spill] sm:$0xff] %v12413_v48  ;;  %v12424_v31 = vsel %vm1843_vm0, %v4186_v7, %v4187_v34  ;;  %v4336_v43 = vmul.f32 %v7485_v47, %v11730_v25  ;;  %v16319_v2 = vld [vmem:[#allocation405_spill] sm:$0xff]  ;;  %v4425_v29 = vrot.slane %v4329_v33, 1  ;;  %v12453_v33 = vmul.f32 %v7479_v52, %v11748_v53 }
 0x22d   : > { %7670 = vperm.xlu1 %7643, %v16307_v6   ;;  %v12420_v61 = vsel %vm1843_vm0, %v4176_v12, %v16313_v16  ;;  %8135 = vperm.xlu0 %7978, %v16315_v55   ;;  %16316 = vst [vmem:[#allocation36_spill] sm:$0xff] %v12424_v31  ;;  %v16317_v6 = vrot.slane %v12014_v10, 1  ;;  %v16320_v12 = vrot.slane %v16319_v2, 1  ;;  %v12442_v7 = vld [vmem:[%s15075_s1 + $0x2] ss:$0 sm:$0xff]  ;;  %v4335_v2 = vmul.f32 %v7484_v8, %v11730_v25 }
 0x22e   : > { %16314 = vst [vmem:[#allocation582_spill] sm:$0xff] %v12420_v61  ;;  %v928_v10 = vmul.f32 %v12442_v7, %v7983_v50  ;;  %16323 = vst [vmem:[#allocation585_spill] sm:$0xff] %v12453_v33  ;;  %v12456_v37 = vmul.f32 %v7485_v47, %v11748_v53  ;;  %v927_v13 = vmul.f32 %v12442_v7, %v7982_v63  ;;  %v16327_v31 = vrot.slane %v12413_v48, 1  ;;  %v12475_v47 = vld [vmem:[%s15075_s1 + $0x1a] ss:$0 sm:$0xff]  ;;  %v16331_v33 = vld [vmem:[#allocation42_spill] sm:$0xff] }
 0x22f   : > { %v12430_v58 = vsel %vm1843_vm0, %v16317_v6, %v4488_v26  ;;  %v12436_v16 = vsel %vm1843_vm0, %v4187_v34, %v16320_v12  ;;  %v4436_v6 = vrot.slane %v4336_v43, 1  ;;  %v5861_v34 = vmul.f32 %v11947_v49, %v7983_v50 }
 0x230   : > { %16318 = vst [vmem:[#allocation583_spill] sm:$0xff] %v12430_v58  ;;  %16321 = vst [vmem:[#allocation405_spill] sm:$0xff] %v12436_v16  ;;  %v12450_v12 = vmul.f32 %v7480_v21, %v11748_v53  ;;  %v3005_v26 = vmul.f32 %v7484_v8, %v11748_v53  ;;  %v12464_v43 = vmul.f32 %v11939_v19, %v7983_v50  ;;  %v16326_v58 = vld [vmem:[#allocation148_spill] sm:$0xff]  ;;  %v7488_v21 = vpop.permute.xlu1 %7487 }
 0x231   : > { %7675 = vperm.xlu1 %7643, %v16315_v55   ;;  %16324 = vst [vmem:[#allocation586_spill] sm:$0xff] %v12456_v37  ;;  %v12461_v55 = vsel %vm1843_vm0, %v4436_v6, %v4438_v22  ;;  %v960_v16 = vadd.f32 %v928_v10, %v16326_v58  ;;  %v12470_v52 = vsel %vm1843_vm0, %v4425_v29, %v16327_v31  ;;  %v16330_v22 = vld [vmem:[#allocation155_spill] sm:$0xff]  ;;  %v4435_v58 = vrot.slane %v4335_v2, 1  ;;  %v16332_v37 = vld [vmem:[#allocation337_spill] sm:$0xff] }
 0x232   : > { %16322 = vst [vmem:[#allocation584_spill] sm:$0xff] %v12450_v12  ;;  %16325 = vst [vmem:[#allocation587_spill] sm:$0xff] %v12461_v55  ;;  %v12478_v8 = vmul.f32 %v12475_v47, %v7983_v50  ;;  %v959_v55 = vadd.f32 %v927_v13, %v16330_v22  ;;  %v5860_v61 = vmul.f32 %v11947_v49, %v7982_v63  ;;  %v7986_v12 = vpop.permute.xlu0 %7985  ;;  %v5957_v10 = vrot.slane %v5861_v34, 1  ;;  %v16339_v22 = vld [vmem:[#allocation169_spill] sm:$0xff] }
 0x233   : > { %16328 = vst [vmem:[#allocation148_spill] sm:$0xff] %v12470_v52  ;;  %v1222_v48 = vadd.f32 %v16331_v33, %v960_v16  ;;  %v12484_v31 = vmul.f32 %v11939_v19, %v7982_v63  ;;  %v7490_v52 = vunpack.i.h.bf16 %v7488_v21  ;;  %8140 = vperm.xlu0 %7978, %v16333_v5   ;;  %v7489_v50 = vunpack.i.l.bf16 %v7488_v21 }
 0x234   : > { %16329 = vst [vmem:[#allocation588_spill] sm:$0xff] %v12478_v8  ;;  %v5956_v29 = vrot.slane %v5860_v61, 1  ;;  %v1221_v46 = vadd.f32 %v16332_v37, %v959_v55  ;;  %v7988_v8 = vunpack.i.h.bf16 %v7986_v12  ;;  %v7987_v0 = vunpack.i.l.bf16 %v7986_v12  ;;  %v16340_v37 = vld [vmem:[#allocation457_spill] sm:$0xff] }
 0x235   : > { %v12489_v13 = vadd.f32 %v3005_v26, %v12250_v39  ;;  %v1419_v2 = vadd.f32 %v11313_v36, %v1222_v48  ;;  %7680 = vperm.xlu1 %7643, %v16333_v5   ;;  %v4339_v61 = vmul.f32 %v7490_v52, %v11730_v25  ;;  %v12498_v16 = vsel %vm1843_vm0, %v4435_v58, %v4436_v6  ;;  %v16345_v48 = vld [vmem:[#allocation179_spill] sm:$0xff] }
 0x236   : > { %v12493_v34 = vsel %vm1843_vm0, %v5956_v29, %v5957_v10  ;;  %16335 = vst [vmem:[#allocation42_spill] sm:$0xff] %v12498_v16  ;;  %v4338_v33 = vmul.f32 %v7489_v50, %v11730_v25  ;;  %v934_v12 = vmul.f32 %v12442_v7, %v7988_v8  ;;  %v16336_v39 = vrot.slane %v11950_v54, 1  ;;  %v7493_v29 = vpop.permute.xlu1 %7492 }
 0x237   : > { %16334 = vst [vmem:[#allocation155_spill] sm:$0xff] %v12493_v34  ;;  %v12510_v5 = vmul.f32 %v12475_v47, %v7982_v63  ;;  %v4441_v26 = vrot.slane %v4339_v61, 1  ;;  %v1418_v6 = vadd.f32 %v11322_v42, %v1221_v46  ;;  %v5870_v55 = vmul.f32 %v11947_v49, %v7988_v8 }
 0x238   : > { %v12506_v36 = vsel %vm1843_vm0, %v5957_v10, %v16336_v39  ;;  %v933_v21 = vmul.f32 %v12442_v7, %v7987_v0  ;;  %v966_v58 = vadd.f32 %v934_v12, %v16339_v22  ;;  %v12517_v54 = vadd.f32 %v16340_v37, %v1419_v2  ;;  %v16346_v22 = vld [vmem:[#allocation346_spill] sm:$0xff] }
 0x239   : > { %16337 = vst [vmem:[#allocation337_spill] sm:$0xff] %v12506_v36  ;;  %16338 = vst [vmem:[#allocation37_spill] sm:$0xff] %v12510_v5  ;;  %v12520_v10 = vmul.f32 %v7490_v52, %v11748_v53  ;;  %v16342_v39 = vrot.slane %v12365_v59, 1  ;;  %v12528_v42 = vmul.f32 %v11939_v19, %v7988_v8  ;;  %v16344_v46 = vmov 2   ;;  %v7991_v52 = vpop.permute.xlu0 %7990  ;;  %v16349_v5 = vld [vmem:[#allocation348_spill] sm:$0xff] }
 0x23a   : > { %7684 = vset.pattern.permute.xlu1 %v16344_v46  ;;  %v4440_v61 = vrot.slane %v4338_v33, 1  ;;  %v965_v12 = vadd.f32 %v933_v21, %v16345_v48  ;;  %v1228_v36 = vadd.f32 %v16346_v22, %v966_v58  ;;  %v12534_v2 = vmul.f32 %v11939_v19, %v7987_v0  ;;  %v16351_v21 = vld [vmem:[#allocation9_spill] sm:$0xff] }
 0x23b   : > { %16341 = vst [vmem:[#allocation169_spill] sm:$0xff] %v12520_v10  ;;  %v12525_v63 = vsel %vm1843_vm0, %v4441_v26, %v16342_v39  ;;  %v5972_v37 = vrot.slane %v5870_v55, 1  ;;  %v5869_v59 = vmul.f32 %v11947_v49, %v7987_v0  ;;  %v7495_v34 = vunpack.i.h.bf16 %v7493_v29  ;;  %v16347_v39 = vld [vmem:[#allocation459_spill] sm:$0xff]  ;;  %v16352_v10 = vld [vmem:[#allocation38_spill] sm:$0xff]  ;;  %7686 = vperm.xlu1 %7684, %v16171_v17  }
 0x23c   : > { %16343 = vst [vmem:[#allocation457_spill] sm:$0xff] %v12525_v63  ;;  %v12538_v63 = vadd.f32 %v16347_v39, %v1418_v6  ;;  %v12541_v16 = vmul.f32 %v7489_v50, %v11748_v53  ;;  %v1227_v33 = vadd.f32 %v16349_v5, %v965_v12  ;;  %v7494_v46 = vunpack.i.l.bf16 %v7493_v29  ;;  %8150 = vperm.xlu0 %7978, %v16352_v10   ;;  %v16359_v12 = vld [vmem:[#allocation484_spill] sm:$0xff]  ;;  %v12606_v17 = vld [vmem:[%s15075_s1 + $0x15] ss:$0 sm:$0xff] }
 0x23d   : > { %v12545_v48 = vmul.f32 %v12475_v47, %v7988_v8  ;;  %v1425_v58 = vadd.f32 %v16351_v21, %v1228_v36  ;;  %v5971_v22 = vrot.slane %v5869_v59, 1  ;;  %v7993_v55 = vunpack.i.h.bf16 %v7991_v52 }
 0x23e   : > { %16348 = vst [vmem:[#allocation179_spill] sm:$0xff] %v12541_v16  ;;  %v12550_v23 = vsel %vm1843_vm0, %v4440_v61, %v4441_v26  ;;  %v12555_v39 = vmul.f32 %v12475_v47, %v7987_v0  ;;  %v16355_v5 = vrot.slane %v12009_v62, 1  ;;  %v12566_v29 = vmul.f32 %v7495_v34, %v11730_v25  ;;  %v7498_v61 = vpop.permute.xlu1 %7497 }
 0x23f   : > { %16350 = vst [vmem:[#allocation346_spill] sm:$0xff] %v12545_v48  ;;  %16353 = vst [vmem:[#allocation459_spill] sm:$0xff] %v12550_v23  ;;  %v12563_v36 = vsel %vm1843_vm0, %v5971_v22, %v5972_v37  ;;  %v938_v26 = vmul.f32 %v12442_v7, %v7993_v55  ;;  %v1424_v59 = vadd.f32 %v16359_v12, %v1227_v33  ;;  %v16362_v22 = vld [vmem:[#allocation178_spill] sm:$0xff]  ;;  %v16365_v12 = vld [vmem:[#allocation352_spill] sm:$0xff]  ;;  %7691 = vperm.xlu1 %7684, %v11955_v44  }
 0x240   : > { %16354 = vst [vmem:[#allocation348_spill] sm:$0xff] %v12555_v39  ;;  %v12560_v8 = vsel %vm1843_vm0, %v5972_v37, %v16355_v5  ;;  %16357 = vst [vmem:[#allocation589_spill] sm:$0xff] %v12563_v36  ;;  %v12571_v21 = vmul.f32 %v7495_v34, %v11748_v53  ;;  %v4344_v0 = vmul.f32 %v7494_v46, %v11730_v25  ;;  %v16361_v5 = vld [vmem:[#allocation122_spill] sm:$0xff]  ;;  %v7992_v37 = vunpack.i.l.bf16 %v7991_v52 }
 0x241   : > { %16356 = vst [vmem:[#allocation9_spill] sm:$0xff] %v12560_v8  ;;  %16358 = vst [vmem:[#allocation590_spill] sm:$0xff] %v12566_v29  ;;  %v5876_v62 = vmul.f32 %v11947_v49, %v7993_v55  ;;  %v12576_v50 = vadd.f32 %v16361_v5, %v1425_v58  ;;  %v970_v6 = vadd.f32 %v938_v26, %v16362_v22  ;;  %v7500_v36 = vunpack.i.h.bf16 %v7498_v61  ;;  %v7996_v58 = vpop.permute.xlu0 %7995  ;;  %v16366_v52 = vld [vmem:[#allocation470_spill] sm:$0xff]  ;;  %v16369_v22 = vld [vmem:[#allocation39_spill] sm:$0xff] }
 0x242   : > { %16360 = vst [vmem:[#allocation484_spill] sm:$0xff] %v12571_v21  ;;  %v12580_v8 = vmul.f32 %v7494_v46, %v11748_v53  ;;  %v12584_v34 = vmul.f32 %v11939_v19, %v7993_v55  ;;  %v937_v25 = vmul.f32 %v12442_v7, %v7992_v37  ;;  %v12590_v5 = vadd.f32 %v16366_v52, %v1424_v59  ;;  %v16370_v33 = vld [vmem:[#allocation194_spill] sm:$0xff]  ;;  %v7503_v21 = vpop.permute.xlu1 %7502 }
 0x243   : > { %v5982_v48 = vrot.slane %v5876_v62, 1  ;;  %v1232_v39 = vadd.f32 %v16365_v12, %v970_v6  ;;  %v4450_v26 = vrot.slane %v4344_v0, 1  ;;  %v16367_v53 = vrot.slane %v12041_v45, 1  ;;  %8166 = vperm.xlu0 %7978, %v16369_v22   ;;  %v16373_v0 = vld [vmem:[#allocation28_spill] sm:$0xff]  ;;  %7696 = vperm.xlu1 %7684, %v16204_v35  }
 0x244   : > { %16363 = vst [vmem:[#allocation122_spill] sm:$0xff] %v12580_v8  ;;  %16364 = vst [vmem:[#allocation178_spill] sm:$0xff] %v12584_v34  ;;  %v5875_v62 = vmul.f32 %v11947_v49, %v7992_v37  ;;  %v969_v23 = vadd.f32 %v937_v25, %v16370_v33  ;;  %v12601_v6 = vmul.f32 %v11939_v19, %v7992_v37  ;;  %v7499_v45 = vunpack.i.l.bf16 %v7498_v61  ;;  %v16375_v25 = vld [vmem:[#allocation354_spill] sm:$0xff] }
 0x245   : > { %v12595_v46 = vsel %vm1843_vm0, %v5982_v48, %v16367_v53  ;;  %v12609_v59 = vmul.f32 %v12606_v17, %v7500_v36  ;;  %v1429_v12 = vadd.f32 %v16373_v0, %v1232_v39  ;;  %v7998_v53 = vunpack.i.h.bf16 %v7996_v58  ;;  %v16388_v0 = vld [vmem:[#allocation358_spill] sm:$0xff] }
 0x246   : > { %16368 = vst [vmem:[#allocation352_spill] sm:$0xff] %v12595_v46  ;;  %16371 = vst [vmem:[#allocation470_spill] sm:$0xff] %v12601_v6  ;;  %v5981_v52 = vrot.slane %v5875_v62, 1  ;;  %v7997_v46 = vunpack.i.l.bf16 %v7996_v58  ;;  %v12614_v33 = vmul.f32 %v12475_v47, %v7993_v55  ;;  %v1231_v8 = vadd.f32 %v16375_v25, %v969_v23  ;;  %v12634_v23 = vld [vmem:[%s15075_s1 + $0xd] ss:$0 sm:$0xff]  ;;  %v16385_v25 = vld [vmem:[#allocation191_spill] sm:$0xff] }
 0x247   : > { %16372 = vst [vmem:[#allocation194_spill] sm:$0xff] %v12609_v59  ;;  %v4350_v16 = vmul.f32 %v12606_v17, %v7499_v45  ;;  %v16376_v22 = vrot.slane %v12566_v29, 1  ;;  %v12624_v61 = vmul.f32 %v12475_v47, %v7992_v37  ;;  %v942_v58 = vmul.f32 %v12442_v7, %v7998_v53  ;;  %v16389_v6 = vld [vmem:[#allocation361_spill] sm:$0xff]  ;;  %7701 = vperm.xlu1 %7684, %v16209_v40  }
 0x248   : > { %16374 = vst [vmem:[#allocation28_spill] sm:$0xff] %v12614_v33  ;;  %v12627_v39 = vsel %vm1843_vm0, %v5981_v52, %v5982_v48  ;;  %v12637_v62 = vmul.f32 %v12634_v23, %v7500_v36  ;;  %v941_v37 = vmul.f32 %v12442_v7, %v7997_v46  ;;  %v12648_v52 = vmul.f32 %v12634_v23, %v7499_v45  ;;  %v16386_v33 = vld [vmem:[#allocation490_spill] sm:$0xff] }
 0x249   : > { %v12621_v10 = vsel %vm1843_vm0, %v4450_v26, %v16376_v22  ;;  %16378 = vst [vmem:[#allocation591_spill] sm:$0xff] %v12624_v61  ;;  %16379 = vst [vmem:[#allocation592_spill] sm:$0xff] %v12627_v39  ;;  %v12640_v26 = vmul.f32 %v11947_v49, %v7998_v53  ;;  %v16382_v22 = vld [vmem:[#allocation475_spill] sm:$0xff]  ;;  %v974_v55 = vadd.f32 %v942_v58, %v16385_v25  ;;  %v4460_v36 = vrot.slane %v4350_v16, 1  ;;  %v16387_v61 = vld [vmem:[#allocation198_spill] sm:$0xff] }
 0x24a   : > { %16377 = vst [vmem:[#allocation354_spill] sm:$0xff] %v12621_v10  ;;  %16380 = vst [vmem:[#allocation593_spill] sm:$0xff] %v12637_v62  ;;  %v12644_v48 = vadd.f32 %v16382_v22, %v1429_v12  ;;  %v1428_v29 = vadd.f32 %v16386_v33, %v1231_v8  ;;  %v12653_v39 = vmul.f32 %v11939_v19, %v7998_v53  ;;  %v8001_v62 = vpop.permute.xlu0 %8000  ;;  %v7505_v58 = vunpack.i.h.bf16 %v7503_v21 }
 0x24b   : > { %16381 = vst [vmem:[#allocation594_spill] sm:$0xff] %v12640_v26  ;;  %16384 = vst [vmem:[#allocation595_spill] sm:$0xff] %v12648_v52  ;;  %v973_v10 = vadd.f32 %v941_v37, %v16387_v61  ;;  %v12658_v22 = vmul.f32 %v11939_v19, %v7997_v46  ;;  %v5881_v45 = vmul.f32 %v11947_v49, %v7997_v46  ;;  %v7504_v25 = vunpack.i.l.bf16 %v7503_v21  ;;  %v16393_v21 = vld [vmem:[#allocation26_spill] sm:$0xff] }
 0x24c   : > { %16383 = vst [vmem:[#allocation475_spill] sm:$0xff] %v12644_v48  ;;  %v1236_v52 = vadd.f32 %v16388_v0, %v974_v55  ;;  %v8003_v33 = vunpack.i.h.bf16 %v8001_v62  ;;  %v8002_v34 = vunpack.i.l.bf16 %v8001_v62  ;;  %v12666_v37 = vmul.f32 %v12475_v47, %v7998_v53  ;;  %v16392_v48 = vld [vmem:[#allocation40_spill] sm:$0xff]  ;;  %7706 = vperm.xlu1 %7684, %v16220_v9  }
 0x24d   : > { %v1235_v8 = vadd.f32 %v16389_v6, %v973_v10  ;;  %v5991_v16 = vrot.slane %v5881_v45, 1  ;;  %v12669_v12 = vmul.f32 %v12475_v47, %v7997_v46  ;;  %8176 = vperm.xlu0 %7978, %v16392_v48   ;;  %v4357_v55 = vmul.f32 %v12606_v17, %v7505_v58 }
 0x24e   : > { %16390 = vst [vmem:[#allocation191_spill] sm:$0xff] %v12666_v37  ;;  %v12674_v0 = vadd.f32 %v16393_v21, %v1428_v29  ;;  %v16394_v10 = vrot.slane %v12640_v26, 1  ;;  %v4356_v6 = vmul.f32 %v12606_v17, %v7504_v25  ;;  %v946_v53 = vmul.f32 %v12442_v7, %v8003_v33  ;;  %v16398_v21 = vld [vmem:[#allocation497_spill] sm:$0xff] }
 0x24f   : > { %16391 = vst [vmem:[#allocation490_spill] sm:$0xff] %v12669_v12  ;;  %v16396_v62 = vrot.slane %v12609_v59, 1  ;;  %v4471_v45 = vrot.slane %v4357_v55, 1  ;;  %v5888_v61 = vmul.f32 %v11947_v49, %v8003_v33  ;;  %v945_v29 = vmul.f32 %v12442_v7, %v8002_v34  ;;  %v16399_v12 = vld [vmem:[#allocation29_spill] sm:$0xff] }
 0x250   : > { %v12679_v44 = vsel %vm1843_vm0, %v5991_v16, %v16394_v10  ;;  %v12691_v37 = vadd.f32 %v16398_v21, %v1235_v8  ;;  %v12694_v16 = vadd.f32 %v16399_v12, %v1236_v52  ;;  %v12699_v59 = vmul.f32 %v12634_v23, %v7505_v58  ;;  %v7508_v8 = vpop.permute.xlu1 %7507  ;;  %v8006_v58 = vpop.permute.xlu0 %8005  ;;  %v16411_v10 = vld [vmem:[#allocation368_spill] sm:$0xff]  ;;  %7711 = vperm.xlu1 %7684, %v16234_v18  }
 0x251   : > { %16395 = vst [vmem:[#allocation198_spill] sm:$0xff] %v12679_v44  ;;  %v12686_v46 = vsel %vm1843_vm0, %v4460_v36, %v16396_v62  ;;  %v16401_v44 = vld [vmem:[#allocation206_spill] sm:$0xff]  ;;  %v16403_v36 = vrot.slane %v12394_v30, 1  ;;  %v6002_v62 = vrot.slane %v5888_v61, 1  ;;  %v12708_v21 = vmul.f32 %v12634_v23, %v7504_v25 }
 0x252   : > { %16397 = vst [vmem:[#allocation358_spill] sm:$0xff] %v12686_v46  ;;  %16400 = vst [vmem:[#allocation361_spill] sm:$0xff] %v12694_v16  ;;  %v978_v48 = vadd.f32 %v946_v53, %v16401_v44  ;;  %v16405_v46 = vld [vmem:[#allocation213_spill] sm:$0xff]  ;;  %v4470_v52 = vrot.slane %v4356_v6, 1  ;;  %v12711_v12 = vmul.f32 %v11939_v19, %v8003_v33  ;;  %v5887_v44 = vmul.f32 %v11947_v49, %v8002_v34 }
 0x253   : > { %16402 = vst [vmem:[#allocation26_spill] sm:$0xff] %v12699_v59  ;;  %v12704_v55 = vsel %vm1843_vm0, %v4471_v45, %v16403_v36  ;;  %v977_v26 = vadd.f32 %v945_v29, %v16405_v46  ;;  %16406 = vst [vmem:[#allocation29_spill] sm:$0xff] %v12708_v21  ;;  %v16408_v53 = vrot.slane %v12093_v20, 1  ;;  %v16410_v36 = vld [vmem:[#allocation365_spill] sm:$0xff]  ;;  %v7509_v25 = vunpack.i.l.bf16 %v7508_v8  ;;  %v12761_v20 = vld [vmem:[%s15075_s1 + $0xa] ss:$0 sm:$0xff] }
 0x254   : > { %16404 = vst [vmem:[#allocation497_spill] sm:$0xff] %v12704_v55  ;;  %16407 = vst [vmem:[#allocation206_spill] sm:$0xff] %v12711_v12  ;;  %v1240_v61 = vadd.f32 %v16410_v36, %v978_v48  ;;  %v6001_v29 = vrot.slane %v5887_v44, 1  ;;  %v7510_v55 = vunpack.i.h.bf16 %v7508_v8  ;;  %v12722_v6 = vmul.f32 %v11939_v19, %v8002_v34  ;;  %v16413_v21 = vld [vmem:[#allocation41_spill] sm:$0xff]  ;;  %v16419_v44 = vld [vmem:[#allocation12_spill] sm:$0xff]  ;;  %7716 = vperm.xlu1 %7684, %v16242_v28  }
 0x255   : > { %v12717_v30 = vsel %vm1843_vm0, %v6002_v62, %v16408_v53  ;;  %v1239_v46 = vadd.f32 %v16411_v10, %v977_v26  ;;  %8186 = vperm.xlu0 %7978, %v16413_v21   ;;  %v8008_v59 = vunpack.i.h.bf16 %v8006_v58  ;;  %v8007_v16 = vunpack.i.l.bf16 %v8006_v58 }
 0x256   : > { %16409 = vst [vmem:[#allocation213_spill] sm:$0xff] %v12717_v30  ;;  %16412 = vst [vmem:[#allocation365_spill] sm:$0xff] %v12722_v6  ;;  %v12728_v53 = vmul.f32 %v12475_v47, %v8003_v33  ;;  %v12731_v48 = vsel %vm1843_vm0, %v6001_v29, %v6002_v62  ;;  %v12734_v26 = vmul.f32 %v12606_v17, %v7510_v55  ;;  %v16420_v33 = vld [vmem:[#allocation502_spill] sm:$0xff] }
 0x257   : > { %16415 = vst [vmem:[#allocation596_spill] sm:$0xff] %v12731_v48  ;;  %v12737_v19 = vsel %vm1843_vm0, %v4470_v52, %v4471_v45  ;;  %v12740_v35 = vmul.f32 %v12475_v47, %v8002_v34  ;;  %v4362_v10 = vmul.f32 %v12606_v17, %v7509_v25  ;;  %v950_v8 = vmul.f32 %v12442_v7, %v8008_v59  ;;  %v7513_v45 = vpop.permute.xlu1 %7512  ;;  %v16425_v52 = vld [vmem:[#allocation223_spill] sm:$0xff]  ;;  %v16429_v6 = vld [vmem:[#allocation374_spill] sm:$0xff] }
 0x258   : > { %16414 = vst [vmem:[#allocation368_spill] sm:$0xff] %v12728_v53  ;;  %16416 = vst [vmem:[#allocation597_spill] sm:$0xff] %v12734_v26  ;;  %v12745_v58 = vadd.f32 %v16419_v44, %v1239_v46  ;;  %v12748_v36 = vadd.f32 %v16420_v33, %v1240_v61  ;;  %v12751_v62 = vmul.f32 %v11947_v49, %v8008_v59  ;;  %v16424_v61 = vld [vmem:[#allocation215_spill] sm:$0xff]  ;;  %v8011_v49 = vpop.permute.xlu0 %8010  ;;  %v12775_v53 = vld [vmem:[%s15075_s1 + $0x22] ss:$0 sm:$0xff]  ;;  %v7515_v40 = vunpack.i.h.bf16 %v7513_v45 }
 0x259   : > { %16417 = vst [vmem:[#allocation598_spill] sm:$0xff] %v12737_v19  ;;  %16418 = vst [vmem:[#allocation599_spill] sm:$0xff] %v12740_v35  ;;  %v949_v29 = vmul.f32 %v12442_v7, %v8007_v16  ;;  %v12756_v34 = vmul.f32 %v12634_v23, %v7510_v55  ;;  %v12764_v46 = vmul.f32 %v12761_v20, %v8008_v59  ;;  %8196 = vset.pattern.permute.xlu0 %v16270_v3  ;;  %v16426_v19 = vld [vmem:[#allocation372_spill] sm:$0xff] }
 0x25a   : > { %16421 = vst [vmem:[#allocation12_spill] sm:$0xff] %v12748_v36  ;;  %16422 = vst [vmem:[#allocation502_spill] sm:$0xff] %v12751_v62  ;;  %v982_v44 = vadd.f32 %v950_v8, %v16424_v61  ;;  %v5893_v48 = vmul.f32 %v12775_v53, %v8007_v16  ;;  %v4480_v35 = vrot.slane %v4362_v10, 1  ;;  %v12779_v8 = vmul.f32 %v12761_v20, %v8007_v16 }
 0x25b   : > { %16423 = vst [vmem:[#allocation600_spill] sm:$0xff] %v12756_v34  ;;  %v981_v30 = vadd.f32 %v949_v29, %v16425_v52  ;;  %v7514_v61 = vunpack.i.l.bf16 %v7513_v45  ;;  %v8013_v21 = vunpack.i.h.bf16 %v8011_v49  ;;  %v8012_v55 = vunpack.i.l.bf16 %v8011_v49  ;;  %7721 = vperm.xlu1 %7684, %v16257_v15  }
 0x25c   : > { %v1244_v34 = vadd.f32 %v16426_v19, %v982_v44  ;;  %v6011_v33 = vrot.slane %v5893_v48, 1  ;;  %v12783_v29 = vmul.f32 %v12634_v23, %v7509_v25  ;;  %v12787_v3 = vmul.f32 %v12475_v47, %v8008_v59 }
 0x25d   : > { %v4369_v10 = vmul.f32 %v12606_v17, %v7515_v40  ;;  %v1243_v12 = vadd.f32 %v16429_v6, %v981_v30  ;;  %v16430_v36 = vrot.slane %v12751_v62, 1  ;;  %v4368_v48 = vmul.f32 %v12606_v17, %v7514_v61  ;;  %v16435_v6 = vld [vmem:[#allocation505_spill] sm:$0xff] }
 0x25e   : > { %16427 = vst [vmem:[#allocation215_spill] sm:$0xff] %v12783_v29  ;;  %16428 = vst [vmem:[#allocation223_spill] sm:$0xff] %v12787_v3  ;;  %v954_v19 = vmul.f32 %v12442_v7, %v8013_v21  ;;  %v12800_v44 = vmul.f32 %v12475_v47, %v8007_v16  ;;  %v5900_v49 = vmul.f32 %v12775_v53, %v8013_v21  ;;  %v16433_v52 = vrot.slane %v12734_v26, 1  ;;  %v16437_v3 = vld [vmem:[#allocation228_spill] sm:$0xff]  ;;  %v7518_v29 = vpop.permute.xlu1 %7517  ;;  %v16465_v62 = vld [vmem:[#allocation389_spill] sm:$0xff] }
 0x25f   : > { %v12794_v45 = vsel %vm1843_vm0, %v6011_v33, %v16430_v36  ;;  %v4491_v59 = vrot.slane %v4369_v10, 1  ;;  %v12809_v36 = vadd.f32 %v16435_v6, %v1244_v34  ;;  %v953_v33 = vmul.f32 %v12442_v7, %v8012_v55  ;;  %v16442_v34 = vld [vmem:[#allocation507_spill] sm:$0xff] }
 0x260   : > { %16431 = vst [vmem:[#allocation372_spill] sm:$0xff] %v12794_v45  ;;  %16432 = vst [vmem:[#allocation374_spill] sm:$0xff] %v12800_v44  ;;  %v12806_v30 = vsel %vm1843_vm0, %v4480_v35, %v16433_v52  ;;  %v986_v45 = vadd.f32 %v954_v19, %v16437_v3  ;;  %v12814_v25 = vmul.f32 %v12634_v23, %v7515_v40  ;;  %v16440_v10 = vrot.slane %v12410_v60, 1  ;;  %v8016_v52 = vpop.permute.xlu0 %8015  ;;  %v16444_v19 = vld [vmem:[#allocation237_spill] sm:$0xff] }
 0x261   : > { %16434 = vst [vmem:[#allocation601_spill] sm:$0xff] %v12806_v30  ;;  %16436 = vst [vmem:[#allocation505_spill] sm:$0xff] %v12809_v36  ;;  %v12817_v16 = vmul.f32 %v12634_v23, %v7514_v61  ;;  %v6022_v35 = vrot.slane %v5900_v49, 1  ;;  %v12825_v6 = vadd.f32 %v16442_v34, %v1243_v12  ;;  %v4490_v7 = vrot.slane %v4368_v48, 1 }
 0x262   : > { %16438 = vst [vmem:[#allocation228_spill] sm:$0xff] %v12814_v25  ;;  %v12822_v26 = vsel %vm1843_vm0, %v4491_v59, %v16440_v10  ;;  %v12828_v3 = vmul.f32 %v12761_v20, %v8013_v21  ;;  %v985_v40 = vadd.f32 %v953_v33, %v16444_v19  ;;  %v16445_v44 = vrot.slane %v12142_v14, 1  ;;  %v16462_v25 = vld [vmem:[#allocation388_spill] sm:$0xff] }
 0x263   : > { %16439 = vst [vmem:[#allocation602_spill] sm:$0xff] %v12817_v16  ;;  %16441 = vst [vmem:[#allocation603_spill] sm:$0xff] %v12822_v26  ;;  %v5899_v60 = vmul.f32 %v12775_v53, %v8012_v55  ;;  %v7520_v10 = vunpack.i.h.bf16 %v7518_v29  ;;  %v16447_v26 = vld [vmem:[#allocation379_spill] sm:$0xff]  ;;  %v12839_v30 = vmul.f32 %v12761_v20, %v8012_v55  ;;  %v7519_v12 = vunpack.i.l.bf16 %v7518_v29  ;;  %v16450_v16 = vld [vmem:[#allocation382_spill] sm:$0xff] }
 0x264   : > { %16443 = vst [vmem:[#allocation507_spill] sm:$0xff] %v12828_v3  ;;  %v12834_v61 = vsel %vm1843_vm0, %v6022_v35, %v16445_v44  ;;  %v1248_v49 = vadd.f32 %v16447_v26, %v986_v45  ;;  %v8018_v48 = vunpack.i.h.bf16 %v8016_v52  ;;  %v12842_v34 = vmul.f32 %v12475_v47, %v8013_v21  ;;  %v12860_v21 = vld [vmem:[%s15075_s1 + $0x6] ss:$0 sm:$0xff]  ;;  %v8021_v44 = vpop.permute.xlu0 %8020 }
 0x265   : > { %16446 = vst [vmem:[#allocation237_spill] sm:$0xff] %v12834_v61  ;;  %16448 = vst [vmem:[#allocation379_spill] sm:$0xff] %v12839_v30  ;;  %v1247_v33 = vadd.f32 %v16450_v16, %v985_v40  ;;  %v6021_v19 = vrot.slane %v5899_v60, 1  ;;  %v8017_v14 = vunpack.i.l.bf16 %v8016_v52  ;;  %v12848_v61 = vmul.f32 %v12475_v47, %v8012_v55  ;;  %v16454_v16 = vld [vmem:[#allocation416_spill] sm:$0xff]  ;;  %v16455_v52 = vld [vmem:[#allocation150_spill] sm:$0xff] }
 0x266   : > { %16449 = vst [vmem:[#allocation604_spill] sm:$0xff] %v12842_v34  ;;  %v12851_v26 = vmul.f32 %v12606_v17, %v7520_v10  ;;  %v4374_v29 = vmul.f32 %v12606_v17, %v7519_v12  ;;  %v1582_v9 = vmul.f32 %v12860_v21, %v8018_v48  ;;  %v1219_v40 = vadd.f32 %v16455_v52, %v16454_v16  ;;  %v16456_v47 = vld [vmem:[#allocation51_spill] sm:$0xff]  ;;  %v16457_v55 = vld [vmem:[#allocation146_spill] sm:$0xff]  ;;  %v16459_v17 = vld [vmem:[#allocation13_spill] sm:$0xff] }
 0x267   : > { %16451 = vst [vmem:[#allocation382_spill] sm:$0xff] %v12848_v61  ;;  %v12855_v45 = vsel %vm1843_vm0, %v6021_v19, %v6022_v35  ;;  %v1220_v60 = vadd.f32 %v16457_v55, %v16456_v47  ;;  %v12868_v34 = vsel %vm1843_vm0, %v4490_v7, %v4491_v59  ;;  %v12871_v35 = vadd.f32 %v16459_v17, %v1248_v49  ;;  %v16461_v61 = vld [vmem:[#allocation511_spill] sm:$0xff]  ;;  %v16463_v7 = vld [vmem:[#allocation58_spill] sm:$0xff] }
 0x268   : > { %16452 = vst [vmem:[#allocation605_spill] sm:$0xff] %v12851_v26  ;;  %16453 = vst [vmem:[#allocation606_spill] sm:$0xff] %v12855_v45  ;;  %v12875_v45 = vmul.f32 %v12634_v23, %v7520_v10  ;;  %v12878_v48 = vadd.f32 %v16461_v61, %v1247_v33  ;;  %v1581_v52 = vmul.f32 %v12860_v21, %v8017_v14  ;;  %v8023_v55 = vunpack.i.h.bf16 %v8021_v44  ;;  %v16466_v10 = vld [vmem:[#allocation52_spill] sm:$0xff]  ;;  %v16467_v61 = vld [vmem:[#allocation254_spill] sm:$0xff] }
 0x269   : > { %16458 = vst [vmem:[#allocation416_spill] sm:$0xff] %v12868_v34  ;;  %v1417_v16 = vadd.f32 %v16462_v25, %v1220_v60  ;;  %v8022_v59 = vunpack.i.l.bf16 %v8021_v44  ;;  %v16464_v34 = vld [vmem:[#allocation257_spill] sm:$0xff]  ;;  %v4500_v17 = vrot.slane %v4374_v29, 1  ;;  %v1416_v19 = vadd.f32 %v16465_v62, %v1219_v40  ;;  %v16469_v14 = vld [vmem:[#allocation30_spill] sm:$0xff]  ;;  %v7524_v62 = vpop.permute.xlu1 %7523 }
 0x26a   : > { %16460 = vst [vmem:[#allocation150_spill] sm:$0xff] %v12875_v45  ;;  %v963_v49 = vadd.f32 %v16464_v34, %v16463_v7  ;;  %v964_v33 = vadd.f32 %v16467_v61, %v16466_v10  ;;  %v12890_v25 = vmul.f32 %v12634_v23, %v7519_v12  ;;  %v16470_v60 = vrot.slane %v16469_v14, 1  ;;  %v16471_v47 = vld [vmem:[#allocation46_spill] sm:$0xff] }
 0x26b   : > { %v1614_v36 = vadd.f32 %v1582_v9, %v1417_v16  ;;  %v16472_v45 = vrot.slane %v16471_v47, 1  ;;  %v16473_v30 = vld [vmem:[#allocation158_spill] sm:$0xff]  ;;  %v1587_v29 = vmul.f32 %v12860_v21, %v8022_v59  ;;  %v1613_v9 = vadd.f32 %v1581_v52, %v1416_v19  ;;  %v16486_v47 = vld [vmem:[#allocation235_spill] sm:$0xff] }
 0x26c   : > { %16468 = vst [vmem:[#allocation51_spill] sm:$0xff] %v12890_v25  ;;  %v1225_v34 = vadd.f32 %v16473_v30, %v963_v49  ;;  %v1588_v18 = vmul.f32 %v12860_v21, %v8023_v55  ;;  %v16474_v16 = vld [vmem:[#allocation154_spill] sm:$0xff]  ;;  %v16482_v49 = vld [vmem:[#allocation401_spill] sm:$0xff] }
 0x26d   : > { %v1848_v44 = vsel %vm1843_vm0, %v16472_v45, %v16470_v60  ;;  %v1226_v7 = vadd.f32 %v16474_v16, %v964_v33  ;;  %v16475_v23 = vmov %v16472_v45  ;;  %v16476_v12 = vld [vmem:[#allocation50_spill] sm:$0xff]  ;;  %v16480_v45 = vld [vmem:[#allocation55_spill] sm:$0xff] }
 0x26e   : > { %v1957_v40 = vadd.f32 %v1848_v44, %v1614_v36  ;;  %v16477_v10 = vrot.slane %v16476_v12, 1  ;;  %v16478_v14 = vld [vmem:[#allocation54_spill] sm:$0xff]  ;;  %v16481_v60 = vrot.slane %v16480_v45, 1  ;;  %v1422_v3 = vadd.f32 %v16482_v49, %v1225_v34  ;;  %v12926_v12 = vld [vmem:[%s15075_s1 + $0x16] ss:$0 sm:$0xff] }
 0x26f   : > { %v16479_v25 = vrot.slane %v16478_v14, 1  ;;  %v16483_v36 = vrot.slane %v12851_v26, 1  ;;  %v16485_v52 = vld [vmem:[#allocation398_spill] sm:$0xff]  ;;  %v16487_v44 = vrot.slane %v16486_v47, 1 }
 0x270   : > { %v1846_v61 = vsel %vm1843_vm0, %v16477_v10, %v16475_v23  ;;  %v1423_v33 = vadd.f32 %v16485_v52, %v1226_v7  ;;  %v1619_v34 = vadd.f32 %v1587_v29, %v1422_v3  ;;  %v7525_v10 = vunpack.i.l.bf16 %v7524_v62  ;;  %v16490_v7 = vld [vmem:[#allocation14_spill] sm:$0xff]  ;;  %v16492_v52 = vld [vmem:[#allocation151_spill] sm:$0xff] }
 0x271   : > { %v1861_v30 = vsel %vm1843_vm0, %v16481_v60, %v16479_v25  ;;  %v12915_v19 = vsel %vm1843_vm0, %v4500_v17, %v16483_v36  ;;  %v16488_v16 = vmov %v16479_v25  ;;  %v7526_v25 = vunpack.i.h.bf16 %v7524_v62  ;;  %v16489_v17 = vld [vmem:[#allocation69_spill] sm:$0xff] }
 0x272   : > { %16484 = vst [vmem:[#allocation146_spill] sm:$0xff] %v12915_v19  ;;  %v1863_v23 = vsel %vm1843_vm0, %v16488_v16, %v16487_v44  ;;  %v1958_v45 = vadd.f32 %v16489_v17, %v12538_v63  ;;  %v1959_v60 = vadd.f32 %v16490_v7, %v12517_v54  ;;  %v1956_v49 = vadd.f32 %v1846_v61, %v1613_v9  ;;  %v12946_v63 = vld [vmem:[%s15075_s1 + $0x1e] ss:$0 sm:$0xff] }
 0x273   : > { %v1620_v14 = vadd.f32 %v1588_v18, %v1423_v33  ;;  %v16491_v36 = vrot.slane %v9410_v56, 1  ;;  %v16493_v47 = vrot.slane %v16492_v52, 1  ;;  %v16494_v16 = vrot.slane %v12464_v43, 1  ;;  %v12954_v56 = vld [vmem:[%s15075_s1 + $0xe] ss:$0 sm:$0xff]  ;;  %v8026_v18 = vpop.permute.xlu0 %8025 }
 0x274   : > { %v16495_v3 = vrot.slane %v12484_v31, 1  ;;  %v12949_v54 = vmul.f32 %v12946_v63, %v8023_v55  ;;  %v12957_v29 = vmul.f32 %v7526_v25, %v12926_v12  ;;  %v16498_v31 = vld [vmem:[#allocation15_spill] sm:$0xff]  ;;  %v1962_v61 = vadd.f32 %v1861_v30, %v1619_v34 }
 0x275   : > { %v2160_v44 = vsel %vm1843_vm0, %v16493_v47, %v16491_v36  ;;  %v2268_v9 = vadd.f32 %v16498_v31, %v1959_v60  ;;  %v1963_v33 = vadd.f32 %v1863_v23, %v1620_v14  ;;  %v16499_v17 = vrot.slane %v11942_v57, 1  ;;  %v16502_v47 = vld [vmem:[#allocation418_spill] sm:$0xff]  ;;  %v16505_v23 = vld [vmem:[#allocation420_spill] sm:$0xff] }
 0x276   : > { %v2469_v28 = vsel %vm1843_vm0, %v16495_v3, %v16494_v16  ;;  %16496 = vst [vmem:[#allocation13_spill] sm:$0xff] %v12949_v54  ;;  %16497 = vst [vmem:[#allocation511_spill] sm:$0xff] %v12957_v29  ;;  %v2267_v62 = vadd.f32 %v2160_v44, %v1958_v45  ;;  %v16500_v7 = vmov %v16494_v16  ;;  %v4641_v36 = vmul.f32 %v7525_v10, %v12926_v12 }
 0x277   : > { %v2471_v55 = vsel %vm1843_vm0, %v16500_v7, %v16499_v17  ;;  %v16501_v52 = vrot.slane %v10864_v51, 1  ;;  %v16503_v16 = vrot.slane %v16502_v47, 1  ;;  %v12972_v45 = vmul.f32 %v12946_v63, %v8022_v59  ;;  %v16506_v17 = vld [vmem:[#allocation70_spill] sm:$0xff] }
 0x278   : > { %v2576_v60 = vadd.f32 %v2469_v28, %v2267_v62  ;;  %v2577_v30 = vadd.f32 %v2471_v55, %v2268_v9  ;;  %v12975_v34 = vadd.f32 %v16505_v23, %v1956_v49  ;;  %v12978_v57 = vadd.f32 %v11587_v24, %v1957_v40  ;;  %v16507_v7 = vld [vmem:[#allocation270_spill] sm:$0xff]  ;;  %v16509_v9 = vld [vmem:[#allocation267_spill] sm:$0xff]  ;;  %v7529_v40 = vpop.permute.xlu1 %7528 }
 0x279   : > { %v2170_v3 = vsel %vm1843_vm0, %v16503_v16, %v16501_v52  ;;  %16504 = vst [vmem:[#allocation388_spill] sm:$0xff] %v12972_v45  ;;  %v3201_v43 = vmul.f32 %v7526_v25, %v12954_v56  ;;  %v8028_v14 = vunpack.i.h.bf16 %v8026_v18  ;;  %v15368_v51 = vrot.slane %v12957_v29, 1  ;;  %v16508_v62 = vld [vmem:[#allocation62_spill] sm:$0xff]  ;;  %v16513_v23 = vld [vmem:[#allocation71_spill] sm:$0xff] }
 0x27a   : > { %v2839_v44 = vadd.f32 %v12204_v32, %v2577_v30  ;;  %v8027_v31 = vunpack.i.l.bf16 %v8026_v18  ;;  %v967_v59 = vadd.f32 %v16507_v7, %v16506_v17  ;;  %v12985_v52 = vadd.f32 %v2170_v3, %v1962_v61  ;;  %v16510_v47 = vld [vmem:[#allocation170_spill] sm:$0xff]  ;;  %v16511_v18 = vld [vmem:[#allocation63_spill] sm:$0xff] }
 0x27b   : > { %v3200_v28 = vmul.f32 %v7525_v10, %v12954_v56  ;;  %v4739_v49 = vrot.slane %v4641_v36, 1  ;;  %v968_v24 = vadd.f32 %v16509_v9, %v16508_v62  ;;  %v2838_v25 = vadd.f32 %v12207_v11, %v2576_v60  ;;  %v16515_v36 = vld [vmem:[#allocation165_spill] sm:$0xff]  ;;  %v16590_v29 = vld [vmem:[#allocation83_spill] sm:$0xff] }
 0x27c   : > { %v3036_v55 = vadd.f32 %v11801_v4, %v2839_v44  ;;  %v1229_v16 = vadd.f32 %v16510_v47, %v967_v59  ;;  %v1591_v32 = vmul.f32 %v12860_v21, %v8027_v31  ;;  %v16512_v30 = vrot.slane %v16511_v18, 1  ;;  %v16517_v4 = vld [vmem:[#allocation407_spill] sm:$0xff]  ;;  %v13007_v59 = vpop.permute.xlu0 %8030  ;;  %v16519_v9 = vld [vmem:[#allocation509_spill] sm:$0xff]  ;;  %v16525_v18 = vld [vmem:[#allocation430_spill] sm:$0xff] }
 0x27d   : > { %v16514_v61 = vrot.slane %v16513_v23, 1  ;;  %v1592_v10 = vmul.f32 %v12860_v21, %v8028_v14  ;;  %v1230_v17 = vadd.f32 %v16515_v36, %v968_v24  ;;  %v13002_v7 = vadd.f32 %v11787_v27, %v1963_v33  ;;  %v16521_v27 = vld [vmem:[#allocation404_spill] sm:$0xff] }
 0x27e   : > { %v13004_v11 = vadd.f32 %v3201_v43, %v3036_v55  ;;  %v1426_v60 = vadd.f32 %v16517_v4, %v1229_v16  ;;  %v7531_v44 = vunpack.i.h.bf16 %v7529_v40  ;;  %v13012_v62 = vsel %vm1843_vm0, %v4739_v49, %v15368_v51 }
 0x27f   : > { %v1871_v3 = vsel %vm1843_vm0, %v16514_v61, %v16512_v30  ;;  %16518 = vst [vmem:[#allocation257_spill] sm:$0xff] %v13012_v62  ;;  %v16520_v47 = vrot.slane %v16519_v9, 1  ;;  %v1427_v33 = vadd.f32 %v16521_v27, %v1230_v17  ;;  %v7530_v43 = vunpack.i.l.bf16 %v7529_v40  ;;  %v16633_v62 = vld [vmem:[#allocation528_spill] sm:$0xff] }
 0x280   : > { %16516 = vst [vmem:[#allocation58_spill] sm:$0xff] %v13004_v11  ;;  %v3035_v55 = vadd.f32 %v11826_v38, %v2838_v25  ;;  %v13023_v16 = vmul.f32 %v12946_v63, %v8028_v14  ;;  %v1623_v23 = vadd.f32 %v1591_v32, %v1426_v60  ;;  %v13026_v49 = vmul.f32 %v7531_v44, %v12926_v12  ;;  %v16529_v25 = vld [vmem:[#allocation80_spill] sm:$0xff] }
 0x281   : > { %v1873_v24 = vsel %vm1843_vm0, %v16512_v30, %v16520_v47  ;;  %v1624_v61 = vadd.f32 %v1592_v10, %v1427_v33  ;;  %v16524_v36 = vrot.slane %v16151_v41, 1  ;;  %v16526_v4 = vrot.slane %v16525_v18, 1  ;;  %v16531_v10 = vld [vmem:[#allocation82_spill] sm:$0xff]  ;;  %v16536_v33 = vld [vmem:[#allocation281_spill] sm:$0xff]  ;;  %v16706_v11 = vld [vmem:[#allocation572_spill] sm:$0xff] }
 0x282   : > { %16522 = vst [vmem:[#allocation389_spill] sm:$0xff] %v13023_v16  ;;  %16523 = vst [vmem:[#allocation52_spill] sm:$0xff] %v13026_v49  ;;  %v8033_v17 = vunpack.i.h.bf16 %v13007_v59  ;;  %v8032_v15 = vunpack.i.l.bf16 %v13007_v59  ;;  %v13035_v40 = vadd.f32 %v3200_v28, %v3035_v55  ;;  %v13038_v38 = vmul.f32 %v12946_v63, %v8027_v31  ;;  %v16535_v31 = vld [vmem:[#allocation87_spill] sm:$0xff]  ;;  %v16549_v16 = vld [vmem:[#allocation174_spill] sm:$0xff] }
 0x283   : > { %v2180_v9 = vsel %vm1843_vm0, %v16526_v4, %v16524_v36  ;;  %v4644_v14 = vmul.f32 %v7530_v43, %v12926_v12  ;;  %v16530_v32 = vrot.slane %v16529_v25, 1  ;;  %v16532_v60 = vrot.slane %v16531_v10, 1  ;;  %v7534_v36 = vpop.permute.xlu1 %7533  ;;  %v16540_v25 = vld [vmem:[#allocation181_spill] sm:$0xff] }
 0x284   : > { %16527 = vst [vmem:[#allocation254_spill] sm:$0xff] %v13035_v40  ;;  %16528 = vst [vmem:[#allocation30_spill] sm:$0xff] %v13038_v38  ;;  %v1967_v47 = vadd.f32 %v1873_v24, %v1624_v61  ;;  %v13047_v30 = vmul.f32 %v7531_v44, %v12954_v56  ;;  %v16533_v27 = vrot.slane %v11551_v1, 1  ;;  %v971_v55 = vadd.f32 %v16536_v33, %v16535_v31  ;;  %v16538_v24 = vld [vmem:[#allocation278_spill] sm:$0xff]  ;;  %v16541_v31 = vld [vmem:[#allocation177_spill] sm:$0xff] }
 0x285   : > { %v1881_v41 = vsel %vm1843_vm0, %v16532_v60, %v16530_v32  ;;  %v16534_v28 = vmov %v16530_v32  ;;  %v1966_v18 = vadd.f32 %v1871_v3, %v1623_v23  ;;  %v3202_v10 = vmul.f32 %v7530_v43, %v12954_v56  ;;  %v16537_v32 = vld [vmem:[#allocation75_spill] sm:$0xff]  ;;  %v16542_v23 = vld [vmem:[#allocation412_spill] sm:$0xff] }
 0x286   : > { %v1883_v59 = vsel %vm1843_vm0, %v16534_v28, %v16533_v27  ;;  %v972_v61 = vadd.f32 %v16538_v24, %v16537_v32  ;;  %v1596_v44 = vmul.f32 %v12860_v21, %v8033_v17  ;;  %v13062_v1 = vmul.f32 %v12946_v63, %v8033_v17  ;;  %v16543_v43 = vld [vmem:[#allocation84_spill] sm:$0xff]  ;;  %v16544_v32 = vld [vmem:[#allocation66_spill] sm:$0xff] }
 0x287   : > { %v1233_v60 = vadd.f32 %v16540_v25, %v971_v55  ;;  %v1595_v27 = vmul.f32 %v12860_v21, %v8032_v15  ;;  %v4744_v28 = vrot.slane %v4644_v14, 1  ;;  %v7536_v3 = vunpack.i.h.bf16 %v7534_v36  ;;  %v16545_v55 = vld [vmem:[#allocation45_spill] sm:$0xff]  ;;  %v16546_v14 = vld [vmem:[#allocation419_spill] sm:$0xff] }
 0x288   : > { %16539 = vst [vmem:[#allocation46_spill] sm:$0xff] %v13062_v1  ;;  %v1234_v33 = vadd.f32 %v16541_v31, %v972_v61  ;;  %v7535_v4 = vunpack.i.l.bf16 %v7534_v36  ;;  %v1964_v19 = vadd.f32 %v16543_v43, %v12590_v5  ;;  %v1965_v24 = vadd.f32 %v16544_v32, %v12576_v50  ;;  %7726 = vperm.xlu1 %7684, %v16546_v14   ;;  %v16547_v61 = vld [vmem:[#allocation166_spill] sm:$0xff]  ;;  %v16551_v43 = vld [vmem:[#allocation524_spill] sm:$0xff] }
 0x289   : > { %v1430_v51 = vadd.f32 %v16542_v23, %v1233_v60  ;;  %v13072_v26 = vadd.f32 %v2180_v9, %v1966_v18  ;;  %v13075_v17 = vadd.f32 %v3202_v10, %v12489_v13  ;;  %v16548_v31 = vrot.slane %v16547_v61, 1  ;;  %v8036_v18 = vpop.permute.xlu0 %8035 }
 0x28a   : > { %v1431_v25 = vadd.f32 %v16545_v55, %v1234_v33  ;;  %v16550_v60 = vrot.slane %v16549_v16, 1  ;;  %v2274_v54 = vadd.f32 %v16551_v43, %v1965_v24  ;;  %v16552_v50 = vrot.slane %v12528_v42, 1  ;;  %v16554_v33 = vld [vmem:[#allocation438_spill] sm:$0xff]  ;;  %v16556_v55 = vld [vmem:[#allocation439_spill] sm:$0xff] }
 0x28b   : > { %v1627_v23 = vadd.f32 %v1595_v27, %v1430_v51  ;;  %v16553_v9 = vrot.slane %v12534_v2, 1  ;;  %v16555_v32 = vrot.slane %v16554_v33, 1  ;;  %v16557_v14 = vrot.slane %v16556_v55, 1  ;;  %v16562_v2 = vld [vmem:[#allocation427_spill] sm:$0xff] }
 0x28c   : > { %v2175_v36 = vsel %vm1843_vm0, %v16550_v60, %v16548_v31  ;;  %v1628_v10 = vadd.f32 %v1596_v44, %v1431_v25  ;;  %v13096_v61 = vmul.f32 %v7536_v3, %v12926_v12  ;;  %v16561_v27 = vmov %v16552_v50  ;;  %v16566_v55 = vld [vmem:[#allocation559_spill] sm:$0xff] }
 0x28d   : > { %v2273_v5 = vadd.f32 %v2175_v36, %v1964_v19  ;;  %v2484_v13 = vsel %vm1843_vm0, %v16553_v9, %v16552_v50  ;;  %v2190_v16 = vsel %vm1843_vm0, %v16557_v14, %v16555_v32  ;;  %v16559_v19 = vld [vmem:[#allocation536_spill] sm:$0xff]  ;;  %v13104_v31 = vadd.f32 %v16562_v2, %v1967_v47 }
 0x28e   : > { %16558 = vst [vmem:[#allocation158_spill] sm:$0xff] %v13096_v61  ;;  %v16560_v51 = vrot.slane %v16559_v19, 1  ;;  %v16563_v44 = vrot.slane %v13026_v49, 1  ;;  %v4650_v36 = vmul.f32 %v7535_v4, %v12926_v12  ;;  %v1970_v43 = vadd.f32 %v1881_v41, %v1627_v23  ;;  %v16567_v19 = vld [vmem:[#allocation96_spill] sm:$0xff] }
 0x28f   : > { %v1971_v50 = vadd.f32 %v1883_v59, %v1628_v10  ;;  %v2582_v9 = vadd.f32 %v2484_v13, %v2273_v5  ;;  %v8037_v33 = vunpack.i.l.bf16 %v8036_v18  ;;  %v16565_v32 = vmov 0   ;;  %v16570_v59 = vld [vmem:[#allocation94_spill] sm:$0xff]  ;;  %v16572_v5 = vld [vmem:[#allocation97_spill] sm:$0xff] }
 0x290   : > { %v2486_v24 = vsel %vm1843_vm0, %v16561_v27, %v16560_v51  ;;  %v13109_v25 = vsel %vm1843_vm0, %v4744_v28, %v16563_v44  ;;  %7735 = vset.pattern.permute.xlu1 %v16565_v32  ;;  %v3207_v42 = vmul.f32 %v7536_v3, %v12954_v56  ;;  %v8038_v47 = vunpack.i.h.bf16 %v8036_v18  ;;  %v16568_v51 = vld [vmem:[#allocation293_spill] sm:$0xff]  ;;  %v16574_v3 = vld [vmem:[#allocation523_spill] sm:$0xff]  ;;  %v16576_v44 = vld [vmem:[#allocation288_spill] sm:$0xff] }
 0x291   : > { %16564 = vst [vmem:[#allocation154_spill] sm:$0xff] %v13109_v25  ;;  %v2583_v60 = vadd.f32 %v2486_v24, %v2274_v54  ;;  %v975_v27 = vadd.f32 %v16568_v51, %v16567_v19  ;;  %v13118_v28 = vmul.f32 %v12946_v63, %v8032_v15  ;;  %v3206_v41 = vmul.f32 %v7535_v4, %v12954_v56  ;;  %v16575_v18 = vld [vmem:[#allocation89_spill] sm:$0xff]  ;;  %v7539_v15 = vpop.permute.xlu1 %7538  ;;  %v16578_v54 = vld [vmem:[#allocation514_spill] sm:$0xff]  ;;  %v16579_v4 = vld [vmem:[#allocation560_spill] sm:$0xff] }
 0x292   : > { %v16571_v23 = vrot.slane %v16570_v59, 1  ;;  %v16573_v13 = vrot.slane %v16572_v5, 1  ;;  %v4754_v2 = vrot.slane %v4650_v36, 1  ;;  %v13131_v51 = vadd.f32 %v2190_v16, %v1970_v43  ;;  %v16581_v36 = vld [vmem:[#allocation188_spill] sm:$0xff]  ;;  %v16589_v25 = vld [vmem:[#allocation475_spill] sm:$0xff] }
 0x293   : > { %v2845_v14 = vadd.f32 %v16566_v55, %v2583_v60  ;;  %16569 = vst [vmem:[#allocation50_spill] sm:$0xff] %v13118_v28  ;;  %v976_v60 = vadd.f32 %v16576_v44, %v16575_v18  ;;  %v16577_v55 = vld [vmem:[#allocation192_spill] sm:$0xff]  ;;  %v13134_v49 = vadd.f32 %v16578_v54, %v1971_v50  ;;  %v2844_v1 = vadd.f32 %v16579_v4, %v2582_v9  ;;  %v16585_v44 = vld [vmem:[#allocation185_spill] sm:$0xff]  ;;  %v16588_v4 = vld [vmem:[#allocation414_spill] sm:$0xff] }
 0x294   : > { %v1891_v10 = vsel %vm1843_vm0, %v16573_v13, %v16571_v23  ;;  %v1237_v19 = vadd.f32 %v16577_v55, %v975_v27  ;;  %v1599_v5 = vmul.f32 %v12860_v21, %v8037_v33  ;;  %v16582_v13 = vld [vmem:[#allocation417_spill] sm:$0xff]  ;;  %v16583_v18 = vld [vmem:[#allocation176_spill] sm:$0xff]  ;;  %v16586_v16 = vrot.slane %v16585_v44, 1 }
 0x295   : > { %v3042_v24 = vadd.f32 %v16574_v3, %v2845_v14  ;;  %v1600_v14 = vmul.f32 %v12860_v21, %v8038_v47  ;;  %v1238_v23 = vadd.f32 %v16581_v36, %v976_v60  ;;  %v16584_v27 = vrot.slane %v16583_v18, 1  ;;  %v16587_v9 = vld [vmem:[#allocation93_spill] sm:$0xff]  ;;  %v16591_v60 = vld [vmem:[#allocation178_spill] sm:$0xff] }
 0x296   : > { %v1434_v3 = vadd.f32 %v16582_v13, %v1237_v19  ;;  %v7541_v50 = vunpack.i.h.bf16 %v7539_v15  ;;  %v7540_v54 = vunpack.i.l.bf16 %v7539_v15  ;;  %v1968_v55 = vadd.f32 %v16587_v9, %v12674_v0  ;;  %v16593_v19 = vld [vmem:[#allocation470_spill] sm:$0xff]  ;;  %v16595_v44 = vld [vmem:[#allocation525_spill] sm:$0xff]  ;;  %v16602_v9 = vld [vmem:[#allocation516_spill] sm:$0xff] }
 0x297   : > { %v13138_v45 = vadd.f32 %v3207_v42, %v3042_v24  ;;  %v2185_v43 = vsel %vm1843_vm0, %v16586_v16, %v16584_v27  ;;  %v1435_v42 = vadd.f32 %v16588_v4, %v1238_v23  ;;  %v1969_v28 = vadd.f32 %v16590_v29, %v16589_v25  ;;  %v16598_v0 = vld [vmem:[#allocation238_spill] sm:$0xff] }
 0x298   : > { %v1631_v24 = vadd.f32 %v1599_v5, %v1434_v3  ;;  %v16592_v36 = vrot.slane %v16591_v60, 1  ;;  %v16594_v13 = vrot.slane %v16593_v19, 1  ;;  %v3041_v38 = vadd.f32 %v16595_v44, %v2844_v1 }
 0x299   : > { %16580 = vst [vmem:[#allocation54_spill] sm:$0xff] %v13138_v45  ;;  %v16596_v27 = vrot.slane %v13096_v61, 1  ;;  %v16599_v16 = vrot.slane %v16598_v0, 1  ;;  %v16600_v5 = vrot.slane %v16570_v59, 1  ;;  %v2277_v29 = vadd.f32 %v2185_v43, %v1968_v55  ;;  %v16607_v55 = vld [vmem:[#allocation450_spill] sm:$0xff]  ;;  %v16609_v0 = vld [vmem:[#allocation452_spill] sm:$0xff] }
 0x29a   : > { %v2494_v18 = vsel %vm1843_vm0, %v16594_v13, %v16592_v36  ;;  %v1632_v25 = vadd.f32 %v1600_v14, %v1435_v42  ;;  %v13170_v3 = vmul.f32 %v7541_v50, %v12926_v12  ;;  %v2278_v4 = vadd.f32 %v16602_v9, %v1969_v28  ;;  %v16603_v36 = vld [vmem:[#allocation539_spill] sm:$0xff]  ;;  %v13178_v13 = vpop.permute.xlu0 %8040 }
 0x29b   : > { %v13162_v15 = vsel %vm1843_vm0, %v4754_v2, %v16596_v27  ;;  %v1893_v23 = vsel %vm1843_vm0, %v16600_v5, %v16599_v16  ;;  %v16604_v1 = vrot.slane %v16603_v36, 1  ;;  %v16605_v19 = vrot.slane %v16591_v60, 1  ;;  %v16615_v36 = vld [vmem:[#allocation111_spill] sm:$0xff] }
 0x29c   : > { %16597 = vst [vmem:[#allocation55_spill] sm:$0xff] %v13162_v15  ;;  %16601 = vst [vmem:[#allocation401_spill] sm:$0xff] %v13170_v3  ;;  %v1974_v44 = vadd.f32 %v1891_v10, %v1631_v24  ;;  %v2586_v27 = vadd.f32 %v2494_v18, %v2277_v29  ;;  %v4656_v59 = vmul.f32 %v7540_v54, %v12926_v12  ;;  %v16608_v42 = vrot.slane %v16607_v55, 1  ;;  %v16613_v24 = vld [vmem:[#allocation432_spill] sm:$0xff]  ;;  %v16614_v18 = vld [vmem:[#allocation563_spill] sm:$0xff] }
 0x29d   : > { %v2496_v2 = vsel %vm1843_vm0, %v16605_v19, %v16604_v1  ;;  %v13182_v43 = vmul.f32 %v12946_v63, %v8038_v47  ;;  %v1975_v14 = vadd.f32 %v1893_v23, %v1632_v25  ;;  %v16610_v28 = vrot.slane %v16609_v0, 1  ;;  %7737 = vperm.xlu1 %7735, %v16613_v24   ;;  %v16617_v1 = vld [vmem:[#allocation564_spill] sm:$0xff]  ;;  %v16618_v55 = vld [vmem:[#allocation527_spill] sm:$0xff] }
 0x29e   : > { %v2587_v5 = vadd.f32 %v2496_v2, %v2278_v4  ;;  %v13189_v60 = vadd.f32 %v3206_v41, %v3041_v38  ;;  %v13192_v9 = vmul.f32 %v12946_v63, %v8037_v33  ;;  %v3211_v10 = vmul.f32 %v7541_v50, %v12954_v56  ;;  %v16616_v4 = vld [vmem:[#allocation305_spill] sm:$0xff]  ;;  %v7544_v2 = vpop.permute.xlu1 %7543  ;;  %v16619_v0 = vld [vmem:[#allocation100_spill] sm:$0xff] }
 0x29f   : > { %16606 = vst [vmem:[#allocation398_spill] sm:$0xff] %v13182_v43  ;;  %v2200_v16 = vsel %vm1843_vm0, %v16610_v28, %v16608_v42  ;;  %v8043_v47 = vunpack.i.h.bf16 %v13178_v13  ;;  %v3210_v29 = vmul.f32 %v7540_v54, %v12954_v56  ;;  %v8042_v25 = vunpack.i.l.bf16 %v13178_v13  ;;  %v16620_v28 = vld [vmem:[#allocation303_spill] sm:$0xff]  ;;  %v16621_v54 = vld [vmem:[#allocation204_spill] sm:$0xff] }
 0x2a0   : > { %16611 = vst [vmem:[#allocation235_spill] sm:$0xff] %v13189_v60  ;;  %16612 = vst [vmem:[#allocation69_spill] sm:$0xff] %v13192_v9  ;;  %v2849_v23 = vadd.f32 %v16614_v18, %v2587_v5  ;;  %v979_v38 = vadd.f32 %v16616_v4, %v16615_v36  ;;  %v13202_v41 = vadd.f32 %v2200_v16, %v1974_v44  ;;  %v4764_v19 = vrot.slane %v4656_v59, 1  ;;  %v268_v43 = vld [vmem:[%s8542_s28 + $0x1d0] sm:$0x1]  ;;  %v16622_v36 = vld [vmem:[#allocation21_spill] sm:$0xff] }
 0x2a1   : > { %v2848_v50 = vadd.f32 %v16617_v1, %v2586_v27  ;;  %v980_v5 = vadd.f32 %v16620_v28, %v16619_v0  ;;  %v1603_v13 = vmul.f32 %v12860_v21, %v8042_v25  ;;  %v13213_v44 = vadd.f32 %v16622_v36, %v1975_v14  ;;  %v16623_v16 = vld [vmem:[#allocation107_spill] sm:$0xff]  ;;  %v16625_v33 = vld [vmem:[#allocation108_spill] sm:$0xff]  ;;  %v16627_v1 = vld [vmem:[#allocation513_spill] sm:$0xff] }
 0x2a2   : > { %v3046_v42 = vadd.f32 %v16618_v55, %v2849_v23  ;;  %v1241_v18 = vadd.f32 %v16621_v54, %v979_v38  ;;  %v16624_v4 = vrot.slane %v16623_v16, 1  ;;  %v16626_v27 = vrot.slane %v16625_v33, 1  ;;  %v16631_v28 = vld [vmem:[#allocation200_spill] sm:$0xff] }
 0x2a3   : > { %v16628_v61 = vrot.slane %v16627_v1, 1  ;;  %v1604_v38 = vmul.f32 %v12860_v21, %v8043_v47  ;;  %v1242_v54 = vadd.f32 %v16631_v28, %v980_v5  ;;  %v16632_v14 = vld [vmem:[#allocation428_spill] sm:$0xff]  ;;  %v7546_v9 = vunpack.i.h.bf16 %v7544_v2  ;;  %v16639_v28 = vld [vmem:[#allocation190_spill] sm:$0xff] }
 0x2a4   : > { %v1901_v59 = vsel %vm1843_vm0, %v16626_v27, %v16624_v4  ;;  %v16629_v23 = vmov %v16624_v4  ;;  %v13226_v0 = vadd.f32 %v3211_v10, %v3046_v42  ;;  %v1438_v36 = vadd.f32 %v16632_v14, %v1241_v18  ;;  %v271_v15 = vld [vmem:[%s8542_s28 + $0x1dc] sm:$0x1]  ;;  %v16634_v4 = vld [vmem:[#allocation27_spill] sm:$0xff]  ;;  %v8046_v18 = vpop.permute.xlu0 %8045 }
 0x2a5   : > { %v1903_v55 = vsel %vm1843_vm0, %v16629_v23, %v16628_v61  ;;  %v3045_v33 = vadd.f32 %v16633_v62, %v2848_v50  ;;  %v7545_v45 = vunpack.i.l.bf16 %v7544_v2  ;;  %v1629_v27 = vadd.f32 %v16634_v4, %v12691_v37  ;;  %v16637_v10 = vld [vmem:[#allocation424_spill] sm:$0xff]  ;;  %v16641_v62 = vld [vmem:[#allocation197_spill] sm:$0xff] }
 0x2a6   : > { %16630 = vst [vmem:[#allocation14_spill] sm:$0xff] %v13226_v0  ;;  %v3922_v1 = vunpack.c.l.bf16 %v268_v43  ;;  %v16635_v16 = vrot.slane %v13170_v3, 1  ;;  %v1439_v42 = vadd.f32 %v16637_v10, %v1242_v54  ;;  %v1635_v23 = vadd.f32 %v1603_v13, %v1438_v36  ;;  %v16643_v37 = vld [vmem:[#allocation113_spill] sm:$0xff] }
 0x2a7   : > { %v13241_v5 = vmul.f32 %v7546_v9, %v12926_v12  ;;  %v16640_v14 = vrot.slane %v16639_v28, 1  ;;  %v16642_v50 = vrot.slane %v16641_v62, 1  ;;  %v1972_v43 = vadd.f32 %v16643_v37, %v1629_v27  ;;  %v16650_v37 = vld [vmem:[#allocation461_spill] sm:$0xff] }
 0x2a8   : > { %v13237_v61 = vsel %vm1843_vm0, %v4764_v19, %v16635_v16  ;;  %v4662_v4 = vmul.f32 %v7545_v45, %v12926_v12  ;;  %v3923_v3 = vunpack.c.l.bf16 %v271_v15  ;;  %v1636_v19 = vadd.f32 %v1604_v38, %v1439_v42  ;;  %v16647_v38 = vld [vmem:[#allocation6_spill] sm:$0xff] }
 0x2a9   : > { %16636 = vst [vmem:[#allocation151_spill] sm:$0xff] %v13237_v61  ;;  %16638 = vst [vmem:[#allocation15_spill] sm:$0xff] %v13241_v5  ;;  %v2195_v2 = vsel %vm1843_vm0, %v16642_v50, %v16640_v14  ;;  %v1978_v16 = vadd.f32 %v1901_v59, %v1635_v23  ;;  %v16644_v13 = vrot.slane %v12653_v39, 1  ;;  %v16645_v36 = vrot.slane %v12658_v22, 1  ;;  %v16648_v59 = vld [vmem:[#allocation317_spill] sm:$0xff]  ;;  %v16652_v22 = vld [vmem:[#allocation462_spill] sm:$0xff] }
 0x2aa   : > { %v2281_v28 = vadd.f32 %v2195_v2, %v1972_v43  ;;  %v4774_v61 = vrot.slane %v4662_v4, 1  ;;  %v13256_v62 = vpack.i.bf16 %v3923_v3, %v3922_v1  ;;  %v8048_v14 = vunpack.i.h.bf16 %v8046_v18  ;;  %v16658_v43 = vld [vmem:[#allocation217_spill] sm:$0xff] }
 0x2ab   : > { %v2504_v10 = vsel %vm1843_vm0, %v16645_v36, %v16644_v13  ;;  %v13259_v27 = vmul.f32 %v12946_v63, %v8043_v47  ;;  %v1979_v50 = vadd.f32 %v1903_v55, %v1636_v19  ;;  %v8047_v15 = vunpack.i.l.bf16 %v8046_v18  ;;  %v16656_v18 = vld [vmem:[#allocation43_spill] sm:$0xff]  ;;  %v7549_v19 = vpop.permute.xlu1 %7548 }
 0x2ac   : > { %v983_v42 = vadd.f32 %v16648_v59, %v16647_v38  ;;  %v13263_v23 = vadd.f32 %v3210_v29, %v3045_v33  ;;  %v16651_v54 = vrot.slane %v16650_v37, 1  ;;  %v16653_v0 = vrot.slane %v16652_v22, 1  ;;  %7742 = vperm.xlu1 %7735, %v13256_v62   ;;  %v16657_v29 = vld [vmem:[#allocation313_spill] sm:$0xff]  ;;  %v16665_v38 = vld [vmem:[#allocation112_spill] sm:$0xff] }
 0x2ad   : > { %16646 = vst [vmem:[#allocation418_spill] sm:$0xff] %v13259_v27  ;;  %v13271_v3 = vmul.f32 %v12946_v63, %v8042_v25  ;;  %v2590_v1 = vadd.f32 %v2504_v10, %v2281_v28  ;;  %v13275_v47 = vmul.f32 %v7546_v9, %v12954_v56  ;;  %v3214_v55 = vmul.f32 %v7545_v45, %v12954_v56  ;;  %v16663_v10 = vld [vmem:[#allocation123_spill] sm:$0xff]  ;;  %v16674_v27 = vld [vmem:[#allocation248_spill] sm:$0xff] }
 0x2ae   : > { %16649 = vst [vmem:[#allocation420_spill] sm:$0xff] %v13263_v23  ;;  %v2210_v2 = vsel %vm1843_vm0, %v16653_v0, %v16651_v54  ;;  %v984_v33 = vadd.f32 %v16657_v29, %v16656_v18  ;;  %v1245_v4 = vadd.f32 %v16658_v43, %v983_v42  ;;  %v16659_v0 = vrot.slane %v13241_v5, 1  ;;  %v16661_v54 = vld [vmem:[#allocation118_spill] sm:$0xff]  ;;  %v16669_v29 = vld [vmem:[#allocation488_spill] sm:$0xff] }
 0x2af   : > { %16654 = vst [vmem:[#allocation70_spill] sm:$0xff] %v13271_v3  ;;  %16655 = vst [vmem:[#allocation270_spill] sm:$0xff] %v13275_v47  ;;  %v13281_v13 = vadd.f32 %v2210_v2, %v1978_v16  ;;  %v16662_v36 = vrot.slane %v16661_v54, 1  ;;  %v16664_v9 = vrot.slane %v16663_v10, 1  ;;  %v1608_v45 = vmul.f32 %v12860_v21, %v8048_v14  ;;  %v16667_v16 = vld [vmem:[#allocation211_spill] sm:$0xff]  ;;  %v16677_v3 = vld [vmem:[#allocation44_spill] sm:$0xff] }
 0x2b0   : > { %v13286_v25 = vsel %vm1843_vm0, %v4774_v61, %v16659_v0  ;;  %v13295_v59 = vadd.f32 %v16665_v38, %v1979_v50  ;;  %v13298_v42 = vmul.f32 %v12946_v63, %v8048_v14  ;;  %v1246_v37 = vadd.f32 %v16667_v16, %v984_v33  ;;  %v16668_v61 = vld [vmem:[#allocation570_spill] sm:$0xff]  ;;  %v16670_v0 = vld [vmem:[#allocation12_spill] sm:$0xff]  ;;  %v16686_v47 = vld [vmem:[#allocation207_spill] sm:$0xff] }
 0x2b1   : > { %16660 = vst [vmem:[#allocation62_spill] sm:$0xff] %v13286_v25  ;;  %v1911_v28 = vsel %vm1843_vm0, %v16664_v9, %v16662_v36  ;;  %v1607_v22 = vmul.f32 %v12860_v21, %v8047_v15  ;;  %v2852_v2 = vadd.f32 %v16668_v61, %v2590_v1  ;;  %v7551_v18 = vunpack.i.h.bf16 %v7549_v19  ;;  %v16671_v36 = vld [vmem:[#allocation486_spill] sm:$0xff]  ;;  %v16672_v9 = vld [vmem:[#allocation440_spill] sm:$0xff] }
 0x2b2   : > { %16666 = vst [vmem:[#allocation267_spill] sm:$0xff] %v13298_v42  ;;  %v1633_v43 = vadd.f32 %v16669_v29, %v12745_v58  ;;  %v1634_v10 = vadd.f32 %v16671_v36, %v16670_v0  ;;  %v1442_v5 = vadd.f32 %v16672_v9, %v1245_v4  ;;  %v16673_v50 = vld [vmem:[#allocation436_spill] sm:$0xff]  ;;  %v16675_v14 = vrot.slane %v16674_v27, 1  ;;  %v16679_v61 = vld [vmem:[#allocation466_spill] sm:$0xff]  ;;  %v16683_v36 = vld [vmem:[#allocation17_spill] sm:$0xff] }
 0x2b3   : > { %v1443_v38 = vadd.f32 %v16673_v50, %v1246_v37  ;;  %v16676_v42 = vrot.slane %v16661_v54, 1  ;;  %v7550_v16 = vunpack.i.l.bf16 %v7549_v19  ;;  %v16678_v1 = vrot.slane %v16677_v3, 1  ;;  %v16682_v0 = vld [vmem:[#allocation126_spill] sm:$0xff]  ;;  %v16684_v50 = vld [vmem:[#allocation203_spill] sm:$0xff] }
 0x2b4   : > { %v16680_v25 = vrot.slane %v16679_v61, 1  ;;  %v13320_v29 = vmul.f32 %v12946_v63, %v8047_v15  ;;  %v1976_v4 = vadd.f32 %v16682_v0, %v1633_v43  ;;  %v1977_v37 = vadd.f32 %v16683_v36, %v1634_v10  ;;  %v16688_v3 = vld [vmem:[#allocation206_spill] sm:$0xff]  ;;  %v16690_v61 = vld [vmem:[#allocation365_spill] sm:$0xff] }
 0x2b5   : > { %v1913_v33 = vsel %vm1843_vm0, %v16676_v42, %v16675_v14  ;;  %v1639_v9 = vadd.f32 %v1607_v22, %v1442_v5  ;;  %v1640_v27 = vadd.f32 %v1608_v45, %v1443_v38  ;;  %v16685_v54 = vrot.slane %v16684_v50, 1  ;;  %v16694_v5 = vld [vmem:[#allocation543_spill] sm:$0xff]  ;;  %v8051_v38 = vpop.permute.xlu0 %8050  ;;  %v16697_v50 = vld [vmem:[#allocation132_spill] sm:$0xff] }
 0x2b6   : > { %v2220_v58 = vsel %vm1843_vm0, %v16680_v25, %v16678_v1  ;;  %16681 = vst [vmem:[#allocation170_spill] sm:$0xff] %v13320_v29  ;;  %v16687_v42 = vrot.slane %v16686_v47, 1  ;;  %v16689_v14 = vrot.slane %v16688_v3, 1  ;;  %v16691_v23 = vrot.slane %v16690_v61, 1  ;;  %v16693_v1 = vld [vmem:[#allocation18_spill] sm:$0xff]  ;;  %v16701_v61 = vld [vmem:[#allocation533_spill] sm:$0xff] }
 0x2b7   : > { %v13335_v15 = vmul.f32 %v7551_v18, %v12926_v12  ;;  %v2286_v10 = vadd.f32 %v16693_v1, %v1977_v37  ;;  %v16695_v45 = vrot.slane %v16694_v5, 1  ;;  %v1983_v0 = vadd.f32 %v1913_v33, %v1640_v27  ;;  %v16702_v3 = vld [vmem:[#allocation442_spill] sm:$0xff]  ;;  %v16703_v33 = vld [vmem:[#allocation131_spill] sm:$0xff]  ;;  %v16704_v27 = vld [vmem:[#allocation329_spill] sm:$0xff] }
 0x2b8   : > { %v2205_v19 = vsel %vm1843_vm0, %v16687_v42, %v16685_v54  ;;  %v2514_v25 = vsel %vm1843_vm0, %v16691_v23, %v16689_v14  ;;  %v16696_v22 = vmov %v16689_v14  ;;  %v4668_v36 = vmul.f32 %v7550_v16, %v12926_v12  ;;  %v16699_v42 = vld [vmem:[#allocation134_spill] sm:$0xff]  ;;  %7752 = vperm.xlu1 %7735, %v16702_v3  }
 0x2b9   : > { %16692 = vst [vmem:[#allocation63_spill] sm:$0xff] %v13335_v15  ;;  %v2285_v43 = vadd.f32 %v2205_v19, %v1976_v4  ;;  %v2516_v47 = vsel %vm1843_vm0, %v16696_v22, %v16695_v45  ;;  %v16698_v54 = vrot.slane %v16697_v50, 1  ;;  %v16700_v23 = vrot.slane %v16699_v42, 1 }
 0x2ba   : > { %v3049_v4 = vadd.f32 %v16701_v61, %v2852_v2  ;;  %v3219_v37 = vmul.f32 %v7551_v18, %v12954_v56  ;;  %v2595_v1 = vadd.f32 %v2516_v47, %v2286_v10  ;;  %v1982_v5 = vadd.f32 %v1911_v28, %v1639_v9  ;;  %v16708_v2 = vld [vmem:[#allocation325_spill] sm:$0xff]  ;;  %v7554_v18 = vpop.permute.xlu1 %7553  ;;  %v16710_v9 = vld [vmem:[#allocation231_spill] sm:$0xff] }
 0x2bb   : > { %v1921_v14 = vsel %vm1843_vm0, %v16700_v23, %v16698_v54  ;;  %v2594_v19 = vadd.f32 %v2514_v25, %v2285_v43  ;;  %v8053_v45 = vunpack.i.h.bf16 %v8051_v38  ;;  %v8052_v22 = vunpack.i.l.bf16 %v8051_v38  ;;  %v16707_v23 = vld [vmem:[#allocation129_spill] sm:$0xff]  ;;  %v16711_v38 = vld [vmem:[#allocation535_spill] sm:$0xff] }
 0x2bc   : > { %v987_v29 = vadd.f32 %v16704_v27, %v16703_v33  ;;  %v13354_v60 = vadd.f32 %v3214_v55, %v3049_v4  ;;  %v2857_v54 = vadd.f32 %v16706_v11, %v2595_v1  ;;  %v988_v61 = vadd.f32 %v16708_v2, %v16707_v23  ;;  %v16709_v25 = vld [vmem:[#allocation573_spill] sm:$0xff]  ;;  %v16715_v11 = vld [vmem:[#allocation471_spill] sm:$0xff] }
 0x2bd   : > { %v2856_v43 = vadd.f32 %v16709_v25, %v2594_v19  ;;  %v4784_v28 = vrot.slane %v4668_v36, 1  ;;  %v1611_v47 = vmul.f32 %v12860_v21, %v8052_v22  ;;  %v1612_v55 = vmul.f32 %v12860_v21, %v8053_v45  ;;  %v16712_v4 = vld [vmem:[#allocation225_spill] sm:$0xff] }
 0x2be   : > { %16705 = vst [vmem:[#allocation71_spill] sm:$0xff] %v13354_v60  ;;  %v1249_v10 = vadd.f32 %v16710_v9, %v987_v29  ;;  %v3054_v40 = vadd.f32 %v16711_v38, %v2857_v54  ;;  %v1250_v33 = vadd.f32 %v16712_v4, %v988_v61  ;;  %v16713_v27 = vld [vmem:[#allocation469_spill] sm:$0xff]  ;;  %v16716_v1 = vrot.slane %v16715_v11, 1  ;;  %v16719_v54 = vld [vmem:[#allocation16_spill] sm:$0xff]  ;;  %v16722_v4 = vld [vmem:[#allocation446_spill] sm:$0xff] }
 0x2bf   : > { %v16714_v42 = vrot.slane %v16713_v27, 1  ;;  %v13371_v2 = vadd.f32 %v2220_v58, %v1982_v5  ;;  %v3218_v36 = vmul.f32 %v7550_v16, %v12954_v56  ;;  %v16717_v19 = vld [vmem:[#allocation449_spill] sm:$0xff]  ;;  %v7556_v25 = vunpack.i.h.bf16 %v7554_v18  ;;  %v16723_v60 = vld [vmem:[#allocation531_spill] sm:$0xff] }
 0x2c0   : > { %v1446_v29 = vadd.f32 %v16717_v19, %v1249_v10  ;;  %v13375_v9 = vadd.f32 %v3219_v37, %v3054_v40  ;;  %v16720_v38 = vrot.slane %v16719_v54, 1  ;;  %v16721_v21 = vrot.slane %v16697_v50, 1  ;;  %v16726_v40 = vld [vmem:[#allocation494_spill] sm:$0xff]  ;;  %v8056_v10 = vpop.permute.xlu0 %8055  ;;  %v16730_v54 = vld [vmem:[#allocation141_spill] sm:$0xff] }
 0x2c1   : > { %v2230_v23 = vsel %vm1843_vm0, %v16716_v1, %v16714_v42  ;;  %v1447_v27 = vadd.f32 %v16722_v4, %v1250_v33  ;;  %v7555_v11 = vunpack.i.l.bf16 %v7554_v18  ;;  %v13384_v42 = vadd.f32 %v16723_v60, %v1983_v0  ;;  %v16727_v1 = vld [vmem:[#allocation537_spill] sm:$0xff]  ;;  %v13400_v60 = vpop.permute.xlu1 %7558 }
 0x2c2   : > { %16718 = vst [vmem:[#allocation165_spill] sm:$0xff] %v13375_v9  ;;  %v1923_v61 = vsel %vm1843_vm0, %v16721_v21, %v16720_v38  ;;  %v16724_v58 = vrot.slane %v13335_v15, 1  ;;  %v1643_v5 = vadd.f32 %v1611_v47, %v1446_v29  ;;  %v1637_v37 = vadd.f32 %v16726_v40, %v12825_v6  ;;  %v16731_v38 = vld [vmem:[#allocation214_spill] sm:$0xff]  ;;  %v16733_v21 = vld [vmem:[#allocation220_spill] sm:$0xff]  ;;  %v16755_v15 = vld [vmem:[#allocation137_spill] sm:$0xff] }
 0x2c3   : > { %v3053_v50 = vadd.f32 %v16727_v1, %v2856_v43  ;;  %v13395_v19 = vmul.f32 %v12946_v63, %v8053_v45  ;;  %v1644_v33 = vadd.f32 %v1612_v55, %v1447_v27  ;;  %v13398_v18 = vmul.f32 %v7556_v25, %v12926_v12  ;;  %v16738_v1 = vld [vmem:[#allocation519_spill] sm:$0xff] }
 0x2c4   : > { %v13389_v16 = vsel %vm1843_vm0, %v4784_v28, %v16724_v58  ;;  %v1986_v0 = vadd.f32 %v1921_v14, %v1643_v5  ;;  %v1980_v28 = vadd.f32 %v16730_v54, %v1637_v37  ;;  %v4674_v47 = vmul.f32 %v7555_v11, %v12926_v12  ;;  %v16737_v37 = vld [vmem:[#allocation451_spill] sm:$0xff] }
 0x2c5   : > { %16725 = vst [vmem:[#allocation407_spill] sm:$0xff] %v13389_v16  ;;  %16728 = vst [vmem:[#allocation509_spill] sm:$0xff] %v13395_v19  ;;  %v1987_v29 = vadd.f32 %v1923_v61, %v1644_v33  ;;  %v16732_v6 = vrot.slane %v16731_v38, 1  ;;  %v16734_v4 = vrot.slane %v16733_v21, 1  ;;  %v8058_v45 = vunpack.i.h.bf16 %v8056_v10  ;;  %7762 = vperm.xlu1 %7735, %v16737_v37   ;;  %v16771_v16 = vld [vmem:[#allocation541_spill] sm:$0xff] }
 0x2c6   : > { %16729 = vst [vmem:[#allocation404_spill] sm:$0xff] %v13398_v18  ;;  %v8057_v58 = vunpack.i.l.bf16 %v8056_v10  ;;  %v13409_v55 = vadd.f32 %v2230_v23, %v1986_v0  ;;  %v16735_v40 = vrot.slane %v12764_v46, 1  ;;  %v16736_v14 = vrot.slane %v12779_v8, 1 }
 0x2c7   : > { %v2215_v43 = vsel %vm1843_vm0, %v16734_v4, %v16732_v6  ;;  %v7561_v61 = vunpack.i.h.bf16 %v13400_v60  ;;  %v13419_v33 = vadd.f32 %v16738_v1, %v1987_v29  ;;  %v13422_v54 = vmul.f32 %v12946_v63, %v8052_v22  ;;  %v16749_v1 = vld [vmem:[#allocation229_spill] sm:$0xff] }
 0x2c8   : > { %v2289_v27 = vadd.f32 %v2215_v43, %v1980_v28  ;;  %v2524_v5 = vsel %vm1843_vm0, %v16736_v14, %v16735_v40  ;;  %v2377_v23 = vmul.f32 %v12761_v20, %v8058_v45  ;;  %v5868_v10 = vmul.f32 %v12775_v53, %v8058_v45  ;;  %v16745_v40 = vld [vmem:[#allocation251_spill] sm:$0xff] }
 0x2c9   : > { %16739 = vst [vmem:[#allocation430_spill] sm:$0xff] %v13422_v54  ;;  %v13426_v0 = vadd.f32 %v3218_v36, %v3053_v50  ;;  %v15377_v8 = vrot.slane %v13398_v18, 1  ;;  %v4794_v28 = vrot.slane %v4674_v47, 1  ;;  %v2374_v38 = vmul.f32 %v12761_v20, %v8057_v58  ;;  %v16743_v36 = vld [vmem:[#allocation500_spill] sm:$0xff] }
 0x2ca   : > { %v13431_v6 = vmul.f32 %v7556_v25, %v12954_v56  ;;  %v2598_v21 = vadd.f32 %v2524_v5, %v2289_v27  ;;  %v2480_v29 = vrot.slane %v2377_v23, 1  ;;  %v5865_v4 = vmul.f32 %v12775_v53, %v8057_v58  ;;  %v16747_v27 = vld [vmem:[#allocation226_spill] sm:$0xff] }
 0x2cb   : > { %16740 = vst [vmem:[#allocation80_spill] sm:$0xff] %v13426_v0  ;;  %v5969_v63 = vrot.slane %v5868_v10, 1  ;;  %v2475_v22 = vrot.slane %v2374_v38, 1  ;;  %v13435_v43 = vmul.f32 %v7561_v61, %v12926_v12  ;;  %v1641_v50 = vadd.f32 %v16743_v36, %v12878_v48  ;;  %v16751_v10 = vld [vmem:[#allocation11_spill] sm:$0xff]  ;;  %v16781_v0 = vld [vmem:[#allocation289_spill] sm:$0xff] }
 0x2cc   : > { %16741 = vst [vmem:[#allocation82_spill] sm:$0xff] %v13431_v6  ;;  %v16744_v45 = vmov 1   ;;  %v3222_v47 = vmul.f32 %v7555_v11, %v12954_v56  ;;  %v16746_v14 = vrot.slane %v16745_v40, 1  ;;  %v16748_v5 = vrot.slane %v16747_v27, 1  ;;  %v16753_v27 = vld [vmem:[#allocation34_spill] sm:$0xff] }
 0x2cd   : > { %16742 = vst [vmem:[#allocation87_spill] sm:$0xff] %v13435_v43  ;;  %7942 = vset.pattern.permute.xlu1 %v16744_v45  ;;  %v16750_v58 = vrot.slane %v16749_v1, 1  ;;  %v1642_v38 = vadd.f32 %v16751_v10, %v12871_v35  ;;  %v13454_v48 = vsel %vm1843_vm0, %v4794_v28, %v15377_v8  ;;  %v3227_v36 = vmul.f32 %v7561_v61, %v12954_v56  ;;  %v16756_v10 = vld [vmem:[#allocation252_spill] sm:$0xff]  ;;  %v16759_v8 = vld [vmem:[#allocation241_spill] sm:$0xff] }
 0x2ce   : > { %v2481_v25 = vsel %vm1843_vm0, %v16746_v14, %v2480_v29  ;;  %16752 = vst [vmem:[#allocation281_spill] sm:$0xff] %v13454_v48  ;;  %v7560_v29 = vunpack.i.l.bf16 %v13400_v60  ;;  %v8061_v14 = vpop.permute.xlu0 %8060  ;;  %v2860_v1 = vadd.f32 %v16753_v27, %v2598_v21  ;;  %v5964_v19 = vrot.slane %v5865_v4, 1  ;;  %v16761_v60 = vld [vmem:[#allocation507_spill] sm:$0xff]  ;;  %v16769_v61 = vld [vmem:[#allocation361_spill] sm:$0xff] }
 0x2cf   : > { %v2225_v23 = vsel %vm1843_vm0, %v16750_v58, %v16748_v5  ;;  %v13457_v11 = vadd.f32 %v2481_v25, %v13002_v7  ;;  %v16754_v5 = vld [vmem:[#allocation147_spill] sm:$0xff]  ;;  %v1985_v35 = vadd.f32 %v16755_v15, %v1642_v38  ;;  %v16757_v18 = vrot.slane %v16756_v10, 1 }
 0x2d0   : > { %v1984_v58 = vadd.f32 %v16754_v5, %v1641_v50  ;;  %v16760_v7 = vrot.slane %v16759_v8, 1  ;;  %v16762_v54 = vrot.slane %v16761_v60, 1  ;;  %v16763_v48 = vld [vmem:[#allocation379_spill] sm:$0xff]  ;;  %v13478_v50 = vpop.permute.xlu1 %7564  ;;  %v8063_v5 = vunpack.i.h.bf16 %v8061_v14 }
 0x2d1   : > { %v13467_v28 = vsel %vm1843_vm0, %v16757_v18, %v5969_v63  ;;  %v16764_v21 = vrot.slane %v16763_v48, 1  ;;  %v16765_v38 = vld [vmem:[#allocation19_spill] sm:$0xff]  ;;  %v16766_v18 = vld [vmem:[#allocation400_spill] sm:$0xff]  ;;  %v4680_v10 = vmul.f32 %v7560_v29, %v12926_v12  ;;  %v16782_v9 = vrot.slane %v16781_v0, 1 }
 0x2d2   : > { %16758 = vst [vmem:[#allocation75_spill] sm:$0xff] %v13467_v28  ;;  %v2476_v25 = vsel %vm1843_vm0, %v16760_v7, %v2475_v22  ;;  %v2293_v15 = vadd.f32 %v2225_v23, %v1984_v58  ;;  %v2294_v27 = vadd.f32 %v16765_v38, %v1985_v35  ;;  %v16767_v63 = vrot.slane %v16766_v18, 1  ;;  %v16770_v28 = vld [vmem:[#allocation480_spill] sm:$0xff]  ;;  %v16772_v23 = vld [vmem:[#allocation38_spill] sm:$0xff] }
 0x2d3   : > { %v2534_v4 = vsel %vm1843_vm0, %v16764_v21, %v16762_v54  ;;  %v16768_v8 = vmov %v16762_v54  ;;  %v8062_v7 = vunpack.i.l.bf16 %v8061_v14  ;;  %v1630_v48 = vadd.f32 %v16770_v28, %v16769_v61  ;;  %7944 = vperm.xlu1 %7942, %v16772_v23   ;;  %v16773_v35 = vld [vmem:[#allocation242_spill] sm:$0xff]  ;;  %v16777_v28 = vld [vmem:[#allocation156_spill] sm:$0xff] }
 0x2d4   : > { %v2536_v22 = vsel %vm1843_vm0, %v16768_v8, %v16767_v63  ;;  %v3057_v54 = vadd.f32 %v16771_v16, %v2860_v1  ;;  %v2602_v21 = vadd.f32 %v2534_v4, %v2293_v15  ;;  %v2395_v58 = vmul.f32 %v12761_v20, %v8063_v5  ;;  %v16776_v63 = vld [vmem:[#allocation250_spill] sm:$0xff]  ;;  %v16778_v16 = vld [vmem:[#allocation579_spill] sm:$0xff] }
 0x2d5   : > { %v2603_v6 = vadd.f32 %v2536_v22, %v2294_v27  ;;  %v16774_v38 = vrot.slane %v16773_v35, 1  ;;  %v5886_v18 = vmul.f32 %v12775_v53, %v8063_v5  ;;  %v1973_v14 = vadd.f32 %v16776_v63, %v1630_v48  ;;  %v8066_v27 = vpop.permute.xlu0 %8065  ;;  %v16779_v5 = vld [vmem:[#allocation580_spill] sm:$0xff]  ;;  %v16780_v48 = vld [vmem:[#allocation542_spill] sm:$0xff] }
 0x2d6   : > { %v2392_v8 = vmul.f32 %v12761_v20, %v8062_v7  ;;  %v2579_v61 = vadd.f32 %v2476_v25, %v16777_v28  ;;  %v2510_v4 = vrot.slane %v2395_v58, 1  ;;  %v5883_v15 = vmul.f32 %v12775_v53, %v8062_v7 }
 0x2d7   : > { %v13495_v60 = vsel %vm1843_vm0, %v16774_v38, %v5964_v19  ;;  %v2865_v1 = vadd.f32 %v16778_v16, %v2603_v6  ;;  %v13503_v22 = vadd.f32 %v3222_v47, %v3057_v54  ;;  %v4804_v23 = vrot.slane %v4680_v10, 1  ;;  %v7575_v38 = vpop.permute.xlu1 %7574  ;;  %v16783_v6 = vld [vmem:[#allocation529_spill] sm:$0xff]  ;;  %7954 = vperm.xlu1 %7942, %v13256_v62  }
 0x2d8   : > { %16775 = vst [vmem:[#allocation278_spill] sm:$0xff] %v13495_v60  ;;  %v2505_v35 = vrot.slane %v2392_v8, 1  ;;  %v7567_v19 = vunpack.i.h.bf16 %v13478_v50  ;;  %v2864_v60 = vadd.f32 %v16779_v5, %v2602_v21  ;;  %v2511_v25 = vsel %vm1843_vm0, %v16782_v9, %v2510_v4 }
 0x2d9   : > { %v3062_v63 = vadd.f32 %v16780_v48, %v2865_v1  ;;  %v2282_v58 = vadd.f32 %v16783_v6, %v1973_v14  ;;  %v3226_v7 = vmul.f32 %v7560_v29, %v12954_v56  ;;  %v5999_v28 = vrot.slane %v5886_v18, 1  ;;  %v16787_v29 = vld [vmem:[#allocation505_spill] sm:$0xff]  ;;  %v16788_v18 = vld [vmem:[#allocation492_spill] sm:$0xff] }
 0x2da   : > { %v16784_v47 = vrot.slane %v12653_v39, 1  ;;  %v13517_v54 = vadd.f32 %v2511_v25, %v13213_v44  ;;  %v5994_v16 = vrot.slane %v5883_v15, 1  ;;  %v16785_v1 = vrot.slane %v13435_v43, 1  ;;  %v16789_v39 = vld [vmem:[#allocation544_spill] sm:$0xff]  ;;  %v13535_v44 = vld [vmem:[%s15075_s1 + $0x10] ss:$0 sm:$0xff] }
 0x2db   : > { %v13519_v8 = vadd.f32 %v3227_v36, %v3062_v63  ;;  %v8068_v14 = vunpack.i.h.bf16 %v8066_v27  ;;  %v8067_v4 = vunpack.i.l.bf16 %v8066_v27  ;;  %v1638_v5 = vadd.f32 %v16788_v18, %v16787_v29  ;;  %v16791_v15 = vld [vmem:[#allocation555_spill] sm:$0xff]  ;;  %v16792_v63 = vld [vmem:[#allocation285_spill] sm:$0xff]  ;;  %v16796_v29 = vld [vmem:[#allocation594_spill] sm:$0xff] }
 0x2dc   : > { %v2506_v10 = vsel %vm1843_vm0, %v16784_v47, %v2505_v35  ;;  %v13524_v9 = vsel %vm1843_vm0, %v4804_v23, %v16785_v1  ;;  %v3061_v48 = vadd.f32 %v16789_v39, %v2864_v60  ;;  %v16790_v35 = vld [vmem:[#allocation569_spill] sm:$0xff]  ;;  %v13538_v36 = vmul.f32 %v13535_v44, %v7567_v19  ;;  %v8071_v23 = vpop.permute.xlu0 %8070  ;;  %v16795_v47 = vld [vmem:[#allocation124_spill] sm:$0xff]  ;;  %v7580_v1 = vpop.permute.xlu1 %7579 }
 0x2dd   : > { %v2591_v21 = vadd.f32 %v2506_v10, %v2282_v58  ;;  %16786 = vst [vmem:[#allocation181_spill] sm:$0xff] %v13524_v9  ;;  %v2841_v27 = vadd.f32 %v16791_v15, %v2579_v61  ;;  %v16793_v25 = vrot.slane %v16792_v63, 1  ;;  %v2407_v58 = vmul.f32 %v12761_v20, %v8068_v14  ;;  %v16817_v9 = vld [vmem:[#allocation40_spill] sm:$0xff] }
 0x2de   : > { %v1981_v10 = vadd.f32 %v16795_v47, %v1638_v5  ;;  %v16797_v19 = vrot.slane %v16796_v29, 1  ;;  %v7566_v61 = vunpack.i.l.bf16 %v13478_v50  ;;  %v7577_v39 = vunpack.i.h.bf16 %v7575_v38  ;;  %v16801_v5 = vld [vmem:[#allocation22_spill] sm:$0xff] }
 0x2df   : > { %v13530_v6 = vadd.f32 %v16790_v35, %v2591_v21  ;;  %v13545_v60 = vsel %vm1843_vm0, %v16793_v25, %v5999_v28  ;;  %v2404_v21 = vmul.f32 %v12761_v20, %v8067_v4  ;;  %v16799_v35 = vld [vmem:[#allocation586_spill] sm:$0xff]  ;;  %v2530_v63 = vrot.slane %v2407_v58, 1 }
 0x2e0   : > { %16794 = vst [vmem:[#allocation177_spill] sm:$0xff] %v13545_v60  ;;  %v13553_v18 = vsel %vm1843_vm0, %v16797_v19, %v5994_v16  ;;  %v3038_v15 = vadd.f32 %v16799_v35, %v2841_v27  ;;  %v13558_v28 = vmul.f32 %v12775_v53, %v8068_v14  ;;  %v7576_v60 = vunpack.i.l.bf16 %v7575_v38  ;;  %v16802_v16 = vld [vmem:[#allocation314_spill] sm:$0xff]  ;;  %v16807_v35 = vld [vmem:[#allocation244_spill] sm:$0xff] }
 0x2e1   : > { %16798 = vst [vmem:[#allocation412_spill] sm:$0xff] %v13553_v18  ;;  %v2525_v25 = vrot.slane %v2404_v21, 1  ;;  %v2290_v47 = vadd.f32 %v16801_v5, %v1981_v10  ;;  %v5895_v20 = vmul.f32 %v12775_v53, %v8067_v4  ;;  %v13563_v43 = vadd.f32 %v3226_v7, %v3061_v48  ;;  %v8076_v7 = vpop.permute.xlu0 %8075  ;;  %v16809_v5 = vld [vmem:[#allocation236_spill] sm:$0xff] }
 0x2e2   : > { %16800 = vst [vmem:[#allocation84_spill] sm:$0xff] %v13558_v28  ;;  %v3235_v29 = vadd.f32 %v13047_v30, %v3038_v15  ;;  %v16803_v19 = vrot.slane %v16802_v16, 1  ;;  %v16804_v27 = vrot.slane %v12764_v46, 1  ;;  %v8073_v14 = vunpack.i.h.bf16 %v8071_v23  ;;  %v16805_v30 = vld [vmem:[#allocation39_spill] sm:$0xff]  ;;  %v16814_v28 = vld [vmem:[#allocation256_spill] sm:$0xff] }
 0x2e3   : > { %v3460_v21 = vmul.f32 %v13535_v44, %v7566_v61  ;;  %v3465_v53 = vmul.f32 %v13535_v44, %v7577_v39  ;;  %7959 = vperm.xlu1 %7942, %v16805_v30   ;;  %v3464_v4 = vmul.f32 %v13535_v44, %v7576_v60  ;;  %v8072_v46 = vunpack.i.l.bf16 %v8071_v23 }
 0x2e4   : > { %v2531_v50 = vsel %vm1843_vm0, %v16803_v19, %v2530_v63  ;;  %v2526_v58 = vsel %vm1843_vm0, %v16804_v27, %v2525_v25  ;;  %v13579_v48 = vmul.f32 %v8073_v14, %v12926_v12  ;;  %v2574_v15 = vadd.f32 %v16807_v35, %v12975_v34  ;;  %v13583_v63 = vpop.permute.xlu1 %7589  ;;  %v16810_v19 = vld [vmem:[#allocation263_spill] sm:$0xff]  ;;  %v16811_v34 = vld [vmem:[#allocation261_spill] sm:$0xff] }
 0x2e5   : > { %v2599_v38 = vadd.f32 %v2526_v58, %v2290_v47  ;;  %v13573_v10 = vadd.f32 %v2531_v50, %v13384_v42  ;;  %v16808_v42 = vld [vmem:[#allocation578_spill] sm:$0xff]  ;;  %v6014_v39 = vrot.slane %v5895_v20, 1  ;;  %v2575_v47 = vadd.f32 %v16809_v5, %v12978_v57 }
 0x2e6   : > { %16806 = vst [vmem:[#allocation66_spill] sm:$0xff] %v13579_v48  ;;  %v3199_v60 = vmul.f32 %v8073_v14, %v12954_v56  ;;  %v2836_v50 = vadd.f32 %v16810_v19, %v2574_v15  ;;  %v3198_v23 = vmul.f32 %v8072_v46, %v12954_v56  ;;  %v4638_v27 = vmul.f32 %v8072_v46, %v12926_v12  ;;  %v16816_v15 = vld [vmem:[#allocation584_spill] sm:$0xff] }
 0x2e7   : > { %v13587_v25 = vadd.f32 %v16808_v42, %v2599_v38  ;;  %v2837_v58 = vadd.f32 %v16811_v34, %v2575_v47  ;;  %v7582_v30 = vunpack.i.h.bf16 %v7580_v1  ;;  %v7581_v35 = vunpack.i.l.bf16 %v7580_v1  ;;  %v16812_v38 = vld [vmem:[#allocation585_spill] sm:$0xff]  ;;  %7969 = vperm.xlu1 %7942, %v16817_v9   ;;  %v16818_v1 = vld [vmem:[#allocation272_spill] sm:$0xff]  ;;  %v8081_v34 = vpop.permute.xlu0 %8080 }
 0x2e8   : > { %v3033_v42 = vadd.f32 %v16812_v38, %v2836_v50  ;;  %v16813_v20 = vrot.slane %v16745_v40, 1  ;;  %v16815_v57 = vrot.slane %v16814_v28, 1  ;;  %v8078_v5 = vunpack.i.h.bf16 %v8076_v7  ;;  %v7600_v38 = vpop.permute.xlu1 %7599 }
 0x2e9   : > { %v3034_v19 = vadd.f32 %v16816_v15, %v2837_v58  ;;  %v4734_v18 = vrot.slane %v4638_v27, 1  ;;  %v2843_v47 = vadd.f32 %v16818_v1, %v13457_v11  ;;  %v8077_v28 = vunpack.i.l.bf16 %v8076_v7  ;;  %v16820_v58 = vld [vmem:[#allocation275_spill] sm:$0xff]  ;;  %v16828_v1 = vld [vmem:[#allocation262_spill] sm:$0xff] }
 0x2ea   : > { %v2479_v14 = vsel %vm1843_vm0, %v16815_v57, %v16813_v20  ;;  %v3230_v61 = vadd.f32 %v3198_v23, %v3033_v42  ;;  %v3205_v50 = vmul.f32 %v8078_v5, %v12954_v56  ;;  %v13610_v40 = vmul.f32 %v8078_v5, %v12926_v12  ;;  %v16821_v57 = vld [vmem:[#allocation169_spill] sm:$0xff] }
 0x2eb   : > { %v2580_v46 = vadd.f32 %v2479_v14, %v12985_v52  ;;  %v13613_v20 = vadd.f32 %v3464_v4, %v13075_v17  ;;  %v3231_v27 = vadd.f32 %v3199_v60, %v3034_v19  ;;  %v3040_v52 = vadd.f32 %v16821_v57, %v2843_v47  ;;  %v16822_v14 = vld [vmem:[#allocation502_spill] sm:$0xff] }
 0x2ec   : > { %16819 = vst [vmem:[#allocation45_spill] sm:$0xff] %v13610_v40  ;;  %v16823_v15 = vrot.slane %v16822_v14, 1  ;;  %v13622_v23 = vadd.f32 %v3465_v53, %v3235_v29  ;;  %v3467_v42 = vmul.f32 %v13535_v44, %v7582_v30  ;;  %v3466_v7 = vmul.f32 %v13535_v44, %v7581_v35  ;;  %v16827_v30 = vld [vmem:[#allocation179_spill] sm:$0xff] }
 0x2ed   : > { %v2842_v9 = vadd.f32 %v16820_v58, %v2580_v46  ;;  %v16825_v5 = vrot.slane %v13579_v48, 1  ;;  %v3237_v4 = vadd.f32 %v3205_v50, %v3040_v52  ;;  %v4647_v60 = vmul.f32 %v8077_v28, %v12926_v12  ;;  %v8086_v52 = vpop.permute.xlu0 %8085 }
 0x2ee   : > { %v13620_v11 = vsel %vm1843_vm0, %v16823_v15, %v6014_v39  ;;  %v7592_v19 = vunpack.i.h.bf16 %v13583_v63  ;;  %v13633_v46 = vadd.f32 %v3460_v21, %v3230_v61  ;;  %v3204_v29 = vmul.f32 %v8077_v28, %v12954_v56  ;;  %v16832_v61 = vld [vmem:[#allocation41_spill] sm:$0xff]  ;;  %v13651_v15 = vpop.permute.xlu1 %7609 }
 0x2ef   : > { %16824 = vst [vmem:[#allocation419_spill] sm:$0xff] %v13620_v11  ;;  %v13629_v17 = vsel %vm1843_vm0, %v4734_v18, %v16825_v5  ;;  %v13638_v53 = vadd.f32 %v13538_v36, %v3231_v27  ;;  %v3039_v35 = vadd.f32 %v16827_v30, %v2842_v9  ;;  %v16829_v47 = vrot.slane %v16828_v1, 1  ;;  %v16830_v18 = vld [vmem:[#allocation265_spill] sm:$0xff]  ;;  %8145 = vperm.xlu1 %7942, %v16832_v61   ;;  %v16833_v36 = vld [vmem:[#allocation390_spill] sm:$0xff] }
 0x2f0   : > { %16826 = vst [vmem:[#allocation166_spill] sm:$0xff] %v13629_v17  ;;  %v16831_v58 = vrot.slane %v16830_v18, 1  ;;  %v8083_v57 = vunpack.i.h.bf16 %v8081_v34  ;;  %v7591_v21 = vunpack.i.l.bf16 %v13583_v63  ;;  %v8082_v14 = vunpack.i.l.bf16 %v8081_v34  ;;  %v16836_v18 = vld [vmem:[#allocation283_spill] sm:$0xff] }
 0x2f1   : > { %v2585_v27 = vadd.f32 %v16833_v36, %v13104_v31  ;;  %v4749_v9 = vrot.slane %v4647_v60, 1  ;;  %v3471_v5 = vmul.f32 %v13535_v44, %v7592_v19  ;;  %v7602_v61 = vunpack.i.h.bf16 %v7600_v38  ;;  %v16837_v60 = vld [vmem:[#allocation122_spill] sm:$0xff]  ;;  %v16838_v19 = vld [vmem:[#allocation484_spill] sm:$0xff]  ;;  %v8091_v31 = vpop.permute.xlu0 %8090 }
 0x2f2   : > { %v2489_v50 = vsel %vm1843_vm0, %v16831_v58, %v16829_v47  ;;  %v3209_v30 = vmul.f32 %v8083_v57, %v12954_v56  ;;  %v13656_v1 = vmul.f32 %v8083_v57, %v12926_v12  ;;  %v16835_v47 = vld [vmem:[#allocation286_spill] sm:$0xff]  ;;  %v3208_v34 = vmul.f32 %v8082_v14, %v12954_v56 }
 0x2f3   : > { %v2584_v28 = vadd.f32 %v2489_v50, %v13072_v26  ;;  %v2847_v58 = vadd.f32 %v16836_v18, %v2585_v27  ;;  %v4653_v26 = vmul.f32 %v8082_v14, %v12926_v12  ;;  %v3236_v50 = vadd.f32 %v3204_v29, %v3039_v35  ;;  %v16840_v57 = vld [vmem:[#allocation274_spill] sm:$0xff] }
 0x2f4   : > { %16834 = vst [vmem:[#allocation174_spill] sm:$0xff] %v13656_v1  ;;  %v7601_v11 = vunpack.i.l.bf16 %v7600_v38  ;;  %v16839_v48 = vmov 2   ;;  %v16841_v17 = vrot.slane %v16840_v57, 1  ;;  %v8088_v29 = vunpack.i.h.bf16 %v8086_v52  ;;  %v7620_v57 = vpop.permute.xlu1 %7619 }
 0x2f5   : > { %v2846_v63 = vadd.f32 %v16835_v47, %v2584_v28  ;;  %v3044_v39 = vadd.f32 %v16838_v19, %v2847_v58  ;;  %8154 = vset.pattern.permute.xlu1 %v16839_v48  ;;  %v16842_v28 = vld [vmem:[#allocation277_spill] sm:$0xff]  ;;  %v4759_v18 = vrot.slane %v4653_v26, 1  ;;  %v8087_v35 = vunpack.i.l.bf16 %v8086_v52 }
 0x2f6   : > { %v16843_v47 = vrot.slane %v16842_v28, 1  ;;  %8156 = vperm.xlu1 %8154, %v16613_v24   ;;  %v16845_v28 = vrot.slane %v13610_v40, 1  ;;  %v3470_v24 = vmul.f32 %v13535_v44, %v7591_v21  ;;  %v13684_v52 = vmul.f32 %v8088_v29, %v12926_v12 }
 0x2f7   : > { %v3043_v36 = vadd.f32 %v16837_v60, %v2846_v63  ;;  %v13673_v63 = vadd.f32 %v3467_v42, %v3237_v4  ;;  %v3241_v38 = vadd.f32 %v3209_v30, %v3044_v39  ;;  %v16844_v60 = vld [vmem:[#allocation545_spill] sm:$0xff]  ;;  %v13687_v42 = vadd.f32 %v3466_v7, %v3236_v50  ;;  %v13702_v7 = vld [vmem:[%s15075_s1 + $0x16] ss:$0 sm:$0xff] }
 0x2f8   : > { %v2499_v27 = vsel %vm1843_vm0, %v16843_v47, %v16841_v17  ;;  %v2589_v19 = vadd.f32 %v16844_v60, %v13134_v49  ;;  %v13680_v17 = vsel %vm1843_vm0, %v4749_v9, %v16845_v28  ;;  %v3475_v4 = vmul.f32 %v13535_v44, %v7602_v61  ;;  %v16847_v49 = vld [vmem:[#allocation295_spill] sm:$0xff]  ;;  %v8096_v28 = vpop.permute.xlu0 %8095 }
 0x2f9   : > { %v2588_v14 = vadd.f32 %v2499_v27, %v13131_v51  ;;  %v3240_v58 = vadd.f32 %v3208_v34, %v3043_v36  ;;  %v16846_v51 = vld [vmem:[#allocation297_spill] sm:$0xff]  ;;  %v3474_v39 = vmul.f32 %v13535_v44, %v7601_v11  ;;  %v16848_v34 = vrot.slane %v13656_v1, 1  ;;  %v16850_v47 = vld [vmem:[#allocation595_spill] sm:$0xff] }
 0x2fa   : > { %v2851_v30 = vadd.f32 %v16847_v49, %v2589_v19  ;;  %v3213_v21 = vmul.f32 %v8088_v29, %v12954_v56  ;;  %v3212_v12 = vmul.f32 %v8087_v35, %v12954_v56  ;;  %v4659_v50 = vmul.f32 %v13702_v7, %v8087_v35  ;;  %v16852_v56 = vld [vmem:[#allocation290_spill] sm:$0xff]  ;;  %8161 = vperm.xlu1 %8154, %v13256_v62   ;;  %v16859_v36 = vld [vmem:[#allocation29_spill] sm:$0xff] }
 0x2fb   : > { %v2850_v26 = vadd.f32 %v16846_v51, %v2588_v14  ;;  %v13695_v9 = vsel %vm1843_vm0, %v4759_v18, %v16848_v34  ;;  %v13705_v61 = vadd.f32 %v3470_v24, %v3240_v58  ;;  %v13707_v11 = vadd.f32 %v3471_v5, %v3241_v38  ;;  %v16854_v51 = vld [vmem:[#allocation593_spill] sm:$0xff]  ;;  %v13721_v24 = vpop.permute.xlu1 %7629 }
 0x2fc   : > { %16849 = vst [vmem:[#allocation524_spill] sm:$0xff] %v13695_v9  ;;  %v7612_v18 = vunpack.i.h.bf16 %v13651_v15  ;;  %v16851_v29 = vrot.slane %v16781_v0, 1  ;;  %v16853_v14 = vrot.slane %v16852_v56, 1  ;;  %v8093_v19 = vunpack.i.h.bf16 %v8091_v31  ;;  %v13726_v0 = vld [vmem:[%s15075_s1 + $0xe] ss:$0 sm:$0xff] }
 0x2fd   : > { %v3047_v27 = vadd.f32 %v16850_v47, %v2850_v26  ;;  %v3048_v35 = vadd.f32 %v16854_v51, %v2851_v30  ;;  %v7611_v58 = vunpack.i.l.bf16 %v13651_v15  ;;  %v8092_v5 = vunpack.i.l.bf16 %v8091_v31  ;;  %v16856_v15 = vld [vmem:[#allocation307_spill] sm:$0xff] }
 0x2fe   : > { %v2509_v60 = vsel %vm1843_vm0, %v16853_v14, %v16851_v29  ;;  %v4769_v26 = vrot.slane %v4659_v50, 1  ;;  %v3217_v49 = vmul.f32 %v13726_v0, %v8093_v19  ;;  %v13730_v34 = vmul.f32 %v13702_v7, %v8093_v19  ;;  %v16857_v31 = vld [vmem:[#allocation311_spill] sm:$0xff]  ;;  %8171 = vperm.xlu1 %8154, %v16702_v3  }
 0x2ff   : > { %v2592_v38 = vadd.f32 %v2509_v60, %v13202_v41  ;;  %v2855_v30 = vadd.f32 %v16856_v15, %v13517_v54  ;;  %v3244_v62 = vadd.f32 %v3212_v12, %v3047_v27  ;;  %v3216_v41 = vmul.f32 %v13726_v0, %v8092_v5  ;;  %v16858_v60 = vld [vmem:[#allocation26_spill] sm:$0xff]  ;;  %v16860_v12 = vld [vmem:[#allocation301_spill] sm:$0xff] }
 0x300   : > { %16855 = vst [vmem:[#allocation438_spill] sm:$0xff] %v13730_v34  ;;  %v4665_v50 = vmul.f32 %v13702_v7, %v8092_v5  ;;  %v3245_v29 = vadd.f32 %v3213_v21, %v3048_v35  ;;  %v3479_v56 = vmul.f32 %v13535_v44, %v7612_v18  ;;  %v15383_v14 = vrot.slane %v13730_v34, 1  ;;  %v8101_v21 = vpop.permute.xlu0 %8100 }
 0x301   : > { %v2854_v47 = vadd.f32 %v16857_v31, %v2592_v38  ;;  %v3052_v51 = vadd.f32 %v16858_v60, %v2855_v30  ;;  %v7622_v1 = vunpack.i.h.bf16 %v7620_v57  ;;  %v7621_v40 = vunpack.i.l.bf16 %v7620_v57  ;;  %v16862_v38 = vld [vmem:[#allocation302_spill] sm:$0xff] }
 0x302   : > { %v4779_v54 = vrot.slane %v4665_v50, 1  ;;  %v16861_v27 = vrot.slane %v16860_v12, 1  ;;  %v16863_v15 = vrot.slane %v16862_v38, 1  ;;  %v8098_v5 = vunpack.i.h.bf16 %v8096_v28  ;;  %v16867_v12 = vld [vmem:[#allocation322_spill] sm:$0xff]  ;;  %8181 = vperm.xlu1 %8154, %v16737_v37  }
 0x303   : > { %v3051_v19 = vadd.f32 %v16859_v36, %v2854_v47  ;;  %v3249_v9 = vadd.f32 %v3217_v49, %v3052_v51  ;;  %v3478_v18 = vmul.f32 %v13535_v44, %v7611_v58  ;;  %v8097_v30 = vunpack.i.l.bf16 %v8096_v28  ;;  %v13749_v47 = vpop.permute.xlu1 %7639  ;;  %v16865_v58 = vld [vmem:[#allocation549_spill] sm:$0xff]  ;;  %v16866_v28 = vld [vmem:[#allocation323_spill] sm:$0xff] }
 0x304   : > { %v2519_v31 = vsel %vm1843_vm0, %v16863_v15, %v16861_v27  ;;  %v13751_v57 = vadd.f32 %v3474_v39, %v3244_v62  ;;  %v16864_v49 = vrot.slane %v13684_v52, 1  ;;  %v13759_v60 = vmul.f32 %v13702_v7, %v8098_v5 }
 0x305   : > { %v3248_v35 = vadd.f32 %v3216_v41, %v3051_v19  ;;  %v2596_v36 = vadd.f32 %v2519_v31, %v13281_v13  ;;  %v2597_v41 = vadd.f32 %v16865_v58, %v13295_v59  ;;  %v13763_v51 = vadd.f32 %v3475_v4, %v3245_v29  ;;  %v8106_v31 = vpop.permute.xlu0 %8105  ;;  %v16872_v58 = vld [vmem:[#allocation600_spill] sm:$0xff] }
 0x306   : > { %v13756_v50 = vsel %vm1843_vm0, %v4769_v26, %v16864_v49  ;;  %v3483_v3 = vmul.f32 %v13535_v44, %v7622_v1  ;;  %v3482_v13 = vmul.f32 %v13535_v44, %v7621_v40  ;;  %v13768_v62 = vadd.f32 %v3479_v56, %v3249_v9  ;;  %v16869_v56 = vld [vmem:[#allocation315_spill] sm:$0xff]  ;;  %8190 = vset.pattern.permute.xlu1 %v16565_v32 }
 0x307   : > { %v2858_v39 = vadd.f32 %v16866_v28, %v2596_v36  ;;  %v13773_v26 = vsel %vm1843_vm0, %v4779_v54, %v15383_v14  ;;  %v3221_v19 = vmul.f32 %v13726_v0, %v8098_v5  ;;  %v2859_v27 = vadd.f32 %v16867_v12, %v2597_v41  ;;  %v16871_v5 = vld [vmem:[#allocation215_spill] sm:$0xff]  ;;  %v7646_v49 = vpop.permute.xlu1 %7645  ;;  %v16874_v12 = vld [vmem:[#allocation333_spill] sm:$0xff] }
 0x308   : > { %v13777_v59 = vadd.f32 %v3478_v18, %v3248_v35  ;;  %v3220_v4 = vmul.f32 %v13726_v0, %v8097_v30  ;;  %v4671_v1 = vmul.f32 %v13702_v7, %v8097_v30  ;;  %v15385_v40 = vrot.slane %v13759_v60, 1 }
 0x309   : > { %v7632_v9 = vunpack.i.h.bf16 %v13721_v24  ;;  %v16868_v29 = vrot.slane %v16802_v16, 1  ;;  %v16870_v38 = vrot.slane %v16869_v56, 1  ;;  %v8103_v15 = vunpack.i.h.bf16 %v8101_v21 }
 0x30a   : > { %v3055_v36 = vadd.f32 %v16871_v5, %v2858_v39  ;;  %v7631_v18 = vunpack.i.l.bf16 %v13721_v24  ;;  %v8102_v35 = vunpack.i.l.bf16 %v8101_v21  ;;  %v3056_v41 = vadd.f32 %v16872_v58, %v2859_v27  ;;  %v16876_v5 = vld [vmem:[#allocation228_spill] sm:$0xff] }
 0x30b   : > { %v2529_v54 = vsel %vm1843_vm0, %v16870_v38, %v16868_v29  ;;  %v3225_v16 = vmul.f32 %v13726_v0, %v8103_v15  ;;  %v13795_v28 = vmul.f32 %v13702_v7, %v8103_v15  ;;  %v2863_v29 = vadd.f32 %v16874_v12, %v13573_v10  ;;  %v16875_v38 = vld [vmem:[#allocation334_spill] sm:$0xff] }
 0x30c   : > { %v2600_v30 = vadd.f32 %v2529_v54, %v13371_v2  ;;  %v3252_v56 = vadd.f32 %v3220_v4, %v3055_v36  ;;  %v4789_v39 = vrot.slane %v4671_v1, 1  ;;  %v4677_v37 = vmul.f32 %v13702_v7, %v8102_v35  ;;  %v16877_v10 = vld [vmem:[#allocation326_spill] sm:$0xff]  ;;  %v16879_v1 = vld [vmem:[#allocation327_spill] sm:$0xff] }
 0x30d   : > { %16873 = vst [vmem:[#allocation439_spill] sm:$0xff] %v13795_v28  ;;  %v3253_v21 = vadd.f32 %v3221_v19, %v3056_v41  ;;  %v3060_v2 = vadd.f32 %v16876_v5, %v2863_v29  ;;  %v3224_v54 = vmul.f32 %v13726_v0, %v8102_v35  ;;  %v7642_v27 = vunpack.i.h.bf16 %v13749_v47  ;;  %v8111_v29 = vpop.permute.xlu0 %8110 }
 0x30e   : > { %v2862_v24 = vadd.f32 %v16875_v38, %v2600_v30  ;;  %v15384_v15 = vrot.slane %v13795_v28, 1  ;;  %v4799_v58 = vrot.slane %v4677_v37, 1  ;;  %v7641_v14 = vunpack.i.l.bf16 %v13749_v47  ;;  %v16882_v37 = vld [vmem:[#allocation602_spill] sm:$0xff] }
 0x30f   : > { %v16878_v4 = vrot.slane %v16877_v10, 1  ;;  %v16880_v36 = vrot.slane %v16879_v1, 1  ;;  %v3487_v30 = vmul.f32 %v13535_v44, %v7632_v9  ;;  %v3486_v35 = vmul.f32 %v13535_v44, %v7631_v18  ;;  %v6899_v1 = vld [vmem:[%s8542_s28 + $0xc0] sm:$0xff]  }
 0x310   : > { %v3257_v41 = vadd.f32 %v3225_v16, %v3060_v2  ;;  %v8108_v12 = vunpack.i.h.bf16 %v8106_v31  ;;  %v13814_v38 = vadd.f32 %v3482_v13, %v3252_v56  ;;  %v13819_v47 = vsel %vm1843_vm0, %v4789_v39, %v15385_v40  ;;  %v16883_v13 = vld [vmem:[#allocation553_spill] sm:$0xff] }
 0x311   : > { %v2539_v19 = vsel %vm1843_vm0, %v16880_v36, %v16878_v4  ;;  %16881 = vst [vmem:[#allocation536_spill] sm:$0xff] %v13819_v47  ;;  %v3059_v5 = vadd.f32 %v16882_v37, %v2862_v24  ;;  %v13824_v4 = vpop.permute.xlu1 %7650  ;;  %v13826_v9 = vadd.f32 %v3483_v3, %v3253_v21  ;;  %v13829_v18 = vmul.f32 %v13535_v44, %v7642_v27  ;;  %v16887_v24 = vld [vmem:[#allocation341_spill] sm:$0xff] }
 0x312   : > { %v2604_v10 = vadd.f32 %v2539_v19, %v13409_v55  ;;  %v8107_v16 = vunpack.i.l.bf16 %v8106_v31  ;;  %v2605_v56 = vadd.f32 %v16883_v13, %v13419_v33  ;;  %v13833_v36 = vadd.f32 %v3487_v30, %v3257_v41  ;;  %v16888_v33 = vld [vmem:[#allocation48_spill] sm:$0xff] }
 0x313   : > { %v3256_v2 = vadd.f32 %v3224_v54, %v3059_v5  ;;  %v13838_v39 = vsel %vm1843_vm0, %v4799_v58, %v15384_v15  ;;  %v3490_v55 = vmul.f32 %v13535_v44, %v7641_v14  ;;  %v13842_v3 = vmul.f32 %v13702_v7, %v8108_v12  ;;  %v16890_v44 = vld [vmem:[#allocation254_spill] sm:$0xff]  ;;  %v16891_v14 = vld [vmem:[#allocation345_spill] sm:$0xff]  ;;  %v8116_v15 = vpop.permute.xlu0 %8115 }
 0x314   : > { %16884 = vst [vmem:[#allocation427_spill] sm:$0xff] %v13833_v36  ;;  %16885 = vst [vmem:[#allocation559_spill] sm:$0xff] %v13838_v39  ;;  %v2866_v21 = vadd.f32 %v16887_v24, %v2604_v10  ;;  %v6794_v27 = vunpack.c.l.bf16 %v6899_v1  ;;  %v6795_v31 = vunpack.c.h.bf16 %v6899_v1  ;;  %v3229_v19 = vmul.f32 %v13726_v0, %v8108_v12  ;;  %v13856_v10 = vld [vmem:[%s15075_s1 + $0x11] ss:$0 sm:$0xff]  ;;  %v16892_v1 = vld [vmem:[#allocation58_spill] sm:$0xff] }
 0x315   : > { %16886 = vst [vmem:[#allocation96_spill] sm:$0xff] %v13842_v3  ;;  %v2867_v54 = vadd.f32 %v16888_v33, %v2605_v56  ;;  %v7648_v30 = vunpack.i.h.bf16 %v7646_v49  ;;  %v7647_v41 = vunpack.i.l.bf16 %v7646_v49  ;;  %v3228_v37 = vmul.f32 %v13726_v0, %v8107_v16  ;;  %v16893_v49 = vld [vmem:[#allocation344_spill] sm:$0xff]  ;;  %v7656_v24 = vpop.permute.xlu1 %7655  ;;  %v16894_v33 = vld [vmem:[#allocation51_spill] sm:$0xff] }
 0x316   : > { %v13849_v58 = vmul.f32 %v13702_v7, %v8107_v16  ;;  %v8191_v5 = vpack.i.bf16 %v6795_v31, %v6794_v27  ;;  %v3494_v13 = vadd.f32 %v16891_v14, %v16890_v44  ;;  %v3495_v56 = vadd.f32 %v16893_v49, %v16892_v1  ;;  %v13865_v16 = vld [vmem:[%s15075_s1 + $0x12] ss:$0 sm:$0xff] }
 0x317   : > { %v3660_v12 = vmul.f32 %v13856_v10, %v7648_v30  ;;  %v3659_v0 = vmul.f32 %v13856_v10, %v7647_v41  ;;  %v13867_v27 = vadd.f32 %v3486_v35, %v3256_v2  ;;  %v3063_v44 = vadd.f32 %v16894_v33, %v2866_v21  ;;  %v16895_v30 = vld [vmem:[#allocation150_spill] sm:$0xff] }
 0x318   : > { %16889 = vst [vmem:[#allocation293_spill] sm:$0xff] %v13849_v58  ;;  %8192 = vperm.xlu1 %8190, %v8191_v5   ;;  %v8113_v14 = vunpack.i.h.bf16 %v8111_v29  ;;  %v3064_v40 = vadd.f32 %v16895_v30, %v2867_v54  ;;  %8198 = vperm.xlu0 %8196, %v8191_v5   ;;  %v8112_v41 = vunpack.i.l.bf16 %v8111_v29  ;;  %v252_v49 = vld [vmem:[%s8542_s28 + $0x18c] sm:$0xff]   ;;  %v7653_v21 = vunpack.i.h.bf16 %v13824_v4 }
 0x319   : > { %v3691_v28 = vadd.f32 %v3659_v0, %v3494_v13  ;;  %v3692_v1 = vadd.f32 %v3660_v12, %v3495_v56  ;;  %v3260_v34 = vadd.f32 %v3228_v37, %v3063_v44  ;;  %v8118_v33 = vunpack.i.h.bf16 %v8116_v15  ;;  %v8121_v12 = vpop.permute.xlu0 %8120  ;;  %v16896_v37 = vld [vmem:[#allocation408_spill] sm:$0xff]  ;;  %v16898_v0 = vld [vmem:[#allocation550_spill] sm:$0xff] }
 0x31a   : > { %v3857_v47 = vmul.f32 %v8113_v14, %v13865_v16  ;;  %v13875_v35 = vadd.f32 %v3229_v19, %v3064_v40  ;;  %v3856_v2 = vmul.f32 %v8112_v41, %v13865_v16  ;;  %v8117_v54 = vunpack.i.l.bf16 %v8116_v15  ;;  %v16900_v14 = vld [vmem:[#allocation383_spill] sm:$0xff] }
 0x31b   : > { %v5114_v13 = vunpack.c.l.bf16 %v252_v49  ;;  %v5115_v29 = vunpack.c.h.bf16 %v252_v49  ;;  %v16897_v56 = vrot.slane %v16896_v37, 1  ;;  %v16899_v44 = vrot.slane %v16898_v0, 1 }
 0x31c   : > { %v3889_v31 = vadd.f32 %v3857_v47, %v3692_v1  ;;  %8202 = vset.pattern.permute.xlu1 %v16839_v48  ;;  %v3888_v19 = vadd.f32 %v3856_v2, %v3691_v28  ;;  %v16901_v30 = vrot.slane %v16900_v14, 1  ;;  %v3662_v15 = vmul.f32 %v13856_v10, %v7653_v21  ;;  %v7661_v1 = vpop.permute.xlu1 %7660  ;;  %v16906_v21 = vld [vmem:[#allocation351_spill] sm:$0xff] }
 0x31d   : > { %v4123_v40 = vsel %vm1843_vm0, %v16899_v44, %v16897_v56  ;;  %v16902_v41 = vmov %v16897_v56  ;;  %8204 = vperm.xlu1 %8202, %v8191_v5   ;;  %v13891_v39 = vadd.f32 %v3490_v55, %v3260_v34  ;;  %v8214_v58 = vpack.i.bf16 %v5115_v29, %v5114_v13  ;;  %v219_v56 = vld [vmem:[%s8542_s28 + $0xc8] sm:$0x1]  ;;  %v16905_v44 = vld [vmem:[#allocation235_spill] sm:$0xff]  ;;  %v16907_v55 = vld [vmem:[#allocation20_spill] sm:$0xff]  ;;  %s6538_s28 = sshll.u32 %s14120_s19, 4  ;;  %s15025_s28 = int_to_ptr.vmem [resolvable:$true] %s6538_s28 }
 0x31e   : > { %v4125_v47 = vsel %vm1843_vm0, %v16902_v41, %v16901_v30  ;;  %v4230_v3 = vadd.f32 %v4123_v40, %v3888_v19  ;;  %v13896_v0 = vadd.f32 %v3662_v15, %v13622_v23  ;;  %v3863_v28 = vmul.f32 %v8118_v33, %v13865_v16  ;;  %v16908_v23 = vld [vmem:[#allocation54_spill] sm:$0xff]  ;;  %v8126_v41 = vpop.permute.xlu0 %8125  ;;  %s8397_s24 = scalar_lea.vmem %s15025_s28, 2048  ;;  %p8404_p0 = scmp.lt.s32.totalorder %s15025_s28, %s8402_s26 }
 0x31f   : > { %16903 = vst [vmem:[#allocation94_spill] sm:$0xff] %v13891_v39  ;;  %v13893_v49 = vadd.f32 %v4125_v47, %v3889_v31  ;;  %v7658_v2 = vunpack.i.h.bf16 %v7656_v24  ;;  %v3862_v37 = vmul.f32 %v8117_v54, %v13865_v16  ;;  %8215 = vperm.xlu0 %8196, %v8214_v58   ;;  %v7657_v5 = vunpack.i.l.bf16 %v7656_v24  ;;  %v16909_v29 = vld [vmem:[#allocation350_spill] sm:$0xff]  ;;  %v16910_v47 = vld [vmem:[#allocation257_spill] sm:$0xff]  ;;  %p8398_p11 = scmp.ne.s32.totalorder %s15025_s28, %s8397_s24  ;;  %p8405_p1 = scmp.lt.s32.totalorder %s8403_s27, %s8397_s24 }
 0x320   : > { %v3500_v14 = vadd.f32 %v16906_v21, %v16905_v44  ;;  %v8123_v34 = vunpack.i.h.bf16 %v8121_v12  ;;  %v4539_v31 = vadd.f32 %v16907_v55, %v4230_v3  ;;  %v3501_v40 = vadd.f32 %v16909_v29, %v16908_v23  ;;  %v16912_v21 = vld [vmem:[#allocation357_spill] sm:$0xff]  ;;  %v7666_v55 = vpop.permute.xlu1 %7665 }
 0x321   : > { %16904 = vst [vmem:[#allocation97_spill] sm:$0xff] %v13893_v49  ;;  %8208 = vset.pattern.permute.xlu1 %v16565_v32  ;;  %v3666_v13 = vmul.f32 %v13856_v10, %v7658_v2  ;;  %v8122_v33 = vunpack.i.l.bf16 %v8121_v12  ;;  %v3665_v19 = vmul.f32 %v13856_v10, %v7657_v5  ;;  %v13909_v54 = vunpack.c.l.bf16 %v219_v56  ;;  %v16911_v32 = vld [vmem:[#allocation420_spill] sm:$0xff]  ;;  %v16913_v5 = vld [vmem:[#allocation14_spill] sm:$0xff]  ;;  %v16915_v29 = vld [vmem:[#allocation49_spill] sm:$0xff]  ;;  %p8399_p12 = pnand %p8398_p11, %p8525_p5  ;;  %p8406_p2 = por %p8405_p1, %p8404_p0 }
 0x322   : > { %8210 = vperm.xlu1 %8208, %v8214_v58   ;;  %v7663_v24 = vunpack.i.h.bf16 %v7661_v1  ;;  %v7662_v30 = vunpack.i.l.bf16 %v7661_v1  ;;  %v4848_v15 = vadd.f32 %v16910_v47, %v4539_v31  ;;  %v3867_v3 = vmul.f32 %v8123_v34, %v13865_v16  ;;  %v16914_v56 = vld [vmem:[#allocation356_spill] sm:$0xff] }
 0x323   : > { %v3698_v44 = vadd.f32 %v3666_v13, %v3501_v40  ;;  %v3504_v2 = vadd.f32 %v16912_v21, %v16911_v32  ;;  %v3697_v49 = vadd.f32 %v3665_v19, %v3500_v14  ;;  %8219 = vset.pattern.permute.xlu0 %v16839_v48  ;;  %v3505_v23 = vadd.f32 %v16914_v56, %v16913_v5  ;;  %v16916_v47 = vld [vmem:[#allocation164_spill] sm:$0xff]  ;;  %v16917_v56 = vld [vmem:[#allocation31_spill] sm:$0xff]  ;;  %p8400_p13 = pneg %p8399_p12 }
 0x324   : > { %v3670_v12 = vmul.f32 %v13856_v10, %v7663_v24  ;;  %v3669_v1 = vmul.f32 %v13856_v10, %v7662_v30  ;;  %v4930_v39 = vadd.f32 %v16915_v29, %v4848_v15  ;;  %v3866_v34 = vmul.f32 %v8122_v33, %v13865_v16  ;;  %8221 = vperm.xlu0 %8219, %v8214_v58   ;;  %v16918_v33 = vld [vmem:[#allocation249_spill] sm:$0xff]  ;;  %v16923_v29 = vld [vmem:[#allocation568_spill] sm:$0xff] }
 0x325   : > { %v13921_v31 = vadd.f32 %v3863_v28, %v3698_v44  ;;  %v3894_v13 = vadd.f32 %v3862_v37, %v3697_v49  ;;  %v8127_v19 = vunpack.i.l.bf16 %v8126_v41  ;;  %v8128_v24 = vunpack.i.h.bf16 %v8126_v41  ;;  %v8131_v44 = vpop.permute.xlu0 %8130  ;;  %v7671_v41 = vpop.permute.xlu1 %7670  ;;  %p8407_p3 = pnand %p8406_p2, %p8400_p13 }
 0x326   : > { %5355 = vperm.xlu1 %8208, %v13909_v54   ;;  %v3701_v40 = vadd.f32 %v3669_v1, %v3504_v2  ;;  %v3702_v14 = vadd.f32 %v3670_v12, %v3505_v23  ;;  %v5007_v32 = vadd.f32 %v16916_v47, %v4930_v39  ;;  %v7668_v21 = vunpack.i.h.bf16 %v7666_v55  ;;  %v16919_v2 = vld [vmem:[#allocation532_spill] sm:$0xff]  ;;  %v16920_v23 = vld [vmem:[#allocation71_spill] sm:$0xff]  ;;  %v16922_v1 = vld [vmem:[#allocation526_spill] sm:$0xff] }
 0x327   : > { %v7667_v5 = vunpack.i.l.bf16 %v7666_v55  ;;  %v4236_v30 = vadd.f32 %v16917_v56, %v3894_v13  ;;  %v3870_v28 = vmul.f32 %v8127_v19, %v13865_v16  ;;  %v3050_v12 = vadd.f32 %v16919_v2, %v13530_v6  ;;  %v16921_v39 = vld [vmem:[#allocation364_spill] sm:$0xff]  ;;  %v16927_v47 = vld [vmem:[#allocation270_spill] sm:$0xff]  ;;  %v16928_v56 = vld [vmem:[#allocation55_spill] sm:$0xff] }
 0x328   : > { %v3898_v36 = vadd.f32 %v3866_v34, %v3701_v40  ;;  %v3899_v15 = vadd.f32 %v3867_v3, %v3702_v14  ;;  %v5084_v49 = vadd.f32 %v16918_v33, %v5007_v32  ;;  %v3674_v37 = vmul.f32 %v13856_v10, %v7668_v21  ;;  %v16924_v34 = vld [vmem:[#allocation393_spill] sm:$0xff]  ;;  %v16926_v14 = vld [vmem:[#allocation343_spill] sm:$0xff] }
 0x329   : > { %v3508_v58 = vadd.f32 %v16921_v39, %v16920_v23  ;;  %v4545_v55 = vadd.f32 %v16922_v1, %v4236_v30  ;;  %v3673_v40 = vmul.f32 %v13856_v10, %v7667_v5  ;;  %v3247_v32 = vadd.f32 %v16927_v47, %v3050_v12  ;;  %v16929_v30 = vld [vmem:[#allocation448_spill] sm:$0xff]  ;;  %v16931_v1 = vld [vmem:[#allocation363_spill] sm:$0xff] }
 0x32a   : > { %v4240_v13 = vadd.f32 %v16923_v29, %v3898_v36  ;;  %v13937_v3 = vadd.f32 %v16924_v34, %v3899_v15  ;;  %8225 = vset.pattern.permute.xlu1 %v16744_v45  ;;  %v5166_v19 = vadd.f32 %v16926_v14, %v5084_v49  ;;  %v8133_v6 = vunpack.i.h.bf16 %v8131_v44  ;;  %v16930_v15 = vld [vmem:[#allocation394_spill] sm:$0xff]  ;;  %v16933_v34 = vld [vmem:[#allocation151_spill] sm:$0xff] }
 0x32b   : > { %5604 = vperm.xlu1 %8225, %v13909_v54   ;;  %v8132_v21 = vunpack.i.l.bf16 %v8131_v44  ;;  %v4854_v33 = vadd.f32 %v16928_v56, %v4545_v55  ;;  %v3705_v36 = vadd.f32 %v3673_v40, %v3508_v58  ;;  %v7673_v23 = vunpack.i.h.bf16 %v7671_v41  ;;  %v16932_v29 = vld [vmem:[#allocation74_spill] sm:$0xff]  ;;  %v16934_v55 = vld [vmem:[#allocation465_spill] sm:$0xff] }
 0x32c   : > { %16925 = vst [vmem:[#allocation523_spill] sm:$0xff] %v13937_v3  ;;  %v4549_v2 = vadd.f32 %v16929_v30, %v4240_v13  ;;  %v5243_v39 = vadd.f32 %v16930_v15, %v5166_v19  ;;  %v3871_v45 = vmul.f32 %v8128_v24, %v13865_v16  ;;  %v3509_v5 = vadd.f32 %v16931_v1, %v3247_v32  ;;  %v16935_v24 = vld [vmem:[#allocation434_spill] sm:$0xff]  ;;  %v16936_v32 = vld [vmem:[#allocation88_spill] sm:$0xff] }
 0x32d   : > { %v3875_v49 = vmul.f32 %v8133_v6, %v13865_v16  ;;  %v4936_v12 = vadd.f32 %v16932_v29, %v4854_v33  ;;  %v3902_v47 = vadd.f32 %v3870_v28, %v3705_v36  ;;  %v3678_v44 = vmul.f32 %v13856_v10, %v7673_v23  ;;  %v16937_v6 = vld [vmem:[#allocation33_spill] sm:$0xff]  ;;  %v16939_v1 = vld [vmem:[#allocation370_spill] sm:$0xff]  ;;  %v8136_v28 = vpop.permute.xlu0 %8135 }
 0x32e   : > { %v4858_v14 = vadd.f32 %v16933_v34, %v4549_v2  ;;  %v5320_v56 = vadd.f32 %v16934_v55, %v5243_v39  ;;  %v3706_v13 = vadd.f32 %v3674_v37, %v3509_v5  ;;  %v3874_v58 = vmul.f32 %v8132_v21, %v13865_v16  ;;  %v16938_v33 = vld [vmem:[#allocation165_spill] sm:$0xff]  ;;  %v16941_v21 = vld [vmem:[#allocation80_spill] sm:$0xff]  ;;  %v16943_v5 = vld [vmem:[#allocation271_spill] sm:$0xff] }
 0x32f   : > { %v7672_v40 = vunpack.i.l.bf16 %v7671_v41  ;;  %8226 = vset.pattern.permute.xlu1 %v16839_v48  ;;  %v5013_v19 = vadd.f32 %v16935_v24, %v4936_v12  ;;  %v4244_v15 = vadd.f32 %v16937_v6, %v3902_v47  ;;  %v3513_v2 = vadd.f32 %v16939_v1, %v16938_v33  ;;  %v16940_v36 = vld [vmem:[#allocation53_spill] sm:$0xff]  ;;  %v16942_v41 = vld [vmem:[#allocation371_spill] sm:$0xff]  ;;  %v16944_v12 = vld [vmem:[#allocation444_spill] sm:$0xff]  ;;  %v7676_v24 = vpop.permute.xlu1 %7675 }
 0x330   : > { %v4940_v30 = vadd.f32 %v16936_v32, %v4858_v14  ;;  %5853 = vperm.xlu1 %8226, %v13909_v54   ;;  %v5572_v23 = vadd.f32 %v16940_v36, %v5320_v56  ;;  %v13963_v37 = vadd.f32 %v3871_v45, %v3706_v13  ;;  %v3512_v39 = vadd.f32 %v16942_v41, %v16941_v21  ;;  %v16945_v14 = vld [vmem:[#allocation212_spill] sm:$0xff]  ;;  %v16946_v32 = vld [vmem:[#allocation173_spill] sm:$0xff]  ;;  %v16947_v13 = vld [vmem:[#allocation171_spill] sm:$0xff] }
 0x331   : > { %v3677_v48 = vmul.f32 %v13856_v10, %v7672_v40  ;;  %v5090_v29 = vadd.f32 %v16943_v5, %v5013_v19  ;;  %v4553_v47 = vadd.f32 %v16945_v14, %v4244_v15  ;;  %v3710_v55 = vadd.f32 %v3678_v44, %v3513_v2  ;;  %v13975_v45 = vld [vmem:[%s15076_s2] ss:$0 sm:$0xff]  ;;  %v16948_v1 = vld [vmem:[#allocation282_spill] sm:$0xff] }
 0x332   : > { %v5017_v34 = vadd.f32 %v16944_v12, %v4940_v30  ;;  %v5821_v6 = vadd.f32 %v16946_v32, %v5572_v23  ;;  %v8138_v33 = vunpack.i.h.bf16 %v8136_v28  ;;  %v8137_v56 = vunpack.i.l.bf16 %v8136_v28  ;;  %v16949_v36 = vld [vmem:[#allocation62_spill] sm:$0xff]  ;;  %v16950_v15 = vld [vmem:[#allocation253_spill] sm:$0xff] }
 0x333   : > { %v3709_v54 = vadd.f32 %v3677_v48, %v3512_v39  ;;  %v5172_v40 = vadd.f32 %v16947_v13, %v5090_v29  ;;  %v4862_v30 = vadd.f32 %v16949_v36, %v4553_v47  ;;  %v3907_v21 = vadd.f32 %v3875_v49, %v3710_v55  ;;  %v16951_v39 = vld [vmem:[#allocation409_spill] sm:$0xff]  ;;  %v16952_v48 = vld [vmem:[#allocation182_spill] sm:$0xff]  ;;  %v16959_v13 = vld [vmem:[#allocation455_spill] sm:$0xff]  ;;  %v8141_v36 = vpop.permute.xlu0 %8140 }
 0x334   : > { %v5094_v19 = vadd.f32 %v16948_v1, %v5017_v34  ;;  %v6070_v44 = vadd.f32 %v16950_v15, %v5821_v6  ;;  %v3878_v23 = vmul.f32 %v8137_v56, %v13865_v16  ;;  %v7678_v41 = vunpack.i.h.bf16 %v7676_v24  ;;  %v16953_v12 = vld [vmem:[#allocation101_spill] sm:$0xff]  ;;  %v16957_v55 = vld [vmem:[#allocation30_spill] sm:$0xff] }
 0x335   : > { %v3906_v2 = vadd.f32 %v3874_v58, %v3709_v54  ;;  %v5249_v28 = vadd.f32 %v16951_v39, %v5172_v40  ;;  %v4944_v14 = vadd.f32 %v16953_v12, %v4862_v30  ;;  %v16954_v32 = vld [vmem:[#allocation397_spill] sm:$0xff]  ;;  %v7677_v58 = vunpack.i.l.bf16 %v7676_v24  ;;  %v16963_v24 = vld [vmem:[#allocation79_spill] sm:$0xff] }
 0x336   : > { %v5176_v5 = vadd.f32 %v16952_v48, %v5094_v19  ;;  %v13986_v3 = vadd.f32 %v16954_v32, %v3907_v21  ;;  %v13989_v29 = vadd.f32 %v13975_v45, %v6070_v44  ;;  %v16956_v34 = vld [vmem:[#allocation577_spill] sm:$0xff]  ;;  %v3682_v47 = vmul.f32 %v13856_v10, %v7678_v41  ;;  %v16961_v21 = vld [vmem:[#allocation538_spill] sm:$0xff] }
 0x337   : > { %v4248_v49 = vadd.f32 %v16956_v34, %v3906_v2  ;;  %v5326_v6 = vadd.f32 %v16957_v55, %v5249_v28  ;;  %v16958_v54 = vld [vmem:[#allocation413_spill] sm:$0xff]  ;;  %v5021_v40 = vadd.f32 %v16959_v13, %v4944_v14  ;;  %v16962_v44 = vld [vmem:[#allocation378_spill] sm:$0xff]  ;;  %v3681_v41 = vmul.f32 %v13856_v10, %v7677_v58  ;;  %v16968_v13 = vld [vmem:[#allocation435_spill] sm:$0xff] }
 0x338   : > { %16955 = vst [vmem:[#allocation89_spill] sm:$0xff] %v13986_v3  ;;  %v5253_v56 = vadd.f32 %v16958_v54, %v5176_v5  ;;  %v16960_v1 = vld [vmem:[#allocation381_spill] sm:$0xff]  ;;  %v6660_v30 = vmul.f32 -1.442695, %v13989_v29  ;;  %v3516_v2 = vadd.f32 %v16962_v44, %v13503_v22  ;;  %v16964_v28 = vld [vmem:[#allocation50_spill] sm:$0xff]  ;;  %v8143_v54 = vunpack.i.h.bf16 %v8141_v36 }
 0x339   : > { %v3058_v19 = vadd.f32 %v16960_v1, %v13587_v25  ;;  %v4557_v15 = vadd.f32 %v16961_v21, %v4248_v49  ;;  %v5578_v39 = vadd.f32 %v16963_v24, %v5326_v6  ;;  %v16965_v5 = vld [vmem:[#allocation294_spill] sm:$0xff]  ;;  %v16967_v25 = vld [vmem:[#allocation407_spill] sm:$0xff]  ;;  %v16969_v1 = vld [vmem:[#allocation92_spill] sm:$0xff]  ;;  %v7681_v6 = vpop.permute.xlu1 %7680 }
 0x33a   : > { %v5330_v48 = vadd.f32 %v16964_v28, %v5253_v56  ;;  %v5098_v12 = vadd.f32 %v16965_v5, %v5021_v40  ;;  %v16966_v14 = vld [vmem:[#allocation82_spill] sm:$0xff]  ;;  %8227 = vpow2.f32 %v6660_v30  ;;  %v3713_v55 = vadd.f32 %v3681_v41, %v3516_v2  ;;  %v16970_v22 = vld [vmem:[#allocation193_spill] sm:$0xff]  ;;  %v16973_v30 = vld [vmem:[#allocation279_spill] sm:$0xff] }
 0x33b   : > { %v3255_v32 = vadd.f32 %v16966_v14, %v3058_v19  ;;  %v4866_v34 = vadd.f32 %v16967_v25, %v4557_v15  ;;  %v5827_v49 = vadd.f32 %v16968_v13, %v5578_v39  ;;  %v16971_v58 = vld [vmem:[#allocation377_spill] sm:$0xff]  ;;  %v16972_v24 = vld [vmem:[#allocation114_spill] sm:$0xff]  ;;  %v3879_v40 = vmul.f32 %v8138_v33, %v13865_v16  ;;  %v16978_v33 = vld [vmem:[#allocation291_spill] sm:$0xff] }
 0x33c   : > { %v5582_v21 = vadd.f32 %v16969_v1, %v5330_v48  ;;  %v5180_v44 = vadd.f32 %v16970_v22, %v5098_v12  ;;  %v3910_v28 = vadd.f32 %v3878_v23, %v3713_v55  ;;  %v3883_v19 = vmul.f32 %v8143_v54, %v13865_v16  ;;  %v16974_v2 = vld [vmem:[#allocation445_spill] sm:$0xff]  ;;  %v16976_v48 = vld [vmem:[#allocation463_spill] sm:$0xff]  ;;  %v16977_v12 = vld [vmem:[#allocation582_spill] sm:$0xff] }
 0x33d   : > { %v3517_v3 = vadd.f32 %v16971_v58, %v3255_v32  ;;  %v4948_v56 = vadd.f32 %v16972_v24, %v4866_v34  ;;  %v6076_v15 = vadd.f32 %v16973_v30, %v5827_v49  ;;  %v16975_v5 = vld [vmem:[#allocation421_spill] sm:$0xff]  ;;  %v8142_v32 = vunpack.i.l.bf16 %v8141_v36  ;;  %v16980_v49 = vld [vmem:[#allocation306_spill] sm:$0xff]  ;;  %v16981_v58 = vld [vmem:[#allocation395_spill] sm:$0xff] }
 0x33e   : > { %v5831_v41 = vadd.f32 %v16974_v2, %v5582_v21  ;;  %v5257_v39 = vadd.f32 %v16975_v5, %v5180_v44  ;;  %v4252_v13 = vadd.f32 %v16977_v12, %v3910_v28  ;;  %v7683_v1 = vunpack.i.h.bf16 %v7681_v6  ;;  %v16979_v55 = vld [vmem:[#allocation69_spill] sm:$0xff]  ;;  %v16983_v30 = vld [vmem:[#allocation387_spill] sm:$0xff]  ;;  %v16984_v2 = vld [vmem:[#allocation208_spill] sm:$0xff] }
 0x33f   : > { %v3714_v14 = vadd.f32 %v3682_v47, %v3517_v3  ;;  %v5025_v25 = vadd.f32 %v16976_v48, %v4948_v56  ;;  %v14021_v34 = vadd.f32 %v13975_v45, %v6076_v15  ;;  %v7682_v47 = vunpack.i.l.bf16 %v7681_v6  ;;  %v16982_v56 = vld [vmem:[#allocation103_spill] sm:$0xff]  ;;  %v7687_v6 = vpop.permute.xlu1 %7686  ;;  %v16987_v12 = vld [vmem:[#allocation456_spill] sm:$0xff] }
 0x340   : > { %v6080_v23 = vadd.f32 %v16978_v33, %v5831_v41  ;;  %v5334_v54 = vadd.f32 %v16979_v55, %v5257_v39  ;;  %v4561_v44 = vadd.f32 %v16981_v58, %v4252_v13  ;;  %v3686_v3 = vmul.f32 %v13856_v10, %v7683_v1  ;;  %v16985_v41 = vld [vmem:[#allocation281_spill] sm:$0xff]  ;;  %v16986_v39 = vld [vmem:[#allocation386_spill] sm:$0xff]  ;;  %v16989_v55 = vld [vmem:[#allocation127_spill] sm:$0xff]  ;;  %v8151_v58 = vpop.permute.xlu0 %8150 }
 0x341   : > { %v14025_v22 = vadd.f32 %v3879_v40, %v3714_v14  ;;  %v5102_v21 = vadd.f32 %v16980_v49, %v5025_v25  ;;  %v6666_v24 = vmul.f32 -1.442695, %v14021_v34  ;;  %v3520_v15 = vadd.f32 %v16983_v30, %v13563_v43 }
 0x342   : > { %v14032_v36 = vadd.f32 %v13975_v45, %v6080_v23  ;;  %v5586_v28 = vadd.f32 %v16982_v56, %v5334_v54  ;;  %v4870_v5 = vadd.f32 %v16985_v41, %v4561_v44  ;;  %v3521_v14 = vadd.f32 %v16986_v39, %v13519_v8  ;;  %v16988_v23 = vld [vmem:[#allocation429_spill] sm:$0xff]  ;;  %v16991_v56 = vld [vmem:[#allocation70_spill] sm:$0xff] }
 0x343   : > { %v5184_v40 = vadd.f32 %v16984_v2, %v5102_v21  ;;  %v3685_v48 = vmul.f32 %v13856_v10, %v7682_v47  ;;  %8229 = vpow2.f32 %v6666_v24  ;;  %v3882_v1 = vmul.f32 %v8142_v32, %v13865_v16  ;;  %v16990_v47 = vld [vmem:[#allocation299_spill] sm:$0xff]  ;;  %v16992_v2 = vld [vmem:[#allocation468_spill] sm:$0xff] }
 0x344   : > { %v6670_v25 = vmul.f32 -1.442695, %v14032_v36  ;;  %v5835_v13 = vadd.f32 %v16987_v12, %v5586_v28  ;;  %v8228_v33 = vpop.eup %8227  ;;  %v4952_v54 = vadd.f32 %v16989_v55, %v4870_v5  ;;  %v3718_v21 = vadd.f32 %v3686_v3, %v3521_v14  ;;  %v16993_v3 = vld [vmem:[#allocation116_spill] sm:$0xff]  ;;  %v16994_v14 = vld [vmem:[#allocation318_spill] sm:$0xff]  ;;  %v16996_v12 = vld [vmem:[#allocation405_spill] sm:$0xff] }
 0x345   : > { %v5261_v43 = vadd.f32 %v16988_v23, %v5184_v40  ;;  %v3717_v49 = vadd.f32 %v3685_v48, %v3520_v15  ;;  %v6237_v44 = vadd.f32 1.0, %v8228_v33  ;;  %v7652_v8 = vunpack.i.l.bf16 %v13824_v4  ;;  %v16995_v4 = vld [vmem:[#allocation36_spill] sm:$0xff]  ;;  %v14060_v33 = vpop.permute.xlu1 %7691 }
 0x346   : > { %8231 = vpow2.f32 %v6670_v25  ;;  %v6084_v24 = vadd.f32 %v16990_v47, %v5835_v13  ;;  %v5029_v28 = vadd.f32 %v16992_v2, %v4952_v54  ;;  %v3915_v32 = vadd.f32 %v3883_v19, %v3718_v21  ;;  %v16997_v55 = vld [vmem:[#allocation24_spill] sm:$0xff]  ;;  %v17002_v2 = vld [vmem:[#allocation181_spill] sm:$0xff] }
 0x347   : > { %v5338_v30 = vadd.f32 %v16991_v56, %v5261_v43  ;;  %v3914_v41 = vadd.f32 %v3882_v1, %v3717_v49  ;;  %8233 = vrcp.f32 %v6237_v44  ;;  %v8153_v5 = vunpack.i.h.bf16 %v8151_v58  ;;  %v16998_v49 = vld [vmem:[#allocation218_spill] sm:$0xff]  ;;  %v17001_v56 = vld [vmem:[#allocation441_spill] sm:$0xff] }
 0x348   : > { %v14052_v40 = vadd.f32 %v13975_v45, %v6084_v24  ;;  %v8152_v15 = vunpack.i.l.bf16 %v8151_v58  ;;  %v5106_v48 = vadd.f32 %v16994_v14, %v5029_v28  ;;  %v14058_v13 = vadd.f32 %v16996_v12, %v3915_v32  ;;  %v16999_v58 = vld [vmem:[#allocation546_spill] sm:$0xff] }
 0x349   : > { %v5590_v39 = vadd.f32 %v16993_v3, %v5338_v30  ;;  %v4256_v25 = vadd.f32 %v16995_v4, %v3914_v41  ;;  %v14064_v19 = vadd.f32 %v13829_v18, %v13875_v35  ;;  %v3661_v1 = vmul.f32 %v13856_v10, %v7652_v8  ;;  %v17000_v10 = vld [vmem:[#allocation309_spill] sm:$0xff]  ;;  %v17003_v41 = vld [vmem:[#allocation548_spill] sm:$0xff]  ;;  %v8167_v3 = vpop.permute.xlu0 %8166  ;;  %v17005_v14 = vld [vmem:[#allocation258_spill] sm:$0xff] }
 0x34a   : > { %v6674_v23 = vmul.f32 -1.442695, %v14052_v40  ;;  %v7689_v43 = vunpack.i.h.bf16 %v7687_v6  ;;  %v5188_v21 = vadd.f32 %v16998_v49, %v5106_v48  ;;  %v7688_v47 = vunpack.i.l.bf16 %v7687_v6  ;;  %v17004_v6 = vld [vmem:[#allocation547_spill] sm:$0xff] }
 0x34b   : > { %v5839_v54 = vadd.f32 %v16997_v55, %v5590_v39  ;;  %v4565_v44 = vadd.f32 %v16999_v58, %v4256_v25  ;;  %v4643_v24 = vmul.f32 %v13702_v7, %v8153_v5  ;;  %v4640_v18 = vmul.f32 %v13702_v7, %v8152_v15  ;;  %v17007_v4 = vld [vmem:[#allocation259_spill] sm:$0xff]  ;;  %v17013_v58 = vld [vmem:[#allocation142_spill] sm:$0xff] }
 0x34c   : > { %8235 = vpow2.f32 %v6674_v23  ;;  %v3855_v35 = vmul.f32 %v7689_v43, %v13865_v16  ;;  %v5265_v30 = vadd.f32 %v17001_v56, %v5188_v21  ;;  %v3689_v32 = vadd.f32 %v17003_v41, %v13633_v46  ;;  %v17009_v23 = vld [vmem:[#allocation384_spill] sm:$0xff]  ;;  %v17012_v21 = vld [vmem:[#allocation170_spill] sm:$0xff] }
 0x34d   : > { %v6088_v8 = vadd.f32 %v17000_v10, %v5839_v54  ;;  %v4874_v28 = vadd.f32 %v17002_v2, %v4565_v44  ;;  %v8230_v39 = vpop.eup %8229  ;;  %v3690_v5 = vadd.f32 %v17004_v6, %v13638_v53  ;;  %v3854_v15 = vmul.f32 %v7688_v47, %v13865_v16  ;;  %v14098_v47 = vpop.permute.xlu1 %7696 }
 0x34e   : > { %v17006_v48 = vrot.slane %v17005_v14, 1  ;;  %v17008_v25 = vrot.slane %v17007_v4, 1  ;;  %v17010_v43 = vrot.slane %v17009_v23, 1  ;;  %v6243_v54 = vadd.f32 1.0, %v8230_v39 }
 0x34f   : > { %v14094_v49 = vadd.f32 %v13975_v45, %v6088_v8  ;;  %v5342_v53 = vadd.f32 %v17012_v21, %v5265_v30  ;;  %v4956_v44 = vadd.f32 %v17013_v58, %v4874_v28  ;;  %v3886_v56 = vadd.f32 %v3854_v15, %v3689_v32  ;;  %v17016_v32 = vld [vmem:[#allocation7_spill] sm:$0xff]  ;;  %v17017_v15 = vld [vmem:[#allocation330_spill] sm:$0xff]  ;;  %v17018_v21 = vld [vmem:[#allocation148_spill] sm:$0xff] }
 0x350   : > { %v4118_v12 = vsel %vm1843_vm0, %v17008_v25, %v17006_v48  ;;  %v17011_v55 = vmov %v17006_v48  ;;  %v8232_v10 = vpop.eup %8231  ;;  %v3887_v2 = vadd.f32 %v3855_v35, %v3690_v5  ;;  %v8169_v41 = vunpack.i.h.bf16 %v8167_v3  ;;  %v17014_v48 = vld [vmem:[#allocation135_spill] sm:$0xff]  ;;  %v17015_v25 = vld [vmem:[#allocation474_spill] sm:$0xff] }
 0x351   : > { %v4120_v46 = vsel %vm1843_vm0, %v17011_v55, %v17010_v43  ;;  %v8168_v6 = vunpack.i.l.bf16 %v8167_v3  ;;  %8237 = vrcp.f32 %v6243_v54  ;;  %v6247_v14 = vadd.f32 1.0, %v8232_v10  ;;  %v8234_v4 = vpop.eup %8233 }
 0x352   : > { %v6678_v39 = vmul.f32 -1.442695, %v14094_v49  ;;  %v5594_v8 = vadd.f32 %v17014_v48, %v5342_v53  ;;  %v5033_v30 = vadd.f32 %v17015_v25, %v4956_v44  ;;  %v4228_v23 = vadd.f32 %v4118_v12, %v3886_v56  ;;  %v17019_v12 = vld [vmem:[#allocation321_spill] sm:$0xff]  ;;  %v14115_v56 = vpop.permute.xlu1 %7701 }
 0x353   : > { %v14105_v28 = vadd.f32 %v4120_v46, %v3887_v2  ;;  %v4661_v43 = vmul.f32 %v13702_v7, %v8169_v41  ;;  %v6333_v35 = vmul.f32 %v8234_v4, %v13989_v29  ;;  %8239 = vrcp.f32 %v6247_v14  ;;  %v17020_v2 = vld [vmem:[#allocation232_spill] sm:$0xff]  ;;  %v17021_v14 = vld [vmem:[#allocation166_spill] sm:$0xff] }
 0x354   : > { %v5843_v3 = vadd.f32 %v17016_v32, %v5594_v8  ;;  %v4742_v5 = vrot.slane %v4643_v24, 1  ;;  %8241 = vpow2.f32 %v6678_v39  ;;  %v5110_v55 = vadd.f32 %v17017_v15, %v5033_v30  ;;  %v17024_v30 = vld [vmem:[#allocation453_spill] sm:$0xff] }
 0x355   : > { %v4737_v54 = vrot.slane %v4640_v18, 1  ;;  %v4537_v53 = vadd.f32 %v17018_v21, %v4228_v23  ;;  %v6729_v58 = vpack.c.bf16 %v6333_v35, %v6333_v35  ;;  %v3693_v44 = vadd.f32 %v3661_v1, %v13613_v20  ;;  %v8177_v18 = vpop.permute.xlu0 %8176 }
 0x356   : > { %v6092_v46 = vadd.f32 %v17019_v12, %v5843_v3  ;;  %v4658_v10 = vmul.f32 %v13702_v7, %v8168_v6  ;;  %v8236_v29 = vpop.eup %8235  ;;  %v5192_v41 = vadd.f32 %v17020_v2, %v5110_v55  ;;  %v4772_v39 = vrot.slane %v4661_v43, 1  ;;  %v17022_v6 = vld [vmem:[#allocation511_spill] sm:$0xff]  ;;  %v17025_v43 = vld [vmem:[#allocation66_spill] sm:$0xff]  ;;  %v17027_v3 = vld [vmem:[#allocation65_spill] sm:$0xff] }
 0x357   : > { %v4846_v24 = vadd.f32 %v17021_v14, %v4537_v53  ;;  %v7693_v48 = vunpack.i.l.bf16 %v14060_v33  ;;  %6494 = vst.msk [vmem:[%s14120_s19 + $0x8] sm:$0xf] %vm6491_vm1, %v6729_v58  ;;  %v6251_v20 = vadd.f32 1.0, %v8236_v29  ;;  %v17023_v8 = vrot.slane %v17022_v6, 1 }
 0x358   : > { %v14125_v1 = vadd.f32 %v13975_v45, %v6092_v46  ;;  %v7694_v25 = vunpack.i.h.bf16 %v14060_v33  ;;  %v5269_v23 = vadd.f32 %v17024_v30, %v5192_v41  ;;  %v17026_v35 = vrot.slane %v17025_v43, 1  ;;  %v17029_v46 = vld [vmem:[#allocation153_spill] sm:$0xff]  ;;  %v14156_v30 = vpop.permute.xlu1 %7706 }
 0x359   : > { %v14130_v4 = vsel %vm1843_vm0, %v17023_v8, %v4742_v5  ;;  %v4928_v15 = vadd.f32 %v17027_v3, %v4846_v24  ;;  %v3858_v55 = vmul.f32 %v7693_v48, %v13865_v16  ;;  %8243 = vrcp.f32 %v6251_v20  ;;  %v17028_v5 = vld [vmem:[#allocation430_spill] sm:$0xff]  ;;  %v17033_v20 = vld [vmem:[#allocation247_spill] sm:$0xff]  ;;  %v17036_v43 = vld [vmem:[#allocation37_spill] sm:$0xff] }
 0x35a   : > { %v14137_v32 = vsel %vm1843_vm0, %v17026_v35, %v4737_v54  ;;  %v6682_v21 = vmul.f32 -1.442695, %v14125_v1  ;;  %v4767_v53 = vrot.slane %v4658_v10, 1  ;;  %v8179_v58 = vunpack.i.h.bf16 %v8177_v18  ;;  %v17031_v24 = vld [vmem:[#allocation554_spill] sm:$0xff] }
 0x35b   : > { %v5346_v12 = vadd.f32 %v17028_v5, %v5269_v23  ;;  %v5005_v33 = vadd.f32 %v17029_v46, %v4928_v15  ;;  %v17030_v29 = vrot.slane %v13684_v52, 1  ;;  %v3890_v54 = vadd.f32 %v3858_v55, %v3693_v44  ;;  %v8238_v41 = vpop.eup %8237  ;;  %v17035_v23 = vld [vmem:[#allocation144_spill] sm:$0xff] }
 0x35c   : > { %8245 = vpow2.f32 %v6682_v21  ;;  %v3859_v14 = vmul.f32 %v7694_v25, %v13865_v16  ;;  %v17032_v48 = vrot.slane %v17031_v24, 1  ;;  %v17034_v6 = vrot.slane %v17033_v20, 1  ;;  %v17037_v25 = vld [vmem:[#allocation401_spill] sm:$0xff] }
 0x35d   : > { %v14147_v2 = vsel %vm1843_vm0, %v17030_v29, %v4772_v39  ;;  %v7699_v8 = vunpack.i.h.bf16 %v14098_v47  ;;  %v6339_v52 = vmul.f32 %v8238_v41, %v14021_v34  ;;  %v5598_v39 = vadd.f32 %v17035_v23, %v5346_v12  ;;  %v8240_v3 = vpop.eup %8239  ;;  %v17039_v41 = vld [vmem:[#allocation8_spill] sm:$0xff] }
 0x35e   : > { %v4128_v10 = vsel %vm1843_vm0, %v17034_v6, %v17032_v48  ;;  %v5082_v44 = vadd.f32 %v17036_v43, %v5005_v33  ;;  %v17038_v15 = vrot.slane %v17037_v25, 1  ;;  %v4673_v21 = vmul.f32 %v13702_v7, %v8179_v58  ;;  %v8242_v29 = vpop.eup %8241  ;;  %v17040_v48 = vld [vmem:[#allocation338_spill] sm:$0xff] }
 0x35f   : > { %v4232_v35 = vadd.f32 %v4128_v10, %v3890_v54  ;;  %v3861_v5 = vmul.f32 %v7699_v8, %v13865_v16  ;;  %v7698_v46 = vunpack.i.l.bf16 %v14098_v47  ;;  %v6735_v34 = vpack.c.bf16 %v6339_v52, %v6339_v52  ;;  %v17042_v47 = vld [vmem:[#allocation335_spill] sm:$0xff] }
 0x360   : > { %v14164_v55 = vsel %vm1843_vm0, %v17038_v15, %v4767_v53  ;;  %v6343_v12 = vmul.f32 %v8240_v3, %v14032_v36  ;;  %v5847_v33 = vadd.f32 %v17039_v41, %v5598_v39  ;;  %v5164_v54 = vadd.f32 %v17040_v48, %v5082_v44  ;;  %v17041_v53 = vld [vmem:[#allocation42_spill] sm:$0xff]  ;;  %v17043_v52 = vld [vmem:[#allocation479_spill] sm:$0xff]  ;;  %v8187_v3 = vpop.permute.xlu0 %8186 }
 0x361   : > { %v6255_v20 = vadd.f32 1.0, %v8242_v29  ;;  %v14173_v6 = vadd.f32 %v3859_v14, %v13896_v0  ;;  %v4541_v10 = vadd.f32 %v17041_v53, %v4232_v35  ;;  %v8178_v58 = vunpack.i.l.bf16 %v8177_v18  ;;  %6500 = vst.msk [vmem:[%s14120_s19 + $0x20] sm:$0xf] %vm6491_vm1, %v6735_v34  ;;  %v17044_v36 = vld [vmem:[#allocation551_spill] sm:$0xff]  ;;  %v17045_v44 = vld [vmem:[#allocation154_spill] sm:$0xff]  ;;  %v17046_v0 = vld [vmem:[#allocation552_spill] sm:$0xff]  ;;  %v14186_v18 = vpop.permute.xlu1 %7711 }
 0x362   : > { %v6739_v8 = vpack.c.bf16 %v6343_v12, %v6343_v12  ;;  %v6096_v23 = vadd.f32 %v17042_v47, %v5847_v33  ;;  %v5241_v43 = vadd.f32 %v17043_v52, %v5164_v54  ;;  %v3696_v39 = vadd.f32 %v17044_v36, %v13673_v63  ;;  %v17047_v29 = vld [vmem:[#allocation460_spill] sm:$0xff]  ;;  %v17048_v33 = vld [vmem:[#allocation59_spill] sm:$0xff]  ;;  %v17050_v47 = vld [vmem:[#allocation269_spill] sm:$0xff] }
 0x363   : > { %8247 = vrcp.f32 %v6255_v20  ;;  %v4850_v25 = vadd.f32 %v17045_v44, %v4541_v10  ;;  %v3695_v14 = vadd.f32 %v17046_v0, %v13687_v42  ;;  %v3860_v35 = vmul.f32 %v7698_v46, %v13865_v16  ;;  %v8244_v41 = vpop.eup %8243  ;;  %v17049_v10 = vld [vmem:[#allocation73_spill] sm:$0xff]  ;;  %v17054_v36 = vld [vmem:[#allocation423_spill] sm:$0xff] }
 0x364   : > { %6504 = vst.msk [vmem:[%s14120_s19 + $0x30] sm:$0xf] %vm6491_vm1, %v6739_v8  ;;  %v14191_v15 = vadd.f32 %v13975_v45, %v6096_v23  ;;  %v5318_v34 = vadd.f32 %v17047_v29, %v5241_v43  ;;  %v4792_v12 = vrot.slane %v4673_v21, 1  ;;  %v14194_v63 = vadd.f32 %v3861_v5, %v3696_v39  ;;  %v17052_v52 = vld [vmem:[#allocation273_spill] sm:$0xff]  ;;  %v17056_v29 = vld [vmem:[#allocation260_spill] sm:$0xff] }
 0x365   : > { %v4932_v48 = vadd.f32 %v17048_v33, %v4850_v25  ;;  %v4670_v54 = vmul.f32 %v13702_v7, %v8178_v58  ;;  %v3892_v42 = vadd.f32 %v3860_v35, %v3695_v14  ;;  %v8188_v20 = vunpack.i.l.bf16 %v8187_v3  ;;  %v17055_v14 = vld [vmem:[#allocation160_spill] sm:$0xff]  ;;  %v17057_v33 = vld [vmem:[#allocation459_spill] sm:$0xff] }
 0x366   : > { %v6347_v46 = vmul.f32 %v8244_v41, %v14052_v40  ;;  %v6686_v53 = vmul.f32 -1.442695, %v14191_v15  ;;  %v5570_v8 = vadd.f32 %v17049_v10, %v5318_v34  ;;  %v17051_v23 = vrot.slane %v17050_v47, 1  ;;  %v8246_v5 = vpop.eup %8245 }
 0x367   : > { %v17053_v43 = vrot.slane %v17052_v52, 1  ;;  %v5009_v39 = vadd.f32 %v17054_v36, %v4932_v48  ;;  %v8189_v58 = vunpack.i.h.bf16 %v8187_v3  ;;  %v4682_v25 = vmul.f32 %v13702_v7, %v8188_v20  ;;  %v17058_v3 = vld [vmem:[#allocation155_spill] sm:$0xff] }
 0x368   : > { %v6743_v0 = vpack.c.bf16 %v6347_v46, %v6347_v46  ;;  %v6259_v40 = vadd.f32 1.0, %v8246_v5  ;;  %8249 = vpow2.f32 %v6686_v53  ;;  %v5819_v35 = vadd.f32 %v17055_v14, %v5570_v8  ;;  %v17060_v53 = vld [vmem:[#allocation161_spill] sm:$0xff]  ;;  %v17064_v14 = vld [vmem:[#allocation78_spill] sm:$0xff] }
 0x369   : > { %v4133_v21 = vsel %vm1843_vm0, %v17053_v43, %v17051_v23  ;;  %v5086_v34 = vadd.f32 %v17056_v29, %v5009_v39  ;;  %v4787_v41 = vrot.slane %v4670_v54, 1  ;;  %v7704_v52 = vunpack.i.h.bf16 %v14115_v56  ;;  %v14212_v23 = vpop.permute.xlu1 %7716 }
 0x36a   : > { %v4234_v44 = vadd.f32 %v4133_v21, %v3892_v42  ;;  %6508 = vst.msk [vmem:[%s14120_s19 + $0x40] sm:$0xf] %vm6491_vm1, %v6743_v0  ;;  %8251 = vrcp.f32 %v6259_v40  ;;  %v6068_v48 = vadd.f32 %v17058_v3, %v5819_v35  ;;  %v17059_v42 = vrot.slane %v13759_v60, 1  ;;  %v17061_v21 = vld [vmem:[#allocation411_spill] sm:$0xff]  ;;  %v17063_v0 = vld [vmem:[#allocation402_spill] sm:$0xff]  ;;  %v17069_v3 = vld [vmem:[#allocation388_spill] sm:$0xff] }
 0x36b   : > { %v7703_v46 = vunpack.i.l.bf16 %v14115_v56  ;;  %v5168_v54 = vadd.f32 %v17060_v53, %v5086_v34  ;;  %v14226_v43 = vmul.f32 %v13702_v7, %v8189_v58  ;;  %v3699_v5 = vadd.f32 %v17061_v21, %v13705_v61  ;;  %v17062_v60 = vld [vmem:[#allocation163_spill] sm:$0xff]  ;;  %v17071_v53 = vld [vmem:[#allocation558_spill] sm:$0xff] }
 0x36c   : > { %v4543_v10 = vadd.f32 %v17057_v33, %v4234_v44  ;;  %v14220_v20 = vsel %vm1843_vm0, %v17059_v42, %v4792_v12  ;;  %v14231_v36 = vadd.f32 %v13975_v45, %v6068_v48  ;;  %v4807_v39 = vrot.slane %v4682_v25, 1  ;;  %v17065_v25 = vld [vmem:[#allocation284_spill] sm:$0xff]  ;;  %v17067_v33 = vld [vmem:[#allocation287_spill] sm:$0xff] }
 0x36d   : > { %v3700_v12 = vadd.f32 %v17062_v60, %v13707_v11  ;;  %v3864_v44 = vmul.f32 %v7703_v46, %v13865_v16  ;;  %v8248_v56 = vpop.eup %8247  ;;  %v5245_v40 = vadd.f32 %v17063_v0, %v5168_v54  ;;  %v3865_v7 = vmul.f32 %v7704_v52, %v13865_v16  ;;  %v17070_v42 = vld [vmem:[#allocation175_spill] sm:$0xff] }
 0x36e   : > { %v4852_v8 = vadd.f32 %v13680_v17, %v4543_v10  ;;  %v7708_v58 = vunpack.i.l.bf16 %v14156_v30  ;;  %v6351_v61 = vmul.f32 %v8248_v56, %v14094_v49  ;;  %v6658_v35 = vmul.f32 -1.442695, %v14231_v36  ;;  %v14252_v49 = vpop.permute.xlu1 %7721  ;;  %v17074_v0 = vld [vmem:[#allocation63_spill] sm:$0xff] }
 0x36f   : > { %v3896_v29 = vadd.f32 %v3864_v44, %v3699_v5  ;;  %v17066_v34 = vrot.slane %v17065_v25, 1  ;;  %v17068_v11 = vrot.slane %v17067_v33, 1  ;;  %v5322_v48 = vadd.f32 %v17069_v3, %v5245_v40  ;;  %v17072_v5 = vld [vmem:[#allocation557_spill] sm:$0xff]  ;;  %v17073_v44 = vld [vmem:[#allocation64_spill] sm:$0xff]  ;;  %v17080_v3 = vld [vmem:[#allocation431_spill] sm:$0xff] }
 0x370   : > { %v4934_v17 = vadd.f32 %v17064_v14, %v4852_v8  ;;  %v7709_v52 = vunpack.i.h.bf16 %v14156_v30  ;;  %v3703_v54 = vadd.f32 %v17071_v53, %v13751_v57  ;;  %v6747_v8 = vpack.c.bf16 %v6351_v61, %v6351_v61 }
 0x371   : > { %v4143_v10 = vsel %vm1843_vm0, %v17068_v11, %v17066_v34  ;;  %8253 = vpow2.f32 %v6658_v35  ;;  %v3704_v60 = vadd.f32 %v17072_v5, %v13763_v51  ;;  %v5574_v56 = vadd.f32 %v17073_v44, %v5322_v48  ;;  %v17077_v35 = vld [vmem:[#allocation87_spill] sm:$0xff]  ;;  %v17079_v11 = vld [vmem:[#allocation354_spill] sm:$0xff]  ;;  %v17082_v5 = vld [vmem:[#allocation524_spill] sm:$0xff] }
 0x372   : > { %v5011_v46 = vadd.f32 %v17070_v42, %v4934_v17  ;;  %v4238_v21 = vadd.f32 %v4143_v10, %v3896_v29  ;;  %v17075_v14 = vrot.slane %v17074_v0, 1  ;;  %v17076_v17 = vld [vmem:[#allocation348_spill] sm:$0xff]  ;;  %v3868_v34 = vmul.f32 %v7708_v58, %v13865_v16  ;;  %v8250_v57 = vpop.eup %8249  ;;  %6512 = vst.msk [vmem:[%s14120_s19 + $0x50] sm:$0xf] %vm6491_vm1, %v6747_v8  ;;  %v17081_v42 = vld [vmem:[#allocation349_spill] sm:$0xff] }
 0x373   : > { %v4812_v61 = vrot.slane %v14226_v43, 1  ;;  %v17078_v29 = vrot.slane %v17077_v35, 1  ;;  %v14272_v33 = vadd.f32 %v3865_v7, %v3700_v12  ;;  %v5823_v48 = vadd.f32 %v17080_v3, %v5574_v56  ;;  %v17083_v0 = vld [vmem:[#allocation296_spill] sm:$0xff]  ;;  %v17087_v56 = vld [vmem:[#allocation266_spill] sm:$0xff]  ;;  %v17089_v35 = vld [vmem:[#allocation91_spill] sm:$0xff] }
 0x374   : > { %v14260_v40 = vsel %vm1843_vm0, %v17075_v14, %v4787_v41  ;;  %v5088_v30 = vadd.f32 %v17076_v17, %v5011_v46  ;;  %v4547_v10 = vadd.f32 %v17079_v11, %v4238_v21  ;;  %v6263_v41 = vadd.f32 1.0, %v8250_v57  ;;  %v8252_v53 = vpop.eup %8251  ;;  %v17085_v17 = vld [vmem:[#allocation300_spill] sm:$0xff]  ;;  %v14288_v57 = vpop.permute.xlu1 %7726  ;;  %v17090_v11 = vld [vmem:[#allocation562_spill] sm:$0xff]  ;;  %v17091_v3 = vld [vmem:[#allocation561_spill] sm:$0xff] }
 0x375   : > { %v14270_v51 = vsel %vm1843_vm0, %v17078_v29, %v4807_v39  ;;  %v3900_v58 = vadd.f32 %v3868_v34, %v3703_v54  ;;  %v3869_v44 = vmul.f32 %v7709_v52, %v13865_v16  ;;  %v17084_v14 = vrot.slane %v17083_v0, 1  ;;  %v17088_v54 = vld [vmem:[#allocation485_spill] sm:$0xff] }
 0x376   : > { %v5170_v46 = vadd.f32 %v17081_v42, %v5088_v30  ;;  %v4856_v8 = vadd.f32 %v17082_v5, %v4547_v10  ;;  %v17086_v39 = vrot.slane %v17085_v17, 1  ;;  %v7713_v7 = vunpack.i.l.bf16 %v14186_v18 }
 0x377   : > { %v6355_v21 = vmul.f32 %v8252_v53, %v14125_v1  ;;  %8255 = vrcp.f32 %v6263_v41  ;;  %v6072_v30 = vadd.f32 %v17087_v56, %v5823_v48  ;;  %v3707_v10 = vadd.f32 %v17090_v11, %v13777_v59  ;;  %v17092_v41 = vld [vmem:[#allocation472_spill] sm:$0xff]  ;;  %v17093_v53 = vld [vmem:[#allocation186_spill] sm:$0xff]  ;;  %v17101_v11 = vld [vmem:[#allocation567_spill] sm:$0xff] }
 0x378   : > { %v4153_v12 = vsel %vm1843_vm0, %v17086_v39, %v17084_v14  ;;  %v5247_v34 = vadd.f32 %v17088_v54, %v5170_v46  ;;  %v4938_v52 = vadd.f32 %v17089_v35, %v4856_v8  ;;  %v14295_v42 = vadd.f32 %v17091_v3, %v13768_v62  ;;  %v17094_v8 = vld [vmem:[#allocation358_spill] sm:$0xff]  ;;  %v17097_v59 = vld [vmem:[#allocation312_spill] sm:$0xff] }
 0x379   : > { %v4242_v29 = vadd.f32 %v4153_v12, %v3900_v58  ;;  %v6751_v5 = vpack.c.bf16 %v6355_v21, %v6355_v21  ;;  %v14298_v1 = vadd.f32 %v13975_v45, %v6072_v30  ;;  %v3872_v46 = vmul.f32 %v7713_v7, %v13865_v16  ;;  %v17095_v39 = vld [vmem:[#allocation310_spill] sm:$0xff]  ;;  %v17099_v30 = vld [vmem:[#allocation85_spill] sm:$0xff] }
 0x37a   : > { %v5324_v48 = vadd.f32 %v17092_v41, %v5247_v34  ;;  %v5015_v14 = vadd.f32 %v17093_v53, %v4938_v52  ;;  %v3901_v17 = vadd.f32 %v3869_v44, %v3704_v60  ;;  %v17096_v12 = vrot.slane %v17095_v39, 1  ;;  %v17100_v52 = vld [vmem:[#allocation591_spill] sm:$0xff] }
 0x37b   : > { %v4551_v58 = vadd.f32 %v17094_v8, %v4242_v29  ;;  %v17098_v56 = vrot.slane %v17097_v59, 1  ;;  %6516 = vst.msk [vmem:[%s14120_s19 + $0x60] sm:$0xf] %vm6491_vm1, %v6751_v5  ;;  %v6662_v21 = vmul.f32 -1.442695, %v14298_v1  ;;  %v3904_v34 = vadd.f32 %v3872_v46, %v3707_v10  ;;  %v8254_v35 = vpop.eup %8253  ;;  %v17102_v5 = vld [vmem:[#allocation183_spill] sm:$0xff] }
 0x37c   : > { %v5576_v54 = vadd.f32 %v17099_v30, %v5324_v48  ;;  %v7719_v7 = vunpack.i.h.bf16 %v14212_v23  ;;  %v5092_v60 = vadd.f32 %v17100_v52, %v5015_v14  ;;  %v7718_v29 = vunpack.i.l.bf16 %v14212_v23  ;;  %v17103_v10 = vld [vmem:[#allocation355_spill] sm:$0xff] }
 0x37d   : > { %v4163_v62 = vsel %vm1843_vm0, %v17098_v56, %v17096_v12  ;;  %v4860_v44 = vadd.f32 %v13756_v50, %v4551_v58  ;;  %v3711_v3 = vadd.f32 %v17101_v11, %v13814_v38  ;;  %v6235_v41 = vadd.f32 1.0, %v8254_v35  ;;  %v14320_v12 = vpop.permute.xlu1 %7737  ;;  %v17104_v46 = vld [vmem:[#allocation391_spill] sm:$0xff]  ;;  %v17107_v58 = vld [vmem:[#allocation105_spill] sm:$0xff]  ;;  %v17108_v56 = vld [vmem:[#allocation566_spill] sm:$0xff] }
 0x37e   : > { %8257 = vpow2.f32 %v6662_v21  ;;  %v5825_v53 = vadd.f32 %v17102_v5, %v5576_v54  ;;  %v4246_v8 = vadd.f32 %v4163_v62, %v3904_v34  ;;  %v5174_v48 = vadd.f32 %v17103_v10, %v5092_v60  ;;  %v17109_v21 = vld [vmem:[#allocation589_spill] sm:$0xff]  ;;  %v17110_v54 = vld [vmem:[#allocation598_spill] sm:$0xff]  ;;  %v17111_v35 = vld [vmem:[#allocation491_spill] sm:$0xff] }
 0x37f   : > { %v17105_v59 = vrot.slane %v17104_v46, 1  ;;  %v17106_v14 = vrot.slane %v17083_v0, 1  ;;  %v4942_v23 = vadd.f32 %v17107_v58, %v4860_v44  ;;  %v3712_v38 = vadd.f32 %v17108_v56, %v13826_v9  ;;  %v17112_v11 = vld [vmem:[#allocation199_spill] sm:$0xff] }
 0x380   : > { %8259 = vrcp.f32 %v6235_v41  ;;  %v6074_v30 = vadd.f32 %v17109_v21, %v5825_v53  ;;  %v4555_v62 = vadd.f32 %v17110_v54, %v4246_v8  ;;  %v3876_v34 = vmul.f32 %v7718_v29, %v13865_v16  ;;  %v17113_v29 = vld [vmem:[#allocation477_spill] sm:$0xff]  ;;  %v17119_v56 = vld [vmem:[#allocation119_spill] sm:$0xff] }
 0x381   : > { %v4155_v50 = vsel %vm1843_vm0, %v17106_v14, %v17105_v59  ;;  %v5251_v52 = vadd.f32 %v17111_v35, %v5174_v48  ;;  %v5019_v0 = vadd.f32 %v17112_v11, %v4942_v23  ;;  %v7714_v5 = vunpack.i.h.bf16 %v14186_v18  ;;  %v8256_v10 = vpop.eup %8255  ;;  %v17114_v48 = vld [vmem:[#allocation490_spill] sm:$0xff]  ;;  %v17115_v59 = vld [vmem:[#allocation319_spill] sm:$0xff] }
 0x382   : > { %v14335_v60 = vadd.f32 %v4155_v50, %v3901_v17  ;;  %v14340_v44 = vadd.f32 %v13975_v45, %v6074_v30  ;;  %v4864_v9 = vadd.f32 %v13773_v26, %v4555_v62  ;;  %v3877_v41 = vmul.f32 %v7719_v7, %v13865_v16  ;;  %v17117_v50 = vld [vmem:[#allocation320_spill] sm:$0xff]  ;;  %v17120_v30 = vld [vmem:[#allocation99_spill] sm:$0xff]  ;;  %v17121_v62 = vld [vmem:[#allocation362_spill] sm:$0xff] }
 0x383   : > { %v3908_v53 = vadd.f32 %v3876_v34, %v3711_v3  ;;  %v6359_v8 = vmul.f32 %v8256_v10, %v14191_v15  ;;  %v5328_v46 = vadd.f32 %v17113_v29, %v5251_v52  ;;  %v5096_v17 = vadd.f32 %v17114_v48, %v5019_v0  ;;  %v14355_v3 = vpop.permute.xlu1 %7742  ;;  %v17122_v11 = vld [vmem:[#allocation210_spill] sm:$0xff]  ;;  %v17123_v10 = vld [vmem:[#allocation601_spill] sm:$0xff] }
 0x384   : > { %v17116_v14 = vrot.slane %v17115_v59, 1  ;;  %v17118_v18 = vrot.slane %v17117_v50, 1  ;;  %v6664_v23 = vmul.f32 -1.442695, %v14340_v44  ;;  %v4946_v26 = vadd.f32 %v17119_v56, %v4864_v9  ;;  %v17124_v9 = vld [vmem:[#allocation195_spill] sm:$0xff]  ;;  %v17125_v48 = vld [vmem:[#allocation498_spill] sm:$0xff] }
 0x385   : > { %v7724_v7 = vunpack.i.h.bf16 %v14252_v49  ;;  %v6755_v15 = vpack.c.bf16 %v6359_v8, %v6359_v8  ;;  %v5580_v54 = vadd.f32 %v17120_v30, %v5328_v46  ;;  %v5178_v34 = vadd.f32 %v17121_v62, %v5096_v17  ;;  %v17126_v8 = vld [vmem:[#allocation571_spill] sm:$0xff]  ;;  %v17128_v17 = vld [vmem:[#allocation32_spill] sm:$0xff] }
 0x386   : > { %v4173_v58 = vsel %vm1843_vm0, %v17118_v18, %v17116_v14  ;;  %v7723_v35 = vunpack.i.l.bf16 %v14252_v49  ;;  %8261 = vpow2.f32 %v6664_v23  ;;  %v3873_v52 = vmul.f32 %v7714_v5, %v13865_v16  ;;  %v17127_v50 = vld [vmem:[#allocation427_spill] sm:$0xff]  ;;  %v17130_v56 = vld [vmem:[#allocation536_spill] sm:$0xff] }
 0x387   : > { %v4250_v21 = vadd.f32 %v4173_v58, %v3908_v53  ;;  %v5023_v0 = vadd.f32 %v17122_v11, %v4946_v26  ;;  %6520 = vst.msk [vmem:[%s14120_s19 + $0x70] sm:$0xf] %vm6491_vm1, %v6755_v15  ;;  %v5829_v53 = vadd.f32 %v17124_v9, %v5580_v54  ;;  %v5255_v14 = vadd.f32 %v17125_v48, %v5178_v34  ;;  %v17129_v58 = vld [vmem:[#allocation599_spill] sm:$0xff]  ;;  %v17131_v15 = vld [vmem:[#allocation592_spill] sm:$0xff]  ;;  %v17132_v54 = vld [vmem:[#allocation482_spill] sm:$0xff] }
 0x388   : > { %v3715_v46 = vadd.f32 %v17126_v8, %v13867_v27  ;;  %v3716_v18 = vadd.f32 %v17128_v17, %v17127_v50  ;;  %v8258_v49 = vpop.eup %8257  ;;  %v3909_v5 = vadd.f32 %v3877_v41, %v3712_v38  ;;  %v3881_v34 = vmul.f32 %v7724_v7, %v13865_v16  ;;  %v17133_v27 = vld [vmem:[#allocation369_spill] sm:$0xff]  ;;  %v17134_v48 = vld [vmem:[#allocation138_spill] sm:$0xff]  ;;  %v17135_v17 = vld [vmem:[#allocation331_spill] sm:$0xff] }
 0x389   : > { %v4559_v29 = vadd.f32 %v17123_v10, %v4250_v21  ;;  %v5100_v23 = vadd.f32 %v17129_v58, %v5023_v0  ;;  %v3880_v21 = vmul.f32 %v7723_v35, %v13865_v16  ;;  %v6239_v30 = vadd.f32 1.0, %v8258_v49  ;;  %v17137_v38 = vld [vmem:[#allocation332_spill] sm:$0xff]  ;;  %v14384_v35 = vpop.permute.xlu1 %7752  ;;  %v17139_v7 = vld [vmem:[#allocation106_spill] sm:$0xff] }
 0x38a   : > { %v6078_v62 = vadd.f32 %v17131_v15, %v5829_v53  ;;  %v5332_v11 = vadd.f32 %v17132_v54, %v5255_v14  ;;  %v8260_v10 = vpop.eup %8259  ;;  %v17136_v0 = vrot.slane %v17135_v17, 1  ;;  %v17138_v41 = vrot.slane %v17137_v38, 1  ;;  %v17140_v49 = vld [vmem:[#allocation504_spill] sm:$0xff]  ;;  %v17142_v54 = vld [vmem:[#allocation202_spill] sm:$0xff] }
 0x38b   : > { %v4868_v26 = vadd.f32 %v17130_v56, %v4559_v29  ;;  %v5182_v9 = vadd.f32 %v17133_v27, %v5100_v23  ;;  %v3912_v50 = vadd.f32 %v3880_v21, %v3715_v46  ;;  %v6331_v53 = vmul.f32 %v8260_v10, %v14231_v36  ;;  %v17141_v46 = vld [vmem:[#allocation222_spill] sm:$0xff] }
 0x38c   : > { %v4183_v29 = vsel %vm1843_vm0, %v17138_v41, %v17136_v0  ;;  %8263 = vrcp.f32 %v6239_v30  ;;  %v14388_v16 = vadd.f32 %v13975_v45, %v6078_v62  ;;  %v5584_v14 = vadd.f32 %v17139_v7, %v5332_v11  ;;  %v17143_v30 = vld [vmem:[#allocation489_spill] sm:$0xff]  ;;  %v17144_v62 = vld [vmem:[#allocation374_spill] sm:$0xff]  ;;  %v17145_v0 = vld [vmem:[#allocation416_spill] sm:$0xff] }
 0x38d   : > { %v4950_v8 = vadd.f32 %v17134_v48, %v4868_v26  ;;  %v5259_v58 = vadd.f32 %v17140_v49, %v5182_v9  ;;  %v4254_v56 = vadd.f32 %v4183_v29, %v3912_v50  ;;  %v7729_v26 = vunpack.i.h.bf16 %v14288_v57  ;;  %v17146_v38 = vld [vmem:[#allocation94_spill] sm:$0xff]  ;;  %v17147_v9 = vld [vmem:[#allocation575_spill] sm:$0xff]  ;;  %v17150_v49 = vld [vmem:[#allocation128_spill] sm:$0xff] }
 0x38e   : > { %v6727_v21 = vpack.c.bf16 %v6331_v53, %v6331_v53  ;;  %v6668_v15 = vmul.f32 -1.442695, %v14388_v16  ;;  %v5833_v27 = vadd.f32 %v17142_v54, %v5584_v14  ;;  %v7728_v36 = vunpack.i.l.bf16 %v14288_v57  ;;  %v17149_v29 = vld [vmem:[#allocation574_spill] sm:$0xff]  ;;  %v8383_v57 = vld [vmem:[%s15075_s1 + $0x12] ss:$0 sm:$0xff] }
 0x38f   : > { %v5027_v23 = vadd.f32 %v17141_v46, %v4950_v8  ;;  %v5336_v10 = vadd.f32 %v17143_v30, %v5259_v58  ;;  %v4563_v11 = vadd.f32 %v17145_v0, %v4254_v56  ;;  %v3719_v41 = vadd.f32 %v17147_v9, %v17146_v38  ;;  %v17148_v8 = vld [vmem:[#allocation198_spill] sm:$0xff]  ;;  %v17151_v46 = vld [vmem:[#allocation396_spill] sm:$0xff]  ;;  %v17156_v38 = vld [vmem:[#allocation221_spill] sm:$0xff] }
 0x390   : > { %6492 = vst.msk [vmem:[%s14120_s19] sm:$0xf] %vm6491_vm1, %v6727_v21  ;;  %8265 = vpow2.f32 %v6668_v15  ;;  %v6082_v50 = vadd.f32 %v17148_v8, %v5833_v27  ;;  %v3720_v53 = vadd.f32 %v17149_v29, %v14064_v19  ;;  %v3884_v7 = vmul.f32 %v8383_v57, %v7728_v36  ;;  %v8262_v14 = vpop.eup %8261  ;;  %v17154_v15 = vld [vmem:[#allocation375_spill] sm:$0xff] }
 0x391   : > { %v5104_v48 = vadd.f32 %v17144_v62, %v5027_v23  ;;  %v5588_v58 = vadd.f32 %v17150_v49, %v5336_v10  ;;  %v17152_v23 = vrot.slane %v17151_v46, 1  ;;  %v17153_v56 = vrot.slane %v17115_v59, 1  ;;  %v17155_v27 = vld [vmem:[#allocation559_spill] sm:$0xff]  ;;  %v14418_v62 = vpop.permute.xlu1 %7762  ;;  %v17157_v59 = vld [vmem:[#allocation508_spill] sm:$0xff] }
 0x392   : > { %v4872_v30 = vadd.f32 %v17155_v27, %v4563_v11  ;;  %v6241_v19 = vadd.f32 1.0, %v8262_v14  ;;  %v14421_v0 = vadd.f32 %v13975_v45, %v6082_v50  ;;  %v14424_v36 = vadd.f32 %v3873_v52, %v14295_v42  ;;  %v17159_v50 = vld [vmem:[#allocation596_spill] sm:$0xff]  ;;  %v17160_v42 = vld [vmem:[#allocation495_spill] sm:$0xff] }
 0x393   : > { %v4175_v21 = vsel %vm1843_vm0, %v17153_v56, %v17152_v23  ;;  %v5186_v54 = vadd.f32 %v17154_v15, %v5104_v48  ;;  %v5837_v9 = vadd.f32 %v17156_v38, %v5588_v58  ;;  %v14430_v29 = vadd.f32 %v3881_v34, %v3716_v18  ;;  %v17158_v48 = vld [vmem:[#allocation145_spill] sm:$0xff] }
 0x394   : > { %v14426_v10 = vadd.f32 %v4175_v21, %v3909_v5  ;;  %v4954_v49 = vadd.f32 %v17158_v48, %v4872_v30  ;;  %8267 = vrcp.f32 %v6241_v19  ;;  %v6672_v11 = vmul.f32 -1.442695, %v14421_v0  ;;  %v17161_v5 = vld [vmem:[#allocation234_spill] sm:$0xff] }
 0x395   : > { %v5263_v8 = vadd.f32 %v17157_v59, %v5186_v54  ;;  %v3885_v14 = vmul.f32 %v8383_v57, %v7729_v26  ;;  %v14434_v46 = vadd.f32 %v3884_v7, %v3719_v41  ;;  %v6086_v23 = vadd.f32 %v17159_v50, %v5837_v9  ;;  %v17162_v57 = vld [vmem:[#allocation136_spill] sm:$0xff]  ;;  %v17163_v54 = vld [vmem:[#allocation382_spill] sm:$0xff]  ;;  %v14449_v30 = vpop.permute.xlu1 %7944 }
 0x396   : > { %v5031_v56 = vadd.f32 %v17161_v5, %v4954_v49  ;;  %v7740_v58 = vunpack.i.h.bf16 %v14320_v12  ;;  %v8264_v21 = vpop.eup %8263  ;;  %8269 = vpow2.f32 %v6672_v11  ;;  %v7739_v18 = vunpack.i.l.bf16 %v14320_v12  ;;  %v8384_v12 = vld [vmem:[%s15075_s1 + $0x14] ss:$0 sm:$0xff]  ;;  %v17165_v49 = vld [vmem:[#allocation385_spill] sm:$0xff] }
 0x397   : > { %v5340_v52 = vadd.f32 %v17160_v42, %v5263_v8  ;;  %v7745_v34 = vunpack.i.h.bf16 %v14355_v3  ;;  %v7744_v15 = vunpack.i.l.bf16 %v14355_v3  ;;  %v6335_v26 = vmul.f32 %v8264_v21, %v14298_v1  ;;  %v17164_v8 = vld [vmem:[#allocation224_spill] sm:$0xff] }
 0x398   : > { %v14445_v41 = vadd.f32 %v13975_v45, %v6086_v23  ;;  %v5108_v27 = vadd.f32 %v17163_v54, %v5031_v56  ;;  %v4031_v19 = vmul.f32 %v8384_v12, %v7740_v58  ;;  %v4028_v38 = vmul.f32 %v8384_v12, %v7739_v18  ;;  %v17166_v58 = vld [vmem:[#allocation372_spill] sm:$0xff] }
 0x399   : > { %v5592_v7 = vadd.f32 %v17162_v57, %v5340_v52  ;;  %v4037_v9 = vmul.f32 %v8384_v12, %v7745_v34  ;;  %v4034_v3 = vmul.f32 %v8384_v12, %v7744_v15  ;;  %v6731_v59 = vpack.c.bf16 %v6335_v26, %v6335_v26  ;;  %v17167_v18 = vld [vmem:[#allocation512_spill] sm:$0xff] }
 0x39a   : > { %v6676_v1 = vmul.f32 -1.442695, %v14445_v41  ;;  %v5190_v11 = vadd.f32 %v17165_v49, %v5108_v27  ;;  %v8266_v50 = vpop.eup %8265  ;;  %v4134_v23 = vrot.slane %v4031_v19, 1  ;;  %v4129_v42 = vrot.slane %v4028_v38, 1 }
 0x39b   : > { %v5841_v48 = vadd.f32 %v17164_v8, %v5592_v7  ;;  %v4144_v52 = vrot.slane %v4037_v9, 1  ;;  %v4139_v5 = vrot.slane %v4034_v3, 1  ;;  %6496 = vst.msk [vmem:[%s14120_s19 + $0x10] sm:$0xf] %vm6491_vm1, %v6731_v59  ;;  %v6245_v56 = vadd.f32 1.0, %v8266_v50  ;;  %v17171_v9 = vld [vmem:[#allocation501_spill] sm:$0xff] }
 0x39c   : > { %8271 = vpow2.f32 %v6676_v1  ;;  %v5267_v34 = vadd.f32 %v17167_v18, %v5190_v11  ;;  %v14461_v15 = vadd.f32 %v3885_v14, %v3720_v53  ;;  %v17168_v26 = vrot.slane %v17031_v24, 1  ;;  %v14479_v24 = vpop.permute.xlu1 %7954  ;;  %v17172_v59 = vld [vmem:[#allocation556_spill] sm:$0xff]  ;;  %v17174_v11 = vld [vmem:[#allocation149_spill] sm:$0xff] }
 0x39d   : > { %v6090_v21 = vadd.f32 %v17166_v58, %v5841_v48  ;;  %v17169_v7 = vrot.slane %v17050_v47, 1  ;;  %v17170_v27 = vrot.slane %v17065_v25, 1  ;;  %8273 = vrcp.f32 %v6245_v56 }
 0x39e   : > { %v4130_v57 = vsel %vm1843_vm0, %v17168_v26, %v4129_v42  ;;  %v5344_v3 = vadd.f32 %v17171_v9, %v5267_v34  ;;  %v8268_v14 = vpop.eup %8267  ;;  %v17173_v1 = vrot.slane %v17172_v59, 1  ;;  %v7755_v48 = vunpack.i.h.bf16 %v14384_v35 }
 0x39f   : > { %v4135_v54 = vsel %vm1843_vm0, %v17169_v7, %v4134_v23  ;;  %v4145_v19 = vsel %vm1843_vm0, %v17170_v27, %v4144_v52  ;;  %v14473_v38 = vadd.f32 %v13975_v45, %v6090_v21  ;;  %v14477_v53 = vadd.f32 %v4130_v57, %v14173_v6  ;;  %v17175_v21 = vld [vmem:[#allocation239_spill] sm:$0xff] }
 0x3a0   : > { %v14482_v47 = vadd.f32 %v4135_v54, %v14194_v63  ;;  %v4140_v25 = vsel %vm1843_vm0, %v17173_v1, %v4139_v5  ;;  %v14488_v8 = vadd.f32 %v4145_v19, %v14272_v33  ;;  %v6337_v49 = vmul.f32 %v8268_v14, %v14340_v44  ;;  %v8270_v63 = vpop.eup %8269  ;;  %v7960_v19 = vpop.permute.xlu1 %7959 }
 0x3a1   : > { %v6680_v6 = vmul.f32 -1.442695, %v14473_v38  ;;  %v5596_v50 = vadd.f32 %v17174_v11, %v5344_v3  ;;  %v7754_v23 = vunpack.i.l.bf16 %v14384_v35  ;;  %v4049_v42 = vmul.f32 %v8384_v12, %v7755_v48  ;;  %v17176_v35 = vld [vmem:[#allocation606_spill] sm:$0xff] }
 0x3a2   : > { %v7765_v52 = vunpack.i.h.bf16 %v14418_v62  ;;  %v7764_v5 = vunpack.i.l.bf16 %v14418_v62  ;;  %v7947_v33 = vunpack.i.h.bf16 %v14449_v30  ;;  %v6733_v56 = vpack.c.bf16 %v6337_v49, %v6337_v49  ;;  %v14505_v62 = vld [vmem:[%s15075_s1 + $0x15] ss:$0 sm:$0xff] }
 0x3a3   : > { %v6249_v58 = vadd.f32 1.0, %v8270_v63  ;;  %8275 = vpow2.f32 %v6680_v6  ;;  %v5845_v44 = vadd.f32 %v17175_v21, %v5596_v50  ;;  %v4164_v18 = vrot.slane %v4049_v42, 1 }
 0x3a4   : > { %v4046_v34 = vmul.f32 %v8384_v12, %v7754_v23  ;;  %v4061_v26 = vmul.f32 %v8384_v12, %v7765_v52  ;;  %v4058_v57 = vmul.f32 %v8384_v12, %v7764_v5  ;;  %6498 = vst.msk [vmem:[%s14120_s19 + $0x18] sm:$0xf] %vm6491_vm1, %v6733_v56  ;;  %v4334_v54 = vmul.f32 %v14505_v62, %v7947_v33  ;;  %v17178_v23 = vld [vmem:[#allocation565_spill] sm:$0xff]  ;;  %v17181_v33 = vld [vmem:[#allocation576_spill] sm:$0xff] }
 0x3a5   : > { %8277 = vrcp.f32 %v6249_v58  ;;  %v6094_v7 = vadd.f32 %v17176_v35, %v5845_v44  ;;  %v7946_v27 = vunpack.i.l.bf16 %v14449_v30  ;;  %v17177_v3 = vrot.slane %v17095_v39, 1  ;;  %v7970_v35 = vpop.permute.xlu1 %7969 }
 0x3a6   : > { %v4159_v9 = vrot.slane %v4046_v34, 1  ;;  %v4184_v14 = vrot.slane %v4061_v26, 1  ;;  %v4179_v59 = vrot.slane %v4058_v57, 1  ;;  %v8272_v1 = vpop.eup %8271  ;;  %v4433_v6 = vrot.slane %v4334_v54, 1  ;;  %v17185_v34 = vld [vmem:[#allocation97_spill] sm:$0xff] }
 0x3a7   : > { %v4165_v12 = vsel %vm1843_vm0, %v17177_v3, %v4164_v18  ;;  %v14513_v48 = vadd.f32 %v13975_v45, %v6094_v7  ;;  %v4331_v11 = vmul.f32 %v14505_v62, %v7946_v27  ;;  %v6253_v50 = vadd.f32 1.0, %v8272_v1  ;;  %v8274_v5 = vpop.eup %8273 }
 0x3a8   : > { %v14516_v49 = vadd.f32 %v4165_v12, %v14424_v36  ;;  %v4237_v30 = vadd.f32 %v4140_v25, %v13921_v31  ;;  %v17179_v63 = vrot.slane %v17178_v23, 1  ;;  %v17180_v42 = vrot.slane %v17135_v17, 1  ;;  %v17183_v17 = vld [vmem:[#allocation520_spill] sm:$0xff] }
 0x3a9   : > { %v6684_v45 = vmul.f32 -1.442695, %v14513_v48  ;;  %v17182_v56 = vrot.slane %v17181_v33, 1  ;;  %v6341_v25 = vmul.f32 %v8274_v5, %v14388_v16  ;;  %8279 = vrcp.f32 %v6253_v50  ;;  %v17189_v33 = vld [vmem:[#allocation61_spill] sm:$0xff] }
 0x3aa   : > { %v4160_v39 = vsel %vm1843_vm0, %v17179_v63, %v4159_v9  ;;  %v4185_v52 = vsel %vm1843_vm0, %v17180_v42, %v4184_v14  ;;  %v4428_v21 = vrot.slane %v4331_v11, 1  ;;  %v17184_v44 = vrot.slane %v17183_v17, 1  ;;  %v17188_v63 = vld [vmem:[#allocation47_spill] sm:$0xff] }
 0x3ab   : > { %v14528_v36 = vadd.f32 %v4160_v39, %v13963_v37  ;;  %v4180_v58 = vsel %vm1843_vm0, %v17182_v56, %v4179_v59  ;;  %v14534_v31 = vadd.f32 %v4185_v52, %v14430_v29  ;;  %8281 = vpow2.f32 %v6684_v45  ;;  %v17186_v29 = vld [vmem:[#allocation581_spill] sm:$0xff]  ;;  %v17191_v17 = vld [vmem:[#allocation359_spill] sm:$0xff] }
 0x3ac   : > { %v4434_v18 = vsel %vm1843_vm0, %v17184_v44, %v4433_v6  ;;  %v7957_v26 = vunpack.i.h.bf16 %v14479_v24  ;;  %v7956_v57 = vunpack.i.l.bf16 %v14479_v24  ;;  %v6737_v7 = vpack.c.bf16 %v6341_v25, %v6341_v25  ;;  %v17190_v25 = vld [vmem:[#allocation162_spill] sm:$0xff] }
 0x3ad   : > { %v4540_v37 = vadd.f32 %v4434_v18, %v17185_v34  ;;  %v17187_v54 = vrot.slane %v17186_v29, 1  ;;  %v7962_v27 = vunpack.i.h.bf16 %v7960_v19  ;;  %v7961_v9 = vunpack.i.l.bf16 %v7960_v19  ;;  %v8276_v3 = vpop.eup %8275  ;;  %v8146_v18 = vpop.permute.xlu1 %8145 }
 0x3ae   : > { %v4346_v59 = vmul.f32 %v14505_v62, %v7957_v26  ;;  %v4343_v1 = vmul.f32 %v14505_v62, %v7956_v57  ;;  %6502 = vst.msk [vmem:[%s14120_s19 + $0x28] sm:$0xf] %vm6491_vm1, %v6737_v7  ;;  %v6257_v24 = vadd.f32 1.0, %v8276_v3  ;;  %v7972_v50 = vunpack.i.h.bf16 %v7970_v35  ;;  %v17195_v7 = vld [vmem:[#allocation367_spill] sm:$0xff] }
 0x3af   : > { %v4429_v16 = vsel %vm1843_vm0, %v17187_v54, %v4428_v21  ;;  %v4849_v14 = vadd.f32 %v14130_v4, %v4540_v37  ;;  %v4352_v6 = vmul.f32 %v14505_v62, %v7962_v27  ;;  %v4349_v11 = vmul.f32 %v14505_v62, %v7961_v9  ;;  %v8278_v23 = vpop.eup %8277  ;;  %v17193_v37 = vld [vmem:[#allocation590_spill] sm:$0xff] }
 0x3b0   : > { %v4538_v12 = vadd.f32 %v4429_v16, %v14105_v28  ;;  %v4453_v28 = vrot.slane %v4346_v59, 1  ;;  %v4448_v42 = vrot.slane %v4343_v1, 1  ;;  %v6345_v4 = vmul.f32 %v8278_v23, %v14421_v0  ;;  %v17198_v16 = vld [vmem:[#allocation246_spill] sm:$0xff] }
 0x3b1   : > { %v4931_v39 = vadd.f32 %v17188_v63, %v4849_v14  ;;  %8283 = vrcp.f32 %v6257_v24  ;;  %v4463_v52 = vrot.slane %v4352_v6, 1  ;;  %v4458_v5 = vrot.slane %v4349_v11, 1  ;;  %v17199_v9 = vld [vmem:[#allocation194_spill] sm:$0xff]  ;;  %v17201_v14 = vld [vmem:[#allocation523_spill] sm:$0xff]  ;;  %v17202_v63 = vld [vmem:[#allocation588_spill] sm:$0xff] }
 0x3b2   : > { %v4847_v19 = vadd.f32 %v14137_v32, %v4538_v12  ;;  %v14558_v45 = vadd.f32 %v4180_v58, %v14025_v22  ;;  %v17192_v44 = vrot.slane %v17191_v17, 1  ;;  %v6741_v34 = vpack.c.bf16 %v6345_v4, %v6345_v4  ;;  %v17197_v58 = vld [vmem:[#allocation152_spill] sm:$0xff]  ;;  %v17206_v17 = vld [vmem:[#allocation81_spill] sm:$0xff] }
 0x3b3   : > { %v5008_v21 = vadd.f32 %v17190_v25, %v4931_v39  ;;  %v17194_v26 = vrot.slane %v17193_v37, 1  ;;  %v17196_v29 = vrot.slane %v17195_v7, 1  ;;  %v17200_v3 = vrot.slane %v17199_v9, 1  ;;  %v8280_v1 = vpop.eup %8279  ;;  %v17205_v25 = vld [vmem:[#allocation392_spill] sm:$0xff]  ;;  %v17208_v37 = vld [vmem:[#allocation597_spill] sm:$0xff] }
 0x3b4   : > { %v4929_v56 = vadd.f32 %v17189_v33, %v4847_v19  ;;  %v4449_v32 = vsel %vm1843_vm0, %v17192_v44, %v4448_v42  ;;  %6506 = vst.msk [vmem:[%s14120_s19 + $0x38] sm:$0xf] %vm6491_vm1, %v6741_v34  ;;  %v4364_v24 = vmul.f32 %v14505_v62, %v7972_v50  ;;  %v7971_v6 = vunpack.i.l.bf16 %v7970_v35  ;;  %v17204_v50 = vld [vmem:[#allocation336_spill] sm:$0xff] }
 0x3b5   : > { %v4454_v0 = vsel %vm1843_vm0, %v17194_v26, %v4453_v28  ;;  %v14568_v57 = vadd.f32 %v4449_v32, %v4237_v30  ;;  %v4459_v22 = vsel %vm1843_vm0, %v17196_v29, %v4458_v5  ;;  %v5085_v27 = vadd.f32 %v17198_v16, %v5008_v21  ;;  %v8282_v23 = vpop.eup %8281  ;;  %v17203_v28 = vld [vmem:[#allocation342_spill] sm:$0xff]  ;;  %v17207_v44 = vld [vmem:[#allocation104_spill] sm:$0xff]  ;;  %v17211_v29 = vld [vmem:[#allocation115_spill] sm:$0xff] }
 0x3b6   : > { %v5006_v54 = vadd.f32 %v17197_v58, %v4929_v56  ;;  %v4464_v12 = vsel %vm1843_vm0, %v17200_v3, %v4463_v52  ;;  %v4550_v59 = vadd.f32 %v4459_v22, %v17201_v14  ;;  %v8148_v11 = vunpack.i.h.bf16 %v8146_v18  ;;  %v17212_v58 = vld [vmem:[#allocation443_spill] sm:$0xff]  ;;  %v17213_v9 = vld [vmem:[#allocation196_spill] sm:$0xff] }
 0x3b7   : > { %v4552_v30 = vadd.f32 %v4464_v12, %v14335_v60  ;;  %v6349_v19 = vmul.f32 %v8280_v1, %v14445_v41  ;;  %v5167_v42 = vadd.f32 %v17203_v28, %v5085_v27  ;;  %v6261_v52 = vadd.f32 1.0, %v8282_v23  ;;  %v17214_v12 = vld [vmem:[#allocation534_spill] sm:$0xff] }
 0x3b8   : > { %v5083_v39 = vadd.f32 %v17202_v63, %v5006_v54  ;;  %v4859_v4 = vadd.f32 %v14164_v55, %v4550_v59  ;;  %v4483_v33 = vrot.slane %v4364_v24, 1  ;;  %v4361_v60 = vmul.f32 %v14505_v62, %v7971_v6  ;;  %v17216_v6 = vld [vmem:[#allocation458_spill] sm:$0xff] }
 0x3b9   : > { %v4861_v5 = vadd.f32 %v14147_v2, %v4552_v30  ;;  %v6745_v56 = vpack.c.bf16 %v6349_v19, %v6349_v19  ;;  %v5244_v21 = vadd.f32 %v17205_v25, %v5167_v42  ;;  %8285 = vrcp.f32 %v6261_v52  ;;  %v17210_v2 = vld [vmem:[#allocation478_spill] sm:$0xff]  ;;  %v17217_v19 = vld [vmem:[#allocation243_spill] sm:$0xff]  ;;  %v17220_v52 = vld [vmem:[#allocation89_spill] sm:$0xff] }
 0x3ba   : > { %v5165_v35 = vadd.f32 %v17204_v50, %v5083_v39  ;;  %v4941_v41 = vadd.f32 %v17206_v17, %v4859_v4  ;;  %v4478_v34 = vrot.slane %v4361_v60, 1  ;;  %v17209_v26 = vrot.slane %v17208_v37, 1  ;;  %v17218_v39 = vld [vmem:[#allocation280_spill] sm:$0xff]  ;;  %v17219_v42 = vld [vmem:[#allocation191_spill] sm:$0xff] }
 0x3bb   : > { %v4943_v32 = vadd.f32 %v17207_v44, %v4861_v5  ;;  %6510 = vst.msk [vmem:[%s14120_s19 + $0x48] sm:$0xf] %vm6491_vm1, %v6745_v56  ;;  %v5321_v22 = vadd.f32 %v17211_v29, %v5244_v21  ;;  %v8284_v27 = vpop.eup %8283  ;;  %v17215_v14 = vrot.slane %v17214_v12, 1  ;;  %v14607_v1 = vmul.f32 %v14505_v62, %v8148_v11  ;;  %v17223_v50 = vld [vmem:[#allocation180_spill] sm:$0xff]  ;;  %v8157_v44 = vpop.permute.xlu1 %8156  ;;  %v17233_v12 = vld [vmem:[#allocation46_spill] sm:$0xff] }
 0x3bc   : > { %v4484_v55 = vsel %vm1843_vm0, %v17209_v26, %v4483_v33  ;;  %v5242_v7 = vadd.f32 %v17210_v2, %v5165_v35  ;;  %v5018_v54 = vadd.f32 %v17212_v58, %v4941_v41  ;;  %v8147_v30 = vunpack.i.l.bf16 %v8146_v18  ;;  %v17221_v18 = vld [vmem:[#allocation57_spill] sm:$0xff]  ;;  %v17224_v25 = vld [vmem:[#allocation360_spill] sm:$0xff]  ;;  %v17225_v41 = vld [vmem:[#allocation130_spill] sm:$0xff] }
 0x3bd   : > { %v4560_v16 = vadd.f32 %v4484_v55, %v14426_v10  ;;  %v5020_v3 = vadd.f32 %v17213_v9, %v4943_v32  ;;  %v4479_v59 = vsel %vm1843_vm0, %v17215_v14, %v4478_v34  ;;  %v6353_v24 = vmul.f32 %v8284_v27, %v14473_v38  ;;  %v17222_v38 = vld [vmem:[#allocation159_spill] sm:$0xff]  ;;  %v17226_v32 = vld [vmem:[#allocation72_spill] sm:$0xff]  ;;  %v17227_v34 = vld [vmem:[#allocation278_spill] sm:$0xff] }
 0x3be   : > { %v5319_v23 = vadd.f32 %v17216_v6, %v5242_v7  ;;  %v5573_v63 = vadd.f32 %v17217_v19, %v5321_v22  ;;  %v5095_v10 = vadd.f32 %v17218_v39, %v5018_v54  ;;  %v14614_v28 = vadd.f32 %v4454_v0, %v14488_v8  ;;  %v17228_v26 = vld [vmem:[#allocation410_spill] sm:$0xff]  ;;  %v17229_v7 = vld [vmem:[#allocation496_spill] sm:$0xff]  ;;  %v17232_v27 = vld [vmem:[#allocation337_spill] sm:$0xff] }
 0x3bf   : > { %v5097_v4 = vadd.f32 %v17219_v42, %v5020_v3  ;;  %v4558_v5 = vadd.f32 %v4479_v59, %v17220_v52  ;;  %v4869_v11 = vadd.f32 %v14220_v20, %v4560_v16  ;;  %v6749_v33 = vpack.c.bf16 %v6353_v24, %v6353_v24  ;;  %v17230_v22 = vld [vmem:[#allocation110_spill] sm:$0xff]  ;;  %v14639_v9 = vld [vmem:[%s15076_s2] ss:$0 sm:$0xff] }
 0x3c0   : > { %v5571_v60 = vadd.f32 %v17221_v18, %v5319_v23  ;;  %v5822_v56 = vadd.f32 %v17222_v38, %v5573_v63  ;;  %v5177_v35 = vadd.f32 %v17223_v50, %v5095_v10  ;;  %v4373_v0 = vmul.f32 %v14505_v62, %v8147_v30  ;;  %v17234_v24 = vld [vmem:[#allocation481_spill] sm:$0xff]  ;;  %v17236_v63 = vld [vmem:[#allocation223_spill] sm:$0xff]  ;;  %v17237_v10 = vld [vmem:[#allocation540_spill] sm:$0xff] }
 0x3c1   : > { %v5179_v21 = vadd.f32 %v17224_v25, %v5097_v4  ;;  %v4867_v17 = vadd.f32 %v14260_v40, %v4558_v5  ;;  %v4951_v8 = vadd.f32 %v17225_v41, %v4869_v11  ;;  %6514 = vst.msk [vmem:[%s14120_s19 + $0x58] sm:$0xf] %vm6491_vm1, %v6749_v33  ;;  %v4503_v2 = vrot.slane %v14607_v1, 1  ;;  %v17231_v40 = vld [vmem:[#allocation219_spill] sm:$0xff]  ;;  %v17235_v23 = vld [vmem:[#allocation5_spill] sm:$0xff]  ;;  %v17239_v33 = vld [vmem:[#allocation76_spill] sm:$0xff] }
 0x3c2   : > { %v5820_v20 = vadd.f32 %v17226_v32, %v5571_v60  ;;  %v6071_v37 = vadd.f32 %v17227_v34, %v5822_v56  ;;  %v5254_v55 = vadd.f32 %v17228_v26, %v5177_v35  ;;  %v4498_v16 = vrot.slane %v4373_v0, 1  ;;  %v17240_v60 = vld [vmem:[#allocation98_spill] sm:$0xff]  ;;  %v17241_v56 = vld [vmem:[#allocation304_spill] sm:$0xff]  ;;  %v17242_v35 = vld [vmem:[#allocation373_spill] sm:$0xff] }
 0x3c3   : > { %v5256_v29 = vadd.f32 %v17229_v7, %v5179_v21  ;;  %v4949_v58 = vadd.f32 %v17230_v22, %v4867_v17  ;;  %v5028_v54 = vadd.f32 %v17231_v40, %v4951_v8  ;;  %v8159_v59 = vunpack.i.h.bf16 %v8157_v44  ;;  %v8286_v30 = vpop.eup %8285  ;;  %v17244_v0 = vld [vmem:[#allocation376_spill] sm:$0xff] }
 0x3c4   : > { %v6069_v62 = vadd.f32 %v17232_v27, %v5820_v20  ;;  %v14642_v3 = vadd.f32 %v14639_v9, %v6071_v37  ;;  %v5331_v14 = vadd.f32 %v17233_v12, %v5254_v55  ;;  %v17238_v42 = vrot.slane %v17237_v10, 1  ;;  %v17245_v20 = vld [vmem:[#allocation201_spill] sm:$0xff]  ;;  %v17246_v37 = vld [vmem:[#allocation506_spill] sm:$0xff]  ;;  %v17247_v7 = vld [vmem:[#allocation276_spill] sm:$0xff] }
 0x3c5   : > { %v5333_v6 = vadd.f32 %v17234_v24, %v5256_v29  ;;  %v5026_v19 = vadd.f32 %v17235_v23, %v4949_v58  ;;  %v5105_v39 = vadd.f32 %v17236_v63, %v5028_v54  ;;  %v6357_v52 = vmul.f32 %v8286_v30, %v14513_v48  ;;  %v17243_v48 = vld [vmem:[#allocation515_spill] sm:$0xff]  ;;  %v17248_v40 = vld [vmem:[#allocation412_spill] sm:$0xff]  ;;  %v8162_v30 = vpop.permute.xlu1 %8161  ;;  %v17253_v63 = vld [vmem:[#allocation457_spill] sm:$0xff] }
 0x3c6   : > { %v4499_v4 = vsel %vm1843_vm0, %v17238_v42, %v4498_v16  ;;  %v14653_v5 = vadd.f32 %v14639_v9, %v6069_v62  ;;  %v6661_v11 = vmul.f32 -1.442695, %v14642_v3  ;;  %v5583_v18 = vadd.f32 %v17239_v33, %v5331_v14  ;;  %v17249_v16 = vld [vmem:[#allocation425_spill] sm:$0xff]  ;;  %v17252_v23 = vld [vmem:[#allocation587_spill] sm:$0xff]  ;;  %v17353_v1 = vld [vmem:[#allocation604_spill] sm:$0xff] }
 0x3c7   : > { %v5585_v38 = vadd.f32 %v17240_v60, %v5333_v6  ;;  %v5103_v50 = vadd.f32 %v17241_v56, %v5026_v19  ;;  %v5187_v25 = vadd.f32 %v17242_v35, %v5105_v39  ;;  %v4566_v21 = vadd.f32 %v4499_v4, %v14058_v13  ;;  %v14673_v13 = vld [vmem:[%s15075_s1 + $0x16] ss:$0 sm:$0xff]  ;;  %v17250_v62 = vld [vmem:[#allocation493_spill] sm:$0xff]  ;;  %v17254_v39 = vld [vmem:[#allocation418_spill] sm:$0xff] }
 0x3c8   : > { %v6753_v17 = vpack.c.bf16 %v6357_v52, %v6357_v52  ;;  %v6659_v41 = vmul.f32 -1.442695, %v14653_v5  ;;  %8287 = vpow2.f32 %v6661_v11  ;;  %v5832_v8 = vadd.f32 %v17243_v48, %v5583_v18  ;;  %v17255_v42 = vld [vmem:[#allocation125_spill] sm:$0xff] }
 0x3c9   : > { %v5834_v32 = vadd.f32 %v17244_v0, %v5585_v38  ;;  %v5185_v34 = vadd.f32 %v17245_v20, %v5103_v50  ;;  %v5264_v26 = vadd.f32 %v17246_v37, %v5187_v25  ;;  %v4875_v55 = vadd.f32 %v14270_v51, %v4566_v21  ;;  %v17251_v51 = vld [vmem:[#allocation139_spill] sm:$0xff]  ;;  %v17256_v52 = vld [vmem:[#allocation473_spill] sm:$0xff]  ;;  %v17259_v50 = vld [vmem:[#allocation102_spill] sm:$0xff] }
 0x3ca   : > { %6518 = vst.msk [vmem:[%s14120_s19 + $0x68] sm:$0xf] %vm6491_vm1, %v6753_v17  ;;  %8289 = vpow2.f32 %v6659_v41  ;;  %v6081_v29 = vadd.f32 %v17247_v7, %v5832_v8  ;;  %v4649_v22 = vmul.f32 %v14673_v13, %v8159_v59  ;;  %v8158_v58 = vunpack.i.l.bf16 %v8157_v44  ;;  %v17257_v60 = vld [vmem:[#allocation45_spill] sm:$0xff]  ;;  %v17260_v25 = vld [vmem:[#allocation23_spill] sm:$0xff]  ;;  %v17261_v17 = vld [vmem:[#allocation328_spill] sm:$0xff] }
 0x3cb   : > { %v6083_v54 = vadd.f32 %v17248_v40, %v5834_v32  ;;  %v5262_v27 = vadd.f32 %v17249_v16, %v5185_v34  ;;  %v5341_v12 = vadd.f32 %v17250_v62, %v5264_v26  ;;  %v4957_v14 = vadd.f32 %v17251_v51, %v4875_v55  ;;  %v17262_v32 = vld [vmem:[#allocation518_spill] sm:$0xff]  ;;  %v17263_v34 = vld [vmem:[#allocation419_spill] sm:$0xff]  ;;  %v17267_v40 = vld [vmem:[#allocation77_spill] sm:$0xff] }
 0x3cc   : > { %v14681_v24 = vadd.f32 %v14639_v9, %v6081_v29  ;;  %v4752_v6 = vrot.slane %v4649_v22, 1  ;;  %v4542_v19 = vadd.f32 %v17252_v23, %v14477_v53  ;;  %v4544_v59 = vadd.f32 %v17253_v63, %v14482_v47  ;;  %v17264_v26 = vld [vmem:[#allocation230_spill] sm:$0xff]  ;;  %v17265_v29 = vld [vmem:[#allocation52_spill] sm:$0xff] }
 0x3cd   : > { %v14688_v44 = vadd.f32 %v14639_v9, %v6083_v54  ;;  %v5339_v10 = vadd.f32 %v17254_v39, %v5262_v27  ;;  %v5593_v4 = vadd.f32 %v17255_v42, %v5341_v12  ;;  %v5034_v11 = vadd.f32 %v17256_v52, %v4957_v14  ;;  %v17268_v12 = vld [vmem:[#allocation298_spill] sm:$0xff]  ;;  %v17270_v39 = vld [vmem:[#allocation172_spill] sm:$0xff] }
 0x3ce   : > { %v6671_v33 = vmul.f32 -1.442695, %v14681_v24  ;;  %v4646_v18 = vmul.f32 %v14673_v13, %v8158_v58  ;;  %v17258_v38 = vrot.slane %v17257_v60, 1  ;;  %v8164_v56 = vunpack.i.h.bf16 %v8162_v30 }
 0x3cf   : > { %v6673_v47 = vmul.f32 -1.442695, %v14688_v44  ;;  %v5591_v35 = vadd.f32 %v17259_v50, %v5339_v10  ;;  %v5842_v21 = vadd.f32 %v17260_v25, %v5593_v4  ;;  %v5111_v41 = vadd.f32 %v17261_v17, %v5034_v11  ;;  %v17271_v4 = vld [vmem:[#allocation174_spill] sm:$0xff] }
 0x3d0   : > { %v4753_v53 = vsel %vm1843_vm0, %v17258_v38, %v4752_v6  ;;  %8291 = vpow2.f32 %v6671_v33  ;;  %v4747_v48 = vrot.slane %v4646_v18, 1  ;;  %v4655_v0 = vmul.f32 %v14673_v13, %v8164_v56  ;;  %v17269_v6 = vld [vmem:[#allocation447_spill] sm:$0xff]  ;;  %v8172_v33 = vpop.permute.xlu1 %8171  ;;  %v17273_v38 = vld [vmem:[#allocation509_spill] sm:$0xff]  ;;  %v17274_v56 = vld [vmem:[#allocation56_spill] sm:$0xff] }
 0x3d1   : > { %v4853_v8 = vadd.f32 %v4753_v53, %v4544_v59  ;;  %8293 = vpow2.f32 %v6673_v47  ;;  %v5840_v20 = vadd.f32 %v17262_v32, %v5591_v35  ;;  %v6091_v37 = vadd.f32 %v17263_v34, %v5842_v21  ;;  %v17275_v47 = vld [vmem:[#allocation346_spill] sm:$0xff]  ;;  %v17278_v32 = vld [vmem:[#allocation347_spill] sm:$0xff] }
 0x3d2   : > { %v5193_v55 = vadd.f32 %v17264_v26, %v5111_v41  ;;  %v8288_v7 = vpop.eup %8287  ;;  %v17266_v22 = vrot.slane %v17265_v29, 1  ;;  %v4762_v16 = vrot.slane %v4655_v0, 1  ;;  %v8163_v27 = vunpack.i.l.bf16 %v8162_v30  ;;  %v17276_v41 = vld [vmem:[#allocation133_spill] sm:$0xff]  ;;  %v17279_v34 = vld [vmem:[#allocation158_spill] sm:$0xff] }
 0x3d3   : > { %v4935_v54 = vadd.f32 %v17267_v40, %v4853_v8  ;;  %v6238_v62 = vadd.f32 1.0, %v8288_v7  ;;  %v6089_v51 = vadd.f32 %v17268_v12, %v5840_v20  ;;  %v14712_v14 = vadd.f32 %v14639_v9, %v6091_v37  ;;  %v17277_v8 = vld [vmem:[#allocation422_spill] sm:$0xff]  ;;  %v17283_v40 = vld [vmem:[#allocation255_spill] sm:$0xff] }
 0x3d4   : > { %v4748_v58 = vsel %vm1843_vm0, %v17266_v22, %v4747_v48  ;;  %v5270_v23 = vadd.f32 %v17269_v6, %v5193_v55  ;;  %v8290_v63 = vpop.eup %8289  ;;  %v4652_v42 = vmul.f32 %v14673_v13, %v8163_v27  ;;  %v17272_v52 = vrot.slane %v17271_v4, 1  ;;  %v17281_v55 = vld [vmem:[#allocation90_spill] sm:$0xff]  ;;  %v17285_v6 = vld [vmem:[#allocation184_spill] sm:$0xff]  ;;  %v17287_v4 = vld [vmem:[#allocation157_spill] sm:$0xff] }
 0x3d5   : > { %v4851_v59 = vadd.f32 %v4748_v58, %v4542_v19  ;;  %v5012_v10 = vadd.f32 %v17270_v39, %v4935_v54  ;;  %v6236_v30 = vadd.f32 1.0, %v8290_v63  ;;  %8295 = vrcp.f32 %v6238_v62  ;;  %v17282_v58 = vld [vmem:[#allocation521_spill] sm:$0xff] }
 0x3d6   : > { %v4763_v11 = vsel %vm1843_vm0, %v17272_v52, %v4762_v16  ;;  %v14721_v18 = vadd.f32 %v14639_v9, %v6089_v51  ;;  %v6681_v60 = vmul.f32 -1.442695, %v14712_v14  ;;  %v5347_v53 = vadd.f32 %v17273_v38, %v5270_v23  ;;  %v17284_v16 = vld [vmem:[#allocation483_spill] sm:$0xff] }
 0x3d7   : > { %v4933_v19 = vadd.f32 %v17274_v56, %v4851_v59  ;;  %v5089_v50 = vadd.f32 %v17275_v47, %v5012_v10  ;;  %v4757_v35 = vrot.slane %v4652_v42, 1  ;;  %8297 = vrcp.f32 %v6236_v30  ;;  %v17286_v10 = vld [vmem:[#allocation324_spill] sm:$0xff] }
 0x3d8   : > { %v6679_v25 = vmul.f32 -1.442695, %v14721_v18  ;;  %v4857_v21 = vadd.f32 %v4763_v11, %v14614_v28  ;;  %v8174_v17 = vunpack.i.h.bf16 %v8172_v33  ;;  %8299 = vpow2.f32 %v6681_v60  ;;  %v17288_v11 = vld [vmem:[#allocation25_spill] sm:$0xff]  ;;  %v17289_v60 = vld [vmem:[#allocation67_spill] sm:$0xff] }
 0x3d9   : > { %v5599_v48 = vadd.f32 %v17276_v41, %v5347_v53  ;;  %v5010_v0 = vadd.f32 %v17277_v8, %v4933_v19  ;;  %v5171_v20 = vadd.f32 %v17278_v32, %v5089_v50  ;;  %v17280_v37 = vrot.slane %v17279_v34, 1  ;;  %v17290_v53 = vld [vmem:[#allocation28_spill] sm:$0xff] }
 0x3da   : > { %8301 = vpow2.f32 %v6679_v25  ;;  %v4939_v7 = vadd.f32 %v17281_v55, %v4857_v21  ;;  %v4667_v29 = vmul.f32 %v14673_v13, %v8174_v17  ;;  %v8292_v22 = vpop.eup %8291  ;;  %v8173_v59 = vunpack.i.l.bf16 %v8172_v33  ;;  %v17292_v33 = vld [vmem:[#allocation399_spill] sm:$0xff]  ;;  %v17294_v17 = vld [vmem:[#allocation433_spill] sm:$0xff]  ;;  %v17298_v55 = vld [vmem:[#allocation168_spill] sm:$0xff] }
 0x3db   : > { %v4758_v26 = vsel %vm1843_vm0, %v17280_v37, %v4757_v35  ;;  %v5848_v28 = vadd.f32 %v17282_v58, %v5599_v48  ;;  %v5087_v54 = vadd.f32 %v17283_v40, %v5010_v0  ;;  %v5248_v27 = vadd.f32 %v17284_v16, %v5171_v20  ;;  %v8294_v12 = vpop.eup %8293  ;;  %v17293_v35 = vld [vmem:[#allocation68_spill] sm:$0xff]  ;;  %v17295_v48 = vld [vmem:[#allocation353_spill] sm:$0xff]  ;;  %v17301_v16 = vld [vmem:[#allocation438_spill] sm:$0xff] }
 0x3dc   : > { %v4855_v62 = vadd.f32 %v4758_v26, %v14568_v57  ;;  %v6248_v51 = vadd.f32 1.0, %v8292_v22  ;;  %v5016_v23 = vadd.f32 %v17285_v6, %v4939_v7  ;;  %v4782_v63 = vrot.slane %v4667_v29, 1  ;;  %v17291_v57 = vld [vmem:[#allocation35_spill] sm:$0xff]  ;;  %v17296_v0 = vld [vmem:[#allocation497_spill] sm:$0xff]  ;;  %v17299_v22 = vld [vmem:[#allocation268_spill] sm:$0xff] }
 0x3dd   : > { %v6250_v39 = vadd.f32 1.0, %v8294_v12  ;;  %v6097_v42 = vadd.f32 %v17286_v10, %v5848_v28  ;;  %v5169_v52 = vadd.f32 %v17287_v4, %v5087_v54  ;;  %v5325_v30 = vadd.f32 %v17288_v11, %v5248_v27  ;;  %v17297_v37 = vld [vmem:[#allocation13_spill] sm:$0xff]  ;;  %v17300_v28 = vld [vmem:[#allocation10_spill] sm:$0xff] }
 0x3de   : > { %8303 = vrcp.f32 %v6248_v51  ;;  %v4937_v38 = vadd.f32 %v17289_v60, %v4855_v62  ;;  %v5093_v56 = vadd.f32 %v17290_v53, %v5016_v23  ;;  %v4554_v19 = vadd.f32 %v17291_v57, %v14528_v36  ;;  %v17303_v51 = vld [vmem:[#allocation240_spill] sm:$0xff]  ;;  %v17307_v60 = vld [vmem:[#allocation522_spill] sm:$0xff]  ;;  %v8182_v57 = vpop.permute.xlu1 %8181 }
 0x3df   : > { %8305 = vrcp.f32 %v6250_v39  ;;  %v14750_v47 = vadd.f32 %v14639_v9, %v6097_v42  ;;  %v5246_v50 = vadd.f32 %v17292_v33, %v5169_v52  ;;  %v5577_v25 = vadd.f32 %v17293_v35, %v5325_v30  ;;  %v8296_v21 = vpop.eup %8295  ;;  %v17304_v39 = vld [vmem:[#allocation9_spill] sm:$0xff]  ;;  %v17305_v42 = vld [vmem:[#allocation167_spill] sm:$0xff]  ;;  %v17306_v52 = vld [vmem:[#allocation476_spill] sm:$0xff] }
 0x3e0   : > { %v5014_v41 = vadd.f32 %v17294_v17, %v4937_v38  ;;  %v5175_v8 = vadd.f32 %v17295_v48, %v5093_v56  ;;  %v4556_v32 = vadd.f32 %v17296_v0, %v14516_v49  ;;  %v4664_v20 = vmul.f32 %v14673_v13, %v8173_v59  ;;  %v17312_v17 = vld [vmem:[#allocation75_spill] sm:$0xff] }
 0x3e1   : > { %v6334_v36 = vmul.f32 %v8296_v21, %v14642_v3  ;;  %v6687_v34 = vmul.f32 -1.442695, %v14750_v47  ;;  %v5323_v26 = vadd.f32 %v17297_v37, %v5246_v50  ;;  %v5826_v7 = vadd.f32 %v17298_v55, %v5577_v25  ;;  %v8298_v29 = vpop.eup %8297  ;;  %v17310_v50 = vld [vmem:[#allocation406_spill] sm:$0xff]  ;;  %v17314_v37 = vld [vmem:[#allocation517_spill] sm:$0xff] }
 0x3e2   : > { %v5091_v58 = vadd.f32 %v17299_v22, %v5014_v41  ;;  %v5252_v40 = vadd.f32 %v17300_v28, %v5175_v8  ;;  %v4777_v54 = vrot.slane %v4664_v20, 1  ;;  %v17302_v27 = vrot.slane %v17301_v16, 1  ;;  %v8300_v62 = vpop.eup %8299  ;;  %v17311_v25 = vld [vmem:[#allocation86_spill] sm:$0xff] }
 0x3e3   : > { %v6332_v3 = vmul.f32 %v8298_v29, %v14653_v5  ;;  %v6730_v12 = vpack.c.bf16 %v6334_v36, %v6334_v36  ;;  %8307 = vpow2.f32 %v6687_v34  ;;  %v5575_v6 = vadd.f32 %v17303_v51, %v5323_v26  ;;  %v17308_v5 = vld [vmem:[#allocation15_spill] sm:$0xff]  ;;  %v17313_v36 = vld [vmem:[#allocation389_spill] sm:$0xff] }
 0x3e4   : > { %v4783_v49 = vsel %vm1843_vm0, %v17302_v27, %v4782_v63  ;;  %v8302_v23 = vpop.eup %8301  ;;  %v6258_v59 = vadd.f32 1.0, %v8300_v62  ;;  %v6075_v10 = vadd.f32 %v17304_v39, %v5826_v7  ;;  %v5173_v4 = vadd.f32 %v17305_v42, %v5091_v58  ;;  %v17315_v58 = vld [vmem:[#allocation95_spill] sm:$0xff]  ;;  %v17318_v27 = vld [vmem:[#allocation352_spill] sm:$0xff]  ;;  %v17320_v51 = vld [vmem:[#allocation209_spill] sm:$0xff] }
 0x3e5   : > { %v5329_v11 = vadd.f32 %v17306_v52, %v5252_v40  ;;  %v6728_v30 = vpack.c.bf16 %v6332_v3, %v6332_v3  ;;  %6495 = vst.msk [vmem:[%s14120_s19 + $0xc] sm:$0xf] %vm6491_vm1, %v6730_v12  ;;  %v6256_v63 = vadd.f32 1.0, %v8302_v23  ;;  %v5824_v38 = vadd.f32 %v17307_v60, %v5575_v6  ;;  %v17316_v40 = vld [vmem:[#allocation117_spill] sm:$0xff] }
 0x3e6   : > { %v17309_v53 = vrot.slane %v17308_v5, 1  ;;  %8309 = vrcp.f32 %v6258_v59  ;;  %v14780_v33 = vadd.f32 %v14639_v9, %v6075_v10  ;;  %v5250_v35 = vadd.f32 %v17310_v50, %v5173_v4  ;;  %v17321_v59 = vld [vmem:[#allocation426_spill] sm:$0xff]  ;;  %v17322_v4 = vld [vmem:[#allocation292_spill] sm:$0xff]  ;;  %v17325_v50 = vld [vmem:[#allocation189_spill] sm:$0xff] }
 0x3e7   : > { %v5581_v21 = vadd.f32 %v17311_v25, %v5329_v11  ;;  %6493 = vst.msk [vmem:[%s14120_s19 + $0x4] sm:$0xf] %vm6491_vm1, %v6728_v30  ;;  %8311 = vrcp.f32 %v6256_v63  ;;  %v6073_v41 = vadd.f32 %v17312_v17, %v5824_v38  ;;  %v4865_v8 = vadd.f32 %v4783_v49, %v4556_v32  ;;  %v17323_v11 = vld [vmem:[#allocation368_spill] sm:$0xff]  ;;  %v17326_v25 = vld [vmem:[#allocation366_spill] sm:$0xff]  ;;  %v17327_v17 = vld [vmem:[#allocation583_spill] sm:$0xff] }
 0x3e8   : > { %v4778_v56 = vsel %vm1843_vm0, %v17309_v53, %v4777_v54  ;;  %v8304_v0 = vpop.eup %8303  ;;  %v6665_v20 = vmul.f32 -1.442695, %v14780_v33  ;;  %v5327_v34 = vadd.f32 %v17313_v36, %v5250_v35  ;;  %v8184_v55 = vunpack.i.h.bf16 %v8182_v57  ;;  %v17317_v54 = vld [vmem:[#allocation60_spill] sm:$0xff] }
 0x3e9   : > { %v4863_v48 = vadd.f32 %v4778_v56, %v4554_v19  ;;  %v5830_v26 = vadd.f32 %v17314_v37, %v5581_v21  ;;  %v8306_v7 = vpop.eup %8305  ;;  %v6344_v29 = vmul.f32 %v8304_v0, %v14681_v24  ;;  %v14792_v22 = vadd.f32 %v14639_v9, %v6073_v41  ;;  %v17319_v24 = vld [vmem:[#allocation454_spill] sm:$0xff]  ;;  %v17324_v38 = vld [vmem:[#allocation264_spill] sm:$0xff]  ;;  %v14821_v0 = vpop.permute.xlu1 %8192 }
 0x3ea   : > { %v4947_v19 = vadd.f32 %v17316_v40, %v4865_v8  ;;  %v6346_v32 = vmul.f32 %v8306_v7, %v14688_v44  ;;  %8313 = vpow2.f32 %v6665_v20  ;;  %v5579_v16 = vadd.f32 %v17317_v54, %v5327_v34  ;;  %v17329_v34 = vld [vmem:[#allocation439_spill] sm:$0xff]  ;;  %v17333_v54 = vld [vmem:[#allocation398_spill] sm:$0xff] }
 0x3eb   : > { %v4945_v28 = vadd.f32 %v17315_v58, %v4863_v48  ;;  %v6079_v49 = vadd.f32 %v17318_v27, %v5830_v26  ;;  %v6740_v62 = vpack.c.bf16 %v6344_v29, %v6344_v29  ;;  %v6663_v3 = vmul.f32 -1.442695, %v14792_v22  ;;  %v17328_v48 = vld [vmem:[#allocation603_spill] sm:$0xff] }
 0x3ec   : > { %v5024_v6 = vadd.f32 %v17320_v51, %v4947_v19  ;;  %v6742_v23 = vpack.c.bf16 %v6346_v32, %v6346_v32  ;;  %v5828_v39 = vadd.f32 %v17321_v59, %v5579_v16  ;;  %v4679_v44 = vmul.f32 %v14673_v13, %v8184_v55  ;;  %v17332_v29 = vld [vmem:[#allocation503_spill] sm:$0xff]  ;;  %v17338_v59 = vld [vmem:[#allocation245_spill] sm:$0xff] }
 0x3ed   : > { %v5022_v12 = vadd.f32 %v17319_v24, %v4945_v28  ;;  %v14804_v10 = vadd.f32 %v14639_v9, %v6079_v49  ;;  %v8308_v42 = vpop.eup %8307  ;;  %6505 = vst.msk [vmem:[%s14120_s19 + $0x34] sm:$0xf] %vm6491_vm1, %v6740_v62  ;;  %8315 = vpow2.f32 %v6663_v3  ;;  %v8183_v63 = vunpack.i.l.bf16 %v8182_v57  ;;  %v17334_v27 = vld [vmem:[#allocation487_spill] sm:$0xff]  ;;  %v17335_v24 = vld [vmem:[#allocation404_spill] sm:$0xff] }
 0x3ee   : > { %v5101_v30 = vadd.f32 %v17323_v11, %v5024_v6  ;;  %6507 = vst.msk [vmem:[%s14120_s19 + $0x3c] sm:$0xf] %vm6491_vm1, %v6742_v23  ;;  %v6264_v60 = vadd.f32 1.0, %v8308_v42  ;;  %v6077_v5 = vadd.f32 %v17324_v38, %v5828_v39  ;;  %v4802_v56 = vrot.slane %v4679_v44, 1  ;;  %v17339_v44 = vld [vmem:[#allocation109_spill] sm:$0xff]  ;;  %v17340_v11 = vld [vmem:[#allocation339_spill] sm:$0xff] }
 0x3ef   : > { %v5099_v52 = vadd.f32 %v17322_v4, %v5022_v12  ;;  %v6669_v53 = vmul.f32 -1.442695, %v14804_v10  ;;  %v4562_v41 = vadd.f32 %v17327_v17, %v14558_v45  ;;  %v4564_v8 = vadd.f32 %v17328_v48, %v14534_v31  ;;  %v17331_v45 = vld [vmem:[#allocation415_spill] sm:$0xff]  ;;  %v17349_v17 = vld [vmem:[#allocation233_spill] sm:$0xff] }
 0x3f0   : > { %v5183_v21 = vadd.f32 %v17326_v25, %v5101_v30  ;;  %v8310_v57 = vpop.eup %8309  ;;  %8317 = vrcp.f32 %v6264_v60  ;;  %v14824_v20 = vadd.f32 %v14639_v9, %v6077_v5  ;;  %v4676_v36 = vmul.f32 %v14673_v13, %v8183_v63  ;;  %v17342_v63 = vld [vmem:[#allocation340_spill] sm:$0xff]  ;;  %v17344_v5 = vld [vmem:[#allocation403_spill] sm:$0xff] }
 0x3f1   : > { %v5181_v35 = vadd.f32 %v17325_v50, %v5099_v52  ;;  %v17330_v37 = vrot.slane %v17329_v34, 1  ;;  %v8312_v55 = vpop.eup %8311  ;;  %v6354_v7 = vmul.f32 %v8310_v57, %v14712_v14  ;;  %8319 = vpow2.f32 %v6669_v53  ;;  %v14846_v52 = vpop.permute.xlu1 %8204 }
 0x3f2   : > { %v5260_v58 = vadd.f32 %v17332_v29, %v5183_v21  ;;  %v6352_v28 = vmul.f32 %v8312_v55, %v14721_v18  ;;  %v6667_v40 = vmul.f32 -1.442695, %v14824_v20  ;;  %v4797_v19 = vrot.slane %v4676_v36, 1  ;;  %v17337_v18 = vld [vmem:[#allocation143_spill] sm:$0xff]  ;;  %v17351_v36 = vld [vmem:[#allocation205_spill] sm:$0xff] }
 0x3f3   : > { %v4803_v26 = vsel %vm1843_vm0, %v17330_v37, %v4802_v56  ;;  %v5258_v31 = vadd.f32 %v17331_v45, %v5181_v35  ;;  %v6750_v13 = vpack.c.bf16 %v6354_v7, %v6354_v7  ;;  %v8195_v14 = vunpack.i.h.bf16 %v14821_v0  ;;  %v17347_v35 = vld [vmem:[#allocation605_spill] sm:$0xff] }
 0x3f4   : > { %v4873_v32 = vadd.f32 %v4803_v26, %v4564_v8  ;;  %v5337_v49 = vadd.f32 %v17334_v27, %v5260_v58  ;;  %v8314_v62 = vpop.eup %8313  ;;  %v6748_v3 = vpack.c.bf16 %v6352_v28, %v6352_v28  ;;  %8321 = vpow2.f32 %v6667_v40  ;;  %v17350_v8 = vld [vmem:[#allocation187_spill] sm:$0xff]  ;;  %v17352_v37 = vld [vmem:[#allocation121_spill] sm:$0xff] }
 0x3f5   : > { %v5335_v16 = vadd.f32 %v17333_v54, %v5258_v31  ;;  %v17336_v12 = vrot.slane %v17335_v24, 1  ;;  %6515 = vst.msk [vmem:[%s14120_s19 + $0x5c] sm:$0xf] %vm6491_vm1, %v6750_v13  ;;  %v6242_v23 = vadd.f32 1.0, %v8314_v62  ;;  %v17341_v30 = vrot.slane %v17340_v11, 1  ;;  %v17354_v29 = vld [vmem:[#allocation177_spill] sm:$0xff] }
 0x3f6   : > { %v4955_v6 = vadd.f32 %v17337_v18, %v4873_v32  ;;  %v5589_v42 = vadd.f32 %v17339_v44, %v5337_v49  ;;  %v17343_v60 = vrot.slane %v17342_v63, 1  ;;  %v17345_v53 = vrot.slane %v17344_v5, 1  ;;  %6513 = vst.msk [vmem:[%s14120_s19 + $0x54] sm:$0xf] %vm6491_vm1, %v6748_v3  ;;  %v17356_v40 = vld [vmem:[#allocation467_spill] sm:$0xff]  ;;  %v17360_v44 = vld [vmem:[#allocation146_spill] sm:$0xff] }
 0x3f7   : > { %v4798_v51 = vsel %vm1843_vm0, %v17336_v12, %v4797_v19  ;;  %v5587_v39 = vadd.f32 %v17338_v59, %v5335_v16  ;;  %v17346_v56 = vmov %v17341_v30  ;;  %v17348_v25 = vrot.slane %v17347_v35, 1  ;;  %v8316_v48 = vpop.eup %8315  ;;  %v8388_v32 = vld [vmem:[%s15075_s1 + $0x18] ss:$0 sm:$0xff]  ;;  %v17359_v59 = vld [vmem:[#allocation510_spill] sm:$0xff]  ;;  %v17362_v5 = vld [vmem:[#allocation499_spill] sm:$0xff] }
 0x3f8   : > { %v4871_v4 = vadd.f32 %v4798_v51, %v4562_v41  ;;  %v4193_v38 = vsel %vm1843_vm0, %v17343_v60, %v17341_v30  ;;  %v4195_v50 = vsel %vm1843_vm0, %v17346_v56, %v17345_v53  ;;  %v5032_v41 = vadd.f32 %v17349_v17, %v4955_v6  ;;  %v17357_v16 = vld [vmem:[#allocation380_spill] sm:$0xff]  ;;  %v14895_v6 = vpop.permute.xlu1 %8210  ;;  %v8199_v60 = vpop.permute.xlu0 %8198  ;;  %v17365_v35 = vld [vmem:[#allocation293_spill] sm:$0xff] }
 0x3f9   : > { %v4504_v21 = vsel %vm1843_vm0, %v17348_v25, %v4503_v2  ;;  %8323 = vrcp.f32 %v6242_v23  ;;  %v5836_v57 = vadd.f32 %v17350_v8, %v5587_v39  ;;  %v5838_v34 = vadd.f32 %v17351_v36, %v5589_v42  ;;  %v17355_v2 = vld [vmem:[#allocation213_spill] sm:$0xff]  ;;  %v17358_v51 = vld [vmem:[#allocation316_spill] sm:$0xff] }
 0x3fa   : > { %v4953_v26 = vadd.f32 %v17352_v37, %v4871_v4  ;;  %v4258_v55 = vadd.f32 %v4193_v38, %v14434_v46  ;;  %v4259_v7 = vadd.f32 %v4195_v50, %v14461_v15  ;;  %v6240_v45 = vadd.f32 1.0, %v8316_v48  ;;  %v8318_v54 = vpop.eup %8317  ;;  %v14882_v15 = vld [vmem:[%s15075_s1 + $0x20] ss:$0 sm:$0xff]  ;;  %v17361_v30 = vld [vmem:[#allocation216_spill] sm:$0xff] }
 0x3fb   : > { %v5109_v31 = vadd.f32 %v17353_v1, %v5032_v41  ;;  %v6085_v58 = vadd.f32 %v17354_v29, %v5836_v57  ;;  %v6087_v28 = vadd.f32 %v17355_v2, %v5838_v34  ;;  %v4927_v13 = vmul.f32 %v8388_v32, %v8195_v14  ;;  %v8320_v62 = vpop.eup %8319  ;;  %v17363_v56 = vld [vmem:[#allocation96_spill] sm:$0xff]  ;;  %v17368_v48 = vld [vmem:[#allocation437_spill] sm:$0xff]  ;;  %v17371_v29 = vld [vmem:[#allocation227_spill] sm:$0xff] }
 0x3fc   : > { %v5030_v19 = vadd.f32 %v17356_v40, %v4953_v26  ;;  %8325 = vrcp.f32 %v6240_v45  ;;  %v14885_v27 = vmul.f32 %v14882_v15, %v8195_v14  ;;  %v4568_v49 = vadd.f32 %v4504_v21, %v4259_v7  ;;  %v17369_v36 = vld [vmem:[#allocation140_spill] sm:$0xff]  ;;  %v17370_v7 = vld [vmem:[#allocation267_spill] sm:$0xff] }
 0x3fd   : > { %v5191_v46 = vadd.f32 %v17357_v16, %v5109_v31  ;;  %v6360_v3 = vmul.f32 %v8318_v54, %v14750_v47  ;;  %v14889_v24 = vadd.f32 %v14639_v9, %v6085_v58  ;;  %v14892_v12 = vadd.f32 %v14639_v9, %v6087_v28  ;;  %v14919_v31 = vpop.permute.xlu1 %5355  ;;  %v8390_v28 = vld [vmem:[%s15075_s1 + $0x19] ss:$0 sm:$0xff] }
 0x3fe   : > { %v5107_v18 = vadd.f32 %v17358_v51, %v5030_v19  ;;  %v6246_v23 = vadd.f32 1.0, %v8320_v62  ;;  %v8194_v14 = vunpack.i.l.bf16 %v14821_v0  ;;  %v4567_v42 = vadd.f32 %v17360_v44, %v4258_v55  ;;  %v8322_v38 = vpop.eup %8321  ;;  %v17372_v19 = vld [vmem:[#allocation530_spill] sm:$0xff]  ;;  %v17374_v54 = vld [vmem:[#allocation464_spill] sm:$0xff] }
 0x3ff   : > { %v5268_v39 = vadd.f32 %v17359_v59, %v5191_v46  ;;  %v6756_v4 = vpack.c.bf16 %v6360_v3, %v6360_v3  ;;  %v6675_v47 = vmul.f32 -1.442695, %v14889_v24  ;;  %v6677_v11 = vmul.f32 -1.442695, %v14892_v12  ;;  %v17378_v44 = vld [vmem:[#allocation84_spill] sm:$0xff] }
 0x400   : > { %v5189_v63 = vadd.f32 %v17361_v30, %v5107_v18  ;;  %8327 = vrcp.f32 %v6246_v23  ;;  %v17364_v50 = vrot.slane %v17363_v56, 1  ;;  %v17366_v25 = vrot.slane %v17365_v35, 1  ;;  %v17377_v18 = vld [vmem:[#allocation237_spill] sm:$0xff] }
 0x401   : > { %v5345_v53 = vadd.f32 %v17362_v5, %v5268_v39  ;;  %6521 = vst.msk [vmem:[%s14120_s19 + $0x74] sm:$0xf] %vm6491_vm1, %v6756_v4  ;;  %v6244_v41 = vadd.f32 1.0, %v8322_v38  ;;  %8329 = vpow2.f32 %v6675_v47  ;;  %v4926_v37 = vmul.f32 %v8388_v32, %v8194_v14  ;;  %v17380_v4 = vld [vmem:[#allocation308_spill] sm:$0xff]  ;;  %v8391_v38 = vld [vmem:[%s15075_s1 + $0x21] ss:$0 sm:$0xff] }
 0x402   : > { %v4811_v0 = vsel %vm1843_vm0, %v17366_v25, %v17364_v50  ;;  %v17367_v21 = vmov %v17364_v50  ;;  %v5266_v8 = vadd.f32 %v17368_v48, %v5189_v63  ;;  %8331 = vpow2.f32 %v6677_v11  ;;  %v8216_v50 = vpop.permute.xlu0 %8215  ;;  %v8392_v25 = vld [vmem:[%s15075_s1 + $0x1a] ss:$0 sm:$0xff] }
 0x403   : > { %v4813_v17 = vsel %vm1843_vm0, %v17367_v21, %v4812_v61  ;;  %v5597_v34 = vadd.f32 %v17369_v36, %v5345_v53  ;;  %v8201_v26 = vunpack.i.h.bf16 %v8199_v60  ;;  %v8324_v55 = vpop.eup %8323  ;;  %8333 = vrcp.f32 %v6244_v41 }
 0x404   : > { %v4877_v57 = vadd.f32 %v4813_v17, %v4568_v49  ;;  %v5343_v43 = vadd.f32 %v17370_v7, %v5266_v8  ;;  %v4876_v45 = vadd.f32 %v4811_v0, %v4567_v42  ;;  %v8200_v1 = vunpack.i.l.bf16 %v8199_v60  ;;  %v17376_v49 = vld [vmem:[#allocation120_spill] sm:$0xff]  ;;  %v5605_v17 = vpop.permute.xlu1 %5604 }
 0x405   : > { %v6338_v61 = vmul.f32 %v8324_v55, %v14780_v33  ;;  %v5846_v58 = vadd.f32 %v17371_v29, %v5597_v34  ;;  %v5004_v40 = vmul.f32 %v8390_v28, %v8201_v26  ;;  %v17373_v32 = vrot.slane %v17372_v19, 1  ;;  %v8393_v55 = vld [vmem:[%s15075_s1 + $0x1c] ss:$0 sm:$0xff] }
 0x406   : > { %v4959_v2 = vadd.f32 %v4927_v13, %v4877_v57  ;;  %v17375_v16 = vrot.slane %v17374_v54, 1  ;;  %v5595_v62 = vadd.f32 %v17376_v49, %v5343_v43  ;;  %v14933_v3 = vmul.f32 %v14882_v15, %v8194_v14  ;;  %v8326_v13 = vpop.eup %8325  ;;  %v8222_v54 = vpop.permute.xlu0 %8221 }
 0x407   : > { %v8207_v33 = vunpack.i.h.bf16 %v14846_v52  ;;  %v6734_v51 = vpack.c.bf16 %v6338_v61, %v6338_v61  ;;  %v6095_v23 = vadd.f32 %v17377_v18, %v5846_v58  ;;  %v4958_v59 = vadd.f32 %v4926_v37, %v4876_v45 }
 0x408   : > { %v5771_v46 = vsel %vm1843_vm0, %v17375_v16, %v17373_v32  ;;  %v5003_v39 = vmul.f32 %v8390_v28, %v8200_v1  ;;  %v17379_v42 = vrot.slane %v17378_v44, 1  ;;  %v17381_v47 = vrot.slane %v17380_v4, 1 }
 0x409   : > { %v6336_v30 = vmul.f32 %v8326_v13, %v14792_v22  ;;  %v5844_v63 = vadd.f32 %v5771_v46, %v5595_v62  ;;  %v5534_v14 = vrot.slane %v14885_v27, 1  ;;  %6499 = vst.msk [vmem:[%s14120_s19 + $0x1c] sm:$0xf] %vm6491_vm1, %v6734_v51  ;;  %v14947_v60 = vadd.f32 %v14639_v9, %v6095_v23  ;;  %v8395_v23 = vld [vmem:[%s15075_s1 + $0x1d] ss:$0 sm:$0xff] }
 0x40a   : > { %v6020_v11 = vsel %vm1843_vm0, %v17381_v47, %v17379_v42  ;;  %v14952_v5 = vmul.f32 %v8391_v38, %v8201_v26  ;;  %v5036_v53 = vadd.f32 %v5004_v40, %v4959_v2  ;;  %v8206_v56 = vunpack.i.l.bf16 %v14846_v52  ;;  %v8328_v41 = vpop.eup %8327 }
 0x40b   : > { %v6732_v22 = vpack.c.bf16 %v6336_v30, %v6336_v30  ;;  %v6093_v35 = vadd.f32 %v6020_v11, %v5844_v63  ;;  %v5081_v0 = vmul.f32 %v8392_v25, %v8207_v33  ;;  %v8213_v21 = vunpack.i.h.bf16 %v14895_v6  ;;  %v8330_v34 = vpop.eup %8329 }
 0x40c   : > { %v6685_v48 = vmul.f32 -1.442695, %v14947_v60  ;;  %v5533_v8 = vrot.slane %v14933_v3, 1  ;;  %v5035_v57 = vadd.f32 %v5003_v39, %v4958_v59  ;;  %v5080_v36 = vmul.f32 %v8392_v25, %v8206_v56  ;;  %v8332_v43 = vpop.eup %8331 }
 0x40d   : > { %6497 = vst.msk [vmem:[%s14120_s19 + $0x14] sm:$0xf] %vm6491_vm1, %v6732_v22  ;;  %v6342_v52 = vmul.f32 %v8328_v41, %v14804_v10  ;;  %v14965_v37 = vadd.f32 %v14639_v9, %v6093_v35  ;;  %v14967_v26 = vmul.f32 %v8391_v38, %v8200_v1  ;;  %v5163_v7 = vmul.f32 %v8393_v55, %v8213_v21  ;;  %v8334_v58 = vpop.eup %8333 }
 0x40e   : > { %v6252_v45 = vadd.f32 1.0, %v8330_v34  ;;  %8335 = vpow2.f32 %v6685_v48  ;;  %v5783_v61 = vrot.slane %v14952_v5, 1  ;;  %v8212_v29 = vunpack.i.l.bf16 %v14895_v6  ;;  %v5854_v6 = vpop.permute.xlu1 %5853 }
 0x40f   : > { %v6738_v10 = vpack.c.bf16 %v6342_v52, %v6342_v52  ;;  %v6254_v2 = vadd.f32 1.0, %v8332_v43  ;;  %v6683_v28 = vmul.f32 -1.442695, %v14965_v37  ;;  %v5113_v1 = vadd.f32 %v5081_v0, %v5036_v53 }
 0x410   : > { %v6340_v40 = vmul.f32 %v8334_v58, %v14824_v20  ;;  %8337 = vrcp.f32 %v6252_v45  ;;  %v5112_v19 = vadd.f32 %v5080_v36, %v5035_v57  ;;  %v5162_v32 = vmul.f32 %v8393_v55, %v8212_v29  ;;  %v8394_v20 = vld [vmem:[%s15075_s1 + $0x22] ss:$0 sm:$0xff] }
 0x411   : > { %6503 = vst.msk [vmem:[%s14120_s19 + $0x2c] sm:$0xf] %vm6491_vm1, %v6738_v10  ;;  %8339 = vrcp.f32 %v6254_v2  ;;  %v5195_v16 = vadd.f32 %v5163_v7, %v5113_v1  ;;  %v8218_v46 = vunpack.i.h.bf16 %v8216_v50  ;;  %v8217_v49 = vunpack.i.l.bf16 %v8216_v50 }
 0x412   : > { %v6736_v62 = vpack.c.bf16 %v6340_v40, %v6340_v40  ;;  %8341 = vpow2.f32 %v6683_v28  ;;  %v5194_v13 = vadd.f32 %v5162_v32, %v5112_v19  ;;  %v5409_v51 = vmul.f32 %v14882_v15, %v14919_v31 }
 0x413   : > { %v5906_v18 = vmul.f32 %v8394_v20, %v8207_v33  ;;  %v5240_v59 = vmul.f32 %v8395_v23, %v8218_v46  ;;  %v5239_v39 = vmul.f32 %v8395_v23, %v8217_v49  ;;  %v8224_v44 = vunpack.i.h.bf16 %v8222_v54  ;;  %v8396_v33 = vld [vmem:[%s15075_s1 + $0x1e] ss:$0 sm:$0xff] }
 0x414   : > { %6501 = vst.msk [vmem:[%s14120_s19 + $0x24] sm:$0xf] %vm6491_vm1, %v6736_v62  ;;  %v5536_v42 = vrot.slane %v5409_v51, 1  ;;  %v8223_v4 = vunpack.i.l.bf16 %v8222_v54  ;;  %v5658_v47 = vmul.f32 %v8391_v38, %v5605_v17  ;;  %v5907_v11 = vmul.f32 %v8394_v20, %v5854_v6 }
 0x415   : > { %v5905_v30 = vmul.f32 %v8394_v20, %v8206_v56  ;;  %v5271_v15 = vadd.f32 %v5239_v39, %v5194_v13  ;;  %v5272_v31 = vadd.f32 %v5240_v59, %v5195_v16  ;;  %v5317_v63 = vmul.f32 %v8396_v33, %v8224_v44 }
 0x416   : > { %v5537_v5 = vsel %vm1843_vm0, %v5534_v14, %v5536_v42  ;;  %v5316_v53 = vmul.f32 %v8396_v33, %v8223_v4  ;;  %v5785_v50 = vrot.slane %v5658_v47, 1  ;;  %v6034_v22 = vrot.slane %v5907_v11, 1 }
 0x417   : > { %v5782_v35 = vrot.slane %v14967_v26, 1  ;;  %v5349_v25 = vadd.f32 %v5317_v63, %v5272_v31  ;;  %v6032_v0 = vrot.slane %v5906_v18, 1  ;;  %v6031_v41 = vrot.slane %v5905_v30, 1 }
 0x418   : > { %v8336_v38 = vpop.eup %8335  ;;  %v5348_v56 = vadd.f32 %v5316_v53, %v5271_v15  ;;  %v5786_v21 = vsel %vm1843_vm0, %v5783_v61, %v5785_v50  ;;  %v5535_v48 = vsel %vm1843_vm0, %v5533_v8, %v5534_v14 }
 0x419   : > { %v6262_v17 = vadd.f32 1.0, %v8336_v38  ;;  %v5601_v57 = vadd.f32 %v5537_v5, %v5349_v25  ;;  %v6035_v52 = vsel %vm1843_vm0, %v6032_v0, %v6034_v22  ;;  %v5784_v7 = vsel %vm1843_vm0, %v5782_v35, %v5783_v61 }
 0x41a   : > { %v8338_v36 = vpop.eup %8337  ;;  %v5600_v34 = vadd.f32 %v5535_v48, %v5348_v56  ;;  %v6033_v8 = vsel %vm1843_vm0, %v6031_v41, %v6032_v0 }
 0x41b   : > { %v8340_v26 = vpop.eup %8339  ;;  %v6348_v55 = vmul.f32 %v8338_v36, %v14889_v24  ;;  %8343 = vrcp.f32 %v6262_v17  ;;  %v5850_v43 = vadd.f32 %v5786_v21, %v5601_v57 }
 0x41c   : > { %v8342_v45 = vpop.eup %8341  ;;  %v6350_v27 = vmul.f32 %v8340_v26, %v14892_v12  ;;  %v5849_v3 = vadd.f32 %v5784_v7, %v5600_v34 }
 0x41d   : > { %v6744_v29 = vpack.c.bf16 %v6348_v55, %v6348_v55  ;;  %v6260_v14 = vadd.f32 1.0, %v8342_v45  ;;  %v6099_v58 = vadd.f32 %v6035_v52, %v5850_v43 }
 0x41e   : > { %v6746_v10 = vpack.c.bf16 %v6350_v27, %v6350_v27  ;;  %v6098_v2 = vadd.f32 %v6033_v8, %v5849_v3 }
 0x41f   : > { %6509 = vst.msk [vmem:[%s14120_s19 + $0x44] sm:$0xf] %vm6491_vm1, %v6744_v29  ;;  %8345 = vrcp.f32 %v6260_v14  ;;  %v6138_v24 = vadd.f32 %v14639_v9, %v6099_v58 }
 0x420   : > { %6511 = vst.msk [vmem:[%s14120_s19 + $0x4c] sm:$0xf] %vm6491_vm1, %v6746_v10  ;;  %v6137_v61 = vadd.f32 %v14639_v9, %v6098_v2 }
 0x421   : > { %v6689_v12 = vmul.f32 -1.442695, %v6138_v24 }
 0x422   : > { %v6688_v28 = vmul.f32 -1.442695, %v6137_v61 }
 0x423   : > { %8347 = vpow2.f32 %v6689_v12 }
 0x424   : > { %8349 = vpow2.f32 %v6688_v28 }
 0x425   : > { %v8344_v1 = vpop.eup %8343 }
 0x426   : > { %v6358_v40 = vmul.f32 %v8344_v1, %v14947_v60 }
 0x428   : > { %v6754_v19 = vpack.c.bf16 %v6358_v40, %v6358_v40 }
 0x429   : > { %v8346_v32 = vpop.eup %8345 }
 0x42a   : > { %v6356_v54 = vmul.f32 %v8346_v32, %v14965_v37  ;;  %6519 = vst.msk [vmem:[%s14120_s19 + $0x6c] sm:$0xf] %vm6491_vm1, %v6754_v19 }
 0x42c   : > { %v6752_v16 = vpack.c.bf16 %v6356_v54, %v6356_v54 }
 0x42d   : > { %v8348_v46 = vpop.eup %8347 }
 0x42e   : > { %v8350_v49 = vpop.eup %8349  ;;  %6517 = vst.msk [vmem:[%s14120_s19 + $0x64] sm:$0xf] %vm6491_vm1, %v6752_v16  ;;  %v6266_v9 = vadd.f32 1.0, %v8348_v46 }
 0x42f   : > { %v6265_v6 = vadd.f32 1.0, %v8350_v49 }
 0x430   : > { %8351 = vrcp.f32 %v6266_v9 }
 0x431   : > { %8353 = vrcp.f32 %v6265_v6 }
 0x43a   : > { %v8352_v60 = vpop.eup %8351 }
 0x43b   : > { %v8354_v62 = vpop.eup %8353  ;;  %v6362_v37 = vmul.f32 %v8352_v60, %v6138_v24 }
 0x43c   : > { %v6361_v13 = vmul.f32 %v8354_v62, %v6137_v61 }
 0x43d   : > { %v6758_v51 = vpack.c.bf16 %v6362_v37, %v6362_v37 }
 0x43e   : > { %v6757_v20 = vpack.c.bf16 %v6361_v13, %v6361_v13 }
 0x43f   : > { %6523 = vst.msk [vmem:[%s14120_s19 + $0x7c] sm:$0xf] %vm6491_vm1, %v6758_v51 }
 0x440   : > { %6522 = vst.msk [vmem:[%s14120_s19 + $0x78] sm:$0xf] %vm6491_vm1, %v6757_v20 }
 0x441   : > { %8410 = shalt.err (!%p8407_p3)
}
 0x442   : > { %s8411_s11 = scalar_lea.hbm %s15023_s20, 2048  ;;  %s8415_s30 = scalar_lea.hbm %s15077_s3, 4096 }
 0x443   : > { %p8412_p4 = scmp.ne.s32.totalorder %s15023_s20, %s8411_s11  ;;  %p8416_p9 = scmp.lt.u32.totalorder %s15023_s20, %s15077_s3 }
 0x444   : > { %p8417_p10 = scmp.lt.u32.totalorder %s8415_s30, %s8411_s11  ;;  %p8419_p12 = scmp.lt.u32.totalorder %s8411_s11, %s15023_s20 }
 0x445   : > { %p8413_p7 = pnand %p8412_p4, %p8525_p5 }
 0x446   : > { %p8418_p11 = por %p8417_p10, %p8416_p9 }
 0x447   : > { %p8414_p8 = pneg %p8413_p7 }
 0x448   : > { %p8420_p13 = por %p8419_p12, %p8418_p11 }
 0x44a   : > { %p8421_p0 = pnand %p8420_p13, %p8414_p8 }
 0x44c   : > { %8424 = shalt.err (!%p8421_p0)
}
 0x44d   : > { %s8465_s6 = smov 64   ;;  %s8466_s7 = smov 4  }
 0x44e   : > { %6925 = dma.vmem_to_hbm [thread:$0]  (%p8525_p5), %s15025_s28, 2048, %s15023_s20, %s15033_s16, %s8465_s6, %s8465_s6, %s8466_s7  }
 0x44f PF: > { %p6931_p1 = scmp.ge.s32.totalorder %s8459_s15, 2  ;;  %s6553_s8 = sand.u32 1, %s8447_s12  }
 0x450   : > { %s6554_s9 = scalar_lea.sflag [#allocation3], %s6553_s8 }
 0x451   : > { %p6928_p2 = pnand %p6931_p1, %p8529_p6 }
 0x453   : > { %8442 = dma.done.wait (!%p6928_p2), %s6554_s9, 2048  }
 0x454   : > { %8444 = vsyncadd (!%p6928_p2), %s6554_s9, 4294965248  ;;  %p13_p3 = scmp.ge.s32.totalorder %s8512_s18, 4   ;;  %s17382_s12 = smov %s8451_s13 }
 0x455   : > { %s17383_s13 = smov %s8455_s14  ;;  %s17384_s14 = smov %s8523_s21 }
 0x456   : > { %s17385_s15 = smov %s8512_s18  ;;  %15 = sbr.rel (!%p13_p3) target bundleno = 3 (0x3), region = 75 }
 0x45d   :  { %6559 = vsyncpa [#allocation3], 1 }
 0x45e   :  { %6561 = vsyncpa [#allocation3 + $0x1], 1 }

</bundles_post_ra>
